<compile_context>
chip_gen: v7x
topology: tpu7x:2x2x1
jax: 0.10.0
libtpu: 0.0.40
codegen_flags: <defaults>
</compile_context>

<pallas_src>
import jax
import jax.numpy as jnp
from jax.experimental import pallas as pl
from jax.experimental.pallas import tpu as pltpu

# ---- model dims (small but consistent with the module: d_words == hidden) ----
V = 43        # n_trg_vocab
D = 128       # d_words      (512 in the reference; small here)
H = 128       # hidden_size  (== d_words, as in the reference)
VP = ((V + 127) // 128) * 128   # vocab padded to lane multiple
EPS = 1e-5
NEG = -1e30

_VMEM = pl.BlockSpec(memory_space=pltpu.MemorySpace.VMEM)
_SMEM = pl.BlockSpec(memory_space=pltpu.MemorySpace.SMEM)


# --------------------------- in-kernel helpers ---------------------------------
def _layernorm(x, g, b):
    mu = jnp.mean(x, axis=-1, keepdims=True)
    xc = x - mu
    var = jnp.mean(xc * xc, axis=-1, keepdims=True)
    return xc * jax.lax.rsqrt(var + EPS) * g + b


def _dot(a, w):
    # bf16 weights, bf16 operands, f32 accumulation on the MXU.
    return jnp.dot(a.astype(w.dtype), w, preferred_element_type=jnp.float32)


def _lstm_cell(gates, c):
    # Gate columns are pre-permuted to [i, f, o, g]:
    # one sigmoid over 3H lanes + one tanh over H lanes.
    s = jax.nn.sigmoid(gates[:, : 3 * H])
    g = jnp.tanh(gates[:, 3 * H:])
    c_new = s[:, H:2 * H] * c + s[:, :H] * g
    h_new = s[:, 2 * H:3 * H] * jnp.tanh(c_new)
    return h_new, c_new


# ------------------------------- fused kernel ----------------------------------
def seq2seq_kernel(tf_ref, emb_ref,
                   ln1_g, ln1_b, proj_w, proj_b, ln2_g, ln2_b,
                   enc_wih0, enc_whh0, enc_b0, enc_wih1, enc_whh1, enc_b1,
                   dec_emb_w, dec_emb_b,
                   dec_wih0, dec_whh0, dec_b0, dec_wih1, dec_whh1, dec_b1,
                   out_w, out_b,
                   feat_ref, logp_ref,
                   xg0_sc, yemb_sc):
    T, Bp, _ = feat_ref.shape
    S = xg0_sc.shape[0]

    # ---- phase 1: shared projection of x and the first T y steps (batched) ----
    # emb_ref rows: [x time-major (S*Bp) ; y[:, :T] time-major (T*Bp)]
    e = emb_ref[...]
    h = _layernorm(e, ln1_g[...], ln1_b[...])
    h = h * jax.nn.sigmoid(h)                              # Swish
    h = _dot(h, proj_w[...]) + proj_b[...]
    proj = _layernorm(h, ln2_g[...], ln2_b[...])           # [(S+T)*Bp, D]

    xp = proj[: S * Bp]                                    # projected x sequence
    x_last = proj[(S - 1) * Bp: S * Bp]                    # x[:, -1, :]
    yp = proj[S * Bp:]                                     # projected y[:, :T]

    # Hoisted encoder layer-0 input-hidden projection (all timesteps at once),
    # stored with ONE contiguous reshape store.
    xg0 = _dot(xp, enc_wih0[...]) + enc_b0[...]            # [S*Bp, 4H]
    xg0_sc[...] = xg0.reshape(S, Bp, 4 * H)

    # Precomputed teacher-path decoder embedding ReLU(Linear(y_proj)), batched.
    yemb = jnp.maximum(_dot(yp, dec_emb_w[...]) + dec_emb_b[...], 0.0)
    yemb_sc[...] = yemb.reshape(T, Bp, H)

    # ---- phase 2: encoder recurrence (h/c kept in the loop carry) -------------
    eb1 = jnp.broadcast_to(enc_b1[...], (Bp, 4 * H))       # hoisted bias bcast

    def enc_step(t, carry):
        h0, c0, h1, c1 = carry
        g0 = xg0_sc[t] + _dot(h0, enc_whh0[...])
        h0, c0 = _lstm_cell(g0, c0)
        # h1 (previous step) matmul is independent of the layer-0 cell above.
        g1 = _dot(h1, enc_whh1[...]) + _dot(h0, enc_wih1[...]) + eb1
        h1, c1 = _lstm_cell(g1, c1)
        return h0, c0, h1, c1

    z = jnp.zeros((Bp, H), jnp.float32)
    h0, c0, h1, c1 = jax.lax.fori_loop(0, S, enc_step, (z, z, z, z), unroll=True)

    # ---- phase 3: autoregressive decoder (vocab head hoisted out) -------------
    db0 = jnp.broadcast_to(dec_b0[...], (Bp, 4 * H))       # hoisted bias bcasts
    db1 = jnp.broadcast_to(dec_b1[...], (Bp, 4 * H))
    demb_b = jnp.broadcast_to(dec_emb_b[...], (Bp, H))

    def dec_step(i, carry):
        h0, c0, h1, c1, prev = carry
        # teacher forcing decision made after step i-1: y[:, i-1] vs output_{i-1}
        im1 = jnp.maximum(i - 1, 0)
        teach = jnp.logical_and(i > 0, tf_ref[im1] > 0)
        y_emb = yemb_sc[im1]                               # precomputed teacher emb
        w_emb = dec_emb_w[...]
        # Skip the free-running embedding matmul on teacher-forced steps.
        emb = jax.lax.cond(
            teach,
            lambda: y_emb,
            lambda: jnp.maximum(
                jnp.dot(prev.astype(w_emb.dtype), w_emb,
                        preferred_element_type=jnp.float32) + demb_b, 0.0),
        )
        g0 = _dot(h0, dec_whh0[...]) + _dot(emb, dec_wih0[...]) + db0
        h0, c0 = _lstm_cell(g0, c0)
        g1 = _dot(h1, dec_whh1[...]) + _dot(h0, dec_wih1[...]) + db1
        h1, c1 = _lstm_cell(g1, c1)
        feat_ref[i] = h1
        return h0, c0, h1, c1, h1

    jax.lax.fori_loop(0, T, dec_step, (h0, c0, h1, c1, x_last), unroll=True)

    # ---- phase 4: batched Linear + log_softmax head (off the serial chain) ----
    feats = feat_ref[...].reshape(T * Bp, H)
    logits = _dot(feats, out_w[...]) + out_b[...]
    col = jax.lax.broadcasted_iota(jnp.int32, (T * Bp, VP), 1)
    logits = jnp.where(col < V, logits, NEG)
    m = jnp.max(logits, axis=-1, keepdims=True)
    lse = jnp.log(jnp.sum(jnp.exp(logits - m), axis=-1, keepdims=True)) + m
    logp_ref[...] = (logits - lse).reshape(T, Bp, VP)


# ------------------------------- wrapper ----------------------------------------
def seq2seq_forward(p, x_tok, y_tok, target_len, tf_mask):
    B, S = x_tok.shape
    T = int(target_len)
    assert T <= y_tok.shape[1]
    Bp = ((max(B, 1) + 7) // 8) * 8          # pad batch to fill 8 sublanes

    emb_x = jnp.take(p["emb_table"], x_tok, axis=0)          # glue: embedding lookup
    emb_y = jnp.take(p["emb_table"], y_tok[:, :T], axis=0)   # only first T y steps used

    def prep(e, steps):  # -> time-major, batch-padded, flattened rows [steps*Bp, D]
        e = jnp.transpose(e, (1, 0, 2))
        e = jnp.pad(e, ((0, 0), (0, Bp - B), (0, 0)))
        return e.reshape(steps * Bp, D)

    emb_all = jnp.concatenate([prep(emb_x, S), prep(emb_y, T)], axis=0)

    feat, logp = pl.pallas_call(
        seq2seq_kernel,
        out_shape=(jax.ShapeDtypeStruct((T, Bp, H), jnp.float32),
                   jax.ShapeDtypeStruct((T, Bp, VP), jnp.float32)),
        in_specs=[_SMEM] + [_VMEM] * 23,
        out_specs=(_VMEM, _VMEM),
        scratch_shapes=[pltpu.VMEM((S, Bp, 4 * H), jnp.float32),   # hoisted x gates
                        pltpu.VMEM((T, Bp, H), jnp.float32)],      # teacher embeddings
    )(tf_mask.astype(jnp.int32), emb_all,
      p["ln1_g"], p["ln1_b"], p["proj_w"], p["proj_b"], p["ln2_g"], p["ln2_b"],
      p["enc_wih0"], p["enc_whh0"], p["enc_b0"],
      p["enc_wih1"], p["enc_whh1"], p["enc_b1"],
      p["dec_emb_w"], p["dec_emb_b"],
      p["dec_wih0"], p["dec_whh0"], p["dec_b0"],
      p["dec_wih1"], p["dec_whh1"], p["dec_b1"],
      p["out_w"], p["out_b"])

    feature = jnp.transpose(feat[:, :B, :], (1, 0, 2))     # [B, T, H]
    logprob = jnp.transpose(logp[:, :B, :V], (1, 0, 2))    # [B, T, V]
    return feature, logprob


# ------------------------------- parameters -------------------------------------
def _lstm_layer(key, in_dim, hid):
    k = 1.0 / float(hid) ** 0.5
    k1, k2, k3, k4 = jax.random.split(key, 4)
    wih = jax.random.uniform(k1, (in_dim, 4 * hid), jnp.float32, -k, k)
    whh = jax.random.uniform(k2, (hid, 4 * hid), jnp.float32, -k, k)
    b = (jax.random.uniform(k3, (4 * hid,), jnp.float32, -k, k)
         + jax.random.uniform(k4, (4 * hid,), jnp.float32, -k, k))
    return wih, whh, b.reshape(1, 4 * hid)


def _ifog(w):
    """Permute PyTorch gate order [i, f, g, o] -> kernel order [i, f, o, g]."""
    i, f, g, o = jnp.split(w, 4, axis=-1)
    return jnp.concatenate([i, f, o, g], axis=-1)


def init_params(key, weight_dtype=jnp.bfloat16):
    ks = jax.random.split(key, 10)
    kd = 1.0 / float(D) ** 0.5

    enc0 = _lstm_layer(ks[3], H, H)
    enc1 = _lstm_layer(ks[4], H, H)
    dec0 = _lstm_layer(ks[5], H, H)
    dec1 = _lstm_layer(ks[6], H, H)

    out_w = jax.random.uniform(ks[7], (H, V), jnp.float32, -kd, kd)
    out_b = jax.random.uniform(ks[8], (V,), jnp.float32, -kd, kd)

    wd = weight_dtype
    return dict(
        emb_table=0.02 * jax.random.normal(ks[0], (V, D), jnp.float32),
        ln1_g=jnp.ones((1, D), jnp.float32), ln1_b=jnp.zeros((1, D), jnp.float32),
        proj_w=jax.random.uniform(ks[1], (D, D), jnp.float32, -kd, kd).astype(wd),
        proj_b=jax.random.uniform(ks[2], (1, D), jnp.float32, -kd, kd),
        ln2_g=jnp.ones((1, D), jnp.float32), ln2_b=jnp.zeros((1, D), jnp.float32),
        # W_ih / W_hh kept separate so the previous-step-hidden matmul can issue
        # at the top of each recurrent step (ILP on the latency-bound chain).
        enc_wih0=_ifog(enc0[0]).astype(wd),
        enc_whh0=_ifog(enc0[1]).astype(wd),
        enc_b0=_ifog(enc0[2]),
        enc_wih1=_ifog(enc1[0]).astype(wd),
        enc_whh1=_ifog(enc1[1]).astype(wd),
        enc_b1=_ifog(enc1[2]),
        dec_emb_w=jax.random.uniform(ks[9], (H, H), jnp.float32, -kd, kd).astype(wd),
        dec_emb_b=jnp.zeros((1, H), jnp.float32),
        dec_wih0=_ifog(dec0[0]).astype(wd),
        dec_whh0=_ifog(dec0[1]).astype(wd),
        dec_b0=_ifog(dec0[2]),
        dec_wih1=_ifog(dec1[0]).astype(wd),
        dec_whh1=_ifog(dec1[1]).astype(wd),
        dec_b1=_ifog(dec1[2]),
        out_w=jnp.zeros((H, VP), jnp.float32).at[:, :V].set(out_w).astype(wd),
        out_b=jnp.zeros((1, VP), jnp.float32).at[:, :V].set(out_b),
    )


# TODO(synk): `Swish` / `Linear` in the projection are undefined custom classes in the
# reference; implemented as x*sigmoid(x) and a standard affine layer respectively.

if __name__ == "__main__":
    key = jax.random.PRNGKey(0)
    pkey, xkey, ykey, tkey = jax.random.split(key, 4)
    params = init_params(pkey)

    B, S, T = 2, 8, 4
    x_tok = jax.random.randint(xkey, (B, S), 0, V, jnp.int32)
    y_tok = jax.random.randint(ykey, (B, S), 0, V, jnp.int32)
    # deterministic replacement of random.random() < teacher_forcing_ratio (0.5)
    tf_mask = (jax.random.uniform(tkey, (T,)) < 0.5).astype(jnp.int32)

    fwd = jax.jit(seq2seq_forward, static_argnums=(3,))
    feature, logp = fwd(params, x_tok, y_tok, T, tf_mask)
    feature, logp = jax.block_until_ready((feature, logp))

    assert feature.shape == (B, T, H) and logp.shape == (B, T, V)
    assert bool(jnp.all(jnp.isfinite(feature))) and bool(jnp.all(jnp.isfinite(logp)))
    assert bool(jnp.allclose(jnp.exp(logp).sum(-1), 1.0, atol=1e-4))
    print("KERNEL_OK")
</pallas_src>

<mosaic_0001>
module attributes {stable_mosaic.version = 11 : i64} {
  func.func @seq2seq_kernel(%arg0: memref<4xi32, #tpu.memory_space<smem>>, %arg1: memref<96x128xf32, #tpu.memory_space<vmem>>, %arg2: memref<1x128xf32, #tpu.memory_space<vmem>>, %arg3: memref<1x128xf32, #tpu.memory_space<vmem>>, %arg4: memref<128x128xbf16, #tpu.memory_space<vmem>>, %arg5: memref<1x128xf32, #tpu.memory_space<vmem>>, %arg6: memref<1x128xf32, #tpu.memory_space<vmem>>, %arg7: memref<1x128xf32, #tpu.memory_space<vmem>>, %arg8: memref<128x512xbf16, #tpu.memory_space<vmem>>, %arg9: memref<128x512xbf16, #tpu.memory_space<vmem>>, %arg10: memref<1x512xf32, #tpu.memory_space<vmem>>, %arg11: memref<128x512xbf16, #tpu.memory_space<vmem>>, %arg12: memref<128x512xbf16, #tpu.memory_space<vmem>>, %arg13: memref<1x512xf32, #tpu.memory_space<vmem>>, %arg14: memref<128x128xbf16, #tpu.memory_space<vmem>>, %arg15: memref<1x128xf32, #tpu.memory_space<vmem>>, %arg16: memref<128x512xbf16, #tpu.memory_space<vmem>>, %arg17: memref<128x512xbf16, #tpu.memory_space<vmem>>, %arg18: memref<1x512xf32, #tpu.memory_space<vmem>>, %arg19: memref<128x512xbf16, #tpu.memory_space<vmem>>, %arg20: memref<128x512xbf16, #tpu.memory_space<vmem>>, %arg21: memref<1x512xf32, #tpu.memory_space<vmem>>, %arg22: memref<128x128xbf16, #tpu.memory_space<vmem>>, %arg23: memref<1x128xf32, #tpu.memory_space<vmem>>, %arg24: memref<4x8x128xf32, #tpu.memory_space<vmem>>, %arg25: memref<4x8x128xf32, #tpu.memory_space<vmem>>, %arg26: memref<8x8x512xf32, #tpu.memory_space<vmem>>, %arg27: memref<4x8x128xf32, #tpu.memory_space<vmem>>) attributes {dimension_semantics = [], scalar_prefetch = 0 : i64, scratch_operands = 2 : i64, tpu.core_type = #tpu.core_type<tc>} {
    %c0 = arith.constant 0 : index
    %c0_0 = arith.constant 0 : index
    %0 = vector.load %arg1[%c0, %c0_0] : memref<96x128xf32, #tpu.memory_space<vmem>>, vector<96x128xf32>
    %c0_1 = arith.constant 0 : index
    %c0_2 = arith.constant 0 : index
    %1 = vector.load %arg2[%c0_1, %c0_2] : memref<1x128xf32, #tpu.memory_space<vmem>>, vector<1x128xf32>
    %c0_3 = arith.constant 0 : index
    %c0_4 = arith.constant 0 : index
    %2 = vector.load %arg3[%c0_3, %c0_4] : memref<1x128xf32, #tpu.memory_space<vmem>>, vector<1x128xf32>
    %cst = arith.constant dense<0.000000e+00> : vector<96xf32>
    %3 = vector.multi_reduction <add>, %0, %cst [1] : vector<96x128xf32> to vector<96xf32>
    %4 = vector.shape_cast %3 : vector<96xf32> to vector<96x1xf32>
    %cst_5 = arith.constant 1.280000e+02 : f32
    %5 = vector.broadcast %cst_5 : f32 to vector<96x1xf32>
    %6 = arith.divf %4, %5 : vector<96x1xf32>
    %7 = vector.broadcast %6 : vector<96x1xf32> to vector<96x128xf32>
    %8 = arith.subf %0, %7 : vector<96x128xf32>
    %9 = arith.mulf %8, %8 : vector<96x128xf32>
    %cst_6 = arith.constant dense<0.000000e+00> : vector<96xf32>
    %10 = vector.multi_reduction <add>, %9, %cst_6 [1] : vector<96x128xf32> to vector<96xf32>
    %11 = vector.shape_cast %10 : vector<96xf32> to vector<96x1xf32>
    %cst_7 = arith.constant 1.280000e+02 : f32
    %12 = vector.broadcast %cst_7 : f32 to vector<96x1xf32>
    %13 = arith.divf %11, %12 : vector<96x1xf32>
    %cst_8 = arith.constant 9.99999974E-6 : f32
    %14 = vector.broadcast %cst_8 : f32 to vector<96x1xf32>
    %15 = arith.addf %13, %14 : vector<96x1xf32>
    %16 = math.rsqrt %15 : vector<96x1xf32>
    %17 = vector.broadcast %16 : vector<96x1xf32> to vector<96x128xf32>
    %18 = arith.mulf %8, %17 : vector<96x128xf32>
    %19 = vector.broadcast %1 : vector<1x128xf32> to vector<96x128xf32>
    %20 = arith.mulf %18, %19 : vector<96x128xf32>
    %21 = vector.broadcast %2 : vector<1x128xf32> to vector<96x128xf32>
    %22 = arith.addf %20, %21 : vector<96x128xf32>
    %23 = arith.negf %22 : vector<96x128xf32>
    %24 = math.exp %23 : vector<96x128xf32>
    %cst_9 = arith.constant 1.000000e+00 : f32
    %25 = vector.broadcast %cst_9 : f32 to vector<96x128xf32>
    %26 = arith.addf %25, %24 : vector<96x128xf32>
    %27 = arith.divf %25, %26 : vector<96x128xf32>
    %28 = arith.mulf %22, %27 : vector<96x128xf32>
    %c0_10 = arith.constant 0 : index
    %c0_11 = arith.constant 0 : index
    %29 = vector.load %arg4[%c0_10, %c0_11] : memref<128x128xbf16, #tpu.memory_space<vmem>>, vector<128x128xbf16>
    %30 = arith.truncf %28 : vector<96x128xf32> to vector<96x128xbf16>
    %cst_12 = arith.constant dense<0.000000e+00> : vector<96x128xf32>
    %31 = tpu.matmul %30, %29, %cst_12 {dimension_numbers = #tpu.dot_dimension_numbers<[1], [0], [0], [1], [0, 0, 1, 1], [], []>} : vector<96x128xbf16>, vector<128x128xbf16>, vector<96x128xf32> -> vector<96x128xf32>
    %c0_13 = arith.constant 0 : index
    %c0_14 = arith.constant 0 : index
    %32 = vector.load %arg5[%c0_13, %c0_14] : memref<1x128xf32, #tpu.memory_space<vmem>>, vector<1x128xf32>
    %33 = vector.broadcast %32 : vector<1x128xf32> to vector<96x128xf32>
    %34 = arith.addf %31, %33 : vector<96x128xf32>
    %c0_15 = arith.constant 0 : index
    %c0_16 = arith.constant 0 : index
    %35 = vector.load %arg6[%c0_15, %c0_16] : memref<1x128xf32, #tpu.memory_space<vmem>>, vector<1x128xf32>
    %c0_17 = arith.constant 0 : index
    %c0_18 = arith.constant 0 : index
    %36 = vector.load %arg7[%c0_17, %c0_18] : memref<1x128xf32, #tpu.memory_space<vmem>>, vector<1x128xf32>
    %cst_19 = arith.constant dense<0.000000e+00> : vector<96xf32>
    %37 = vector.multi_reduction <add>, %34, %cst_19 [1] : vector<96x128xf32> to vector<96xf32>
    %38 = vector.shape_cast %37 : vector<96xf32> to vector<96x1xf32>
    %cst_20 = arith.constant 1.280000e+02 : f32
    %39 = vector.broadcast %cst_20 : f32 to vector<96x1xf32>
    %40 = arith.divf %38, %39 : vector<96x1xf32>
    %41 = vector.broadcast %40 : vector<96x1xf32> to vector<96x128xf32>
    %42 = arith.subf %34, %41 : vector<96x128xf32>
    %43 = arith.mulf %42, %42 : vector<96x128xf32>
    %cst_21 = arith.constant dense<0.000000e+00> : vector<96xf32>
    %44 = vector.multi_reduction <add>, %43, %cst_21 [1] : vector<96x128xf32> to vector<96xf32>
    %45 = vector.shape_cast %44 : vector<96xf32> to vector<96x1xf32>
    %cst_22 = arith.constant 1.280000e+02 : f32
    %46 = vector.broadcast %cst_22 : f32 to vector<96x1xf32>
    %47 = arith.divf %45, %46 : vector<96x1xf32>
    %cst_23 = arith.constant 9.99999974E-6 : f32
    %48 = vector.broadcast %cst_23 : f32 to vector<96x1xf32>
    %49 = arith.addf %47, %48 : vector<96x1xf32>
    %50 = math.rsqrt %49 : vector<96x1xf32>
    %51 = vector.broadcast %50 : vector<96x1xf32> to vector<96x128xf32>
    %52 = arith.mulf %42, %51 : vector<96x128xf32>
    %53 = vector.broadcast %35 : vector<1x128xf32> to vector<96x128xf32>
    %54 = arith.mulf %52, %53 : vector<96x128xf32>
    %55 = vector.broadcast %36 : vector<1x128xf32> to vector<96x128xf32>
    %56 = arith.addf %54, %55 : vector<96x128xf32>
    %57 = vector.extract_strided_slice %56 {offsets = [0, 0], sizes = [64, 128], strides = [1, 1]} : vector<96x128xf32> to vector<64x128xf32>
    %58 = vector.extract_strided_slice %56 {offsets = [56, 0], sizes = [8, 128], strides = [1, 1]} : vector<96x128xf32> to vector<8x128xf32>
    %59 = vector.extract_strided_slice %56 {offsets = [64, 0], sizes = [32, 128], strides = [1, 1]} : vector<96x128xf32> to vector<32x128xf32>
    %c0_24 = arith.constant 0 : index
    %c0_25 = arith.constant 0 : index
    %60 = vector.load %arg8[%c0_24, %c0_25] : memref<128x512xbf16, #tpu.memory_space<vmem>>, vector<128x512xbf16>
    %61 = arith.truncf %57 : vector<64x128xf32> to vector<64x128xbf16>
    %cst_26 = arith.constant dense<0.000000e+00> : vector<64x512xf32>
    %62 = tpu.matmul %61, %60, %cst_26 {dimension_numbers = #tpu.dot_dimension_numbers<[1], [0], [0], [1], [0, 0, 1, 1], [], []>} : vector<64x128xbf16>, vector<128x512xbf16>, vector<64x512xf32> -> vector<64x512xf32>
    %c0_27 = arith.constant 0 : index
    %c0_28 = arith.constant 0 : index
    %63 = vector.load %arg10[%c0_27, %c0_28] : memref<1x512xf32, #tpu.memory_space<vmem>>, vector<1x512xf32>
    %64 = vector.broadcast %63 : vector<1x512xf32> to vector<64x512xf32>
    %65 = arith.addf %62, %64 : vector<64x512xf32>
    %66 = vector.shape_cast %65 : vector<64x512xf32> to vector<8x8x512xf32>
    %c0_29 = arith.constant 0 : index
    %c0_30 = arith.constant 0 : index
    %c0_31 = arith.constant 0 : index
    %67 = vector.load %arg26[%c0_29, %c0_30, %c0_31] : memref<8x8x512xf32, #tpu.memory_space<vmem>>, vector<8x8x512xf32>
    tpu.vector_store %arg26[%c0_29, %c0_30, %c0_31], %66 {strides = array<i32>} : memref<8x8x512xf32, #tpu.memory_space<vmem>>, vector<8x8x512xf32>,
    %c0_32 = arith.constant 0 : index
    %c0_33 = arith.constant 0 : index
    %68 = vector.load %arg14[%c0_32, %c0_33] : memref<128x128xbf16, #tpu.memory_space<vmem>>, vector<128x128xbf16>
    %69 = arith.truncf %59 : vector<32x128xf32> to vector<32x128xbf16>
    %cst_34 = arith.constant dense<0.000000e+00> : vector<32x128xf32>
    %70 = tpu.matmul %69, %68, %cst_34 {dimension_numbers = #tpu.dot_dimension_numbers<[1], [0], [0], [1], [0, 0, 1, 1], [], []>} : vector<32x128xbf16>, vector<128x128xbf16>, vector<32x128xf32> -> vector<32x128xf32>
    %c0_35 = arith.constant 0 : index
    %c0_36 = arith.constant 0 : index
    %71 = vector.load %arg15[%c0_35, %c0_36] : memref<1x128xf32, #tpu.memory_space<vmem>>, vector<1x128xf32>
    %72 = vector.broadcast %71 : vector<1x128xf32> to vector<32x128xf32>
    %73 = arith.addf %70, %72 : vector<32x128xf32>
    %cst_37 = arith.constant 0.000000e+00 : f32
    %74 = vector.broadcast %cst_37 : f32 to vector<32x128xf32>
    %75 = arith.maximumf %73, %74 : vector<32x128xf32>
    %76 = vector.shape_cast %75 : vector<32x128xf32> to vector<4x8x128xf32>
    %c0_38 = arith.constant 0 : index
    %c0_39 = arith.constant 0 : index
    %c0_40 = arith.constant 0 : index
    %77 = vector.load %arg27[%c0_38, %c0_39, %c0_40] : memref<4x8x128xf32, #tpu.memory_space<vmem>>, vector<4x8x128xf32>
    tpu.vector_store %arg27[%c0_38, %c0_39, %c0_40], %76 {strides = array<i32>} : memref<4x8x128xf32, #tpu.memory_space<vmem>>, vector<4x8x128xf32>,
    %c0_41 = arith.constant 0 : index
    %c0_42 = arith.constant 0 : index
    %78 = vector.load %arg13[%c0_41, %c0_42] : memref<1x512xf32, #tpu.memory_space<vmem>>, vector<1x512xf32>
    %79 = vector.shape_cast %78 : vector<1x512xf32> to vector<1x512xf32>
    %80 = vector.broadcast %79 : vector<1x512xf32> to vector<8x512xf32>
    %cst_43 = arith.constant 0.000000e+00 : f32
    %81 = vector.broadcast %cst_43 : f32 to vector<8x128xf32>
    %c0_i32 = arith.constant 0 : i32
    %82 = arith.index_cast %c0_i32 : i32 to index
    %c0_44 = arith.constant 0 : index
    %c0_45 = arith.constant 0 : index
    %83 = vector.load %arg26[%82, %c0_44, %c0_45] : memref<8x8x512xf32, #tpu.memory_space<vmem>>, vector<1x8x512xf32>
    %84 = vector.shape_cast %83 : vector<1x8x512xf32> to vector<8x512xf32>
    %c0_46 = arith.constant 0 : index
    %c0_47 = arith.constant 0 : index
    %85 = vector.load %arg9[%c0_46, %c0_47] : memref<128x512xbf16, #tpu.memory_space<vmem>>, vector<128x512xbf16>
    %86 = arith.truncf %81 : vector<8x128xf32> to vector<8x128xbf16>
    %cst_48 = arith.constant dense<0.000000e+00> : vector<8x512xf32>
    %87 = tpu.matmul %86, %85, %cst_48 {dimension_numbers = #tpu.dot_dimension_numbers<[1], [0], [0], [1], [0, 0, 1, 1], [], []>} : vector<8x128xbf16>, vector<128x512xbf16>, vector<8x512xf32> -> vector<8x512xf32>
    %88 = arith.addf %84, %87 : vector<8x512xf32>
    %89 = vector.extract_strided_slice %88 {offsets = [0, 0], sizes = [8, 384], strides = [1, 1]} : vector<8x512xf32> to vector<8x384xf32>
    %90 = arith.negf %89 : vector<8x384xf32>
    %91 = math.exp %90 : vector<8x384xf32>
    %cst_49 = arith.constant 1.000000e+00 : f32
    %92 = vector.broadcast %cst_49 : f32 to vector<8x384xf32>
    %93 = arith.addf %92, %91 : vector<8x384xf32>
    %94 = arith.divf %92, %93 : vector<8x384xf32>
    %95 = vector.extract_strided_slice %88 {offsets = [0, 384], sizes = [8, 128], strides = [1, 1]} : vector<8x512xf32> to vector<8x128xf32>
    %96 = math.tanh %95 : vector<8x128xf32>
    %97 = vector.extract_strided_slice %94 {offsets = [0, 128], sizes = [8, 128], strides = [1, 1]} : vector<8x384xf32> to vector<8x128xf32>
    %98 = arith.mulf %97, %81 : vector<8x128xf32>
    %99 = vector.extract_strided_slice %94 {offsets = [0, 0], sizes = [8, 128], strides = [1, 1]} : vector<8x384xf32> to vector<8x128xf32>
    %100 = arith.mulf %99, %96 : vector<8x128xf32>
    %101 = arith.addf %98, %100 : vector<8x128xf32>
    %102 = vector.extract_strided_slice %94 {offsets = [0, 256], sizes = [8, 128], strides = [1, 1]} : vector<8x384xf32> to vector<8x128xf32>
    %103 = math.tanh %101 : vector<8x128xf32>
    %104 = arith.mulf %102, %103 : vector<8x128xf32>
    %c0_50 = arith.constant 0 : index
    %c0_51 = arith.constant 0 : index
    %105 = vector.load %arg12[%c0_50, %c0_51] : memref<128x512xbf16, #tpu.memory_space<vmem>>, vector<128x512xbf16>
    %106 = arith.truncf %81 : vector<8x128xf32> to vector<8x128xbf16>
    %cst_52 = arith.constant dense<0.000000e+00> : vector<8x512xf32>
    %107 = tpu.matmul %106, %105, %cst_52 {dimension_numbers = #tpu.dot_dimension_numbers<[1], [0], [0], [1], [0, 0, 1, 1], [], []>} : vector<8x128xbf16>, vector<128x512xbf16>, vector<8x512xf32> -> vector<8x512xf32>
    %c0_53 = arith.constant 0 : index
    %c0_54 = arith.constant 0 : index
    %108 = vector.load %arg11[%c0_53, %c0_54] : memref<128x512xbf16, #tpu.memory_space<vmem>>, vector<128x512xbf16>
    %109 = arith.truncf %104 : vector<8x128xf32> to vector<8x128xbf16>
    %cst_55 = arith.constant dense<0.000000e+00> : vector<8x512xf32>
    %110 = tpu.matmul %109, %108, %cst_55 {dimension_numbers = #tpu.dot_dimension_numbers<[1], [0], [0], [1], [0, 0, 1, 1], [], []>} : vector<8x128xbf16>, vector<128x512xbf16>, vector<8x512xf32> -> vector<8x512xf32>
    %111 = arith.addf %107, %110 : vector<8x512xf32>
    %112 = arith.addf %111, %80 : vector<8x512xf32>
    %113 = vector.extract_strided_slice %112 {offsets = [0, 0], sizes = [8, 384], strides = [1, 1]} : vector<8x512xf32> to vector<8x384xf32>
    %114 = arith.negf %113 : vector<8x384xf32>
    %115 = math.exp %114 : vector<8x384xf32>
    %cst_56 = arith.constant 1.000000e+00 : f32
    %116 = vector.broadcast %cst_56 : f32 to vector<8x384xf32>
    %117 = arith.addf %116, %115 : vector<8x384xf32>
    %118 = arith.divf %116, %117 : vector<8x384xf32>
    %119 = vector.extract_strided_slice %112 {offsets = [0, 384], sizes = [8, 128], strides = [1, 1]} : vector<8x512xf32> to vector<8x128xf32>
    %120 = math.tanh %119 : vector<8x128xf32>
    %121 = vector.extract_strided_slice %118 {offsets = [0, 128], sizes = [8, 128], strides = [1, 1]} : vector<8x384xf32> to vector<8x128xf32>
    %122 = arith.mulf %121, %81 : vector<8x128xf32>
    %123 = vector.extract_strided_slice %118 {offsets = [0, 0], sizes = [8, 128], strides = [1, 1]} : vector<8x384xf32> to vector<8x128xf32>
    %124 = arith.mulf %123, %120 : vector<8x128xf32>
    %125 = arith.addf %122, %124 : vector<8x128xf32>
    %126 = vector.extract_strided_slice %118 {offsets = [0, 256], sizes = [8, 128], strides = [1, 1]} : vector<8x384xf32> to vector<8x128xf32>
    %127 = math.tanh %125 : vector<8x128xf32>
    %128 = arith.mulf %126, %127 : vector<8x128xf32>
    %c1_i32 = arith.constant 1 : i32
    %129 = arith.index_cast %c1_i32 : i32 to index
    %c0_57 = arith.constant 0 : index
    %c0_58 = arith.constant 0 : index
    %130 = vector.load %arg26[%129, %c0_57, %c0_58] : memref<8x8x512xf32, #tpu.memory_space<vmem>>, vector<1x8x512xf32>
    %131 = vector.shape_cast %130 : vector<1x8x512xf32> to vector<8x512xf32>
    %c0_59 = arith.constant 0 : index
    %c0_60 = arith.constant 0 : index
    %132 = vector.load %arg9[%c0_59, %c0_60] : memref<128x512xbf16, #tpu.memory_space<vmem>>, vector<128x512xbf16>
    %133 = arith.truncf %104 : vector<8x128xf32> to vector<8x128xbf16>
    %cst_61 = arith.constant dense<0.000000e+00> : vector<8x512xf32>
    %134 = tpu.matmul %133, %132, %cst_61 {dimension_numbers = #tpu.dot_dimension_numbers<[1], [0], [0], [1], [0, 0, 1, 1], [], []>} : vector<8x128xbf16>, vector<128x512xbf16>, vector<8x512xf32> -> vector<8x512xf32>
    %135 = arith.addf %131, %134 : vector<8x512xf32>
    %136 = vector.extract_strided_slice %135 {offsets = [0, 0], sizes = [8, 384], strides = [1, 1]} : vector<8x512xf32> to vector<8x384xf32>
    %137 = arith.negf %136 : vector<8x384xf32>
    %138 = math.exp %137 : vector<8x384xf32>
    %cst_62 = arith.constant 1.000000e+00 : f32
    %139 = vector.broadcast %cst_62 : f32 to vector<8x384xf32>
    %140 = arith.addf %139, %138 : vector<8x384xf32>
    %141 = arith.divf %139, %140 : vector<8x384xf32>
    %142 = vector.extract_strided_slice %135 {offsets = [0, 384], sizes = [8, 128], strides = [1, 1]} : vector<8x512xf32> to vector<8x128xf32>
    %143 = math.tanh %142 : vector<8x128xf32>
    %144 = vector.extract_strided_slice %141 {offsets = [0, 128], sizes = [8, 128], strides = [1, 1]} : vector<8x384xf32> to vector<8x128xf32>
    %145 = arith.mulf %144, %101 : vector<8x128xf32>
    %146 = vector.extract_strided_slice %141 {offsets = [0, 0], sizes = [8, 128], strides = [1, 1]} : vector<8x384xf32> to vector<8x128xf32>
    %147 = arith.mulf %146, %143 : vector<8x128xf32>
    %148 = arith.addf %145, %147 : vector<8x128xf32>
    %149 = vector.extract_strided_slice %141 {offsets = [0, 256], sizes = [8, 128], strides = [1, 1]} : vector<8x384xf32> to vector<8x128xf32>
    %150 = math.tanh %148 : vector<8x128xf32>
    %151 = arith.mulf %149, %150 : vector<8x128xf32>
    %c0_63 = arith.constant 0 : index
    %c0_64 = arith.constant 0 : index
    %152 = vector.load %arg12[%c0_63, %c0_64] : memref<128x512xbf16, #tpu.memory_space<vmem>>, vector<128x512xbf16>
    %153 = arith.truncf %128 : vector<8x128xf32> to vector<8x128xbf16>
    %cst_65 = arith.constant dense<0.000000e+00> : vector<8x512xf32>
    %154 = tpu.matmul %153, %152, %cst_65 {dimension_numbers = #tpu.dot_dimension_numbers<[1], [0], [0], [1], [0, 0, 1, 1], [], []>} : vector<8x128xbf16>, vector<128x512xbf16>, vector<8x512xf32> -> vector<8x512xf32>
    %c0_66 = arith.constant 0 : index
    %c0_67 = arith.constant 0 : index
    %155 = vector.load %arg11[%c0_66, %c0_67] : memref<128x512xbf16, #tpu.memory_space<vmem>>, vector<128x512xbf16>
    %156 = arith.truncf %151 : vector<8x128xf32> to vector<8x128xbf16>
    %cst_68 = arith.constant dense<0.000000e+00> : vector<8x512xf32>
    %157 = tpu.matmul %156, %155, %cst_68 {dimension_numbers = #tpu.dot_dimension_numbers<[1], [0], [0], [1], [0, 0, 1, 1], [], []>} : vector<8x128xbf16>, vector<128x512xbf16>, vector<8x512xf32> -> vector<8x512xf32>
    %158 = arith.addf %154, %157 : vector<8x512xf32>
    %159 = arith.addf %158, %80 : vector<8x512xf32>
    %160 = vector.extract_strided_slice %159 {offsets = [0, 0], sizes = [8, 384], strides = [1, 1]} : vector<8x512xf32> to vector<8x384xf32>
    %161 = arith.negf %160 : vector<8x384xf32>
    %162 = math.exp %161 : vector<8x384xf32>
    %cst_69 = arith.constant 1.000000e+00 : f32
    %163 = vector.broadcast %cst_69 : f32 to vector<8x384xf32>
    %164 = arith.addf %163, %162 : vector<8x384xf32>
    %165 = arith.divf %163, %164 : vector<8x384xf32>
    %166 = vector.extract_strided_slice %159 {offsets = [0, 384], sizes = [8, 128], strides = [1, 1]} : vector<8x512xf32> to vector<8x128xf32>
    %167 = math.tanh %166 : vector<8x128xf32>
    %168 = vector.extract_strided_slice %165 {offsets = [0, 128], sizes = [8, 128], strides = [1, 1]} : vector<8x384xf32> to vector<8x128xf32>
    %169 = arith.mulf %168, %125 : vector<8x128xf32>
    %170 = vector.extract_strided_slice %165 {offsets = [0, 0], sizes = [8, 128], strides = [1, 1]} : vector<8x384xf32> to vector<8x128xf32>
    %171 = arith.mulf %170, %167 : vector<8x128xf32>
    %172 = arith.addf %169, %171 : vector<8x128xf32>
    %173 = vector.extract_strided_slice %165 {offsets = [0, 256], sizes = [8, 128], strides = [1, 1]} : vector<8x384xf32> to vector<8x128xf32>
    %174 = math.tanh %172 : vector<8x128xf32>
    %175 = arith.mulf %173, %174 : vector<8x128xf32>
    %c2_i32 = arith.constant 2 : i32
    %176 = arith.index_cast %c2_i32 : i32 to index
    %c0_70 = arith.constant 0 : index
    %c0_71 = arith.constant 0 : index
    %177 = vector.load %arg26[%176, %c0_70, %c0_71] : memref<8x8x512xf32, #tpu.memory_space<vmem>>, vector<1x8x512xf32>
    %178 = vector.shape_cast %177 : vector<1x8x512xf32> to vector<8x512xf32>
    %c0_72 = arith.constant 0 : index
    %c0_73 = arith.constant 0 : index
    %179 = vector.load %arg9[%c0_72, %c0_73] : memref<128x512xbf16, #tpu.memory_space<vmem>>, vector<128x512xbf16>
    %180 = arith.truncf %151 : vector<8x128xf32> to vector<8x128xbf16>
    %cst_74 = arith.constant dense<0.000000e+00> : vector<8x512xf32>
    %181 = tpu.matmul %180, %179, %cst_74 {dimension_numbers = #tpu.dot_dimension_numbers<[1], [0], [0], [1], [0, 0, 1, 1], [], []>} : vector<8x128xbf16>, vector<128x512xbf16>, vector<8x512xf32> -> vector<8x512xf32>
    %182 = arith.addf %178, %181 : vector<8x512xf32>
    %183 = vector.extract_strided_slice %182 {offsets = [0, 0], sizes = [8, 384], strides = [1, 1]} : vector<8x512xf32> to vector<8x384xf32>
    %184 = arith.negf %183 : vector<8x384xf32>
    %185 = math.exp %184 : vector<8x384xf32>
    %cst_75 = arith.constant 1.000000e+00 : f32
    %186 = vector.broadcast %cst_75 : f32 to vector<8x384xf32>
    %187 = arith.addf %186, %185 : vector<8x384xf32>
    %188 = arith.divf %186, %187 : vector<8x384xf32>
    %189 = vector.extract_strided_slice %182 {offsets = [0, 384], sizes = [8, 128], strides = [1, 1]} : vector<8x512xf32> to vector<8x128xf32>
    %190 = math.tanh %189 : vector<8x128xf32>
    %191 = vector.extract_strided_slice %188 {offsets = [0, 128], sizes = [8, 128], strides = [1, 1]} : vector<8x384xf32> to vector<8x128xf32>
    %192 = arith.mulf %191, %148 : vector<8x128xf32>
    %193 = vector.extract_strided_slice %188 {offsets = [0, 0], sizes = [8, 128], strides = [1, 1]} : vector<8x384xf32> to vector<8x128xf32>
    %194 = arith.mulf %193, %190 : vector<8x128xf32>
    %195 = arith.addf %192, %194 : vector<8x128xf32>
    %196 = vector.extract_strided_slice %188 {offsets = [0, 256], sizes = [8, 128], strides = [1, 1]} : vector<8x384xf32> to vector<8x128xf32>
    %197 = math.tanh %195 : vector<8x128xf32>
    %198 = arith.mulf %196, %197 : vector<8x128xf32>
    %c0_76 = arith.constant 0 : index
    %c0_77 = arith.constant 0 : index
    %199 = vector.load %arg12[%c0_76, %c0_77] : memref<128x512xbf16, #tpu.memory_space<vmem>>, vector<128x512xbf16>
    %200 = arith.truncf %175 : vector<8x128xf32> to vector<8x128xbf16>
    %cst_78 = arith.constant dense<0.000000e+00> : vector<8x512xf32>
    %201 = tpu.matmul %200, %199, %cst_78 {dimension_numbers = #tpu.dot_dimension_numbers<[1], [0], [0], [1], [0, 0, 1, 1], [], []>} : vector<8x128xbf16>, vector<128x512xbf16>, vector<8x512xf32> -> vector<8x512xf32>
    %c0_79 = arith.constant 0 : index
    %c0_80 = arith.constant 0 : index
    %202 = vector.load %arg11[%c0_79, %c0_80] : memref<128x512xbf16, #tpu.memory_space<vmem>>, vector<128x512xbf16>
    %203 = arith.truncf %198 : vector<8x128xf32> to vector<8x128xbf16>
    %cst_81 = arith.constant dense<0.000000e+00> : vector<8x512xf32>
    %204 = tpu.matmul %203, %202, %cst_81 {dimension_numbers = #tpu.dot_dimension_numbers<[1], [0], [0], [1], [0, 0, 1, 1], [], []>} : vector<8x128xbf16>, vector<128x512xbf16>, vector<8x512xf32> -> vector<8x512xf32>
    %205 = arith.addf %201, %204 : vector<8x512xf32>
    %206 = arith.addf %205, %80 : vector<8x512xf32>
    %207 = vector.extract_strided_slice %206 {offsets = [0, 0], sizes = [8, 384], strides = [1, 1]} : vector<8x512xf32> to vector<8x384xf32>
    %208 = arith.negf %207 : vector<8x384xf32>
    %209 = math.exp %208 : vector<8x384xf32>
    %cst_82 = arith.constant 1.000000e+00 : f32
    %210 = vector.broadcast %cst_82 : f32 to vector<8x384xf32>
    %211 = arith.addf %210, %209 : vector<8x384xf32>
    %212 = arith.divf %210, %211 : vector<8x384xf32>
    %213 = vector.extract_strided_slice %206 {offsets = [0, 384], sizes = [8, 128], strides = [1, 1]} : vector<8x512xf32> to vector<8x128xf32>
    %214 = math.tanh %213 : vector<8x128xf32>
    %215 = vector.extract_strided_slice %212 {offsets = [0, 128], sizes = [8, 128], strides = [1, 1]} : vector<8x384xf32> to vector<8x128xf32>
    %216 = arith.mulf %215, %172 : vector<8x128xf32>
    %217 = vector.extract_strided_slice %212 {offsets = [0, 0], sizes = [8, 128], strides = [1, 1]} : vector<8x384xf32> to vector<8x128xf32>
    %218 = arith.mulf %217, %214 : vector<8x128xf32>
    %219 = arith.addf %216, %218 : vector<8x128xf32>
    %220 = vector.extract_strided_slice %212 {offsets = [0, 256], sizes = [8, 128], strides = [1, 1]} : vector<8x384xf32> to vector<8x128xf32>
    %221 = math.tanh %219 : vector<8x128xf32>
    %222 = arith.mulf %220, %221 : vector<8x128xf32>
    %c3_i32 = arith.constant 3 : i32
    %223 = arith.index_cast %c3_i32 : i32 to index
    %c0_83 = arith.constant 0 : index
    %c0_84 = arith.constant 0 : index
    %224 = vector.load %arg26[%223, %c0_83, %c0_84] : memref<8x8x512xf32, #tpu.memory_space<vmem>>, vector<1x8x512xf32>
    %225 = vector.shape_cast %224 : vector<1x8x512xf32> to vector<8x512xf32>
    %c0_85 = arith.constant 0 : index
    %c0_86 = arith.constant 0 : index
    %226 = vector.load %arg9[%c0_85, %c0_86] : memref<128x512xbf16, #tpu.memory_space<vmem>>, vector<128x512xbf16>
    %227 = arith.truncf %198 : vector<8x128xf32> to vector<8x128xbf16>
    %cst_87 = arith.constant dense<0.000000e+00> : vector<8x512xf32>
    %228 = tpu.matmul %227, %226, %cst_87 {dimension_numbers = #tpu.dot_dimension_numbers<[1], [0], [0], [1], [0, 0, 1, 1], [], []>} : vector<8x128xbf16>, vector<128x512xbf16>, vector<8x512xf32> -> vector<8x512xf32>
    %229 = arith.addf %225, %228 : vector<8x512xf32>
    %230 = vector.extract_strided_slice %229 {offsets = [0, 0], sizes = [8, 384], strides = [1, 1]} : vector<8x512xf32> to vector<8x384xf32>
    %231 = arith.negf %230 : vector<8x384xf32>
    %232 = math.exp %231 : vector<8x384xf32>
    %cst_88 = arith.constant 1.000000e+00 : f32
    %233 = vector.broadcast %cst_88 : f32 to vector<8x384xf32>
    %234 = arith.addf %233, %232 : vector<8x384xf32>
    %235 = arith.divf %233, %234 : vector<8x384xf32>
    %236 = vector.extract_strided_slice %229 {offsets = [0, 384], sizes = [8, 128], strides = [1, 1]} : vector<8x512xf32> to vector<8x128xf32>
    %237 = math.tanh %236 : vector<8x128xf32>
    %238 = vector.extract_strided_slice %235 {offsets = [0, 128], sizes = [8, 128], strides = [1, 1]} : vector<8x384xf32> to vector<8x128xf32>
    %239 = arith.mulf %238, %195 : vector<8x128xf32>
    %240 = vector.extract_strided_slice %235 {offsets = [0, 0], sizes = [8, 128], strides = [1, 1]} : vector<8x384xf32> to vector<8x128xf32>
    %241 = arith.mulf %240, %237 : vector<8x128xf32>
    %242 = arith.addf %239, %241 : vector<8x128xf32>
    %243 = vector.extract_strided_slice %235 {offsets = [0, 256], sizes = [8, 128], strides = [1, 1]} : vector<8x384xf32> to vector<8x128xf32>
    %244 = math.tanh %242 : vector<8x128xf32>
    %245 = arith.mulf %243, %244 : vector<8x128xf32>
    %c0_89 = arith.constant 0 : index
    %c0_90 = arith.constant 0 : index
    %246 = vector.load %arg12[%c0_89, %c0_90] : memref<128x512xbf16, #tpu.memory_space<vmem>>, vector<128x512xbf16>
    %247 = arith.truncf %222 : vector<8x128xf32> to vector<8x128xbf16>
    %cst_91 = arith.constant dense<0.000000e+00> : vector<8x512xf32>
    %248 = tpu.matmul %247, %246, %cst_91 {dimension_numbers = #tpu.dot_dimension_numbers<[1], [0], [0], [1], [0, 0, 1, 1], [], []>} : vector<8x128xbf16>, vector<128x512xbf16>, vector<8x512xf32> -> vector<8x512xf32>
    %c0_92 = arith.constant 0 : index
    %c0_93 = arith.constant 0 : index
    %249 = vector.load %arg11[%c0_92, %c0_93] : memref<128x512xbf16, #tpu.memory_space<vmem>>, vector<128x512xbf16>
    %250 = arith.truncf %245 : vector<8x128xf32> to vector<8x128xbf16>
    %cst_94 = arith.constant dense<0.000000e+00> : vector<8x512xf32>
    %251 = tpu.matmul %250, %249, %cst_94 {dimension_numbers = #tpu.dot_dimension_numbers<[1], [0], [0], [1], [0, 0, 1, 1], [], []>} : vector<8x128xbf16>, vector<128x512xbf16>, vector<8x512xf32> -> vector<8x512xf32>
    %252 = arith.addf %248, %251 : vector<8x512xf32>
    %253 = arith.addf %252, %80 : vector<8x512xf32>
    %254 = vector.extract_strided_slice %253 {offsets = [0, 0], sizes = [8, 384], strides = [1, 1]} : vector<8x512xf32> to vector<8x384xf32>
    %255 = arith.negf %254 : vector<8x384xf32>
    %256 = math.exp %255 : vector<8x384xf32>
    %cst_95 = arith.constant 1.000000e+00 : f32
    %257 = vector.broadcast %cst_95 : f32 to vector<8x384xf32>
    %258 = arith.addf %257, %256 : vector<8x384xf32>
    %259 = arith.divf %257, %258 : vector<8x384xf32>
    %260 = vector.extract_strided_slice %253 {offsets = [0, 384], sizes = [8, 128], strides = [1, 1]} : vector<8x512xf32> to vector<8x128xf32>
    %261 = math.tanh %260 : vector<8x128xf32>
    %262 = vector.extract_strided_slice %259 {offsets = [0, 128], sizes = [8, 128], strides = [1, 1]} : vector<8x384xf32> to vector<8x128xf32>
    %263 = arith.mulf %262, %219 : vector<8x128xf32>
    %264 = vector.extract_strided_slice %259 {offsets = [0, 0], sizes = [8, 128], strides = [1, 1]} : vector<8x384xf32> to vector<8x128xf32>
    %265 = arith.mulf %264, %261 : vector<8x128xf32>
    %266 = arith.addf %263, %265 : vector<8x128xf32>
    %267 = vector.extract_strided_slice %259 {offsets = [0, 256], sizes = [8, 128], strides = [1, 1]} : vector<8x384xf32> to vector<8x128xf32>
    %268 = math.tanh %266 : vector<8x128xf32>
    %269 = arith.mulf %267, %268 : vector<8x128xf32>
    %c4_i32 = arith.constant 4 : i32
    %270 = arith.index_cast %c4_i32 : i32 to index
    %c0_96 = arith.constant 0 : index
    %c0_97 = arith.constant 0 : index
    %271 = vector.load %arg26[%270, %c0_96, %c0_97] : memref<8x8x512xf32, #tpu.memory_space<vmem>>, vector<1x8x512xf32>
    %272 = vector.shape_cast %271 : vector<1x8x512xf32> to vector<8x512xf32>
    %c0_98 = arith.constant 0 : index
    %c0_99 = arith.constant 0 : index
    %273 = vector.load %arg9[%c0_98, %c0_99] : memref<128x512xbf16, #tpu.memory_space<vmem>>, vector<128x512xbf16>
    %274 = arith.truncf %245 : vector<8x128xf32> to vector<8x128xbf16>
    %cst_100 = arith.constant dense<0.000000e+00> : vector<8x512xf32>
    %275 = tpu.matmul %274, %273, %cst_100 {dimension_numbers = #tpu.dot_dimension_numbers<[1], [0], [0], [1], [0, 0, 1, 1], [], []>} : vector<8x128xbf16>, vector<128x512xbf16>, vector<8x512xf32> -> vector<8x512xf32>
    %276 = arith.addf %272, %275 : vector<8x512xf32>
    %277 = vector.extract_strided_slice %276 {offsets = [0, 0], sizes = [8, 384], strides = [1, 1]} : vector<8x512xf32> to vector<8x384xf32>
    %278 = arith.negf %277 : vector<8x384xf32>
    %279 = math.exp %278 : vector<8x384xf32>
    %cst_101 = arith.constant 1.000000e+00 : f32
    %280 = vector.broadcast %cst_101 : f32 to vector<8x384xf32>
    %281 = arith.addf %280, %279 : vector<8x384xf32>
    %282 = arith.divf %280, %281 : vector<8x384xf32>
    %283 = vector.extract_strided_slice %276 {offsets = [0, 384], sizes = [8, 128], strides = [1, 1]} : vector<8x512xf32> to vector<8x128xf32>
    %284 = math.tanh %283 : vector<8x128xf32>
    %285 = vector.extract_strided_slice %282 {offsets = [0, 128], sizes = [8, 128], strides = [1, 1]} : vector<8x384xf32> to vector<8x128xf32>
    %286 = arith.mulf %285, %242 : vector<8x128xf32>
    %287 = vector.extract_strided_slice %282 {offsets = [0, 0], sizes = [8, 128], strides = [1, 1]} : vector<8x384xf32> to vector<8x128xf32>
    %288 = arith.mulf %287, %284 : vector<8x128xf32>
    %289 = arith.addf %286, %288 : vector<8x128xf32>
    %290 = vector.extract_strided_slice %282 {offsets = [0, 256], sizes = [8, 128], strides = [1, 1]} : vector<8x384xf32> to vector<8x128xf32>
    %291 = math.tanh %289 : vector<8x128xf32>
    %292 = arith.mulf %290, %291 : vector<8x128xf32>
    %c0_102 = arith.constant 0 : index
    %c0_103 = arith.constant 0 : index
    %293 = vector.load %arg12[%c0_102, %c0_103] : memref<128x512xbf16, #tpu.memory_space<vmem>>, vector<128x512xbf16>
    %294 = arith.truncf %269 : vector<8x128xf32> to vector<8x128xbf16>
    %cst_104 = arith.constant dense<0.000000e+00> : vector<8x512xf32>
    %295 = tpu.matmul %294, %293, %cst_104 {dimension_numbers = #tpu.dot_dimension_numbers<[1], [0], [0], [1], [0, 0, 1, 1], [], []>} : vector<8x128xbf16>, vector<128x512xbf16>, vector<8x512xf32> -> vector<8x512xf32>
    %c0_105 = arith.constant 0 : index
    %c0_106 = arith.constant 0 : index
    %296 = vector.load %arg11[%c0_105, %c0_106] : memref<128x512xbf16, #tpu.memory_space<vmem>>, vector<128x512xbf16>
    %297 = arith.truncf %292 : vector<8x128xf32> to vector<8x128xbf16>
    %cst_107 = arith.constant dense<0.000000e+00> : vector<8x512xf32>
    %298 = tpu.matmul %297, %296, %cst_107 {dimension_numbers = #tpu.dot_dimension_numbers<[1], [0], [0], [1], [0, 0, 1, 1], [], []>} : vector<8x128xbf16>, vector<128x512xbf16>, vector<8x512xf32> -> vector<8x512xf32>
    %299 = arith.addf %295, %298 : vector<8x512xf32>
    %300 = arith.addf %299, %80 : vector<8x512xf32>
    %301 = vector.extract_strided_slice %300 {offsets = [0, 0], sizes = [8, 384], strides = [1, 1]} : vector<8x512xf32> to vector<8x384xf32>
    %302 = arith.negf %301 : vector<8x384xf32>
    %303 = math.exp %302 : vector<8x384xf32>
    %cst_108 = arith.constant 1.000000e+00 : f32
    %304 = vector.broadcast %cst_108 : f32 to vector<8x384xf32>
    %305 = arith.addf %304, %303 : vector<8x384xf32>
    %306 = arith.divf %304, %305 : vector<8x384xf32>
    %307 = vector.extract_strided_slice %300 {offsets = [0, 384], sizes = [8, 128], strides = [1, 1]} : vector<8x512xf32> to vector<8x128xf32>
    %308 = math.tanh %307 : vector<8x128xf32>
    %309 = vector.extract_strided_slice %306 {offsets = [0, 128], sizes = [8, 128], strides = [1, 1]} : vector<8x384xf32> to vector<8x128xf32>
    %310 = arith.mulf %309, %266 : vector<8x128xf32>
    %311 = vector.extract_strided_slice %306 {offsets = [0, 0], sizes = [8, 128], strides = [1, 1]} : vector<8x384xf32> to vector<8x128xf32>
    %312 = arith.mulf %311, %308 : vector<8x128xf32>
    %313 = arith.addf %310, %312 : vector<8x128xf32>
    %314 = vector.extract_strided_slice %306 {offsets = [0, 256], sizes = [8, 128], strides = [1, 1]} : vector<8x384xf32> to vector<8x128xf32>
    %315 = math.tanh %313 : vector<8x128xf32>
    %316 = arith.mulf %314, %315 : vector<8x128xf32>
    %c5_i32 = arith.constant 5 : i32
    %317 = arith.index_cast %c5_i32 : i32 to index
    %c0_109 = arith.constant 0 : index
    %c0_110 = arith.constant 0 : index
    %318 = vector.load %arg26[%317, %c0_109, %c0_110] : memref<8x8x512xf32, #tpu.memory_space<vmem>>, vector<1x8x512xf32>
    %319 = vector.shape_cast %318 : vector<1x8x512xf32> to vector<8x512xf32>
    %c0_111 = arith.constant 0 : index
    %c0_112 = arith.constant 0 : index
    %320 = vector.load %arg9[%c0_111, %c0_112] : memref<128x512xbf16, #tpu.memory_space<vmem>>, vector<128x512xbf16>
    %321 = arith.truncf %292 : vector<8x128xf32> to vector<8x128xbf16>
    %cst_113 = arith.constant dense<0.000000e+00> : vector<8x512xf32>
    %322 = tpu.matmul %321, %320, %cst_113 {dimension_numbers = #tpu.dot_dimension_numbers<[1], [0], [0], [1], [0, 0, 1, 1], [], []>} : vector<8x128xbf16>, vector<128x512xbf16>, vector<8x512xf32> -> vector<8x512xf32>
    %323 = arith.addf %319, %322 : vector<8x512xf32>
    %324 = vector.extract_strided_slice %323 {offsets = [0, 0], sizes = [8, 384], strides = [1, 1]} : vector<8x512xf32> to vector<8x384xf32>
    %325 = arith.negf %324 : vector<8x384xf32>
    %326 = math.exp %325 : vector<8x384xf32>
    %cst_114 = arith.constant 1.000000e+00 : f32
    %327 = vector.broadcast %cst_114 : f32 to vector<8x384xf32>
    %328 = arith.addf %327, %326 : vector<8x384xf32>
    %329 = arith.divf %327, %328 : vector<8x384xf32>
    %330 = vector.extract_strided_slice %323 {offsets = [0, 384], sizes = [8, 128], strides = [1, 1]} : vector<8x512xf32> to vector<8x128xf32>
    %331 = math.tanh %330 : vector<8x128xf32>
    %332 = vector.extract_strided_slice %329 {offsets = [0, 128], sizes = [8, 128], strides = [1, 1]} : vector<8x384xf32> to vector<8x128xf32>
    %333 = arith.mulf %332, %289 : vector<8x128xf32>
    %334 = vector.extract_strided_slice %329 {offsets = [0, 0], sizes = [8, 128], strides = [1, 1]} : vector<8x384xf32> to vector<8x128xf32>
    %335 = arith.mulf %334, %331 : vector<8x128xf32>
    %336 = arith.addf %333, %335 : vector<8x128xf32>
    %337 = vector.extract_strided_slice %329 {offsets = [0, 256], sizes = [8, 128], strides = [1, 1]} : vector<8x384xf32> to vector<8x128xf32>
    %338 = math.tanh %336 : vector<8x128xf32>
    %339 = arith.mulf %337, %338 : vector<8x128xf32>
    %c0_115 = arith.constant 0 : index
    %c0_116 = arith.constant 0 : index
    %340 = vector.load %arg12[%c0_115, %c0_116] : memref<128x512xbf16, #tpu.memory_space<vmem>>, vector<128x512xbf16>
    %341 = arith.truncf %316 : vector<8x128xf32> to vector<8x128xbf16>
    %cst_117 = arith.constant dense<0.000000e+00> : vector<8x512xf32>
    %342 = tpu.matmul %341, %340, %cst_117 {dimension_numbers = #tpu.dot_dimension_numbers<[1], [0], [0], [1], [0, 0, 1, 1], [], []>} : vector<8x128xbf16>, vector<128x512xbf16>, vector<8x512xf32> -> vector<8x512xf32>
    %c0_118 = arith.constant 0 : index
    %c0_119 = arith.constant 0 : index
    %343 = vector.load %arg11[%c0_118, %c0_119] : memref<128x512xbf16, #tpu.memory_space<vmem>>, vector<128x512xbf16>
    %344 = arith.truncf %339 : vector<8x128xf32> to vector<8x128xbf16>
    %cst_120 = arith.constant dense<0.000000e+00> : vector<8x512xf32>
    %345 = tpu.matmul %344, %343, %cst_120 {dimension_numbers = #tpu.dot_dimension_numbers<[1], [0], [0], [1], [0, 0, 1, 1], [], []>} : vector<8x128xbf16>, vector<128x512xbf16>, vector<8x512xf32> -> vector<8x512xf32>
    %346 = arith.addf %342, %345 : vector<8x512xf32>
    %347 = arith.addf %346, %80 : vector<8x512xf32>
    %348 = vector.extract_strided_slice %347 {offsets = [0, 0], sizes = [8, 384], strides = [1, 1]} : vector<8x512xf32> to vector<8x384xf32>
    %349 = arith.negf %348 : vector<8x384xf32>
    %350 = math.exp %349 : vector<8x384xf32>
    %cst_121 = arith.constant 1.000000e+00 : f32
    %351 = vector.broadcast %cst_121 : f32 to vector<8x384xf32>
    %352 = arith.addf %351, %350 : vector<8x384xf32>
    %353 = arith.divf %351, %352 : vector<8x384xf32>
    %354 = vector.extract_strided_slice %347 {offsets = [0, 384], sizes = [8, 128], strides = [1, 1]} : vector<8x512xf32> to vector<8x128xf32>
    %355 = math.tanh %354 : vector<8x128xf32>
    %356 = vector.extract_strided_slice %353 {offsets = [0, 128], sizes = [8, 128], strides = [1, 1]} : vector<8x384xf32> to vector<8x128xf32>
    %357 = arith.mulf %356, %313 : vector<8x128xf32>
    %358 = vector.extract_strided_slice %353 {offsets = [0, 0], sizes = [8, 128], strides = [1, 1]} : vector<8x384xf32> to vector<8x128xf32>
    %359 = arith.mulf %358, %355 : vector<8x128xf32>
    %360 = arith.addf %357, %359 : vector<8x128xf32>
    %361 = vector.extract_strided_slice %353 {offsets = [0, 256], sizes = [8, 128], strides = [1, 1]} : vector<8x384xf32> to vector<8x128xf32>
    %362 = math.tanh %360 : vector<8x128xf32>
    %363 = arith.mulf %361, %362 : vector<8x128xf32>
    %c6_i32 = arith.constant 6 : i32
    %364 = arith.index_cast %c6_i32 : i32 to index
    %c0_122 = arith.constant 0 : index
    %c0_123 = arith.constant 0 : index
    %365 = vector.load %arg26[%364, %c0_122, %c0_123] : memref<8x8x512xf32, #tpu.memory_space<vmem>>, vector<1x8x512xf32>
    %366 = vector.shape_cast %365 : vector<1x8x512xf32> to vector<8x512xf32>
    %c0_124 = arith.constant 0 : index
    %c0_125 = arith.constant 0 : index
    %367 = vector.load %arg9[%c0_124, %c0_125] : memref<128x512xbf16, #tpu.memory_space<vmem>>, vector<128x512xbf16>
    %368 = arith.truncf %339 : vector<8x128xf32> to vector<8x128xbf16>
    %cst_126 = arith.constant dense<0.000000e+00> : vector<8x512xf32>
    %369 = tpu.matmul %368, %367, %cst_126 {dimension_numbers = #tpu.dot_dimension_numbers<[1], [0], [0], [1], [0, 0, 1, 1], [], []>} : vector<8x128xbf16>, vector<128x512xbf16>, vector<8x512xf32> -> vector<8x512xf32>
    %370 = arith.addf %366, %369 : vector<8x512xf32>
    %371 = vector.extract_strided_slice %370 {offsets = [0, 0], sizes = [8, 384], strides = [1, 1]} : vector<8x512xf32> to vector<8x384xf32>
    %372 = arith.negf %371 : vector<8x384xf32>
    %373 = math.exp %372 : vector<8x384xf32>
    %cst_127 = arith.constant 1.000000e+00 : f32
    %374 = vector.broadcast %cst_127 : f32 to vector<8x384xf32>
    %375 = arith.addf %374, %373 : vector<8x384xf32>
    %376 = arith.divf %374, %375 : vector<8x384xf32>
    %377 = vector.extract_strided_slice %370 {offsets = [0, 384], sizes = [8, 128], strides = [1, 1]} : vector<8x512xf32> to vector<8x128xf32>
    %378 = math.tanh %377 : vector<8x128xf32>
    %379 = vector.extract_strided_slice %376 {offsets = [0, 128], sizes = [8, 128], strides = [1, 1]} : vector<8x384xf32> to vector<8x128xf32>
    %380 = arith.mulf %379, %336 : vector<8x128xf32>
    %381 = vector.extract_strided_slice %376 {offsets = [0, 0], sizes = [8, 128], strides = [1, 1]} : vector<8x384xf32> to vector<8x128xf32>
    %382 = arith.mulf %381, %378 : vector<8x128xf32>
    %383 = arith.addf %380, %382 : vector<8x128xf32>
    %384 = vector.extract_strided_slice %376 {offsets = [0, 256], sizes = [8, 128], strides = [1, 1]} : vector<8x384xf32> to vector<8x128xf32>
    %385 = math.tanh %383 : vector<8x128xf32>
    %386 = arith.mulf %384, %385 : vector<8x128xf32>
    %c0_128 = arith.constant 0 : index
    %c0_129 = arith.constant 0 : index
    %387 = vector.load %arg12[%c0_128, %c0_129] : memref<128x512xbf16, #tpu.memory_space<vmem>>, vector<128x512xbf16>
    %388 = arith.truncf %363 : vector<8x128xf32> to vector<8x128xbf16>
    %cst_130 = arith.constant dense<0.000000e+00> : vector<8x512xf32>
    %389 = tpu.matmul %388, %387, %cst_130 {dimension_numbers = #tpu.dot_dimension_numbers<[1], [0], [0], [1], [0, 0, 1, 1], [], []>} : vector<8x128xbf16>, vector<128x512xbf16>, vector<8x512xf32> -> vector<8x512xf32>
    %c0_131 = arith.constant 0 : index
    %c0_132 = arith.constant 0 : index
    %390 = vector.load %arg11[%c0_131, %c0_132] : memref<128x512xbf16, #tpu.memory_space<vmem>>, vector<128x512xbf16>
    %391 = arith.truncf %386 : vector<8x128xf32> to vector<8x128xbf16>
    %cst_133 = arith.constant dense<0.000000e+00> : vector<8x512xf32>
    %392 = tpu.matmul %391, %390, %cst_133 {dimension_numbers = #tpu.dot_dimension_numbers<[1], [0], [0], [1], [0, 0, 1, 1], [], []>} : vector<8x128xbf16>, vector<128x512xbf16>, vector<8x512xf32> -> vector<8x512xf32>
    %393 = arith.addf %389, %392 : vector<8x512xf32>
    %394 = arith.addf %393, %80 : vector<8x512xf32>
    %395 = vector.extract_strided_slice %394 {offsets = [0, 0], sizes = [8, 384], strides = [1, 1]} : vector<8x512xf32> to vector<8x384xf32>
    %396 = arith.negf %395 : vector<8x384xf32>
    %397 = math.exp %396 : vector<8x384xf32>
    %cst_134 = arith.constant 1.000000e+00 : f32
    %398 = vector.broadcast %cst_134 : f32 to vector<8x384xf32>
    %399 = arith.addf %398, %397 : vector<8x384xf32>
    %400 = arith.divf %398, %399 : vector<8x384xf32>
    %401 = vector.extract_strided_slice %394 {offsets = [0, 384], sizes = [8, 128], strides = [1, 1]} : vector<8x512xf32> to vector<8x128xf32>
    %402 = math.tanh %401 : vector<8x128xf32>
    %403 = vector.extract_strided_slice %400 {offsets = [0, 128], sizes = [8, 128], strides = [1, 1]} : vector<8x384xf32> to vector<8x128xf32>
    %404 = arith.mulf %403, %360 : vector<8x128xf32>
    %405 = vector.extract_strided_slice %400 {offsets = [0, 0], sizes = [8, 128], strides = [1, 1]} : vector<8x384xf32> to vector<8x128xf32>
    %406 = arith.mulf %405, %402 : vector<8x128xf32>
    %407 = arith.addf %404, %406 : vector<8x128xf32>
    %408 = vector.extract_strided_slice %400 {offsets = [0, 256], sizes = [8, 128], strides = [1, 1]} : vector<8x384xf32> to vector<8x128xf32>
    %409 = math.tanh %407 : vector<8x128xf32>
    %410 = arith.mulf %408, %409 : vector<8x128xf32>
    %c7_i32 = arith.constant 7 : i32
    %411 = arith.index_cast %c7_i32 : i32 to index
    %c0_135 = arith.constant 0 : index
    %c0_136 = arith.constant 0 : index
    %412 = vector.load %arg26[%411, %c0_135, %c0_136] : memref<8x8x512xf32, #tpu.memory_space<vmem>>, vector<1x8x512xf32>
    %413 = vector.shape_cast %412 : vector<1x8x512xf32> to vector<8x512xf32>
    %c0_137 = arith.constant 0 : index
    %c0_138 = arith.constant 0 : index
    %414 = vector.load %arg9[%c0_137, %c0_138] : memref<128x512xbf16, #tpu.memory_space<vmem>>, vector<128x512xbf16>
    %415 = arith.truncf %386 : vector<8x128xf32> to vector<8x128xbf16>
    %cst_139 = arith.constant dense<0.000000e+00> : vector<8x512xf32>
    %416 = tpu.matmul %415, %414, %cst_139 {dimension_numbers = #tpu.dot_dimension_numbers<[1], [0], [0], [1], [0, 0, 1, 1], [], []>} : vector<8x128xbf16>, vector<128x512xbf16>, vector<8x512xf32> -> vector<8x512xf32>
    %417 = arith.addf %413, %416 : vector<8x512xf32>
    %418 = vector.extract_strided_slice %417 {offsets = [0, 0], sizes = [8, 384], strides = [1, 1]} : vector<8x512xf32> to vector<8x384xf32>
    %419 = arith.negf %418 : vector<8x384xf32>
    %420 = math.exp %419 : vector<8x384xf32>
    %cst_140 = arith.constant 1.000000e+00 : f32
    %421 = vector.broadcast %cst_140 : f32 to vector<8x384xf32>
    %422 = arith.addf %421, %420 : vector<8x384xf32>
    %423 = arith.divf %421, %422 : vector<8x384xf32>
    %424 = vector.extract_strided_slice %417 {offsets = [0, 384], sizes = [8, 128], strides = [1, 1]} : vector<8x512xf32> to vector<8x128xf32>
    %425 = math.tanh %424 : vector<8x128xf32>
    %426 = vector.extract_strided_slice %423 {offsets = [0, 128], sizes = [8, 128], strides = [1, 1]} : vector<8x384xf32> to vector<8x128xf32>
    %427 = arith.mulf %426, %383 : vector<8x128xf32>
    %428 = vector.extract_strided_slice %423 {offsets = [0, 0], sizes = [8, 128], strides = [1, 1]} : vector<8x384xf32> to vector<8x128xf32>
    %429 = arith.mulf %428, %425 : vector<8x128xf32>
    %430 = arith.addf %427, %429 : vector<8x128xf32>
    %431 = vector.extract_strided_slice %423 {offsets = [0, 256], sizes = [8, 128], strides = [1, 1]} : vector<8x384xf32> to vector<8x128xf32>
    %432 = math.tanh %430 : vector<8x128xf32>
    %433 = arith.mulf %431, %432 : vector<8x128xf32>
    %c0_141 = arith.constant 0 : index
    %c0_142 = arith.constant 0 : index
    %434 = vector.load %arg12[%c0_141, %c0_142] : memref<128x512xbf16, #tpu.memory_space<vmem>>, vector<128x512xbf16>
    %435 = arith.truncf %410 : vector<8x128xf32> to vector<8x128xbf16>
    %cst_143 = arith.constant dense<0.000000e+00> : vector<8x512xf32>
    %436 = tpu.matmul %435, %434, %cst_143 {dimension_numbers = #tpu.dot_dimension_numbers<[1], [0], [0], [1], [0, 0, 1, 1], [], []>} : vector<8x128xbf16>, vector<128x512xbf16>, vector<8x512xf32> -> vector<8x512xf32>
    %c0_144 = arith.constant 0 : index
    %c0_145 = arith.constant 0 : index
    %437 = vector.load %arg11[%c0_144, %c0_145] : memref<128x512xbf16, #tpu.memory_space<vmem>>, vector<128x512xbf16>
    %438 = arith.truncf %433 : vector<8x128xf32> to vector<8x128xbf16>
    %cst_146 = arith.constant dense<0.000000e+00> : vector<8x512xf32>
    %439 = tpu.matmul %438, %437, %cst_146 {dimension_numbers = #tpu.dot_dimension_numbers<[1], [0], [0], [1], [0, 0, 1, 1], [], []>} : vector<8x128xbf16>, vector<128x512xbf16>, vector<8x512xf32> -> vector<8x512xf32>
    %440 = arith.addf %436, %439 : vector<8x512xf32>
    %441 = arith.addf %440, %80 : vector<8x512xf32>
    %442 = vector.extract_strided_slice %441 {offsets = [0, 0], sizes = [8, 384], strides = [1, 1]} : vector<8x512xf32> to vector<8x384xf32>
    %443 = arith.negf %442 : vector<8x384xf32>
    %444 = math.exp %443 : vector<8x384xf32>
    %cst_147 = arith.constant 1.000000e+00 : f32
    %445 = vector.broadcast %cst_147 : f32 to vector<8x384xf32>
    %446 = arith.addf %445, %444 : vector<8x384xf32>
    %447 = arith.divf %445, %446 : vector<8x384xf32>
    %448 = vector.extract_strided_slice %441 {offsets = [0, 384], sizes = [8, 128], strides = [1, 1]} : vector<8x512xf32> to vector<8x128xf32>
    %449 = math.tanh %448 : vector<8x128xf32>
    %450 = vector.extract_strided_slice %447 {offsets = [0, 128], sizes = [8, 128], strides = [1, 1]} : vector<8x384xf32> to vector<8x128xf32>
    %451 = arith.mulf %450, %407 : vector<8x128xf32>
    %452 = vector.extract_strided_slice %447 {offsets = [0, 0], sizes = [8, 128], strides = [1, 1]} : vector<8x384xf32> to vector<8x128xf32>
    %453 = arith.mulf %452, %449 : vector<8x128xf32>
    %454 = arith.addf %451, %453 : vector<8x128xf32>
    %455 = vector.extract_strided_slice %447 {offsets = [0, 256], sizes = [8, 128], strides = [1, 1]} : vector<8x384xf32> to vector<8x128xf32>
    %456 = math.tanh %454 : vector<8x128xf32>
    %457 = arith.mulf %455, %456 : vector<8x128xf32>
    %c8_i32 = arith.constant 8 : i32
    %c0_148 = arith.constant 0 : index
    %c0_149 = arith.constant 0 : index
    %458 = vector.load %arg18[%c0_148, %c0_149] : memref<1x512xf32, #tpu.memory_space<vmem>>, vector<1x512xf32>
    %459 = vector.shape_cast %458 : vector<1x512xf32> to vector<1x512xf32>
    %460 = vector.broadcast %459 : vector<1x512xf32> to vector<8x512xf32>
    %c0_150 = arith.constant 0 : index
    %c0_151 = arith.constant 0 : index
    %461 = vector.load %arg21[%c0_150, %c0_151] : memref<1x512xf32, #tpu.memory_space<vmem>>, vector<1x512xf32>
    %462 = vector.shape_cast %461 : vector<1x512xf32> to vector<1x512xf32>
    %463 = vector.broadcast %462 : vector<1x512xf32> to vector<8x512xf32>
    %c0_152 = arith.constant 0 : index
    %c0_153 = arith.constant 0 : index
    %464 = vector.load %arg15[%c0_152, %c0_153] : memref<1x128xf32, #tpu.memory_space<vmem>>, vector<1x128xf32>
    %465 = vector.shape_cast %464 : vector<1x128xf32> to vector<1x128xf32>
    %466 = vector.broadcast %465 : vector<1x128xf32> to vector<8x128xf32>
    %c0_i32_154 = arith.constant 0 : i32
    %c1_i32_155 = arith.constant 1 : i32
    %467 = arith.subi %c0_i32_154, %c1_i32_155 : i32
    %c0_i32_156 = arith.constant 0 : i32
    %468 = arith.maxsi %467, %c0_i32_156 : i32
    %c0_i32_157 = arith.constant 0 : i32
    %469 = arith.cmpi sgt, %c0_i32_154, %c0_i32_157 : i32
    %470 = arith.index_cast %468 : i32 to index
    %471 = memref.load %arg0[%470] : memref<4xi32, #tpu.memory_space<smem>>
    %c0_i32_158 = arith.constant 0 : i32
    %472 = arith.cmpi sgt, %471, %c0_i32_158 : i32
    %473 = arith.andi %469, %472 : i1
    %474 = arith.index_cast %468 : i32 to index
    %c0_159 = arith.constant 0 : index
    %c0_160 = arith.constant 0 : index
    %475 = vector.load %arg27[%474, %c0_159, %c0_160] : memref<4x8x128xf32, #tpu.memory_space<vmem>>, vector<1x8x128xf32>
    %476 = vector.shape_cast %475 : vector<1x8x128xf32> to vector<8x128xf32>
    %c0_161 = arith.constant 0 : index
    %c0_162 = arith.constant 0 : index
    %477 = vector.load %arg14[%c0_161, %c0_162] : memref<128x128xbf16, #tpu.memory_space<vmem>>, vector<128x128xbf16>
    %478 = arith.extui %473 : i1 to i32
    %c0_i32_163 = arith.constant 0 : i32
    %479 = arith.cmpi ne, %478, %c0_i32_163 : i32
    %480 = scf.if %479 -> (vector<8x128xf32>) {
      scf.yield %476 : vector<8x128xf32>
    } else {
      %757 = arith.truncf %58 : vector<8x128xf32> to vector<8x128xbf16>
      %cst_273 = arith.constant dense<0.000000e+00> : vector<8x128xf32>
      %758 = tpu.matmul %757, %477, %cst_273 {dimension_numbers = #tpu.dot_dimension_numbers<[1], [0], [0], [1], [0, 0, 1, 1], [], []>} : vector<8x128xbf16>, vector<128x128xbf16>, vector<8x128xf32> -> vector<8x128xf32>
      %759 = arith.addf %758, %466 : vector<8x128xf32>
      %cst_274 = arith.constant 0.000000e+00 : f32
      %760 = vector.broadcast %cst_274 : f32 to vector<8x128xf32>
      %761 = arith.maximumf %759, %760 : vector<8x128xf32>
      scf.yield %761 : vector<8x128xf32>
    }
    %c0_164 = arith.constant 0 : index
    %c0_165 = arith.constant 0 : index
    %481 = vector.load %arg17[%c0_164, %c0_165] : memref<128x512xbf16, #tpu.memory_space<vmem>>, vector<128x512xbf16>
    %482 = arith.truncf %433 : vector<8x128xf32> to vector<8x128xbf16>
    %cst_166 = arith.constant dense<0.000000e+00> : vector<8x512xf32>
    %483 = tpu.matmul %482, %481, %cst_166 {dimension_numbers = #tpu.dot_dimension_numbers<[1], [0], [0], [1], [0, 0, 1, 1], [], []>} : vector<8x128xbf16>, vector<128x512xbf16>, vector<8x512xf32> -> vector<8x512xf32>
    %c0_167 = arith.constant 0 : index
    %c0_168 = arith.constant 0 : index
    %484 = vector.load %arg16[%c0_167, %c0_168] : memref<128x512xbf16, #tpu.memory_space<vmem>>, vector<128x512xbf16>
    %485 = arith.truncf %480 : vector<8x128xf32> to vector<8x128xbf16>
    %cst_169 = arith.constant dense<0.000000e+00> : vector<8x512xf32>
    %486 = tpu.matmul %485, %484, %cst_169 {dimension_numbers = #tpu.dot_dimension_numbers<[1], [0], [0], [1], [0, 0, 1, 1], [], []>} : vector<8x128xbf16>, vector<128x512xbf16>, vector<8x512xf32> -> vector<8x512xf32>
    %487 = arith.addf %483, %486 : vector<8x512xf32>
    %488 = arith.addf %487, %460 : vector<8x512xf32>
    %489 = vector.extract_strided_slice %488 {offsets = [0, 0], sizes = [8, 384], strides = [1, 1]} : vector<8x512xf32> to vector<8x384xf32>
    %490 = arith.negf %489 : vector<8x384xf32>
    %491 = math.exp %490 : vector<8x384xf32>
    %cst_170 = arith.constant 1.000000e+00 : f32
    %492 = vector.broadcast %cst_170 : f32 to vector<8x384xf32>
    %493 = arith.addf %492, %491 : vector<8x384xf32>
    %494 = arith.divf %492, %493 : vector<8x384xf32>
    %495 = vector.extract_strided_slice %488 {offsets = [0, 384], sizes = [8, 128], strides = [1, 1]} : vector<8x512xf32> to vector<8x128xf32>
    %496 = math.tanh %495 : vector<8x128xf32>
    %497 = vector.extract_strided_slice %494 {offsets = [0, 128], sizes = [8, 128], strides = [1, 1]} : vector<8x384xf32> to vector<8x128xf32>
    %498 = arith.mulf %497, %430 : vector<8x128xf32>
    %499 = vector.extract_strided_slice %494 {offsets = [0, 0], sizes = [8, 128], strides = [1, 1]} : vector<8x384xf32> to vector<8x128xf32>
    %500 = arith.mulf %499, %496 : vector<8x128xf32>
    %501 = arith.addf %498, %500 : vector<8x128xf32>
    %502 = vector.extract_strided_slice %494 {offsets = [0, 256], sizes = [8, 128], strides = [1, 1]} : vector<8x384xf32> to vector<8x128xf32>
    %503 = math.tanh %501 : vector<8x128xf32>
    %504 = arith.mulf %502, %503 : vector<8x128xf32>
    %c0_171 = arith.constant 0 : index
    %c0_172 = arith.constant 0 : index
    %505 = vector.load %arg20[%c0_171, %c0_172] : memref<128x512xbf16, #tpu.memory_space<vmem>>, vector<128x512xbf16>
    %506 = arith.truncf %457 : vector<8x128xf32> to vector<8x128xbf16>
    %cst_173 = arith.constant dense<0.000000e+00> : vector<8x512xf32>
    %507 = tpu.matmul %506, %505, %cst_173 {dimension_numbers = #tpu.dot_dimension_numbers<[1], [0], [0], [1], [0, 0, 1, 1], [], []>} : vector<8x128xbf16>, vector<128x512xbf16>, vector<8x512xf32> -> vector<8x512xf32>
    %c0_174 = arith.constant 0 : index
    %c0_175 = arith.constant 0 : index
    %508 = vector.load %arg19[%c0_174, %c0_175] : memref<128x512xbf16, #tpu.memory_space<vmem>>, vector<128x512xbf16>
    %509 = arith.truncf %504 : vector<8x128xf32> to vector<8x128xbf16>
    %cst_176 = arith.constant dense<0.000000e+00> : vector<8x512xf32>
    %510 = tpu.matmul %509, %508, %cst_176 {dimension_numbers = #tpu.dot_dimension_numbers<[1], [0], [0], [1], [0, 0, 1, 1], [], []>} : vector<8x128xbf16>, vector<128x512xbf16>, vector<8x512xf32> -> vector<8x512xf32>
    %511 = arith.addf %507, %510 : vector<8x512xf32>
    %512 = arith.addf %511, %463 : vector<8x512xf32>
    %513 = vector.extract_strided_slice %512 {offsets = [0, 0], sizes = [8, 384], strides = [1, 1]} : vector<8x512xf32> to vector<8x384xf32>
    %514 = arith.negf %513 : vector<8x384xf32>
    %515 = math.exp %514 : vector<8x384xf32>
    %cst_177 = arith.constant 1.000000e+00 : f32
    %516 = vector.broadcast %cst_177 : f32 to vector<8x384xf32>
    %517 = arith.addf %516, %515 : vector<8x384xf32>
    %518 = arith.divf %516, %517 : vector<8x384xf32>
    %519 = vector.extract_strided_slice %512 {offsets = [0, 384], sizes = [8, 128], strides = [1, 1]} : vector<8x512xf32> to vector<8x128xf32>
    %520 = math.tanh %519 : vector<8x128xf32>
    %521 = vector.extract_strided_slice %518 {offsets = [0, 128], sizes = [8, 128], strides = [1, 1]} : vector<8x384xf32> to vector<8x128xf32>
    %522 = arith.mulf %521, %454 : vector<8x128xf32>
    %523 = vector.extract_strided_slice %518 {offsets = [0, 0], sizes = [8, 128], strides = [1, 1]} : vector<8x384xf32> to vector<8x128xf32>
    %524 = arith.mulf %523, %520 : vector<8x128xf32>
    %525 = arith.addf %522, %524 : vector<8x128xf32>
    %526 = vector.extract_strided_slice %518 {offsets = [0, 256], sizes = [8, 128], strides = [1, 1]} : vector<8x384xf32> to vector<8x128xf32>
    %527 = math.tanh %525 : vector<8x128xf32>
    %528 = arith.mulf %526, %527 : vector<8x128xf32>
    %529 = arith.index_cast %c0_i32_154 : i32 to index
    %c0_178 = arith.constant 0 : index
    %c0_179 = arith.constant 0 : index
    %530 = vector.load %arg24[%529, %c0_178, %c0_179] : memref<4x8x128xf32, #tpu.memory_space<vmem>>, vector<1x8x128xf32>
    %531 = vector.shape_cast %530 : vector<1x8x128xf32> to vector<8x128xf32>
    %532 = vector.shape_cast %528 : vector<8x128xf32> to vector<1x8x128xf32>
    tpu.vector_store %arg24[%529, %c0_178, %c0_179], %532 {strides = array<i32>} : memref<4x8x128xf32, #tpu.memory_space<vmem>>, vector<1x8x128xf32>,
    %c1_i32_180 = arith.constant 1 : i32
    %c1_i32_181 = arith.constant 1 : i32
    %533 = arith.subi %c1_i32_180, %c1_i32_181 : i32
    %c0_i32_182 = arith.constant 0 : i32
    %534 = arith.maxsi %533, %c0_i32_182 : i32
    %c0_i32_183 = arith.constant 0 : i32
    %535 = arith.cmpi sgt, %c1_i32_180, %c0_i32_183 : i32
    %536 = arith.index_cast %534 : i32 to index
    %537 = memref.load %arg0[%536] : memref<4xi32, #tpu.memory_space<smem>>
    %c0_i32_184 = arith.constant 0 : i32
    %538 = arith.cmpi sgt, %537, %c0_i32_184 : i32
    %539 = arith.andi %535, %538 : i1
    %540 = arith.index_cast %534 : i32 to index
    %c0_185 = arith.constant 0 : index
    %c0_186 = arith.constant 0 : index
    %541 = vector.load %arg27[%540, %c0_185, %c0_186] : memref<4x8x128xf32, #tpu.memory_space<vmem>>, vector<1x8x128xf32>
    %542 = vector.shape_cast %541 : vector<1x8x128xf32> to vector<8x128xf32>
    %c0_187 = arith.constant 0 : index
    %c0_188 = arith.constant 0 : index
    %543 = vector.load %arg14[%c0_187, %c0_188] : memref<128x128xbf16, #tpu.memory_space<vmem>>, vector<128x128xbf16>
    %544 = arith.extui %539 : i1 to i32
    %c0_i32_189 = arith.constant 0 : i32
    %545 = arith.cmpi ne, %544, %c0_i32_189 : i32
    %546 = scf.if %545 -> (vector<8x128xf32>) {
      scf.yield %542 : vector<8x128xf32>
    } else {
      %757 = arith.truncf %528 : vector<8x128xf32> to vector<8x128xbf16>
      %cst_273 = arith.constant dense<0.000000e+00> : vector<8x128xf32>
      %758 = tpu.matmul %757, %543, %cst_273 {dimension_numbers = #tpu.dot_dimension_numbers<[1], [0], [0], [1], [0, 0, 1, 1], [], []>} : vector<8x128xbf16>, vector<128x128xbf16>, vector<8x128xf32> -> vector<8x128xf32>
      %759 = arith.addf %758, %466 : vector<8x128xf32>
      %cst_274 = arith.constant 0.000000e+00 : f32
      %760 = vector.broadcast %cst_274 : f32 to vector<8x128xf32>
      %761 = arith.maximumf %759, %760 : vector<8x128xf32>
      scf.yield %761 : vector<8x128xf32>
    }
    %c0_190 = arith.constant 0 : index
    %c0_191 = arith.constant 0 : index
    %547 = vector.load %arg17[%c0_190, %c0_191] : memref<128x512xbf16, #tpu.memory_space<vmem>>, vector<128x512xbf16>
    %548 = arith.truncf %504 : vector<8x128xf32> to vector<8x128xbf16>
    %cst_192 = arith.constant dense<0.000000e+00> : vector<8x512xf32>
    %549 = tpu.matmul %548, %547, %cst_192 {dimension_numbers = #tpu.dot_dimension_numbers<[1], [0], [0], [1], [0, 0, 1, 1], [], []>} : vector<8x128xbf16>, vector<128x512xbf16>, vector<8x512xf32> -> vector<8x512xf32>
    %c0_193 = arith.constant 0 : index
    %c0_194 = arith.constant 0 : index
    %550 = vector.load %arg16[%c0_193, %c0_194] : memref<128x512xbf16, #tpu.memory_space<vmem>>, vector<128x512xbf16>
    %551 = arith.truncf %546 : vector<8x128xf32> to vector<8x128xbf16>
    %cst_195 = arith.constant dense<0.000000e+00> : vector<8x512xf32>
    %552 = tpu.matmul %551, %550, %cst_195 {dimension_numbers = #tpu.dot_dimension_numbers<[1], [0], [0], [1], [0, 0, 1, 1], [], []>} : vector<8x128xbf16>, vector<128x512xbf16>, vector<8x512xf32> -> vector<8x512xf32>
    %553 = arith.addf %549, %552 : vector<8x512xf32>
    %554 = arith.addf %553, %460 : vector<8x512xf32>
    %555 = vector.extract_strided_slice %554 {offsets = [0, 0], sizes = [8, 384], strides = [1, 1]} : vector<8x512xf32> to vector<8x384xf32>
    %556 = arith.negf %555 : vector<8x384xf32>
    %557 = math.exp %556 : vector<8x384xf32>
    %cst_196 = arith.constant 1.000000e+00 : f32
    %558 = vector.broadcast %cst_196 : f32 to vector<8x384xf32>
    %559 = arith.addf %558, %557 : vector<8x384xf32>
    %560 = arith.divf %558, %559 : vector<8x384xf32>
    %561 = vector.extract_strided_slice %554 {offsets = [0, 384], sizes = [8, 128], strides = [1, 1]} : vector<8x512xf32> to vector<8x128xf32>
    %562 = math.tanh %561 : vector<8x128xf32>
    %563 = vector.extract_strided_slice %560 {offsets = [0, 128], sizes = [8, 128], strides = [1, 1]} : vector<8x384xf32> to vector<8x128xf32>
    %564 = arith.mulf %563, %501 : vector<8x128xf32>
    %565 = vector.extract_strided_slice %560 {offsets = [0, 0], sizes = [8, 128], strides = [1, 1]} : vector<8x384xf32> to vector<8x128xf32>
    %566 = arith.mulf %565, %562 : vector<8x128xf32>
    %567 = arith.addf %564, %566 : vector<8x128xf32>
    %568 = vector.extract_strided_slice %560 {offsets = [0, 256], sizes = [8, 128], strides = [1, 1]} : vector<8x384xf32> to vector<8x128xf32>
    %569 = math.tanh %567 : vector<8x128xf32>
    %570 = arith.mulf %568, %569 : vector<8x128xf32>
    %c0_197 = arith.constant 0 : index
    %c0_198 = arith.constant 0 : index
    %571 = vector.load %arg20[%c0_197, %c0_198] : memref<128x512xbf16, #tpu.memory_space<vmem>>, vector<128x512xbf16>
    %572 = arith.truncf %528 : vector<8x128xf32> to vector<8x128xbf16>
    %cst_199 = arith.constant dense<0.000000e+00> : vector<8x512xf32>
    %573 = tpu.matmul %572, %571, %cst_199 {dimension_numbers = #tpu.dot_dimension_numbers<[1], [0], [0], [1], [0, 0, 1, 1], [], []>} : vector<8x128xbf16>, vector<128x512xbf16>, vector<8x512xf32> -> vector<8x512xf32>
    %c0_200 = arith.constant 0 : index
    %c0_201 = arith.constant 0 : index
    %574 = vector.load %arg19[%c0_200, %c0_201] : memref<128x512xbf16, #tpu.memory_space<vmem>>, vector<128x512xbf16>
    %575 = arith.truncf %570 : vector<8x128xf32> to vector<8x128xbf16>
    %cst_202 = arith.constant dense<0.000000e+00> : vector<8x512xf32>
    %576 = tpu.matmul %575, %574, %cst_202 {dimension_numbers = #tpu.dot_dimension_numbers<[1], [0], [0], [1], [0, 0, 1, 1], [], []>} : vector<8x128xbf16>, vector<128x512xbf16>, vector<8x512xf32> -> vector<8x512xf32>
    %577 = arith.addf %573, %576 : vector<8x512xf32>
    %578 = arith.addf %577, %463 : vector<8x512xf32>
    %579 = vector.extract_strided_slice %578 {offsets = [0, 0], sizes = [8, 384], strides = [1, 1]} : vector<8x512xf32> to vector<8x384xf32>
    %580 = arith.negf %579 : vector<8x384xf32>
    %581 = math.exp %580 : vector<8x384xf32>
    %cst_203 = arith.constant 1.000000e+00 : f32
    %582 = vector.broadcast %cst_203 : f32 to vector<8x384xf32>
    %583 = arith.addf %582, %581 : vector<8x384xf32>
    %584 = arith.divf %582, %583 : vector<8x384xf32>
    %585 = vector.extract_strided_slice %578 {offsets = [0, 384], sizes = [8, 128], strides = [1, 1]} : vector<8x512xf32> to vector<8x128xf32>
    %586 = math.tanh %585 : vector<8x128xf32>
    %587 = vector.extract_strided_slice %584 {offsets = [0, 128], sizes = [8, 128], strides = [1, 1]} : vector<8x384xf32> to vector<8x128xf32>
    %588 = arith.mulf %587, %525 : vector<8x128xf32>
    %589 = vector.extract_strided_slice %584 {offsets = [0, 0], sizes = [8, 128], strides = [1, 1]} : vector<8x384xf32> to vector<8x128xf32>
    %590 = arith.mulf %589, %586 : vector<8x128xf32>
    %591 = arith.addf %588, %590 : vector<8x128xf32>
    %592 = vector.extract_strided_slice %584 {offsets = [0, 256], sizes = [8, 128], strides = [1, 1]} : vector<8x384xf32> to vector<8x128xf32>
    %593 = math.tanh %591 : vector<8x128xf32>
    %594 = arith.mulf %592, %593 : vector<8x128xf32>
    %595 = arith.index_cast %c1_i32_180 : i32 to index
    %c0_204 = arith.constant 0 : index
    %c0_205 = arith.constant 0 : index
    %596 = vector.load %arg24[%595, %c0_204, %c0_205] : memref<4x8x128xf32, #tpu.memory_space<vmem>>, vector<1x8x128xf32>
    %597 = vector.shape_cast %596 : vector<1x8x128xf32> to vector<8x128xf32>
    %598 = vector.shape_cast %594 : vector<8x128xf32> to vector<1x8x128xf32>
    tpu.vector_store %arg24[%595, %c0_204, %c0_205], %598 {strides = array<i32>} : memref<4x8x128xf32, #tpu.memory_space<vmem>>, vector<1x8x128xf32>,
    %c2_i32_206 = arith.constant 2 : i32
    %c1_i32_207 = arith.constant 1 : i32
    %599 = arith.subi %c2_i32_206, %c1_i32_207 : i32
    %c0_i32_208 = arith.constant 0 : i32
    %600 = arith.maxsi %599, %c0_i32_208 : i32
    %c0_i32_209 = arith.constant 0 : i32
    %601 = arith.cmpi sgt, %c2_i32_206, %c0_i32_209 : i32
    %602 = arith.index_cast %600 : i32 to index
    %603 = memref.load %arg0[%602] : memref<4xi32, #tpu.memory_space<smem>>
    %c0_i32_210 = arith.constant 0 : i32
    %604 = arith.cmpi sgt, %603, %c0_i32_210 : i32
    %605 = arith.andi %601, %604 : i1
    %606 = arith.index_cast %600 : i32 to index
    %c0_211 = arith.constant 0 : index
    %c0_212 = arith.constant 0 : index
    %607 = vector.load %arg27[%606, %c0_211, %c0_212] : memref<4x8x128xf32, #tpu.memory_space<vmem>>, vector<1x8x128xf32>
    %608 = vector.shape_cast %607 : vector<1x8x128xf32> to vector<8x128xf32>
    %c0_213 = arith.constant 0 : index
    %c0_214 = arith.constant 0 : index
    %609 = vector.load %arg14[%c0_213, %c0_214] : memref<128x128xbf16, #tpu.memory_space<vmem>>, vector<128x128xbf16>
    %610 = arith.extui %605 : i1 to i32
    %c0_i32_215 = arith.constant 0 : i32
    %611 = arith.cmpi ne, %610, %c0_i32_215 : i32
    %612 = scf.if %611 -> (vector<8x128xf32>) {
      scf.yield %608 : vector<8x128xf32>
    } else {
      %757 = arith.truncf %594 : vector<8x128xf32> to vector<8x128xbf16>
      %cst_273 = arith.constant dense<0.000000e+00> : vector<8x128xf32>
      %758 = tpu.matmul %757, %609, %cst_273 {dimension_numbers = #tpu.dot_dimension_numbers<[1], [0], [0], [1], [0, 0, 1, 1], [], []>} : vector<8x128xbf16>, vector<128x128xbf16>, vector<8x128xf32> -> vector<8x128xf32>
      %759 = arith.addf %758, %466 : vector<8x128xf32>
      %cst_274 = arith.constant 0.000000e+00 : f32
      %760 = vector.broadcast %cst_274 : f32 to vector<8x128xf32>
      %761 = arith.maximumf %759, %760 : vector<8x128xf32>
      scf.yield %761 : vector<8x128xf32>
    }
    %c0_216 = arith.constant 0 : index
    %c0_217 = arith.constant 0 : index
    %613 = vector.load %arg17[%c0_216, %c0_217] : memref<128x512xbf16, #tpu.memory_space<vmem>>, vector<128x512xbf16>
    %614 = arith.truncf %570 : vector<8x128xf32> to vector<8x128xbf16>
    %cst_218 = arith.constant dense<0.000000e+00> : vector<8x512xf32>
    %615 = tpu.matmul %614, %613, %cst_218 {dimension_numbers = #tpu.dot_dimension_numbers<[1], [0], [0], [1], [0, 0, 1, 1], [], []>} : vector<8x128xbf16>, vector<128x512xbf16>, vector<8x512xf32> -> vector<8x512xf32>
    %c0_219 = arith.constant 0 : index
    %c0_220 = arith.constant 0 : index
    %616 = vector.load %arg16[%c0_219, %c0_220] : memref<128x512xbf16, #tpu.memory_space<vmem>>, vector<128x512xbf16>
    %617 = arith.truncf %612 : vector<8x128xf32> to vector<8x128xbf16>
    %cst_221 = arith.constant dense<0.000000e+00> : vector<8x512xf32>
    %618 = tpu.matmul %617, %616, %cst_221 {dimension_numbers = #tpu.dot_dimension_numbers<[1], [0], [0], [1], [0, 0, 1, 1], [], []>} : vector<8x128xbf16>, vector<128x512xbf16>, vector<8x512xf32> -> vector<8x512xf32>
    %619 = arith.addf %615, %618 : vector<8x512xf32>
    %620 = arith.addf %619, %460 : vector<8x512xf32>
    %621 = vector.extract_strided_slice %620 {offsets = [0, 0], sizes = [8, 384], strides = [1, 1]} : vector<8x512xf32> to vector<8x384xf32>
    %622 = arith.negf %621 : vector<8x384xf32>
    %623 = math.exp %622 : vector<8x384xf32>
    %cst_222 = arith.constant 1.000000e+00 : f32
    %624 = vector.broadcast %cst_222 : f32 to vector<8x384xf32>
    %625 = arith.addf %624, %623 : vector<8x384xf32>
    %626 = arith.divf %624, %625 : vector<8x384xf32>
    %627 = vector.extract_strided_slice %620 {offsets = [0, 384], sizes = [8, 128], strides = [1, 1]} : vector<8x512xf32> to vector<8x128xf32>
    %628 = math.tanh %627 : vector<8x128xf32>
    %629 = vector.extract_strided_slice %626 {offsets = [0, 128], sizes = [8, 128], strides = [1, 1]} : vector<8x384xf32> to vector<8x128xf32>
    %630 = arith.mulf %629, %567 : vector<8x128xf32>
    %631 = vector.extract_strided_slice %626 {offsets = [0, 0], sizes = [8, 128], strides = [1, 1]} : vector<8x384xf32> to vector<8x128xf32>
    %632 = arith.mulf %631, %628 : vector<8x128xf32>
    %633 = arith.addf %630, %632 : vector<8x128xf32>
    %634 = vector.extract_strided_slice %626 {offsets = [0, 256], sizes = [8, 128], strides = [1, 1]} : vector<8x384xf32> to vector<8x128xf32>
    %635 = math.tanh %633 : vector<8x128xf32>
    %636 = arith.mulf %634, %635 : vector<8x128xf32>
    %c0_223 = arith.constant 0 : index
    %c0_224 = arith.constant 0 : index
    %637 = vector.load %arg20[%c0_223, %c0_224] : memref<128x512xbf16, #tpu.memory_space<vmem>>, vector<128x512xbf16>
    %638 = arith.truncf %594 : vector<8x128xf32> to vector<8x128xbf16>
    %cst_225 = arith.constant dense<0.000000e+00> : vector<8x512xf32>
    %639 = tpu.matmul %638, %637, %cst_225 {dimension_numbers = #tpu.dot_dimension_numbers<[1], [0], [0], [1], [0, 0, 1, 1], [], []>} : vector<8x128xbf16>, vector<128x512xbf16>, vector<8x512xf32> -> vector<8x512xf32>
    %c0_226 = arith.constant 0 : index
    %c0_227 = arith.constant 0 : index
    %640 = vector.load %arg19[%c0_226, %c0_227] : memref<128x512xbf16, #tpu.memory_space<vmem>>, vector<128x512xbf16>
    %641 = arith.truncf %636 : vector<8x128xf32> to vector<8x128xbf16>
    %cst_228 = arith.constant dense<0.000000e+00> : vector<8x512xf32>
    %642 = tpu.matmul %641, %640, %cst_228 {dimension_numbers = #tpu.dot_dimension_numbers<[1], [0], [0], [1], [0, 0, 1, 1], [], []>} : vector<8x128xbf16>, vector<128x512xbf16>, vector<8x512xf32> -> vector<8x512xf32>
    %643 = arith.addf %639, %642 : vector<8x512xf32>
    %644 = arith.addf %643, %463 : vector<8x512xf32>
    %645 = vector.extract_strided_slice %644 {offsets = [0, 0], sizes = [8, 384], strides = [1, 1]} : vector<8x512xf32> to vector<8x384xf32>
    %646 = arith.negf %645 : vector<8x384xf32>
    %647 = math.exp %646 : vector<8x384xf32>
    %cst_229 = arith.constant 1.000000e+00 : f32
    %648 = vector.broadcast %cst_229 : f32 to vector<8x384xf32>
    %649 = arith.addf %648, %647 : vector<8x384xf32>
    %650 = arith.divf %648, %649 : vector<8x384xf32>
    %651 = vector.extract_strided_slice %644 {offsets = [0, 384], sizes = [8, 128], strides = [1, 1]} : vector<8x512xf32> to vector<8x128xf32>
    %652 = math.tanh %651 : vector<8x128xf32>
    %653 = vector.extract_strided_slice %650 {offsets = [0, 128], sizes = [8, 128], strides = [1, 1]} : vector<8x384xf32> to vector<8x128xf32>
    %654 = arith.mulf %653, %591 : vector<8x128xf32>
    %655 = vector.extract_strided_slice %650 {offsets = [0, 0], sizes = [8, 128], strides = [1, 1]} : vector<8x384xf32> to vector<8x128xf32>
    %656 = arith.mulf %655, %652 : vector<8x128xf32>
    %657 = arith.addf %654, %656 : vector<8x128xf32>
    %658 = vector.extract_strided_slice %650 {offsets = [0, 256], sizes = [8, 128], strides = [1, 1]} : vector<8x384xf32> to vector<8x128xf32>
    %659 = math.tanh %657 : vector<8x128xf32>
    %660 = arith.mulf %658, %659 : vector<8x128xf32>
    %661 = arith.index_cast %c2_i32_206 : i32 to index
    %c0_230 = arith.constant 0 : index
    %c0_231 = arith.constant 0 : index
    %662 = vector.load %arg24[%661, %c0_230, %c0_231] : memref<4x8x128xf32, #tpu.memory_space<vmem>>, vector<1x8x128xf32>
    %663 = vector.shape_cast %662 : vector<1x8x128xf32> to vector<8x128xf32>
    %664 = vector.shape_cast %660 : vector<8x128xf32> to vector<1x8x128xf32>
    tpu.vector_store %arg24[%661, %c0_230, %c0_231], %664 {strides = array<i32>} : memref<4x8x128xf32, #tpu.memory_space<vmem>>, vector<1x8x128xf32>,
    %c3_i32_232 = arith.constant 3 : i32
    %c1_i32_233 = arith.constant 1 : i32
    %665 = arith.subi %c3_i32_232, %c1_i32_233 : i32
    %c0_i32_234 = arith.constant 0 : i32
    %666 = arith.maxsi %665, %c0_i32_234 : i32
    %c0_i32_235 = arith.constant 0 : i32
    %667 = arith.cmpi sgt, %c3_i32_232, %c0_i32_235 : i32
    %668 = arith.index_cast %666 : i32 to index
    %669 = memref.load %arg0[%668] : memref<4xi32, #tpu.memory_space<smem>>
    %c0_i32_236 = arith.constant 0 : i32
    %670 = arith.cmpi sgt, %669, %c0_i32_236 : i32
    %671 = arith.andi %667, %670 : i1
    %672 = arith.index_cast %666 : i32 to index
    %c0_237 = arith.constant 0 : index
    %c0_238 = arith.constant 0 : index
    %673 = vector.load %arg27[%672, %c0_237, %c0_238] : memref<4x8x128xf32, #tpu.memory_space<vmem>>, vector<1x8x128xf32>
    %674 = vector.shape_cast %673 : vector<1x8x128xf32> to vector<8x128xf32>
    %c0_239 = arith.constant 0 : index
    %c0_240 = arith.constant 0 : index
    %675 = vector.load %arg14[%c0_239, %c0_240] : memref<128x128xbf16, #tpu.memory_space<vmem>>, vector<128x128xbf16>
    %676 = arith.extui %671 : i1 to i32
    %c0_i32_241 = arith.constant 0 : i32
    %677 = arith.cmpi ne, %676, %c0_i32_241 : i32
    %678 = scf.if %677 -> (vector<8x128xf32>) {
      scf.yield %674 : vector<8x128xf32>
    } else {
      %757 = arith.truncf %660 : vector<8x128xf32> to vector<8x128xbf16>
      %cst_273 = arith.constant dense<0.000000e+00> : vector<8x128xf32>
      %758 = tpu.matmul %757, %675, %cst_273 {dimension_numbers = #tpu.dot_dimension_numbers<[1], [0], [0], [1], [0, 0, 1, 1], [], []>} : vector<8x128xbf16>, vector<128x128xbf16>, vector<8x128xf32> -> vector<8x128xf32>
      %759 = arith.addf %758, %466 : vector<8x128xf32>
      %cst_274 = arith.constant 0.000000e+00 : f32
      %760 = vector.broadcast %cst_274 : f32 to vector<8x128xf32>
      %761 = arith.maximumf %759, %760 : vector<8x128xf32>
      scf.yield %761 : vector<8x128xf32>
    }
    %c0_242 = arith.constant 0 : index
    %c0_243 = arith.constant 0 : index
    %679 = vector.load %arg17[%c0_242, %c0_243] : memref<128x512xbf16, #tpu.memory_space<vmem>>, vector<128x512xbf16>
    %680 = arith.truncf %636 : vector<8x128xf32> to vector<8x128xbf16>
    %cst_244 = arith.constant dense<0.000000e+00> : vector<8x512xf32>
    %681 = tpu.matmul %680, %679, %cst_244 {dimension_numbers = #tpu.dot_dimension_numbers<[1], [0], [0], [1], [0, 0, 1, 1], [], []>} : vector<8x128xbf16>, vector<128x512xbf16>, vector<8x512xf32> -> vector<8x512xf32>
    %c0_245 = arith.constant 0 : index
    %c0_246 = arith.constant 0 : index
    %682 = vector.load %arg16[%c0_245, %c0_246] : memref<128x512xbf16, #tpu.memory_space<vmem>>, vector<128x512xbf16>
    %683 = arith.truncf %678 : vector<8x128xf32> to vector<8x128xbf16>
    %cst_247 = arith.constant dense<0.000000e+00> : vector<8x512xf32>
    %684 = tpu.matmul %683, %682, %cst_247 {dimension_numbers = #tpu.dot_dimension_numbers<[1], [0], [0], [1], [0, 0, 1, 1], [], []>} : vector<8x128xbf16>, vector<128x512xbf16>, vector<8x512xf32> -> vector<8x512xf32>
    %685 = arith.addf %681, %684 : vector<8x512xf32>
    %686 = arith.addf %685, %460 : vector<8x512xf32>
    %687 = vector.extract_strided_slice %686 {offsets = [0, 0], sizes = [8, 384], strides = [1, 1]} : vector<8x512xf32> to vector<8x384xf32>
    %688 = arith.negf %687 : vector<8x384xf32>
    %689 = math.exp %688 : vector<8x384xf32>
    %cst_248 = arith.constant 1.000000e+00 : f32
    %690 = vector.broadcast %cst_248 : f32 to vector<8x384xf32>
    %691 = arith.addf %690, %689 : vector<8x384xf32>
    %692 = arith.divf %690, %691 : vector<8x384xf32>
    %693 = vector.extract_strided_slice %686 {offsets = [0, 384], sizes = [8, 128], strides = [1, 1]} : vector<8x512xf32> to vector<8x128xf32>
    %694 = math.tanh %693 : vector<8x128xf32>
    %695 = vector.extract_strided_slice %692 {offsets = [0, 128], sizes = [8, 128], strides = [1, 1]} : vector<8x384xf32> to vector<8x128xf32>
    %696 = arith.mulf %695, %633 : vector<8x128xf32>
    %697 = vector.extract_strided_slice %692 {offsets = [0, 0], sizes = [8, 128], strides = [1, 1]} : vector<8x384xf32> to vector<8x128xf32>
    %698 = arith.mulf %697, %694 : vector<8x128xf32>
    %699 = arith.addf %696, %698 : vector<8x128xf32>
    %700 = vector.extract_strided_slice %692 {offsets = [0, 256], sizes = [8, 128], strides = [1, 1]} : vector<8x384xf32> to vector<8x128xf32>
    %701 = math.tanh %699 : vector<8x128xf32>
    %702 = arith.mulf %700, %701 : vector<8x128xf32>
    %c0_249 = arith.constant 0 : index
    %c0_250 = arith.constant 0 : index
    %703 = vector.load %arg20[%c0_249, %c0_250] : memref<128x512xbf16, #tpu.memory_space<vmem>>, vector<128x512xbf16>
    %704 = arith.truncf %660 : vector<8x128xf32> to vector<8x128xbf16>
    %cst_251 = arith.constant dense<0.000000e+00> : vector<8x512xf32>
    %705 = tpu.matmul %704, %703, %cst_251 {dimension_numbers = #tpu.dot_dimension_numbers<[1], [0], [0], [1], [0, 0, 1, 1], [], []>} : vector<8x128xbf16>, vector<128x512xbf16>, vector<8x512xf32> -> vector<8x512xf32>
    %c0_252 = arith.constant 0 : index
    %c0_253 = arith.constant 0 : index
    %706 = vector.load %arg19[%c0_252, %c0_253] : memref<128x512xbf16, #tpu.memory_space<vmem>>, vector<128x512xbf16>
    %707 = arith.truncf %702 : vector<8x128xf32> to vector<8x128xbf16>
    %cst_254 = arith.constant dense<0.000000e+00> : vector<8x512xf32>
    %708 = tpu.matmul %707, %706, %cst_254 {dimension_numbers = #tpu.dot_dimension_numbers<[1], [0], [0], [1], [0, 0, 1, 1], [], []>} : vector<8x128xbf16>, vector<128x512xbf16>, vector<8x512xf32> -> vector<8x512xf32>
    %709 = arith.addf %705, %708 : vector<8x512xf32>
    %710 = arith.addf %709, %463 : vector<8x512xf32>
    %711 = vector.extract_strided_slice %710 {offsets = [0, 0], sizes = [8, 384], strides = [1, 1]} : vector<8x512xf32> to vector<8x384xf32>
    %712 = arith.negf %711 : vector<8x384xf32>
    %713 = math.exp %712 : vector<8x384xf32>
    %cst_255 = arith.constant 1.000000e+00 : f32
    %714 = vector.broadcast %cst_255 : f32 to vector<8x384xf32>
    %715 = arith.addf %714, %713 : vector<8x384xf32>
    %716 = arith.divf %714, %715 : vector<8x384xf32>
    %717 = vector.extract_strided_slice %710 {offsets = [0, 384], sizes = [8, 128], strides = [1, 1]} : vector<8x512xf32> to vector<8x128xf32>
    %718 = math.tanh %717 : vector<8x128xf32>
    %719 = vector.extract_strided_slice %716 {offsets = [0, 128], sizes = [8, 128], strides = [1, 1]} : vector<8x384xf32> to vector<8x128xf32>
    %720 = arith.mulf %719, %657 : vector<8x128xf32>
    %721 = vector.extract_strided_slice %716 {offsets = [0, 0], sizes = [8, 128], strides = [1, 1]} : vector<8x384xf32> to vector<8x128xf32>
    %722 = arith.mulf %721, %718 : vector<8x128xf32>
    %723 = arith.addf %720, %722 : vector<8x128xf32>
    %724 = vector.extract_strided_slice %716 {offsets = [0, 256], sizes = [8, 128], strides = [1, 1]} : vector<8x384xf32> to vector<8x128xf32>
    %725 = math.tanh %723 : vector<8x128xf32>
    %726 = arith.mulf %724, %725 : vector<8x128xf32>
    %727 = arith.index_cast %c3_i32_232 : i32 to index
    %c0_256 = arith.constant 0 : index
    %c0_257 = arith.constant 0 : index
    %728 = vector.load %arg24[%727, %c0_256, %c0_257] : memref<4x8x128xf32, #tpu.memory_space<vmem>>, vector<1x8x128xf32>
    %729 = vector.shape_cast %728 : vector<1x8x128xf32> to vector<8x128xf32>
    %730 = vector.shape_cast %726 : vector<8x128xf32> to vector<1x8x128xf32>
    tpu.vector_store %arg24[%727, %c0_256, %c0_257], %730 {strides = array<i32>} : memref<4x8x128xf32, #tpu.memory_space<vmem>>, vector<1x8x128xf32>,
    %c4_i32_258 = arith.constant 4 : i32
    %c0_259 = arith.constant 0 : index
    %c0_260 = arith.constant 0 : index
    %c0_261 = arith.constant 0 : index
    %731 = vector.load %arg24[%c0_259, %c0_260, %c0_261] : memref<4x8x128xf32, #tpu.memory_space<vmem>>, vector<4x8x128xf32>
    %732 = vector.shape_cast %731 : vector<4x8x128xf32> to vector<32x128xf32>
    %c0_262 = arith.constant 0 : index
    %c0_263 = arith.constant 0 : index
    %733 = vector.load %arg22[%c0_262, %c0_263] : memref<128x128xbf16, #tpu.memory_space<vmem>>, vector<128x128xbf16>
    %734 = arith.truncf %732 : vector<32x128xf32> to vector<32x128xbf16>
    %cst_264 = arith.constant dense<0.000000e+00> : vector<32x128xf32>
    %735 = tpu.matmul %734, %733, %cst_264 {dimension_numbers = #tpu.dot_dimension_numbers<[1], [0], [0], [1], [0, 0, 1, 1], [], []>} : vector<32x128xbf16>, vector<128x128xbf16>, vector<32x128xf32> -> vector<32x128xf32>
    %c0_265 = arith.constant 0 : index
    %c0_266 = arith.constant 0 : index
    %736 = vector.load %arg23[%c0_265, %c0_266] : memref<1x128xf32, #tpu.memory_space<vmem>>, vector<1x128xf32>
    %737 = vector.broadcast %736 : vector<1x128xf32> to vector<32x128xf32>
    %738 = arith.addf %735, %737 : vector<32x128xf32>
    %739 = tpu.iota {dimensions = array<i32: 1>} : vector<32x128xi32>
    %c43_i32 = arith.constant 43 : i32
    %740 = vector.broadcast %c43_i32 : i32 to vector<32x128xi32>
    %741 = arith.cmpi slt, %739, %740 : vector<32x128xi32>
    %cst_267 = arith.constant -1.000000e+30 : f32
    %742 = vector.broadcast %cst_267 : f32 to vector<32x128xf32>
    %743 = arith.select %741, %738, %742 : vector<32x128xi1>, vector<32x128xf32>
    %cst_268 = arith.constant dense<0xFF800000> : vector<32xf32>
    %744 = vector.multi_reduction <maximumf>, %743, %cst_268 [1] : vector<32x128xf32> to vector<32xf32>
    %745 = vector.shape_cast %744 : vector<32xf32> to vector<32x1xf32>
    %746 = vector.broadcast %745 : vector<32x1xf32> to vector<32x128xf32>
    %747 = arith.subf %743, %746 : vector<32x128xf32>
    %748 = math.exp %747 : vector<32x128xf32>
    %cst_269 = arith.constant dense<0.000000e+00> : vector<32xf32>
    %749 = vector.multi_reduction <add>, %748, %cst_269 [1] : vector<32x128xf32> to vector<32xf32>
    %750 = vector.shape_cast %749 : vector<32xf32> to vector<32x1xf32>
    %751 = math.log %750 : vector<32x1xf32>
    %752 = arith.addf %751, %745 : vector<32x1xf32>
    %753 = vector.broadcast %752 : vector<32x1xf32> to vector<32x128xf32>
    %754 = arith.subf %743, %753 : vector<32x128xf32>
    %755 = vector.shape_cast %754 : vector<32x128xf32> to vector<4x8x128xf32>
    %c0_270 = arith.constant 0 : index
    %c0_271 = arith.constant 0 : index
    %c0_272 = arith.constant 0 : index
    %756 = vector.load %arg25[%c0_270, %c0_271, %c0_272] : memref<4x8x128xf32, #tpu.memory_space<vmem>>, vector<4x8x128xf32>
    tpu.vector_store %arg25[%c0_270, %c0_271, %c0_272], %755 {strides = array<i32>} : memref<4x8x128xf32, #tpu.memory_space<vmem>>, vector<4x8x128xf32>,
    return
  }
}

</mosaic_0001>

<bundles_post_ra>
// kernel: seq2seq_forward.1
= control target key start
LH: loop header
LB: loop body
LE: loop exit
PB: predicated region body
PF: predicated region fallthrough
CT: control target
= control target key end

     0   :  { %s16366_s0 = inlined_call_operand.vmem [shape: s32[4], index: 0, kind: input, shape index: {}]   ;;  %s16367_s1 = inlined_call_operand.vmem [shape: f32[96,128], index: 1, kind: input, shape index: {}]   ;;  %s16368_s2 = inlined_call_operand.hbm [shape: f32[1,128], index: 2, kind: input, shape index: {}]   ;;  %s16369_s3 = inlined_call_operand.hbm [shape: f32[1,128], index: 3, kind: input, shape index: {}]   ;;  %s16370_s4 = inlined_call_operand.vmem [shape: bf16[128,128], index: 4, kind: input, shape index: {}]   ;;  %s16371_s5 = inlined_call_operand.vmem [shape: f32[1,128], index: 5, kind: input, shape index: {}]   ;;  %s16372_s6 = inlined_call_operand.hbm [shape: f32[1,128], index: 6, kind: input, shape index: {}]   ;;  %s16373_s7 = inlined_call_operand.hbm [shape: f32[1,128], index: 7, kind: input, shape index: {}]   ;;  %s16374_s8 = inlined_call_operand.vmem [shape: bf16[128,512], index: 8, kind: input, shape index: {}]   ;;  %s16375_s9 = inlined_call_operand.vmem [shape: bf16[128,512], index: 9, kind: input, shape index: {}]   ;;  %s16376_s10 = inlined_call_operand.hbm [shape: f32[1,512], index: 10, kind: input, shape index: {}]   ;;  %s16377_s11 = inlined_call_operand.hbm [shape: bf16[128,512], index: 11, kind: input, shape index: {}]   ;;  %s16378_s12 = inlined_call_operand.hbm [shape: bf16[128,512], index: 12, kind: input, shape index: {}]   ;;  %s16379_s13 = inlined_call_operand.hbm [shape: f32[1,512], index: 13, kind: input, shape index: {}]   ;;  %s16380_s14 = inlined_call_operand.vmem [shape: bf16[128,128], index: 14, kind: input, shape index: {}]   ;;  %s16381_s15 = inlined_call_operand.hbm [shape: f32[1,128], index: 15, kind: input, shape index: {}]   ;;  %s16382_s16 = inlined_call_operand.hbm [shape: bf16[128,512], index: 16, kind: input, shape index: {}]   ;;  %s16383_s17 = inlined_call_operand.hbm [shape: bf16[128,512], index: 17, kind: input, shape index: {}]   ;;  %s16384_s18 = inlined_call_operand.hbm [shape: f32[1,512], index: 18, kind: input, shape index: {}]   ;;  %s16385_s19 = inlined_call_operand.hbm [shape: bf16[128,512], index: 19, kind: input, shape index: {}]   ;;  %s16386_s20 = inlined_call_operand.hbm [shape: bf16[128,512], index: 20, kind: input, shape index: {}]   ;;  %s16387_s21 = inlined_call_operand.hbm [shape: f32[1,512], index: 21, kind: input, shape index: {}]   ;;  %s16388_s22 = inlined_call_operand.vmem [shape: bf16[128,128], index: 22, kind: input, shape index: {}]   ;;  %s16389_s23 = inlined_call_operand.hbm [shape: f32[1,128], index: 23, kind: input, shape index: {}]   ;;  %s16390_s24 = inlined_call_operand.vmem [shape: f32[4,8,128], index: 24, kind: output, shape index: {0}]   ;;  %s16391_s25 = inlined_call_operand.vmem [shape: f32[4,8,128], index: 25, kind: output, shape index: {1}]  }
   0x1   :  { %16663 = sst [smem:[#allocation119_spill]] %s16366_s0 }
   0x2   :  { %16664 = sst [smem:[#allocation120_spill]] %s16367_s1 }
   0x3   :  { %16665 = sst [smem:[#allocation121_spill]] %s16368_s2 }
   0x4   :  { %16666 = sst [smem:[#allocation122_spill]] %s16369_s3 }
   0x5   :  { %16667 = sst [smem:[#allocation123_spill]] %s16370_s4 }
   0x6   :  { %16668 = sst [smem:[#allocation124_spill]] %s16371_s5 }
   0x7   :  { %16669 = sst [smem:[#allocation125_spill]] %s16372_s6 }
   0x8   :  { %16670 = sst [smem:[#allocation126_spill]] %s16373_s7 }
   0x9   :  { %16671 = sst [smem:[#allocation127_spill]] %s16374_s8 }
   0xa   :  { %16672 = sst [smem:[#allocation128_spill]] %s16375_s9 }
   0xb   :  { %16673 = sst [smem:[#allocation129_spill]] %s16391_s25 }
   0xc   :  { %31 = vsyncpa [#allocation6], 0 }
   0xd   :  { %32 = vsyncpa [#allocation5], 0 }
   0xe   :  { %33 = vsyncpa [#allocation9], 0 }
   0xf   :  { %34 = vsyncpa [#allocation12], 0 }
  0x10   :  { %35 = vsyncpa [#allocation15], 0 }
  0x11   :  { %36 = vsyncpa [#allocation18], 0 }
  0x12   :  { %37 = vsyncpa [#allocation21], 0 }
  0x13   :  { %38 = vsyncpa [#allocation24], 0 }
  0x14   :  { %39 = vsyncpa [#allocation27], 0 }
  0x15   :  { %40 = vsyncpa [#allocation30], 0  ;;  %s12963_s29 = smov [#allocation8]   ;;  %s12964_s6 = smov [#allocation11]  }
  0x16   :  { %s69_s2 = sshll.u32 %s12963_s29, 4  ;;  %s93_s30 = sshll.u32 %s12964_s6, 4  ;;  %s70_s2 = int_to_ptr.vmem [resolvable:$true] %s69_s2  ;;  %s94_s30 = int_to_ptr.vmem [resolvable:$true] %s93_s30 }
  0x17   :  { %s16674_s26 = sld [smem:[#allocation122_spill]] }
  0x1d   :  { %s12555_s1 = scalar_lea.hbm %s16674_s26, 16 }
  0x1e   :  { %p12556_p0 = scmp.ne.s32.totalorder %s16674_s26, %s12555_s1  ;;  %p12559_p1 = scmp.lt.u32.totalorder %s12555_s1, %s16674_s26 }
  0x20   :  { %p12561_p2 = pnand %p12559_p1, %p12556_p0 }
  0x22   :  { %12564 = shalt.err (!%p12561_p2)
}
  0x23   :  { %s12565_s9 = scalar_lea.vmem %s70_s2, 16  ;;  %s12569_s5 = scalar_lea.vmem %s70_s2, 32 }
  0x24   :  { %p12566_p3 = scmp.ne.s32.totalorder %s70_s2, %s12565_s9  ;;  %p12570_p4 = scmp.lt.s32.totalorder %s70_s2, %s70_s2 }
  0x25   :  { %p12571_p5 = scmp.lt.s32.totalorder %s12569_s5, %s12565_s9 }
  0x27   :  { %p12572_p6 = por %p12571_p5, %p12570_p4 }
  0x29   :  { %p12573_p7 = pnand %p12572_p6, %p12566_p3 }
  0x2b   :  { %12576 = shalt.err (!%p12573_p7)
}
  0x2c   :  { %72 = dma.hbm_to_vmem [thread:$0]  %s16674_s26, 16, %s70_s2, [#allocation9]  }
  0x2d   :  { %s16675_s3 = sld [smem:[#allocation126_spill]] }
  0x33   :  { %s12577_s8 = scalar_lea.hbm %s16675_s3, 16 }
  0x34   :  { %p12578_p8 = scmp.ne.s32.totalorder %s16675_s3, %s12577_s8  ;;  %p12581_p9 = scmp.lt.u32.totalorder %s12577_s8, %s16675_s3 }
  0x36   :  { %p12583_p10 = pnand %p12581_p9, %p12578_p8 }
  0x38   :  { %12586 = shalt.err (!%p12583_p10)
}
  0x39   :  { %s12587_s9 = scalar_lea.vmem %s94_s30, 16  ;;  %s12591_s5 = scalar_lea.vmem %s94_s30, 32 }
  0x3a   :  { %p12588_p11 = scmp.ne.s32.totalorder %s94_s30, %s12587_s9  ;;  %p12592_p12 = scmp.lt.s32.totalorder %s94_s30, %s94_s30 }
  0x3b   :  { %p12593_p13 = scmp.lt.s32.totalorder %s12591_s5, %s12587_s9 }
  0x3d   :  { %p12594_p0 = por %p12593_p13, %p12592_p12 }
  0x3f   :  { %p12595_p1 = pnand %p12594_p0, %p12588_p11 }
  0x41   :  { %12598 = shalt.err (!%p12595_p1)
}
  0x42   :  { %96 = dma.hbm_to_vmem [thread:$0]  %s16675_s3, 16, %s94_s30, [#allocation12]  }
  0x43   :  { %s12965_s0 = smov [#allocation14]   ;;  %s12599_s8 = scalar_lea.hbm %s16377_s11, 4096 }
  0x44   :  { %s116_s29 = sshll.u32 %s12965_s0, 4  ;;  %p12600_p2 = scmp.ne.s32.totalorder %s16377_s11, %s12599_s8  ;;  %s117_s29 = int_to_ptr.vmem [resolvable:$true] %s116_s29 }
  0x45   :  { %p12603_p3 = scmp.lt.u32.totalorder %s12599_s8, %s16377_s11 }
  0x47   :  { %p12605_p4 = pnand %p12603_p3, %p12600_p2 }
  0x49   :  { %12608 = shalt.err (!%p12605_p4)
}
  0x4a   :  { %s12609_s9 = scalar_lea.vmem %s117_s29, 4096  ;;  %p12614_p6 = scmp.lt.s32.totalorder %s117_s29, %s117_s29 }
  0x4b   :  { %p12610_p5 = scmp.ne.s32.totalorder %s117_s29, %s12609_s9  ;;  %p12615_p7 = scmp.lt.s32.totalorder %s12609_s9, %s12609_s9 }
  0x4d   :  { %p12616_p8 = por %p12615_p7, %p12614_p6 }
  0x4f   :  { %p12617_p9 = pnand %p12616_p8, %p12610_p5 }
  0x51   :  { %12620 = shalt.err (!%p12617_p9)
}
  0x52   :  { %s12966_s30 = smov 256   ;;  %s12967_s3 = smov 16  }
  0x53   :  { %122 = dma.hbm_to_vmem [thread:$0]  %s16377_s11, 4096, %s117_s29, [#allocation15], %s12966_s30, %s12966_s30, %s12967_s3  }
  0x54   :  { %s12968_s26 = smov [#allocation17]   ;;  %s12969_s6 = smov [#allocation20]  }
  0x55   :  { %s141_s0 = sshll.u32 %s12968_s26, 4  ;;  %s162_s7 = sshll.u32 %s12969_s6, 4  ;;  %s142_s0 = int_to_ptr.vmem [resolvable:$true] %s141_s0  ;;  %s163_s7 = int_to_ptr.vmem [resolvable:$true] %s162_s7 }
  0x56   :  { %s12621_s1 = scalar_lea.hbm %s16379_s13, 64 }
  0x57   :  { %p12622_p10 = scmp.ne.s32.totalorder %s16379_s13, %s12621_s1  ;;  %p12625_p11 = scmp.lt.u32.totalorder %s12621_s1, %s16379_s13 }
  0x59   :  { %p12627_p12 = pnand %p12625_p11, %p12622_p10 }
  0x5b   :  { %12630 = shalt.err (!%p12627_p12)
}
  0x5c   :  { %s12631_s11 = scalar_lea.vmem %s142_s0, 64  ;;  %p12636_p0 = scmp.lt.s32.totalorder %s142_s0, %s142_s0 }
  0x5d   :  { %p12632_p13 = scmp.ne.s32.totalorder %s142_s0, %s12631_s11  ;;  %p12637_p1 = scmp.lt.s32.totalorder %s12631_s11, %s12631_s11 }
  0x5f   :  { %p12638_p2 = por %p12637_p1, %p12636_p0 }
  0x61   :  { %p12639_p3 = pnand %p12638_p2, %p12632_p13 }
  0x63   :  { %12642 = shalt.err (!%p12639_p3)
}
  0x64   :  { %144 = dma.hbm_to_vmem [thread:$0]  %s16379_s13, 64, %s142_s0, [#allocation18]  }
  0x65   :  { %s12643_s6 = scalar_lea.hbm %s16382_s16, 4096 }
  0x66   :  { %p12644_p4 = scmp.ne.s32.totalorder %s16382_s16, %s12643_s6  ;;  %p12647_p5 = scmp.lt.u32.totalorder %s12643_s6, %s16382_s16 }
  0x68   :  { %p12649_p6 = pnand %p12647_p5, %p12644_p4 }
  0x6a   :  { %12652 = shalt.err (!%p12649_p6)
}
  0x6b   :  { %s12653_s4 = scalar_lea.vmem %s163_s7, 4096  ;;  %p12658_p8 = scmp.lt.s32.totalorder %s163_s7, %s163_s7 }
  0x6c   :  { %p12654_p7 = scmp.ne.s32.totalorder %s163_s7, %s12653_s4  ;;  %p12659_p9 = scmp.lt.s32.totalorder %s12653_s4, %s12653_s4 }
  0x6e   :  { %p12660_p10 = por %p12659_p9, %p12658_p8 }
  0x70   :  { %p12661_p11 = pnand %p12660_p10, %p12654_p7 }
  0x72   :  { %12664 = shalt.err (!%p12661_p11)
}
  0x73   :  { %168 = dma.hbm_to_vmem [thread:$0]  %s16382_s16, 4096, %s163_s7, [#allocation21], %s12966_s30, %s12966_s30, %s12967_s3  }
  0x74   :  { %s12970_s28 = smov [#allocation23]   ;;  %s12971_s11 = smov [#allocation26]  }
  0x75   :  { %s187_s9 = sshll.u32 %s12970_s28, 4  ;;  %s208_s29 = sshll.u32 %s12971_s11, 4  ;;  %s188_s9 = int_to_ptr.vmem [resolvable:$true] %s187_s9  ;;  %s209_s29 = int_to_ptr.vmem [resolvable:$true] %s208_s29 }
  0x76   :  { %s12665_s26 = scalar_lea.hbm %s16384_s18, 64 }
  0x77   :  { %p12666_p12 = scmp.ne.s32.totalorder %s16384_s18, %s12665_s26  ;;  %p12669_p13 = scmp.lt.u32.totalorder %s12665_s26, %s16384_s18 }
  0x79   :  { %p12671_p0 = pnand %p12669_p13, %p12666_p12 }
  0x7b   :  { %12674 = shalt.err (!%p12671_p0)
}
  0x7c   :  { %s12675_s16 = scalar_lea.vmem %s188_s9, 64  ;;  %p12680_p2 = scmp.lt.s32.totalorder %s188_s9, %s188_s9 }
  0x7d   :  { %p12676_p1 = scmp.ne.s32.totalorder %s188_s9, %s12675_s16  ;;  %p12681_p3 = scmp.lt.s32.totalorder %s12675_s16, %s12675_s16 }
  0x7f   :  { %p12682_p4 = por %p12681_p3, %p12680_p2 }
  0x81   :  { %p12683_p5 = pnand %p12682_p4, %p12676_p1 }
  0x83   :  { %12686 = shalt.err (!%p12683_p5)
}
  0x84   :  { %190 = dma.hbm_to_vmem [thread:$0]  %s16384_s18, 64, %s188_s9, [#allocation24]  }
  0x85   :  { %s16676_s0 = sld [smem:[#allocation119_spill]]  ;;  %s12687_s2 = scalar_lea.hbm %s16386_s20, 4096 }
  0x86   :  { %p12688_p6 = scmp.ne.s32.totalorder %s16386_s20, %s12687_s2  ;;  %p12691_p7 = scmp.lt.u32.totalorder %s12687_s2, %s16386_s20 }
  0x88   :  { %p12693_p8 = pnand %p12691_p7, %p12688_p6 }
  0x8b   :  { %s47_s28 = sshll.u32 %s16676_s0, 4  ;;  %s48_s28 = int_to_ptr.vmem [resolvable:$true] %s47_s28 }
  0x8c   :  { %12696 = shalt.err (!%p12693_p8)
}
  0x8d   :  { %s12697_s18 = scalar_lea.vmem %s209_s29, 4096  ;;  %p12702_p10 = scmp.lt.s32.totalorder %s209_s29, %s209_s29 }
  0x8e   :  { %p12698_p9 = scmp.ne.s32.totalorder %s209_s29, %s12697_s18  ;;  %p12703_p11 = scmp.lt.s32.totalorder %s12697_s18, %s12697_s18 }
  0x90   :  { %p12704_p12 = por %p12703_p11, %p12702_p10 }
  0x92   :  { %p12705_p13 = pnand %p12704_p12, %p12698_p9 }
  0x94   :  { %12708 = shalt.err (!%p12705_p13)
}
  0x95   :  { %214 = dma.hbm_to_vmem [thread:$0]  %s16386_s20, 4096, %s209_s29, [#allocation27], %s12966_s30, %s12966_s30, %s12967_s3  }
  0x96   :  { %s12709_s16 = scalar_lea.vmem %s48_s28, 16  ;;  %p12714_p1 = scmp.lt.s32.totalorder %s48_s28, %s48_s28 }
  0x97   :  { %p12710_p0 = scmp.ne.s32.totalorder %s48_s28, %s12709_s16  ;;  %p12715_p2 = scmp.lt.s32.totalorder %s12709_s16, %s12709_s16 }
  0x99   :  { %p12716_p3 = por %p12715_p2, %p12714_p1 }
  0x9b   :  { %p12717_p4 = pnand %p12716_p3, %p12710_p0 }
  0x9d   :  { %12720 = shalt.err (!%p12717_p4)
}
  0x9e   :  { %s12972_s7 = smov [#allocation4]   ;;  %s12973_s1 = smov [#allocation7]  }
  0x9f   :  { %50 = dma.vmem_to_smem %s48_s28, 16, %s12972_s7, [#allocation6]  }
  0xa0   :  { %s59_s4 = sshll.u32 %s12973_s1, 4  ;;  %s12974_s13 = smov [#allocation10]   ;;  %s60_s4 = int_to_ptr.vmem [resolvable:$true] %s59_s4 }
  0xa1   :  { %s83_s0 = sshll.u32 %s12974_s13, 4  ;;  %s16677_s2 = sld [smem:[#allocation121_spill]]  ;;  %s84_s0 = int_to_ptr.vmem [resolvable:$true] %s83_s0 }
  0xa7   :  { %s12721_s20 = scalar_lea.hbm %s16677_s2, 16 }
  0xa8   :  { %p12722_p5 = scmp.ne.s32.totalorder %s16677_s2, %s12721_s20  ;;  %p12725_p6 = scmp.lt.u32.totalorder %s12721_s20, %s16677_s2 }
  0xaa   :  { %p12727_p7 = pnand %p12725_p6, %p12722_p5 }
  0xac   :  { %12730 = shalt.err (!%p12727_p7)
}
  0xad   :  { %s12731_s28 = scalar_lea.vmem %s60_s4, 16  ;;  %s12735_s8 = scalar_lea.vmem %s60_s4, 32 }
  0xae   :  { %p12732_p8 = scmp.ne.s32.totalorder %s60_s4, %s12731_s28  ;;  %p12736_p9 = scmp.lt.s32.totalorder %s60_s4, %s60_s4 }
  0xaf   :  { %p12737_p10 = scmp.lt.s32.totalorder %s12735_s8, %s12731_s28 }
  0xb1   :  { %p12738_p11 = por %p12737_p10, %p12736_p9 }
  0xb3   :  { %p12739_p12 = pnand %p12738_p11, %p12732_p8 }
  0xb5   :  { %12742 = shalt.err (!%p12739_p12)
}
  0xb6   :  { %62 = dma.hbm_to_vmem [thread:$0]  %s16677_s2, 16, %s60_s4, [#allocation5]  }
  0xb7   :  { %s16678_s7 = sld [smem:[#allocation125_spill]] }
  0xbd   :  { %s12743_s1 = scalar_lea.hbm %s16678_s7, 16 }
  0xbe   :  { %p12744_p13 = scmp.ne.s32.totalorder %s16678_s7, %s12743_s1  ;;  %p12747_p0 = scmp.lt.u32.totalorder %s12743_s1, %s16678_s7 }
  0xc0   :  { %p12749_p1 = pnand %p12747_p0, %p12744_p13 }
  0xc2   :  { %12752 = shalt.err (!%p12749_p1)
}
  0xc3   :  { %s12753_s29 = scalar_lea.vmem %s84_s0, 16  ;;  %s12757_s26 = scalar_lea.vmem %s84_s0, 32 }
  0xc4   :  { %p12754_p2 = scmp.ne.s32.totalorder %s84_s0, %s12753_s29  ;;  %p12758_p3 = scmp.lt.s32.totalorder %s84_s0, %s84_s0 }
  0xc5   :  { %p12759_p4 = scmp.lt.s32.totalorder %s12757_s26, %s12753_s29 }
  0xc7   :  { %p12760_p5 = por %p12759_p4, %p12758_p3 }
  0xc9   :  { %p12761_p6 = pnand %p12760_p5, %p12754_p2 }
  0xcb   :  { %12764 = shalt.err (!%p12761_p6)
}
  0xcc   :  { %86 = dma.hbm_to_vmem [thread:$0]  %s16678_s7, 16, %s84_s0, [#allocation9]  }
  0xcd   :  { %s12975_s6 = smov [#allocation13]   ;;  %s12976_s28 = smov [#allocation16]  }
  0xce   :  { %s107_s25 = sshll.u32 %s12975_s6, 4  ;;  %s128_s8 = sshll.u32 %s12976_s28, 4  ;;  %s108_s25 = int_to_ptr.vmem [resolvable:$true] %s107_s25  ;;  %s13241_s8 = int_to_ptr.vmem [resolvable:$true] %s128_s8 }
  0xcf   :  { %s12765_s27 = scalar_lea.hbm %s16376_s10, 64 }
  0xd0   :  { %p12766_p7 = scmp.ne.s32.totalorder %s16376_s10, %s12765_s27  ;;  %p12769_p8 = scmp.lt.u32.totalorder %s12765_s27, %s16376_s10 }
  0xd2   :  { %p12771_p9 = pnand %p12769_p8, %p12766_p7 }
  0xd4   :  { %12774 = shalt.err (!%p12771_p9)
}
  0xd5   :  { %s12775_s0 = scalar_lea.vmem %s108_s25, 64  ;;  %p12780_p11 = scmp.lt.s32.totalorder %s108_s25, %s108_s25 }
  0xd6   :  { %p12776_p10 = scmp.ne.s32.totalorder %s108_s25, %s12775_s0  ;;  %p12781_p12 = scmp.lt.s32.totalorder %s12775_s0, %s12775_s0 }
  0xd8   :  { %p12782_p13 = por %p12781_p12, %p12780_p11 }
  0xda   :  { %p12783_p0 = pnand %p12782_p13, %p12776_p10 }
  0xdc   :  { %12786 = shalt.err (!%p12783_p0)
}
  0xdd   :  { %110 = dma.hbm_to_vmem [thread:$0]  %s16376_s10, 64, %s108_s25, [#allocation12]  }
  0xde   :  { %s12787_s26 = scalar_lea.hbm %s16378_s12, 4096 }
  0xdf   :  { %p12788_p1 = scmp.ne.s32.totalorder %s16378_s12, %s12787_s26  ;;  %p12791_p2 = scmp.lt.u32.totalorder %s12787_s26, %s16378_s12 }
  0xe1   :  { %p12793_p3 = pnand %p12791_p2, %p12788_p1 }
  0xe3   :  { %12796 = shalt.err (!%p12793_p3)
}
  0xe4   :  { %s12797_s18 = scalar_lea.vmem %s13241_s8, 4096  ;;  %p12802_p5 = scmp.lt.s32.totalorder %s13241_s8, %s13241_s8 }
  0xe5   :  { %p12798_p4 = scmp.ne.s32.totalorder %s13241_s8, %s12797_s18  ;;  %p12803_p6 = scmp.lt.s32.totalorder %s12797_s18, %s12797_s18 }
  0xe7   :  { %p12804_p7 = por %p12803_p6, %p12802_p5 }
  0xe9   :  { %p12805_p8 = pnand %p12804_p7, %p12798_p4 }
  0xeb   :  { %12808 = shalt.err (!%p12805_p8)
}
  0xec   :  { %134 = dma.hbm_to_vmem [thread:$0]  %s16378_s12, 4096, %s13241_s8, [#allocation15], %s12966_s30, %s12966_s30, %s12967_s3  }
  0xed   :  { %s12977_s9 = smov [#allocation19]   ;;  %s12978_s16 = smov [#allocation22]  }
  0xee   :  { %s153_s27 = sshll.u32 %s12977_s9, 4  ;;  %s174_s1 = sshll.u32 %s12978_s16, 4  ;;  %s154_s27 = int_to_ptr.vmem [resolvable:$true] %s153_s27  ;;  %s13275_s1 = int_to_ptr.vmem [resolvable:$true] %s174_s1 }
  0xef   :  { %s12809_s0 = scalar_lea.hbm %s16381_s15, 16 }
  0xf0   :  { %p12810_p9 = scmp.ne.s32.totalorder %s16381_s15, %s12809_s0  ;;  %p12813_p10 = scmp.lt.u32.totalorder %s12809_s0, %s16381_s15 }
  0xf2   :  { %p12815_p11 = pnand %p12813_p10, %p12810_p9 }
  0xf4   :  { %12818 = shalt.err (!%p12815_p11)
}
  0xf5   :  { %s12819_s12 = scalar_lea.vmem %s154_s27, 16  ;;  %s12823_s8 = scalar_lea.vmem %s154_s27, 32 }
  0xf6   :  { %p12820_p12 = scmp.ne.s32.totalorder %s154_s27, %s12819_s12  ;;  %p12824_p13 = scmp.lt.s32.totalorder %s154_s27, %s154_s27 }
  0xf7   :  { %p12825_p0 = scmp.lt.s32.totalorder %s12823_s8, %s12819_s12 }
  0xf9   :  { %p12826_p1 = por %p12825_p0, %p12824_p13 }
  0xfb   :  { %p12827_p2 = pnand %p12826_p1, %p12820_p12 }
  0xfd   :  { %12830 = shalt.err (!%p12827_p2)
}
  0xfe   :  { %156 = dma.hbm_to_vmem [thread:$0]  %s16381_s15, 16, %s154_s27, [#allocation18]  }
  0xff   :  { %s12831_s28 = scalar_lea.hbm %s16383_s17, 4096 }
 0x100   :  { %p12832_p3 = scmp.ne.s32.totalorder %s16383_s17, %s12831_s28  ;;  %p12835_p4 = scmp.lt.u32.totalorder %s12831_s28, %s16383_s17 }
 0x102   :  { %p12837_p5 = pnand %p12835_p4, %p12832_p3 }
 0x104   :  { %12840 = shalt.err (!%p12837_p5)
}
 0x105   :  { %s12841_s16 = scalar_lea.vmem %s13275_s1, 4096  ;;  %p12846_p7 = scmp.lt.s32.totalorder %s13275_s1, %s13275_s1 }
 0x106   :  { %p12842_p6 = scmp.ne.s32.totalorder %s13275_s1, %s12841_s16  ;;  %p12847_p8 = scmp.lt.s32.totalorder %s12841_s16, %s12841_s16 }
 0x108   :  { %p12848_p9 = por %p12847_p8, %p12846_p7 }
 0x10a   :  { %p12849_p10 = pnand %p12848_p9, %p12842_p6 }
 0x10c   :  { %12852 = shalt.err (!%p12849_p10)
}
 0x10d   :  { %180 = dma.hbm_to_vmem [thread:$0]  %s16383_s17, 4096, %s13275_s1, [#allocation21], %s12966_s30, %s12966_s30, %s12967_s3  }
 0x10e   :  { %s12979_s13 = smov [#allocation25]   ;;  %s12980_s0 = smov [#allocation28]  }
 0x10f   :  { %s196_s11 = sshll.u32 %s12979_s13, 4  ;;  %s221_s7 = sshll.u32 %s12980_s0, 4  ;;  %s197_s11 = int_to_ptr.vmem [resolvable:$true] %s196_s11  ;;  %s222_s7 = int_to_ptr.vmem [resolvable:$true] %s221_s7 }
 0x110   :  { %s12853_s29 = scalar_lea.hbm %s16385_s19, 4096 }
 0x111   :  { %p12854_p11 = scmp.ne.s32.totalorder %s16385_s19, %s12853_s29  ;;  %p12857_p12 = scmp.lt.u32.totalorder %s12853_s29, %s16385_s19 }
 0x113   :  { %p12859_p13 = pnand %p12857_p12, %p12854_p11 }
 0x115   :  { %12862 = shalt.err (!%p12859_p13)
}
 0x116   :  { %s12863_s17 = scalar_lea.vmem %s197_s11, 4096  ;;  %p12868_p1 = scmp.lt.s32.totalorder %s197_s11, %s197_s11 }
 0x117   :  { %p12864_p0 = scmp.ne.s32.totalorder %s197_s11, %s12863_s17  ;;  %p12869_p2 = scmp.lt.s32.totalorder %s12863_s17, %s12863_s17 }
 0x119   :  { %p12870_p3 = por %p12869_p2, %p12868_p1 }
 0x11b   :  { %p12871_p4 = pnand %p12870_p3, %p12864_p0 }
 0x11d   :  { %12874 = shalt.err (!%p12871_p4)
}
 0x11e   :  { %202 = dma.hbm_to_vmem [thread:$0]  %s16385_s19, 4096, %s197_s11, [#allocation24], %s12966_s30, %s12966_s30, %s12967_s3  }
 0x11f   :  { %s12875_s18 = scalar_lea.hbm %s16387_s21, 64 }
 0x120   :  { %p12876_p5 = scmp.ne.s32.totalorder %s16387_s21, %s12875_s18  ;;  %p12879_p6 = scmp.lt.u32.totalorder %s12875_s18, %s16387_s21 }
 0x122   :  { %p12881_p7 = pnand %p12879_p6, %p12876_p5 }
 0x124   :  { %12884 = shalt.err (!%p12881_p7)
}
 0x125   :  { %s12885_s15 = scalar_lea.vmem %s222_s7, 64  ;;  %p12890_p9 = scmp.lt.s32.totalorder %s222_s7, %s222_s7 }
 0x126   :  { %p12886_p8 = scmp.ne.s32.totalorder %s222_s7, %s12885_s15  ;;  %p12891_p10 = scmp.lt.s32.totalorder %s12885_s15, %s12885_s15 }
 0x128   :  { %p12892_p11 = por %p12891_p10, %p12890_p9 }
 0x12a   :  { %p12893_p12 = pnand %p12892_p11, %p12886_p8 }
 0x12c   :  { %12896 = shalt.err (!%p12893_p12)
}
 0x12d   :  { %224 = dma.hbm_to_vmem [thread:$0]  %s16387_s21, 64, %s222_s7, [#allocation27]  }
 0x12e   :  { %s12981_s3 = smov [#allocation29]   ;;  %s12897_s0 = scalar_lea.hbm %s16389_s23, 16 }
 0x12f   :  { %s233_s27 = sshll.u32 %s12981_s3, 4  ;;  %p12898_p13 = scmp.ne.s32.totalorder %s16389_s23, %s12897_s0  ;;  %s234_s27 = int_to_ptr.vmem [resolvable:$true] %s233_s27 }
 0x130   :  { %p12901_p0 = scmp.lt.u32.totalorder %s12897_s0, %s16389_s23 }
 0x132   :  { %p12903_p1 = pnand %p12901_p0, %p12898_p13 }
 0x134   :  { %12906 = shalt.err (!%p12903_p1)
}
 0x135   :  { %s12907_s8 = scalar_lea.vmem %s234_s27, 16  ;;  %s12911_s21 = scalar_lea.vmem %s234_s27, 32 }
 0x136   :  { %p12908_p2 = scmp.ne.s32.totalorder %s234_s27, %s12907_s8  ;;  %p12912_p3 = scmp.lt.s32.totalorder %s234_s27, %s234_s27 }
 0x137   :  { %p12913_p4 = scmp.lt.s32.totalorder %s12911_s21, %s12907_s8 }
 0x139   :  { %p12914_p5 = por %p12913_p4, %p12912_p3 }
 0x13b   :  { %p12915_p6 = pnand %p12914_p5, %p12908_p2 }
 0x13d   :  { %12918 = shalt.err (!%p12915_p6)
}
 0x13e   :  { %236 = dma.hbm_to_vmem [thread:$0]  %s16389_s23, 16, %s234_s27, [#allocation30]  }
 0x13f   :  { %12931 = dma.done.wait [#allocation6], 16  }
 0x140   :  { %12932 = vsyncadd [#allocation6], 4294967280 }
 0x141   :  { %12933 = dma.done.wait [#allocation5], 16  }
 0x142   :  { %12934 = vsyncadd [#allocation5], 4294967280 }
 0x143   :  { %12935 = dma.done.wait [#allocation9], 32  }
 0x144   :  { %12936 = vsyncadd [#allocation9], 4294967264 }
 0x145   :  { %12937 = dma.done.wait [#allocation12], 80  }
 0x146   :  { %12938 = vsyncadd [#allocation12], 4294967216 }
 0x147   :  { %12939 = dma.done.wait [#allocation15], 8192  }
 0x148   :  { %12940 = vsyncadd [#allocation15], 4294959104 }
 0x149   :  { %12941 = dma.done.wait [#allocation18], 80  }
 0x14a   :  { %12942 = vsyncadd [#allocation18], 4294967216 }
 0x14b   :  { %12943 = dma.done.wait [#allocation21], 8192  }
 0x14c   :  { %12944 = vsyncadd [#allocation21], 4294959104 }
 0x14d   :  { %12945 = dma.done.wait [#allocation24], 4160  }
 0x14e   :  { %12946 = vsyncadd [#allocation24], 4294963136 }
 0x14f   :  { %12947 = dma.done.wait [#allocation27], 4160  }
 0x150   :  { %12948 = vsyncadd [#allocation27], 4294963136 }
 0x151   :  { %12949 = dma.done.wait [#allocation30], 16  }
 0x152   :  { %12950 = vsyncadd [#allocation30], 4294967280 }
 0x153   :  { %288 = sfence }
 0x154   :  { %s16679_s17 = sld [smem:[#allocation120_spill]]  ;;  %s16680_s26 = sld [smem:[#allocation123_spill]]  ;;  %vm12984_vm0 = vmmov 0  }
 0x155   :  { %s16681_s27 = sld [smem:[#allocation124_spill]]  ;;  %s16682_s0 = sld [smem:[#allocation127_spill]] }
 0x156   :  { %s16683_s2 = sld [smem:[#allocation128_spill]]  ;;  %s15861_s18 = sld [smem:[#allocation4]] }
 0x15a   :  { %v290_v0 = vld [vmem:[%s16679_s17] sm:$0xff]  ;;  %v292_v1 = vld [vmem:[%s16679_s17 + $0x10] sm:$0xff]  ;;  %v291_v2 = vld [vmem:[%s16679_s17 + $0x8] sm:$0xff] }
 0x15b   :  { %304 = vadd.xlane.f32.xlu0 %v290_v0  ;;  %308 = vadd.xlane.f32.xlu1 %v292_v1  ;;  %v293_v3 = vld [vmem:[%s16679_s17 + $0x18] sm:$0xff]  ;;  %v294_v4 = vld [vmem:[%s16679_s17 + $0x20] sm:$0xff]  ;;  %v295_v5 = vld [vmem:[%s16679_s17 + $0x28] sm:$0xff] }
 0x15c   :  { %v296_v6 = vld [vmem:[%s16679_s17 + $0x30] sm:$0xff]  ;;  %v297_v7 = vld [vmem:[%s16679_s17 + $0x38] sm:$0xff]  ;;  %v298_v8 = vld [vmem:[%s16679_s17 + $0x40] sm:$0xff]  ;;  %p5793_p7 = scmp.gt.s32.totalorder %s15861_s18, 0 }
 0x15d   :  { %v299_v9 = vld [vmem:[%s16679_s17 + $0x48] sm:$0xff]  ;;  %v300_v10 = vld [vmem:[%s16679_s17 + $0x50] sm:$0xff]  ;;  %v301_v11 = vld [vmem:[%s16679_s17 + $0x58] sm:$0xff]  ;;  %vm12986_vm1 = vmmov (!%p5793_p7), 0  }
 0x15e   :  { %v10875_v60 = vld [vmem:[%s16680_s26] sm:$0xff]   ;;  %v10876_v61 = vld [vmem:[%s16680_s26 + $0x8] sm:$0xff]   ;;  %v10877_v62 = vld [vmem:[%s16680_s26 + $0x10] sm:$0xff]  }
 0x15f   :  { %306 = vadd.xlane.f32.xlu0 %v291_v2  ;;  %310 = vadd.xlane.f32.xlu1 %v293_v3  ;;  %v10878_v63 = vld [vmem:[%s16680_s26 + $0x18] sm:$0xff]  }
 0x160   :  { %10675 = vmatprep.subr.bf16.mxu0 %v10875_v60 }
 0x161   :  { %10676 = vmatpush3.bf16.msra.mxu0 %v10875_v60 }
 0x162   :  { %10677 = vmatprep.subr.bf16.mxu0 %v10876_v61 }
 0x163   :  { %312 = vadd.xlane.f32.xlu0 %v294_v4  ;;  %314 = vadd.xlane.f32.xlu1 %v295_v5 }
 0x165   :  { %10678 = vmatpush3.bf16.msra.mxu0 %v10876_v61 }
 0x166   :  { %10679 = vmatprep.subr.bf16.mxu0 %v10877_v62 }
 0x167   :  { %316 = vadd.xlane.f32.xlu0 %v296_v6  ;;  %318 = vadd.xlane.f32.xlu1 %v297_v7 }
 0x169   :  { %10680 = vmatpush3.bf16.msra.mxu0 %v10877_v62 }
 0x16a   :  { %10681 = vmatprep.subr.bf16.mxu0 %v10878_v63 }
 0x16b   :  { %320 = vadd.xlane.f32.xlu0 %v298_v8  ;;  %322 = vadd.xlane.f32.xlu1 %v299_v9 }
 0x16d   :  { %10682 = vmatpush3.bf16.msra.mxu0 %v10878_v63 }
 0x16f   :  { %324 = vadd.xlane.f32.xlu0 %v300_v10  ;;  %326 = vadd.xlane.f32.xlu1 %v301_v11 }
 0x1e8   :  { %v305_v12 = vpop.xlane.xlu0 %304  ;;  %v309_v13 = vpop.xlane.xlu1 %308 }
 0x1e9   :  { %v329_v14 = vmul.f32 0.0078125, %v305_v12  ;;  %v331_v15 = vmul.f32 0.0078125, %v309_v13 }
 0x1eb   :  { %v13384_v16 = vsub.f32 %v290_v0, %v329_v14  ;;  %v13386_v17 = vsub.f32 %v292_v1, %v331_v15  ;;  %v10879_v0 = vld [vmem:[%s16680_s26 + $0x20] sm:$0xff]   ;;  %v10880_v1 = vld [vmem:[%s16680_s26 + $0x28] sm:$0xff]  }
 0x1ec   :  { %v307_v18 = vpop.xlane.xlu0 %306  ;;  %v311_v19 = vpop.xlane.xlu1 %310  ;;  %10683 = vmatprep.subr.bf16.mxu0 %v10879_v0 }
 0x1ed   :  { %v330_v20 = vmul.f32 0.0078125, %v307_v18  ;;  %v353_v21 = vmul.f32 %v13384_v16, %v13384_v16  ;;  %v332_v22 = vmul.f32 0.0078125, %v311_v19  ;;  %v355_v25 = vmul.f32 %v13386_v17, %v13386_v17  ;;  %10684 = vmatpush3.bf16.msra.mxu0 %v10879_v0 }
 0x1ee   :  { %10685 = vmatprep.subr.bf16.mxu0 %v10880_v1 }
 0x1ef   :  { %v13390_v23 = vsub.f32 %v291_v2, %v330_v20  ;;  %365 = vadd.xlane.f32.xlu0 %v353_v21  ;;  %v13392_v24 = vsub.f32 %v293_v3, %v332_v22  ;;  %v10881_v2 = vld [vmem:[%s16680_s26 + $0x30] sm:$0xff]   ;;  %v10882_v3 = vld [vmem:[%s16680_s26 + $0x38] sm:$0xff]  }
 0x1f0   :  { %v313_v26 = vpop.xlane.xlu0 %312  ;;  %v315_v27 = vpop.xlane.xlu1 %314 }
 0x1f1   :  { %v333_v28 = vmul.f32 0.0078125, %v313_v26  ;;  %v354_v29 = vmul.f32 %v13390_v23, %v13390_v23  ;;  %v334_v30 = vmul.f32 0.0078125, %v315_v27  ;;  %v356_v33 = vmul.f32 %v13392_v24, %v13392_v24  ;;  %10686 = vmatpush3.bf16.msra.mxu0 %v10880_v1 }
 0x1f2   :  { %10687 = vmatprep.subr.bf16.mxu0 %v10881_v2 }
 0x1f3   :  { %v13398_v31 = vsub.f32 %v294_v4, %v333_v28  ;;  %369 = vadd.xlane.f32.xlu0 %v355_v25  ;;  %367 = vadd.xlane.f32.xlu1 %v354_v29  ;;  %v13400_v32 = vsub.f32 %v295_v5, %v334_v30  ;;  %v13456_v30 = vld [vmem:[#allocation7] ss:$0 sm:$0xff] }
 0x1f4   :  { %v317_v34 = vpop.xlane.xlu0 %316  ;;  %v319_v35 = vpop.xlane.xlu1 %318 }
 0x1f5   :  { %v335_v36 = vmul.f32 0.0078125, %v317_v34  ;;  %v357_v37 = vmul.f32 %v13398_v31, %v13398_v31  ;;  %v336_v38 = vmul.f32 0.0078125, %v319_v35  ;;  %v358_v41 = vmul.f32 %v13400_v32, %v13400_v32  ;;  %10688 = vmatpush3.bf16.msra.mxu0 %v10881_v2 }
 0x1f6   :  { %10689 = vmatprep.subr.bf16.mxu0 %v10882_v3 }
 0x1f7   :  { %v13406_v39 = vsub.f32 %v296_v6, %v335_v36  ;;  %371 = vadd.xlane.f32.xlu1 %v356_v33  ;;  %373 = vadd.xlane.f32.xlu0 %v357_v37  ;;  %v13408_v40 = vsub.f32 %v297_v7, %v336_v38  ;;  %v13459_v38 = vld [vmem:[#allocation8] ss:$0 sm:$0xff] }
 0x1f8   :  { %v321_v42 = vpop.xlane.xlu0 %320  ;;  %v323_v43 = vpop.xlane.xlu1 %322 }
 0x1f9   :  { %v337_v44 = vmul.f32 0.0078125, %v321_v42  ;;  %v359_v45 = vmul.f32 %v13406_v39, %v13406_v39  ;;  %v338_v46 = vmul.f32 0.0078125, %v323_v43  ;;  %v360_v49 = vmul.f32 %v13408_v40, %v13408_v40  ;;  %10690 = vmatpush3.bf16.msra.mxu0 %v10882_v3 }
 0x1fb   :  { %v13414_v47 = vsub.f32 %v298_v8, %v337_v44  ;;  %375 = vadd.xlane.f32.xlu1 %v358_v41  ;;  %377 = vadd.xlane.f32.xlu0 %v359_v45  ;;  %v13416_v48 = vsub.f32 %v299_v9, %v338_v46 }
 0x1fc   :  { %v325_v50 = vpop.xlane.xlu0 %324  ;;  %v327_v51 = vpop.xlane.xlu1 %326 }
 0x1fd   :  { %v339_v52 = vmul.f32 0.0078125, %v325_v50  ;;  %v361_v53 = vmul.f32 %v13414_v47, %v13414_v47  ;;  %v340_v54 = vmul.f32 0.0078125, %v327_v51  ;;  %v362_v57 = vmul.f32 %v13416_v48, %v13416_v48 }
 0x1ff   :  { %v13422_v55 = vsub.f32 %v300_v10, %v339_v52  ;;  %379 = vadd.xlane.f32.xlu1 %v360_v49  ;;  %381 = vadd.xlane.f32.xlu0 %v361_v53  ;;  %v13424_v56 = vsub.f32 %v301_v11, %v340_v54 }
 0x201   :  { %v363_v58 = vmul.f32 %v13422_v55, %v13422_v55  ;;  %v364_v59 = vmul.f32 %v13424_v56, %v13424_v56 }
 0x203   :  { %383 = vadd.xlane.f32.xlu1 %v362_v57  ;;  %385 = vadd.xlane.f32.xlu0 %v363_v58 }
 0x207   :  { %387 = vadd.xlane.f32.xlu1 %v364_v59 }
 0x27c   :  { %v366_v4 = vpop.xlane.xlu0 %365 }
 0x27d   :  { %v389_v5 = vmul.f32 0.0078125, %v366_v4 }
 0x27f   :  { %v401_v6 = vadd.f32 1e-05, %v389_v5 }
 0x280   :  { %v368_v7 = vpop.xlane.xlu1 %367  ;;  %v370_v8 = vpop.xlane.xlu0 %369 }
 0x281   :  { %11283 = vrsqrt.f32 %v401_v6  ;;  %v390_v9 = vmul.f32 0.0078125, %v368_v7  ;;  %v391_v10 = vmul.f32 0.0078125, %v370_v8 }
 0x283   :  { %v402_v11 = vadd.f32 1e-05, %v390_v9  ;;  %v403_v12 = vadd.f32 1e-05, %v391_v10 }
 0x284   :  { %v372_v13 = vpop.xlane.xlu1 %371  ;;  %v374_v14 = vpop.xlane.xlu0 %373 }
 0x285   :  { %11285 = vrsqrt.f32 %v402_v11  ;;  %v392_v15 = vmul.f32 0.0078125, %v372_v13  ;;  %v393_v18 = vmul.f32 0.0078125, %v374_v14 }
 0x286   :  { %11287 = vrsqrt.f32 %v403_v12 }
 0x287   :  { %v404_v19 = vadd.f32 1e-05, %v392_v15  ;;  %v405_v20 = vadd.f32 1e-05, %v393_v18 }
 0x288   :  { %v376_v21 = vpop.xlane.xlu1 %375  ;;  %v378_v22 = vpop.xlane.xlu0 %377 }
 0x289   :  { %11289 = vrsqrt.f32 %v404_v19  ;;  %v394_v25 = vmul.f32 0.0078125, %v376_v21  ;;  %v395_v26 = vmul.f32 0.0078125, %v378_v22 }
 0x28a   :  { %11291 = vrsqrt.f32 %v405_v20 }
 0x28b   :  { %v11284_v27 = vpop.eup %11283  ;;  %v406_v28 = vadd.f32 1e-05, %v394_v25  ;;  %v407_v29 = vadd.f32 1e-05, %v395_v26 }
 0x28c   :  { %v380_v33 = vpop.xlane.xlu1 %379  ;;  %v382_v34 = vpop.xlane.xlu0 %381  ;;  %v425_v35 = vmul.f32 %v11284_v27, %v13384_v16 }
 0x28d   :  { %11293 = vrsqrt.f32 %v406_v28  ;;  %v396_v36 = vmul.f32 0.0078125, %v380_v33  ;;  %v397_v37 = vmul.f32 0.0078125, %v382_v34 }
 0x28e   :  { %11295 = vrsqrt.f32 %v407_v29  ;;  %v443_v41 = vmul.f32 %v13456_v30, %v425_v35 }
 0x28f   :  { %v11286_v42 = vpop.eup %11285  ;;  %v408_v43 = vadd.f32 1e-05, %v396_v36  ;;  %v409_v44 = vadd.f32 1e-05, %v397_v37 }
 0x290   :  { %v11288_v45 = vpop.eup %11287  ;;  %v384_v46 = vpop.xlane.xlu1 %383  ;;  %v426_v50 = vmul.f32 %v11286_v42, %v13390_v23  ;;  %v13464_v51 = vadd.f32 %v13459_v38, %v443_v41 }
 0x291   :  { %v386_v49 = vpop.xlane.xlu0 %385  ;;  %11297 = vrsqrt.f32 %v408_v43  ;;  %v398_v16 = vmul.f32 0.0078125, %v384_v46  ;;  %v427_v53 = vmul.f32 %v11288_v45, %v13386_v17 }
 0x292   :  { %v399_v52 = vmul.f32 0.0078125, %v386_v49  ;;  %11299 = vrsqrt.f32 %v409_v44  ;;  %v444_v54 = vmul.f32 %v13456_v30, %v426_v50  ;;  %v9814_v57 = vmul.f32 -1.442695, %v13464_v51 }
 0x293   :  { %v11290_v58 = vpop.eup %11289  ;;  %v410_v59 = vadd.f32 1e-05, %v398_v16  ;;  %v445_v61 = vmul.f32 %v13456_v30, %v427_v53 }
 0x294   :  { %v411_v60 = vadd.f32 1e-05, %v399_v52  ;;  %v11292_v62 = vpop.eup %11291  ;;  %v388_v23 = vpop.xlane.xlu1 %387  ;;  %v13471_v63 = vadd.f32 %v13459_v38, %v444_v54  ;;  %11301 = vpow2.f32 %v9814_v57  ;;  %v428_v0 = vmul.f32 %v11290_v58, %v13392_v24 }
 0x295   :  { %11303 = vrsqrt.f32 %v410_v59  ;;  %v400_v17 = vmul.f32 0.0078125, %v388_v23  ;;  %v13475_v1 = vadd.f32 %v13459_v38, %v445_v61  ;;  %v429_v2 = vmul.f32 %v11292_v62, %v13398_v31 }
 0x296   :  { %11305 = vrsqrt.f32 %v411_v60  ;;  %v9815_v3 = vmul.f32 -1.442695, %v13471_v63  ;;  %v446_v4 = vmul.f32 %v13456_v30, %v428_v0 }
 0x297   :  { %v11294_v5 = vpop.eup %11293  ;;  %v412_v6 = vadd.f32 1e-05, %v400_v17  ;;  %v9816_v7 = vmul.f32 -1.442695, %v13475_v1  ;;  %v447_v8 = vmul.f32 %v13456_v30, %v429_v2 }
 0x298   :  { %v11296_v9 = vpop.eup %11295  ;;  %11307 = vpow2.f32 %v9815_v3  ;;  %v13483_v24 = vadd.f32 %v13459_v38, %v446_v4  ;;  %v430_v10 = vmul.f32 %v11294_v5, %v13400_v32 }
 0x299   :  { %11309 = vrsqrt.f32 %v412_v6  ;;  %v13487_v31 = vadd.f32 %v13459_v38, %v447_v8  ;;  %v431_v11 = vmul.f32 %v11296_v9, %v13406_v39 }
 0x29a   :  { %11311 = vpow2.f32 %v9816_v7  ;;  %v9817_v12 = vmul.f32 -1.442695, %v13483_v24  ;;  %v448_v13 = vmul.f32 %v13456_v30, %v430_v10 }
 0x29b   :  { %v11298_v14 = vpop.eup %11297  ;;  %v9818_v15 = vmul.f32 -1.442695, %v13487_v31  ;;  %v449_v18 = vmul.f32 %v13456_v30, %v431_v11 }
 0x29c   :  { %v11300_v19 = vpop.eup %11299  ;;  %11313 = vpow2.f32 %v9817_v12  ;;  %v13495_v32 = vadd.f32 %v13459_v38, %v448_v13  ;;  %v432_v20 = vmul.f32 %v11298_v14, %v13408_v40 }
 0x29d   :  { %11315 = vpow2.f32 %v9818_v15  ;;  %v13499_v39 = vadd.f32 %v13459_v38, %v449_v18  ;;  %v433_v21 = vmul.f32 %v11300_v19, %v13414_v47 }
 0x29e   :  { %v11302_v22 = vpop.eup %11301  ;;  %v9819_v25 = vmul.f32 -1.442695, %v13495_v32  ;;  %v450_v26 = vmul.f32 %v13456_v30, %v432_v20 }
 0x29f   :  { %v11304_v27 = vpop.eup %11303  ;;  %v509_v28 = vadd.f32 1.0, %v11302_v22  ;;  %v9820_v29 = vmul.f32 -1.442695, %v13499_v39  ;;  %v451_v33 = vmul.f32 %v13456_v30, %v433_v21 }
 0x2a0   :  { %v11306_v34 = vpop.eup %11305  ;;  %11317 = vpow2.f32 %v9819_v25  ;;  %v13507_v40 = vadd.f32 %v13459_v38, %v450_v26  ;;  %v434_v35 = vmul.f32 %v11304_v27, %v13416_v48 }
 0x2a1   :  { %v13511_v47 = vadd.f32 %v13459_v38, %v451_v33  ;;  %v435_v36 = vmul.f32 %v11306_v34, %v13422_v55  ;;  %11319 = vpow2.f32 %v9820_v29 }
 0x2a2   :  { %v11308_v37 = vpop.eup %11307  ;;  %v9821_v41 = vmul.f32 -1.442695, %v13507_v40  ;;  %v452_v42 = vmul.f32 %v13456_v30, %v434_v35  ;;  %11321 = vrcp.f32 %v509_v28 }
 0x2a3   :  { %v11310_v43 = vpop.eup %11309  ;;  %v510_v44 = vadd.f32 1.0, %v11308_v37  ;;  %v9822_v45 = vmul.f32 -1.442695, %v13511_v47  ;;  %v453_v46 = vmul.f32 %v13456_v30, %v435_v36 }
 0x2a4   :  { %v11312_v49 = vpop.eup %11311  ;;  %11323 = vpow2.f32 %v9821_v41  ;;  %v13519_v48 = vadd.f32 %v13459_v38, %v452_v42  ;;  %v436_v55 = vmul.f32 %v11310_v43, %v13424_v56 }
 0x2a5   :  { %11325 = vrcp.f32 %v510_v44  ;;  %v511_v50 = vadd.f32 1.0, %v11312_v49  ;;  %v13523_v16 = vadd.f32 %v13459_v38, %v453_v46 }
 0x2a6   :  { %v11314_v52 = vpop.eup %11313  ;;  %11327 = vpow2.f32 %v9822_v45  ;;  %v9823_v53 = vmul.f32 -1.442695, %v13519_v48  ;;  %v454_v54 = vmul.f32 %v13456_v30, %v436_v55 }
 0x2a7   :  { %v11316_v57 = vpop.eup %11315  ;;  %v512_v58 = vadd.f32 1.0, %v11314_v52  ;;  %11329 = vrcp.f32 %v511_v50  ;;  %v9824_v59 = vmul.f32 -1.442695, %v13523_v16 }
 0x2a8   :  { %v513_v60 = vadd.f32 1.0, %v11316_v57  ;;  %11331 = vpow2.f32 %v9823_v53  ;;  %v472_v56 = vadd.f32 %v13459_v38, %v454_v54 }
 0x2a9   :  { %11333 = vrcp.f32 %v512_v58 }
 0x2aa   :  { %v11318_v61 = vpop.eup %11317  ;;  %11335 = vrcp.f32 %v513_v60  ;;  %v9825_v62 = vmul.f32 -1.442695, %v472_v56 }
 0x2ab   :  { %v514_v23 = vadd.f32 1.0, %v11318_v61  ;;  %11337 = vpow2.f32 %v9824_v59  ;;  %v11320_v0 = vpop.eup %11319 }
 0x2ac   :  { %11339 = vpow2.f32 %v9825_v62  ;;  %v11322_v17 = vpop.eup %11321  ;;  %v515_v30 = vadd.f32 1.0, %v11320_v0 }
 0x2ad   :  { %11341 = vrcp.f32 %v514_v23  ;;  %v545_v6 = vmul.f32 %v11322_v17, %v13464_v51 }
 0x2ae   :  { %v11324_v2 = vpop.eup %11323  ;;  %11343 = vrcp.f32 %v515_v30 }
 0x2af   :  { %v11326_v3 = vpop.eup %11325  ;;  %v516_v4 = vadd.f32 1.0, %v11324_v2  ;;  %v10883_v2 = vld [vmem:[%s16682_s0 + $0x4] ss:$16 sps:$4 sm:$0xff]  }
 0x2b0   :  { %v11328_v5 = vpop.eup %11327  ;;  %v546_v38 = vmul.f32 %v11326_v3, %v13471_v63  ;;  %v10885_v3 = vld [vmem:[%s16682_s0] ss:$16 sps:$4 sm:$0xff]   ;;  %1103 = vmatprep.subr.bf16.mxu1 %v10883_v2  ;;  %v10907_v2 = vld [vmem:[%s16682_s0 + $0x84] ss:$16 sps:$4 sm:$0xff]  }
 0x2b1   :  { %v11330_v7 = vpop.eup %11329  ;;  %11345 = vrcp.f32 %v516_v4  ;;  %v517_v8 = vadd.f32 1.0, %v11328_v5  ;;  %v10886_v4 = vld [vmem:[%s16682_s0 + $0x8] ss:$16 sps:$4 sm:$0xff]   ;;  %v10888_v5 = vld [vmem:[%s16682_s0 + $0xc] ss:$16 sps:$4 sm:$0xff]   ;;  %1104 = vmatpush1.bf16.msra.mxu1 %v10885_v3 }
 0x2b2   :  { %v11332_v9 = vpop.eup %11331  ;;  %v573_v10 = vpack.c.bf16 %v546_v38, %v545_v6  ;;  %v547_v14 = vmul.f32 %v11330_v7, %v13475_v1  ;;  %v10889_v6 = vld [vmem:[%s16682_s0 + $0x24] ss:$16 sps:$4 sm:$0xff]   ;;  %v10894_v38 = vld [vmem:[%s16682_s0 + $0x2c] ss:$16 sps:$4 sm:$0xff]   ;;  %1176 = vmatprep.subr.bf16.mxu0 %v10888_v5  ;;  %v10891_v7 = vld [vmem:[%s16682_s0 + $0x20] ss:$16 sps:$4 sm:$0xff]  }
 0x2b3   :  { %v11334_v11 = vpop.eup %11333  ;;  %v518_v12 = vadd.f32 1.0, %v11332_v9  ;;  %11347 = vrcp.f32 %v517_v8  ;;  %1105 = vmatprep.subr.bf16.mxu1 %v10889_v6  ;;  %v10892_v8 = vld [vmem:[%s16682_s0 + $0x28] ss:$16 sps:$4 sm:$0xff]   ;;  %v10909_v3 = vld [vmem:[%s16682_s0 + $0x80] ss:$16 sps:$4 sm:$0xff]  }
 0x2b4   :  { %v11336_v13 = vpop.eup %11335  ;;  %10691 = vmatprep.mubr.bf16.mxu0 %v573_v10  ;;  %v548_v15 = vmul.f32 %v11334_v11, %v13483_v24  ;;  %v10910_v5 = vld [vmem:[%s16682_s0 + $0x88] ss:$16 sps:$4 sm:$0xff]   ;;  %v10913_v6 = vld [vmem:[%s16682_s0 + $0xa4] ss:$16 sps:$4 sm:$0xff]  }
 0x2b5   :  { %v11338_v18 = vpop.eup %11337  ;;  %11349 = vrcp.f32 %v518_v12  ;;  %v549_v22 = vmul.f32 %v11336_v13, %v13487_v31  ;;  %1106 = vmatpush1.bf16.msra.mxu1 %v10891_v7  ;;  %v10918_v7 = vld [vmem:[%s16682_s0 + $0xac] ss:$16 sps:$4 sm:$0xff]  }
 0x2b6   :  { %v11340_v19 = vpop.eup %11339  ;;  %v574_v51 = vpack.c.bf16 %v548_v15, %v547_v14  ;;  %v519_v20 = vadd.f32 1.0, %v11338_v18 }
 0x2b7   :  { %v11342_v63 = vpop.eup %11341  ;;  %v520_v21 = vadd.f32 1.0, %v11340_v19 }
 0x2b8   :  { %10692 = vmatmul.mubr.bf16.vlgmr.msra.gmra.mrb[0].mxu0 %v574_v51  ;;  %v550_v25 = vmul.f32 %v11342_v63, %v13495_v32  ;;  %11351 = vrcp.f32 %v519_v20  ;;  %v11344_v26 = vpop.eup %11343 }
 0x2b9   :  { %11353 = vrcp.f32 %v520_v21  ;;  %v551_v1 = vmul.f32 %v11344_v26, %v13499_v39  ;;  %v9826_v39 = vld [vmem:[%s16681_s27] ss:$0 sm:$0xff]  ;;  %1177 = vmatpush1.bf16.msra.mxu0 %v10886_v4  ;;  %v10912_v4 = vld [vmem:[%s16682_s0 + $0x8c] ss:$16 sps:$4 sm:$0xff]  }
 0x2ba   :  { %v575_v27 = vpack.c.bf16 %v550_v25, %v549_v22  ;;  %1178 = vmatprep.subr.bf16.mxu0 %v10894_v38  ;;  %v10915_v38 = vld [vmem:[%s16682_s0 + $0xa0] ss:$16 sps:$4 sm:$0xff]  }
 0x2bb   :  { %v11346_v28 = vpop.eup %11345 }
 0x2bc   :  { %10695 = vmatprep.mubr.bf16.mxu0 %v575_v27  ;;  %v552_v24 = vmul.f32 %v11346_v28, %v13507_v40 }
 0x2bd   :  { %v11348_v29 = vpop.eup %11347  ;;  %1179 = vmatpush1.bf16.msra.mxu0 %v10892_v8  ;;  %v10916_v8 = vld [vmem:[%s16682_s0 + $0xa8] ss:$16 sps:$4 sm:$0xff]  }
 0x2be   :  { %v576_v33 = vpack.c.bf16 %v552_v24, %v551_v1  ;;  %v553_v35 = vmul.f32 %v11348_v29, %v13511_v47 }
 0x2bf   :  { %v11350_v34 = vpop.eup %11349 }
 0x2c0   :  { %10696 = vmatmul.mubr.bf16.gmra.mrb[4].mxu0 %v576_v33  ;;  %v554_v31 = vmul.f32 %v11350_v34, %v13519_v48 }
 0x2c2   :  { %v11352_v36 = vpop.eup %11351  ;;  %v577_v32 = vpack.c.bf16 %v554_v31, %v553_v35 }
 0x2c3   :  { %v11354_v37 = vpop.eup %11353  ;;  %v555_v41 = vmul.f32 %v11352_v36, %v13523_v16 }
 0x2c4   :  { %10699 = vmatprep.mubr.bf16.mxu0 %v577_v32  ;;  %v556_v42 = vmul.f32 %v11354_v37, %v472_v56 }
 0x2c6   :  { %v578_v43 = vpack.c.bf16 %v556_v42, %v555_v41 }
 0x2c8   :  { %10700 = vmatmul.mubr.bf16.gmra.mrb[8].mxu0 %v578_v43 }
 0x38b   :  { %v10693_v40 = vpop.f32.mrb[0].mxu0 }
 0x38c   :  { %v668_v44 = vpop.f32.mrb[1].mxu0  ;;  %v677_v48 = vadd.f32 %v10693_v40, %v9826_v39 }
 0x38d   :  { %v669_v45 = vadd.f32 %v9826_v39, %v668_v44  ;;  %v10694_v46 = vpop.f32.mrb[2].mxu0 }
 0x38e   :  { %v671_v47 = vpop.f32.mrb[3].mxu0  ;;  %v680_v55 = vadd.f32 %v10694_v46, %v9826_v39 }
 0x38f   :  { %v672_v49 = vadd.f32 %v9826_v39, %v671_v47  ;;  %717 = vadd.xlane.f32.xlu0 %v669_v45 }
 0x391   :  { %719 = vadd.xlane.f32.xlu1 %v672_v49 }
 0x393   :  { %721 = vadd.xlane.f32.xlu0 %v677_v48  ;;  %v10697_v50 = vpop.f32.mrb[4].mxu0 }
 0x394   :  { %v684_v16 = vpop.f32.mrb[5].mxu0  ;;  %v13543_v58 = vadd.f32 %v10697_v50, %v9826_v39 }
 0x395   :  { %v685_v52 = vadd.f32 %v9826_v39, %v684_v16  ;;  %723 = vadd.xlane.f32.xlu1 %v680_v55  ;;  %v10698_v53 = vpop.f32.mrb[6].mxu0 }
 0x396   :  { %v687_v54 = vpop.f32.mrb[7].mxu0  ;;  %v13545_v59 = vadd.f32 %v10698_v53, %v9826_v39 }
 0x397   :  { %v688_v57 = vadd.f32 %v9826_v39, %v687_v54  ;;  %725 = vadd.xlane.f32.xlu0 %v685_v52 }
 0x399   :  { %727 = vadd.xlane.f32.xlu1 %v688_v57 }
 0x39b   :  { %729 = vadd.xlane.f32.xlu0 %v13543_v58  ;;  %v10701_v60 = vpop.f32.mrb[8].mxu0 }
 0x39c   :  { %v700_v56 = vpop.f32.mrb[9].mxu0  ;;  %v13554_v17 = vadd.f32 %v10701_v60, %v9826_v39  ;;  %v10898_v60 = vld [vmem:[%s16682_s0 + $0x48] ss:$16 sps:$4 sm:$0xff]  }
 0x39d   :  { %v13548_v61 = vadd.f32 %v9826_v39, %v700_v56  ;;  %731 = vadd.xlane.f32.xlu1 %v13545_v59  ;;  %v10702_v62 = vpop.f32.mrb[10].mxu0 }
 0x39e   :  { %v703_v23 = vpop.f32.mrb[11].mxu0  ;;  %v13557_v30 = vadd.f32 %v10702_v62, %v9826_v39  ;;  %v10901_v62 = vld [vmem:[%s16682_s0 + $0x64] ss:$16 sps:$4 sm:$0xff]  }
 0x39f   :  { %v13551_v0 = vadd.f32 %v9826_v39, %v703_v23  ;;  %733 = vadd.xlane.f32.xlu0 %v13548_v61 }
 0x3a1   :  { %735 = vadd.xlane.f32.xlu1 %v13551_v0 }
 0x3a3   :  { %737 = vadd.xlane.f32.xlu0 %v13554_v17 }
 0x3a5   :  { %739 = vadd.xlane.f32.xlu1 %v13557_v30 }
 0x41c   :  { %v718_v9 = vpop.xlane.xlu0 %717 }
 0x41d   :  { %v741_v10 = vmul.f32 0.0078125, %v718_v9  ;;  %v10919_v9 = vld [vmem:[%s16682_s0 + $0xc4] ss:$16 sps:$4 sm:$0xff]  }
 0x41e   :  { %v720_v11 = vpop.xlane.xlu1 %719 }
 0x41f   :  { %v13585_v12 = vsub.f32 %v669_v45, %v741_v10  ;;  %v742_v13 = vmul.f32 0.0078125, %v720_v11  ;;  %v10921_v10 = vld [vmem:[%s16682_s0 + $0xc0] ss:$16 sps:$4 sm:$0xff]   ;;  %v10924_v11 = vld [vmem:[%s16682_s0 + $0xcc] ss:$16 sps:$4 sm:$0xff]  }
 0x420   :  { %v722_v14 = vpop.xlane.xlu0 %721 }
 0x421   :  { %v13587_v15 = vsub.f32 %v672_v49, %v742_v13  ;;  %v743_v18 = vmul.f32 0.0078125, %v722_v14  ;;  %v765_v19 = vmul.f32 %v13585_v12, %v13585_v12  ;;  %v10922_v13 = vld [vmem:[%s16682_s0 + $0xc8] ss:$16 sps:$4 sm:$0xff]   ;;  %v10925_v14 = vld [vmem:[%s16682_s0 + $0xe4] ss:$16 sps:$4 sm:$0xff]  }
 0x422   :  { %v724_v51 = vpop.xlane.xlu1 %723 }
 0x423   :  { %v13591_v20 = vsub.f32 %v677_v48, %v743_v18  ;;  %v744_v63 = vmul.f32 0.0078125, %v724_v51  ;;  %777 = vadd.xlane.f32.xlu0 %v765_v19  ;;  %v766_v21 = vmul.f32 %v13587_v15, %v13587_v15  ;;  %v10927_v18 = vld [vmem:[%s16682_s0 + $0xe0] ss:$16 sps:$4 sm:$0xff]   ;;  %v10930_v19 = vld [vmem:[%s16682_s0 + $0xec] ss:$16 sps:$4 sm:$0xff]  }
 0x424   :  { %v726_v22 = vpop.xlane.xlu0 %725  ;;  %v10928_v51 = vld [vmem:[%s16682_s0 + $0xe8] ss:$16 sps:$4 sm:$0xff]  }
 0x425   :  { %v13595_v25 = vsub.f32 %v680_v55, %v744_v63  ;;  %v745_v26 = vmul.f32 0.0078125, %v726_v22  ;;  %779 = vadd.xlane.f32.xlu1 %v766_v21  ;;  %v767_v27 = vmul.f32 %v13591_v20, %v13591_v20  ;;  %v13714_v63 = vld [vmem:[%s16380_s14] sm:$0xff]   ;;  %v16401_v22 = vmov 0  }
 0x426   :  { %v728_v28 = vpop.xlane.xlu1 %727  ;;  %v13719_v21 = vld [vmem:[%s16683_s2 + $0x4] ss:$16 sps:$4 sm:$0xff]   ;;  %1135 = vmatprep.mubr.bf16.mxu1 %v16401_v22  ;;  %1208 = vmatprep.mubr.bf16.mxu0 %v16401_v22 }
 0x427   :  { %v13599_v1 = vsub.f32 %v685_v52, %v745_v26  ;;  %v746_v24 = vmul.f32 0.0078125, %v728_v28  ;;  %781 = vadd.xlane.f32.xlu0 %v767_v27  ;;  %v768_v29 = vmul.f32 %v13595_v25, %v13595_v25  ;;  %v10895_v52 = vld [vmem:[%s16682_s0 + $0x44] ss:$16 sps:$4 sm:$0xff]  }
 0x428   :  { %v730_v33 = vpop.xlane.xlu0 %729  ;;  %1107 = vmatprep.subr.bf16.mxu1 %v10895_v52 }
 0x429   :  { %v13603_v34 = vsub.f32 %v688_v57, %v746_v24  ;;  %v747_v35 = vmul.f32 0.0078125, %v730_v33  ;;  %783 = vadd.xlane.f32.xlu1 %v768_v29  ;;  %v769_v31 = vmul.f32 %v13599_v1, %v13599_v1 }
 0x42a   :  { %v732_v36 = vpop.xlane.xlu1 %731 }
 0x42b   :  { %v13608_v32 = vsub.f32 %v13543_v58, %v747_v35  ;;  %v748_v37 = vmul.f32 0.0078125, %v732_v36  ;;  %785 = vadd.xlane.f32.xlu0 %v769_v31  ;;  %v770_v41 = vmul.f32 %v13603_v34, %v13603_v34  ;;  %v10897_v58 = vld [vmem:[%s16682_s0 + $0x40] ss:$16 sps:$4 sm:$0xff]  }
 0x42c   :  { %v734_v42 = vpop.xlane.xlu0 %733  ;;  %1108 = vmatpush1.bf16.msra.mxu1 %v10897_v58 }
 0x42d   :  { %v13613_v43 = vsub.f32 %v13545_v59, %v748_v37  ;;  %v749_v39 = vmul.f32 0.0078125, %v734_v42  ;;  %787 = vadd.xlane.f32.xlu1 %v770_v41  ;;  %v771_v40 = vmul.f32 %v13608_v32, %v13608_v32  ;;  %v10900_v59 = vld [vmem:[%s16682_s0 + $0x4c] ss:$16 sps:$4 sm:$0xff]   ;;  %1109 = vmatprep.subr.bf16.mxu1 %v10901_v62 }
 0x42e   :  { %v736_v44 = vpop.xlane.xlu1 %735  ;;  %1180 = vmatprep.subr.bf16.mxu0 %v10900_v59 }
 0x42f   :  { %v13618_v45 = vsub.f32 %v13548_v61, %v749_v39  ;;  %v750_v46 = vmul.f32 0.0078125, %v736_v44  ;;  %789 = vadd.xlane.f32.xlu0 %v771_v40  ;;  %v772_v47 = vmul.f32 %v13613_v43, %v13613_v43  ;;  %1181 = vmatpush1.bf16.msra.mxu0 %v10898_v60 }
 0x430   :  { %v738_v49 = vpop.xlane.xlu0 %737 }
 0x431   :  { %v13623_v48 = vsub.f32 %v13551_v0, %v750_v46  ;;  %v751_v55 = vmul.f32 0.0078125, %v738_v49  ;;  %791 = vadd.xlane.f32.xlu1 %v772_v47  ;;  %v773_v50 = vmul.f32 %v13618_v45, %v13618_v45  ;;  %v10903_v0 = vld [vmem:[%s16682_s0 + $0x60] ss:$16 sps:$4 sm:$0xff]  }
 0x432   :  { %v740_v16 = vpop.xlane.xlu1 %739  ;;  %1110 = vmatpush1.bf16.msra.mxu1 %v10903_v0 }
 0x433   :  { %v13631_v53 = vsub.f32 %v13554_v17, %v751_v55  ;;  %v752_v54 = vmul.f32 0.0078125, %v740_v16  ;;  %793 = vadd.xlane.f32.xlu0 %v773_v50  ;;  %v774_v57 = vmul.f32 %v13623_v48, %v13623_v48  ;;  %v10906_v17 = vld [vmem:[%s16682_s0 + $0x6c] ss:$16 sps:$4 sm:$0xff]   ;;  %1111 = vmatprep.subr.bf16.mxu1 %v10907_v2 }
 0x434   :  { %1182 = vmatprep.subr.bf16.mxu0 %v10906_v17 }
 0x435   :  { %v13645_v56 = vsub.f32 %v13557_v30, %v752_v54  ;;  %795 = vadd.xlane.f32.xlu1 %v774_v57  ;;  %v775_v61 = vmul.f32 %v13631_v53, %v13631_v53  ;;  %v10904_v30 = vld [vmem:[%s16682_s0 + $0x68] ss:$16 sps:$4 sm:$0xff]   ;;  %v13725_v54 = vld [vmem:[#allocation10] ss:$0 sm:$0xff] }
 0x436   :  { %1183 = vmatpush1.bf16.msra.mxu0 %v10904_v30  ;;  %1112 = vmatpush1.bf16.msra.mxu1 %v10909_v3  ;;  %v13730_v3 = vld [vmem:[#allocation11] ss:$0 sm:$0xff] }
 0x437   :  { %797 = vadd.xlane.f32.xlu0 %v775_v61  ;;  %v776_v23 = vmul.f32 %v13645_v56, %v13645_v56  ;;  %1184 = vmatprep.subr.bf16.mxu0 %v10912_v4 }
 0x438   :  { %1113 = vmatprep.subr.bf16.mxu1 %v10913_v6 }
 0x439   :  { %799 = vadd.xlane.f32.xlu1 %v776_v23 }
 0x43a   :  { %1185 = vmatpush1.bf16.msra.mxu0 %v10910_v5  ;;  %1114 = vmatpush1.bf16.msra.mxu1 %v10915_v38 }
 0x43b   :  { %1186 = vmatprep.subr.bf16.mxu0 %v10918_v7  ;;  %1115 = vmatprep.subr.bf16.mxu1 %v10919_v9 }
 0x43e   :  { %1187 = vmatpush1.bf16.msra.mxu0 %v10916_v8  ;;  %1116 = vmatpush1.bf16.msra.mxu1 %v10921_v10 }
 0x43f   :  { %1188 = vmatprep.subr.bf16.mxu0 %v10924_v11  ;;  %1117 = vmatprep.subr.bf16.mxu1 %v10925_v14  ;;  %v13740_v14 = vld [vmem:[%s16683_s2] ss:$16 sps:$4 sm:$0xff]  }
 0x442   :  { %1189 = vmatpush1.bf16.msra.mxu0 %v10922_v13  ;;  %1118 = vmatpush1.bf16.msra.mxu1 %v10927_v18 }
 0x443   :  { %1190 = vmatprep.subr.bf16.mxu0 %v10930_v19  ;;  %10703 = vmatprep.subr.bf16.mxu1 %v13714_v63  ;;  %v10935_v19 = vld [vmem:[%s16380_s14 + $0x8] sm:$0xff]  }
 0x446   :  { %1191 = vmatpush1.bf16.msra.mxu0 %v10928_v51  ;;  %v13748_v51 = vld [vmem:[%s16683_s2 + $0x24] ss:$16 sps:$4 sm:$0xff]  }
 0x447   :  { %1629 = vmatprep.subr.bf16.mxu0 %v13719_v21 }
 0x4b0   :  { %v778_v26 = vpop.xlane.xlu0 %777 }
 0x4b1   :  { %v801_v27 = vmul.f32 0.0078125, %v778_v26 }
 0x4b2   :  { %v780_v28 = vpop.xlane.xlu1 %779 }
 0x4b3   :  { %v813_v24 = vadd.f32 1e-05, %v801_v27  ;;  %v802_v29 = vmul.f32 0.0078125, %v780_v28 }
 0x4b4   :  { %v782_v33 = vpop.xlane.xlu0 %781 }
 0x4b5   :  { %11355 = vrsqrt.f32 %v813_v24  ;;  %v814_v35 = vadd.f32 1e-05, %v802_v29  ;;  %v803_v31 = vmul.f32 0.0078125, %v782_v33  ;;  %v13757_v29 = vld [vmem:[%s16683_s2 + $0x20] ss:$16 sps:$4 sm:$0xff]  }
 0x4b6   :  { %v784_v36 = vpop.xlane.xlu1 %783  ;;  %v10939_v33 = vld [vmem:[%s16380_s14 + $0x10] sm:$0xff]  }
 0x4b7   :  { %11357 = vrsqrt.f32 %v814_v35  ;;  %v815_v37 = vadd.f32 1e-05, %v803_v31  ;;  %v804_v41 = vmul.f32 0.0078125, %v784_v36 }
 0x4b8   :  { %v786_v42 = vpop.xlane.xlu0 %785 }
 0x4b9   :  { %11359 = vrsqrt.f32 %v815_v37  ;;  %v816_v39 = vadd.f32 1e-05, %v804_v41  ;;  %v805_v40 = vmul.f32 0.0078125, %v786_v42  ;;  %v13778_v42 = vld [vmem:[%s16683_s2 + $0x40] ss:$16 sps:$4 sm:$0xff]  }
 0x4ba   :  { %v788_v44 = vpop.xlane.xlu1 %787 }
 0x4bb   :  { %11361 = vrsqrt.f32 %v816_v39  ;;  %v806_v46 = vmul.f32 0.0078125, %v788_v44  ;;  %v817_v49 = vadd.f32 1e-05, %v805_v40  ;;  %v10943_v39 = vld [vmem:[%s16380_s14 + $0x18] sm:$0xff]  }
 0x4bc   :  { %v790_v47 = vpop.xlane.xlu0 %789 }
 0x4bd   :  { %v818_v55 = vadd.f32 1e-05, %v806_v46  ;;  %v807_v60 = vmul.f32 0.0078125, %v790_v47 }
 0x4be   :  { %v792_v50 = vpop.xlane.xlu1 %791 }
 0x4bf   :  { %v11356_v16 = vpop.eup %11355  ;;  %11363 = vrsqrt.f32 %v818_v55  ;;  %v808_v52 = vmul.f32 0.0078125, %v792_v50  ;;  %v819_v6 = vadd.f32 1e-05, %v807_v60  ;;  %v13795_v55 = vld [vmem:[%s16683_s2 + $0x60] ss:$16 sps:$4 sm:$0xff]  }
 0x4c0   :  { %v794_v57 = vpop.xlane.xlu0 %793  ;;  %v837_v58 = vmul.f32 %v11356_v16, %v13585_v12  ;;  %11365 = vrsqrt.f32 %v817_v49  ;;  %v10947_v16 = vld [vmem:[%s16380_s14 + $0x20] sm:$0xff]  }
 0x4c1   :  { %v11358_v59 = vpop.eup %11357  ;;  %v809_v61 = vmul.f32 0.0078125, %v794_v57  ;;  %v820_v30 = vadd.f32 1e-05, %v808_v52  ;;  %v13805_v57 = vld [vmem:[%s16683_s2 + $0x84] ss:$16 sps:$4 sm:$0xff]  }
 0x4c2   :  { %v796_v62 = vpop.xlane.xlu1 %795  ;;  %v838_v23 = vmul.f32 %v11358_v59, %v13587_v15  ;;  %v855_v0 = vmul.f32 %v13725_v54, %v837_v58 }
 0x4c3   :  { %v11360_v17 = vpop.eup %11359  ;;  %v810_v2 = vmul.f32 0.0078125, %v796_v62  ;;  %v821_v38 = vadd.f32 1e-05, %v809_v61  ;;  %11367 = vrsqrt.f32 %v820_v30  ;;  %v13817_v62 = vld [vmem:[%s16683_s2 + $0x80] ss:$16 sps:$4 sm:$0xff]  }
 0x4c4   :  { %v856_v4 = vmul.f32 %v13725_v54, %v838_v23  ;;  %v798_v7 = vpop.xlane.xlu0 %797  ;;  %v873_v9 = vadd.f32 %v13730_v3, %v855_v0  ;;  %v839_v15 = vmul.f32 %v11360_v17, %v13591_v20 }
 0x4c5   :  { %v11362_v5 = vpop.eup %11361  ;;  %v822_v12 = vadd.f32 1e-05, %v810_v2  ;;  %v811_v26 = vmul.f32 0.0078125, %v798_v7  ;;  %v13850_v7 = vld [vmem:[%s16683_s2 + $0xc4] ss:$16 sps:$4 sm:$0xff]  }
 0x4c6   :  { %v800_v8 = vpop.xlane.xlu1 %799  ;;  %v874_v10 = vadd.f32 %v13730_v3, %v856_v4  ;;  %v840_v11 = vmul.f32 %v11362_v5, %v13595_v25  ;;  %v857_v27 = vmul.f32 %v13725_v54, %v839_v15  ;;  %v13836_v4 = vld [vmem:[%s16683_s2 + $0xa0] ss:$16 sps:$4 sm:$0xff]  }
 0x4c7   :  { %v812_v13 = vmul.f32 0.0078125, %v800_v8  ;;  %11369 = vrsqrt.f32 %v822_v12  ;;  %v823_v36 = vadd.f32 1e-05, %v811_v26  ;;  %v13885_v26 = vld [vmem:[%s16683_s2 + $0xc] ss:$16 sps:$4 sm:$0xff]  }
 0x4c8   :  { %v917_v18 = vpack.c.bf16 %v874_v10, %v873_v9  ;;  %v858_v20 = vmul.f32 %v13725_v54, %v840_v11  ;;  %11371 = vrsqrt.f32 %v819_v6  ;;  %v875_v37 = vadd.f32 %v13730_v3, %v857_v27 }
 0x4c9   :  { %v11364_v25 = vpop.eup %11363  ;;  %11373 = vrsqrt.f32 %v821_v38  ;;  %v824_v24 = vadd.f32 1e-05, %v812_v13  ;;  %v10955_v38 = vld [vmem:[%s16380_s14 + $0x30] sm:$0xff]  }
 0x4ca   :  { %1136 = vmatmul.mubr.bf16.vlgmr.msra.gmra.mrb[0].mxu1 %v917_v18  ;;  %1209 = vmatmul.mubr.bf16.vlgmr.msra.gmra.mrb[12].mxu0 %v917_v18  ;;  %v11366_v28 = vpop.eup %11365  ;;  %v876_v35 = vadd.f32 %v13730_v3, %v858_v20  ;;  %v842_v31 = vmul.f32 %v11364_v25, %v13603_v34  ;;  %v13865_v13 = vld [vmem:[%s16683_s2 + $0xc0] ss:$16 sps:$4 sm:$0xff]  }
 0x4cb   :  { %10704 = vmatpush3.bf16.msra.mxu1 %v13714_v63  ;;  %1630 = vmatpush1.bf16.msra.mxu0 %v13740_v14  ;;  %v13767_v63 = vld [vmem:[%s16683_s2 + $0x44] ss:$16 sps:$4 sm:$0xff]   ;;  %v841_v41 = vmul.f32 %v11366_v28, %v13599_v1  ;;  %11375 = vrsqrt.f32 %v824_v24  ;;  %v13880_v25 = vld [vmem:[%s16683_s2 + $0xe0] ss:$16 sps:$4 sm:$0xff]   ;;  %v13894_v28 = vld [vmem:[%s16683_s2 + $0x8] ss:$16 sps:$4 sm:$0xff]  }
 0x4cc   :  { %10705 = vmatprep.subr.bf16.mxu1 %v10935_v19  ;;  %1631 = vmatprep.subr.bf16.mxu0 %v13748_v51  ;;  %v918_v34 = vpack.c.bf16 %v876_v35, %v875_v37  ;;  %v13787_v1 = vld [vmem:[%s16683_s2 + $0x64] ss:$16 sps:$4 sm:$0xff]   ;;  %v860_v40 = vmul.f32 %v13725_v54, %v842_v31  ;;  %11377 = vrsqrt.f32 %v823_v36  ;;  %v13914_v35 = vld [vmem:[%s16683_s2 + $0x4c] ss:$16 sps:$4 sm:$0xff]   ;;  %v13922_v31 = vld [vmem:[%s16683_s2 + $0x48] ss:$16 sps:$4 sm:$0xff]  }
 0x4cd   :  { %1145 = vmatprep.mubr.bf16.mxu1 %v16401_v22  ;;  %1218 = vmatprep.mubr.bf16.mxu0 %v16401_v22  ;;  %v11368_v44 = vpop.eup %11367  ;;  %v859_v47 = vmul.f32 %v13725_v54, %v841_v41  ;;  %v13928_v36 = vld [vmem:[%s16683_s2 + $0x6c] ss:$16 sps:$4 sm:$0xff]   ;;  %v13934_v37 = vld [vmem:[%s16683_s2 + $0x68] ss:$16 sps:$4 sm:$0xff]  }
 0x4ce   :  { %v878_v52 = vadd.f32 %v13730_v3, %v860_v40  ;;  %v844_v58 = vmul.f32 %v11368_v44, %v13613_v43  ;;  %v13940_v41 = vld [vmem:[%s16683_s2 + $0x8c] ss:$16 sps:$4 sm:$0xff]   ;;  %v13958_v40 = vld [vmem:[%s16683_s2 + $0xa8] ss:$16 sps:$4 sm:$0xff]  }
 0x4cf   :  { %10706 = vmatpush3.bf16.msra.mxu1 %v10935_v19  ;;  %1632 = vmatpush1.bf16.msra.mxu0 %v13757_v29  ;;  %v877_v60 = vadd.f32 %v13730_v3, %v859_v47  ;;  %v13873_v19 = vld [vmem:[%s16683_s2 + $0xe4] ss:$16 sps:$4 sm:$0xff]   ;;  %v13964_v44 = vld [vmem:[%s16683_s2 + $0xcc] ss:$16 sps:$4 sm:$0xff]  }
 0x4d0   :  { %10707 = vmatprep.subr.bf16.mxu1 %v10939_v33  ;;  %1633 = vmatprep.subr.bf16.mxu0 %v13767_v63  ;;  %v862_v0 = vmul.f32 %v13725_v54, %v844_v58  ;;  %v13976_v47 = vld [vmem:[%s16683_s2 + $0xec] ss:$16 sps:$4 sm:$0xff]   ;;  %v13994_v58 = vld [vmem:[#allocation14 + $0x8] ss:$16 sps:$4 sm:$0xff]  }
 0x4d1   :  { %v11370_v46 = vpop.eup %11369  ;;  %v919_v23 = vpack.c.bf16 %v878_v52, %v877_v60  ;;  %v13992_v52 = vld [vmem:[#allocation14] ss:$16 sps:$4 sm:$0xff]   ;;  %16688 = vst [vmem:[#allocation45_spill] sm:$0xff] %v13994_v58  ;;  %v14002_v60 = vld [vmem:[#allocation14 + $0x2c] ss:$16 sps:$4 sm:$0xff]  }
 0x4d2   :  { %1146 = vmatmul.mubr.bf16.gmra.mrb[4].mxu1 %v918_v34  ;;  %1219 = vmatmul.mubr.bf16.gmra.mrb[16].mxu0 %v918_v34  ;;  %v11372_v49 = vpop.eup %11371  ;;  %v846_v59 = vmul.f32 %v11370_v46, %v13623_v48  ;;  %v10951_v48 = vld [vmem:[%s16380_s14 + $0x28] sm:$0xff]   ;;  %v13845_v12 = vadd.f32 %v13730_v3, %v862_v0  ;;  %16687 = vst [vmem:[#allocation44_spill] sm:$0xff] %v13992_v52  ;;  %16690 = vst [vmem:[#allocation47_spill] sm:$0xff] %v14002_v60 }
 0x4d3   :  { %10708 = vmatpush3.bf16.msra.mxu1 %v10939_v33  ;;  %1634 = vmatpush1.bf16.msra.mxu0 %v13778_v42  ;;  %v11374_v50 = vpop.eup %11373  ;;  %v843_v61 = vmul.f32 %v11372_v49, %v13608_v32  ;;  %v13827_v32 = vld [vmem:[%s16683_s2 + $0xa4] ss:$16 sps:$4 sm:$0xff]   ;;  %v13901_v33 = vld [vmem:[%s16683_s2 + $0x2c] ss:$16 sps:$4 sm:$0xff]   ;;  %v13946_v34 = vld [vmem:[%s16683_s2 + $0x88] ss:$16 sps:$4 sm:$0xff]  }
 0x4d4   :  { %10709 = vmatprep.subr.bf16.mxu1 %v10943_v39  ;;  %1635 = vmatprep.subr.bf16.mxu0 %v13787_v1  ;;  %v845_v43 = vmul.f32 %v11374_v50, %v13618_v45  ;;  %v864_v30 = vmul.f32 %v13725_v54, %v846_v59  ;;  %16684 = vst [vmem:[#allocation41_spill] sm:$0xff] %v13845_v12  ;;  %v13970_v46 = vld [vmem:[%s16683_s2 + $0xc8] ss:$16 sps:$4 sm:$0xff]   ;;  %v13988_v50 = vld [vmem:[#allocation14 + $0x4] ss:$16 sps:$4 sm:$0xff]  }
 0x4d5   :  { %1155 = vmatprep.mubr.bf16.mxu1 %v16401_v22  ;;  %1228 = vmatprep.mubr.bf16.mxu0 %v16401_v22  ;;  %v11376_v17 = vpop.eup %11375  ;;  %v861_v45 = vmul.f32 %v13725_v54, %v843_v61  ;;  %v13982_v49 = vld [vmem:[%s16683_s2 + $0xe8] ss:$16 sps:$4 sm:$0xff]   ;;  %16685 = vst [vmem:[#allocation42_spill] sm:$0xff] %v13988_v50  ;;  %v14000_v59 = vld [vmem:[#allocation14 + $0x24] ss:$16 sps:$4 sm:$0xff]  }
 0x4d6   :  { %v11378_v2 = vpop.eup %11377  ;;  %v863_v5 = vmul.f32 %v13725_v54, %v845_v43  ;;  %v848_v6 = vmul.f32 %v11376_v17, %v13645_v56  ;;  %v882_v56 = vadd.f32 %v13730_v3, %v864_v30  ;;  %16689 = vst [vmem:[#allocation46_spill] sm:$0xff] %v14000_v59  ;;  %v14004_v61 = vld [vmem:[#allocation14 + $0x20] ss:$16 sps:$4 sm:$0xff]   ;;  %v14006_v43 = vld [vmem:[#allocation14 + $0x28] ss:$16 sps:$4 sm:$0xff]  }
 0x4d7   :  { %10710 = vmatpush3.bf16.msra.mxu1 %v10943_v39  ;;  %1636 = vmatpush1.bf16.msra.mxu0 %v13795_v55  ;;  %v847_v8 = vmul.f32 %v11378_v2, %v13631_v53  ;;  %v879_v9 = vadd.f32 %v13730_v3, %v861_v45  ;;  %v10959_v53 = vld [vmem:[%s16380_s14 + $0x38] sm:$0xff]   ;;  %16691 = vst [vmem:[#allocation48_spill] sm:$0xff] %v14004_v61  ;;  %16692 = vst [vmem:[#allocation49_spill] sm:$0xff] %v14006_v43  ;;  %v14018_v17 = vld [vmem:[#allocation14 + $0x48] ss:$16 sps:$4 sm:$0xff]  }
 0x4d8   :  { %10711 = vmatprep.subr.bf16.mxu1 %v10947_v16  ;;  %1637 = vmatprep.subr.bf16.mxu0 %v13805_v57  ;;  %v881_v10 = vadd.f32 %v13730_v3, %v863_v5  ;;  %v866_v15 = vmul.f32 %v13725_v54, %v848_v6  ;;  %v13952_v39 = vld [vmem:[%s16683_s2 + $0xac] ss:$16 sps:$4 sm:$0xff]   ;;  %16696 = vst [vmem:[#allocation53_spill] sm:$0xff] %v14018_v17  ;;  %v14024_v30 = vld [vmem:[#allocation14 + $0x64] ss:$16 sps:$4 sm:$0xff]  }
 0x4d9   :  { %v920_v11 = vpack.c.bf16 %v13845_v12, %v879_v9  ;;  %v865_v20 = vmul.f32 %v13725_v54, %v847_v8  ;;  %v14016_v0 = vld [vmem:[#allocation14 + $0x40] ss:$16 sps:$4 sm:$0xff]   ;;  %16697 = vst [vmem:[#allocation54_spill] sm:$0xff] %v14024_v30  ;;  %v14026_v45 = vld [vmem:[#allocation14 + $0x6c] ss:$16 sps:$4 sm:$0xff]  }
 0x4da   :  { %1156 = vmatmul.mubr.bf16.gmra.mrb[8].mxu1 %v919_v23  ;;  %1229 = vmatmul.mubr.bf16.gmra.mrb[20].mxu0 %v919_v23  ;;  %v1297_v18 = vpack.c.bf16 %v882_v56, %v881_v10  ;;  %v884_v27 = vadd.f32 %v13730_v3, %v866_v15  ;;  %v14012_v23 = vld [vmem:[#allocation14 + $0x44] ss:$16 sps:$4 sm:$0xff]   ;;  %16695 = vst [vmem:[#allocation52_spill] sm:$0xff] %v14016_v0  ;;  %16698 = vst [vmem:[#allocation55_spill] sm:$0xff] %v14026_v45  ;;  %v14028_v2 = vld [vmem:[#allocation14 + $0x60] ss:$16 sps:$4 sm:$0xff]  }
 0x4db   :  { %10712 = vmatpush3.bf16.msra.mxu1 %v10947_v16  ;;  %1638 = vmatpush1.bf16.msra.mxu0 %v13817_v62  ;;  %v883_v54 = vadd.f32 %v13730_v3, %v865_v20  ;;  %v13908_v3 = vld [vmem:[%s16683_s2 + $0x28] ss:$16 sps:$4 sm:$0xff]   ;;  %16693 = vst [vmem:[#allocation50_spill] sm:$0xff] %v14012_v23  ;;  %16699 = vst [vmem:[#allocation56_spill] sm:$0xff] %v14028_v2  ;;  %v14030_v5 = vld [vmem:[#allocation14 + $0x68] ss:$16 sps:$4 sm:$0xff]  }
 0x4dc   :  { %10713 = vmatprep.subr.bf16.mxu1 %v10951_v48  ;;  %1639 = vmatprep.subr.bf16.mxu0 %v13827_v32  ;;  %v13990_v16 = vld [vmem:[#allocation14 + $0xc] ss:$16 sps:$4 sm:$0xff]   ;;  %16700 = vst [vmem:[#allocation57_spill] sm:$0xff] %v14030_v5  ;;  %v14036_v6 = vld [vmem:[#allocation14 + $0x84] ss:$16 sps:$4 sm:$0xff]  }
 0x4dd   :  { %1165 = vmatprep.mubr.bf16.mxu1 %v16401_v22  ;;  %1238 = vmatprep.mubr.bf16.mxu0 %v16401_v22  ;;  %v1298_v24 = vpack.c.bf16 %v884_v27, %v883_v54  ;;  %16686 = vst [vmem:[#allocation43_spill] sm:$0xff] %v13990_v16  ;;  %16701 = vst [vmem:[#allocation58_spill] sm:$0xff] %v14036_v6  ;;  %v14040_v56 = vld [vmem:[#allocation14 + $0x80] ss:$16 sps:$4 sm:$0xff]   ;;  %v14042_v8 = vld [vmem:[#allocation14 + $0x88] ss:$16 sps:$4 sm:$0xff]  }
 0x4de   :  { %16703 = vst [vmem:[#allocation60_spill] sm:$0xff] %v14040_v56  ;;  %16704 = vst [vmem:[#allocation61_spill] sm:$0xff] %v14042_v8  ;;  %v14046_v9 = vld [vmem:[#allocation14 + $0xa4] ss:$16 sps:$4 sm:$0xff]   ;;  %v14048_v10 = vld [vmem:[#allocation14 + $0xac] ss:$16 sps:$4 sm:$0xff]  }
 0x4df   :  { %10714 = vmatpush3.bf16.msra.mxu1 %v10951_v48  ;;  %1640 = vmatpush1.bf16.msra.mxu0 %v13836_v4  ;;  %v14014_v48 = vld [vmem:[#allocation14 + $0x4c] ss:$16 sps:$4 sm:$0xff]   ;;  %16705 = vst [vmem:[#allocation62_spill] sm:$0xff] %v14046_v9  ;;  %16706 = vst [vmem:[#allocation63_spill] sm:$0xff] %v14048_v10  ;;  %v14052_v15 = vld [vmem:[#allocation14 + $0xa0] ss:$16 sps:$4 sm:$0xff]  }
 0x4e0   :  { %10715 = vmatprep.subr.bf16.mxu1 %v10955_v38  ;;  %1641 = vmatprep.subr.bf16.mxu0 %v13850_v7  ;;  %16694 = vst [vmem:[#allocation51_spill] sm:$0xff] %v14014_v48  ;;  %16707 = vst [vmem:[#allocation64_spill] sm:$0xff] %v14052_v15  ;;  %v14064_v20 = vld [vmem:[#allocation14 + $0xc0] ss:$16 sps:$4 sm:$0xff]   ;;  %v14066_v27 = vld [vmem:[#allocation14 + $0xc8] ss:$16 sps:$4 sm:$0xff]  }
 0x4e1   :  { %16711 = vst [vmem:[#allocation68_spill] sm:$0xff] %v14064_v20  ;;  %16712 = vst [vmem:[#allocation69_spill] sm:$0xff] %v14066_v27  ;;  %v14070_v54 = vld [vmem:[#allocation14 + $0xe4] ss:$16 sps:$4 sm:$0xff]   ;;  %v14078_v12 = vld [vmem:[#allocation14 + $0xe8] ss:$16 sps:$4 sm:$0xff]  }
 0x4e2   :  { %1166 = vmatmul.mubr.bf16.gmra.mrb[12].mxu1 %v920_v11  ;;  %1239 = vmatmul.mubr.bf16.gmra.mrb[24].mxu0 %v920_v11  ;;  %v14054_v11 = vld [vmem:[#allocation14 + $0xa8] ss:$16 sps:$4 sm:$0xff]   ;;  %16713 = vst [vmem:[#allocation70_spill] sm:$0xff] %v14070_v54  ;;  %16716 = vst [vmem:[#allocation73_spill] sm:$0xff] %v14078_v12 }
 0x4e3   :  { %10716 = vmatpush3.bf16.msra.mxu1 %v10955_v38  ;;  %10719 = vmatprep.mubr.bf16.mxu1 %v1297_v18  ;;  %v14038_v38 = vld [vmem:[#allocation14 + $0x8c] ss:$16 sps:$4 sm:$0xff]   ;;  %16708 = vst [vmem:[#allocation65_spill] sm:$0xff] %v14054_v11 }
 0x4e4   :  { %1642 = vmatpush1.bf16.msra.mxu0 %v13865_v13  ;;  %10717 = vmatprep.subr.bf16.mxu1 %v10959_v53  ;;  %16702 = vst [vmem:[#allocation59_spill] sm:$0xff] %v14038_v38  ;;  %v14060_v18 = vld [vmem:[#allocation14 + $0xcc] ss:$16 sps:$4 sm:$0xff]  }
 0x4e5   :  { %1643 = vmatprep.subr.bf16.mxu0 %v13873_v19  ;;  %1661 = vmatprep.mubr.bf16.mxu0 %v16401_v22  ;;  %16710 = vst [vmem:[#allocation67_spill] sm:$0xff] %v14060_v18 }
 0x4e7   :  { %10718 = vmatpush3.bf16.msra.mxu1 %v10959_v53  ;;  %v14058_v53 = vld [vmem:[#allocation14 + $0xc4] ss:$16 sps:$4 sm:$0xff]  }
 0x4e8   :  { %1644 = vmatpush1.bf16.msra.mxu0 %v13880_v25  ;;  %1670 = vmatprep.subr.bf16.mxu1 %v13885_v26  ;;  %16709 = vst [vmem:[#allocation66_spill] sm:$0xff] %v14058_v53 }
 0x4e9   :  { %1964 = vmatprep.subr.bf16.mxu0 %v13988_v50 }
 0x4ea   :  { %10720 = vmatmul.mubr.bf16.vlgmr.msra.gmra.mrb[16].mxu1 %v1298_v24  ;;  %v14072_v24 = vld [vmem:[#allocation14 + $0xec] ss:$16 sps:$4 sm:$0xff]  }
 0x4eb   :  { %1662 = vmatmul.mubr.bf16.vlgmr.msra.gmra.mrb[28].mxu0 %v16401_v22  ;;  %1671 = vmatpush1.bf16.msra.mxu1 %v13894_v28  ;;  %16714 = vst [vmem:[#allocation71_spill] sm:$0xff] %v14072_v24 }
 0x4ec   :  { %1672 = vmatprep.subr.bf16.mxu1 %v13901_v33  ;;  %1702 = vmatprep.mubr.bf16.mxu1 %v16401_v22 }
 0x4ed   :  { %1996 = vmatprep.mubr.bf16.mxu0 %v16401_v22  ;;  %1965 = vmatpush1.bf16.msra.mxu0 %v13992_v52 }
 0x4ee   :  { %1966 = vmatprep.subr.bf16.mxu0 %v14000_v59 }
 0x4ef   :  { %1673 = vmatpush1.bf16.msra.mxu1 %v13908_v3 }
 0x4f0   :  { %1674 = vmatprep.subr.bf16.mxu1 %v13914_v35 }
 0x4f1   :  { %1967 = vmatpush1.bf16.msra.mxu0 %v14004_v61 }
 0x4f2   :  { %1968 = vmatprep.subr.bf16.mxu0 %v14012_v23 }
 0x4f3   :  { %1675 = vmatpush1.bf16.msra.mxu1 %v13922_v31 }
 0x4f4   :  { %1676 = vmatprep.subr.bf16.mxu1 %v13928_v36 }
 0x4f5   :  { %1969 = vmatpush1.bf16.msra.mxu0 %v14016_v0 }
 0x4f6   :  { %1970 = vmatprep.subr.bf16.mxu0 %v14024_v30 }
 0x4f7   :  { %1677 = vmatpush1.bf16.msra.mxu1 %v13934_v37 }
 0x4f8   :  { %1678 = vmatprep.subr.bf16.mxu1 %v13940_v41 }
 0x4f9   :  { %1971 = vmatpush1.bf16.msra.mxu0 %v14028_v2 }
 0x4fa   :  { %1972 = vmatprep.subr.bf16.mxu0 %v14036_v6 }
 0x4fb   :  { %1679 = vmatpush1.bf16.msra.mxu1 %v13946_v34 }
 0x4fc   :  { %1680 = vmatprep.subr.bf16.mxu1 %v13952_v39 }
 0x4fd   :  { %1973 = vmatpush1.bf16.msra.mxu0 %v14040_v56 }
 0x4fe   :  { %1974 = vmatprep.subr.bf16.mxu0 %v14046_v9 }
 0x4ff   :  { %1681 = vmatpush1.bf16.msra.mxu1 %v13958_v40 }
 0x500   :  { %1682 = vmatprep.subr.bf16.mxu1 %v13964_v44 }
 0x501   :  { %1975 = vmatpush1.bf16.msra.mxu0 %v14052_v15 }
 0x502   :  { %1976 = vmatprep.subr.bf16.mxu0 %v14058_v53  ;;  %v14084_v53 = vld [vmem:[#allocation16 + $0xc] ss:$16 sps:$4 sm:$0xff]  }
 0x503   :  { %1683 = vmatpush1.bf16.msra.mxu1 %v13970_v46  ;;  %16718 = vst [vmem:[#allocation75_spill] sm:$0xff] %v14084_v53 }
 0x504   :  { %1684 = vmatprep.subr.bf16.mxu1 %v13976_v47 }
 0x505   :  { %1977 = vmatpush1.bf16.msra.mxu0 %v14064_v20 }
 0x506   :  { %1978 = vmatprep.subr.bf16.mxu0 %v14070_v54 }
 0x507   :  { %1685 = vmatpush1.bf16.msra.mxu1 %v13982_v49 }
 0x508   :  { %2005 = vmatprep.subr.bf16.mxu1 %v13990_v16 }
 0x50a   :  { %1703 = vmatmul.mubr.bf16.vlgmr.msra.gmra.mrb[20].mxu1 %v16401_v22 }
 0x50b   :  { %2037 = vmatprep.mubr.bf16.mxu1 %v16401_v22  ;;  %2006 = vmatpush1.bf16.msra.mxu1 %v13994_v58  ;;  %v14076_v22 = vld [vmem:[#allocation14 + $0xe0] ss:$16 sps:$4 sm:$0xff]  }
 0x50c   :  { %2007 = vmatprep.subr.bf16.mxu1 %v14002_v60  ;;  %16715 = vst [vmem:[#allocation72_spill] sm:$0xff] %v14076_v22  ;;  %1979 = vmatpush1.bf16.msra.mxu0 %v14076_v22 }
 0x50f   :  { %2008 = vmatpush1.bf16.msra.mxu1 %v14006_v43 }
 0x510   :  { %2009 = vmatprep.subr.bf16.mxu1 %v14014_v48 }
 0x513   :  { %2010 = vmatpush1.bf16.msra.mxu1 %v14018_v17 }
 0x514   :  { %2011 = vmatprep.subr.bf16.mxu1 %v14026_v45 }
 0x517   :  { %2012 = vmatpush1.bf16.msra.mxu1 %v14030_v5 }
 0x518   :  { %2013 = vmatprep.subr.bf16.mxu1 %v14038_v38 }
 0x51b   :  { %2014 = vmatpush1.bf16.msra.mxu1 %v14042_v8 }
 0x51c   :  { %2015 = vmatprep.subr.bf16.mxu1 %v14048_v10 }
 0x51f   :  { %2016 = vmatpush1.bf16.msra.mxu1 %v14054_v11  ;;  %v14082_v11 = vld [vmem:[#allocation16 + $0x4] ss:$16 sps:$4 sm:$0xff]  }
 0x520   :  { %2017 = vmatprep.subr.bf16.mxu1 %v14060_v18  ;;  %16717 = vst [vmem:[#allocation74_spill] sm:$0xff] %v14082_v11  ;;  %2206 = vmatprep.subr.bf16.mxu0 %v14082_v11 }
 0x523   :  { %2018 = vmatpush1.bf16.msra.mxu1 %v14066_v27  ;;  %v16433_v27 = vlaneseq }
 0x524   :  { %2019 = vmatprep.subr.bf16.mxu1 %v14072_v24  ;;  %v921_v24 = vld [vmem:[#allocation13] sm:$0xf] }
 0x525   :  { %v924_v20 = vshrl.u32 %v16433_v27, 7 }
 0x527   :  { %2020 = vmatpush1.bf16.msra.mxu1 %v14078_v12  ;;  %v14091_v18 = vsub.s32 0, %v924_v20  ;;  %v14093_v54 = vsub.s32 2, %v924_v20  ;;  %v14095_v15 = vsub.s32 1, %v924_v20  ;;  %v14097_v10 = vsub.s32 3, %v924_v20 }
 0x528   :  { %2247 = vmatprep.subr.bf16.mxu1 %v14084_v53 }
 0x529   :  { %16719 = vst [vmem:[#allocation76_spill] sm:$0xff] %v14091_v18  ;;  %16720 = vst [vmem:[#allocation77_spill] sm:$0xff] %v14093_v54  ;;  %v14104_v11 = vrot.slane %v921_v24, %v14091_v18  ;;  %v14107_v53 = vrot.slane %v921_v24, %v14093_v54  ;;  %v930_v8 = vrot.slane %v921_v24, %v14095_v15 }
 0x52a   :  { %16721 = vst [vmem:[#allocation78_spill] sm:$0xff] %v14095_v15  ;;  %16722 = vst [vmem:[#allocation79_spill] sm:$0xff] %v14097_v10  ;;  %v14115_v56 = vrot.slane %v921_v24, %v14097_v10 }
 0x59d   :  { %v14099_v9 = vpop.f32.mrb[0].mxu1  ;;  %v14101_v22 = vpop.f32.mrb[12].mxu0 }
 0x59e   :  { %v14109_v27 = vpop.f32.mrb[1].mxu1  ;;  %v14111_v12 = vpop.f32.mrb[13].mxu0 }
 0x59f   :  { %v1141_v20 = vpop.f32.mrb[2].mxu1  ;;  %v1214_v38 = vpop.f32.mrb[14].mxu0 }
 0x5a0   :  { %v14118_v6 = vadd.f32 %v1141_v20, %v14104_v11  ;;  %v14121_v18 = vadd.f32 %v1214_v38, %v14107_v53  ;;  %v1143_v5 = vpop.f32.mrb[3].mxu1  ;;  %v1216_v54 = vpop.f32.mrb[15].mxu0 }
 0x5a1   :  { %v14123_v2 = vadd.f32 %v1143_v5, %v930_v8  ;;  %v14126_v45 = vadd.f32 %v1216_v54, %v14115_v56 }
 0x5a2   :  { %16723 = vst [vmem:[#allocation80_spill] sm:$0xff] %v14118_v6  ;;  %16724 = vst [vmem:[#allocation81_spill] sm:$0xff] %v14121_v18 }
 0x5a3   :  { %16725 = vst [vmem:[#allocation82_spill] sm:$0xff] %v14123_v2  ;;  %16726 = vst [vmem:[#allocation83_spill] sm:$0xff] %v14126_v45 }
 0x5a5   :  { %v1147_v30 = vpop.f32.mrb[4].mxu1  ;;  %v1220_v15 = vpop.f32.mrb[16].mxu0 }
 0x5a6   :  { %v14129_v24 = vadd.f32 %v1147_v30, %v14104_v11  ;;  %v14132_v10 = vadd.f32 %v1220_v15, %v14107_v53  ;;  %v1149_v20 = vpop.f32.mrb[5].mxu1  ;;  %v1222_v6 = vpop.f32.mrb[17].mxu0 }
 0x5a7   :  { %v14134_v17 = vadd.f32 %v1149_v20, %v930_v8  ;;  %v14137_v38 = vadd.f32 %v1222_v6, %v14115_v56  ;;  %v1151_v5 = vpop.f32.mrb[6].mxu1  ;;  %v1224_v2 = vpop.f32.mrb[18].mxu0 }
 0x5a8   :  { %16727 = vst [vmem:[#allocation84_spill] sm:$0xff] %v14129_v24  ;;  %16728 = vst [vmem:[#allocation85_spill] sm:$0xff] %v14132_v10  ;;  %v14140_v54 = vadd.f32 %v1151_v5, %v14104_v11  ;;  %v14143_v45 = vadd.f32 %v1224_v2, %v14107_v53  ;;  %v1153_v30 = vpop.f32.mrb[7].mxu1  ;;  %v1226_v24 = vpop.f32.mrb[19].mxu0 }
 0x5a9   :  { %16729 = vst [vmem:[#allocation86_spill] sm:$0xff] %v14134_v17  ;;  %16730 = vst [vmem:[#allocation87_spill] sm:$0xff] %v14137_v38  ;;  %v14145_v18 = vadd.f32 %v1153_v30, %v930_v8  ;;  %v14148_v15 = vadd.f32 %v1226_v24, %v14115_v56 }
 0x5aa   :  { %16731 = vst [vmem:[#allocation88_spill] sm:$0xff] %v14140_v54  ;;  %16732 = vst [vmem:[#allocation89_spill] sm:$0xff] %v14143_v45 }
 0x5ab   :  { %16733 = vst [vmem:[#allocation90_spill] sm:$0xff] %v14145_v18  ;;  %16734 = vst [vmem:[#allocation91_spill] sm:$0xff] %v14148_v15 }
 0x5ad   :  { %v1157_v20 = vpop.f32.mrb[8].mxu1  ;;  %v1230_v17 = vpop.f32.mrb[20].mxu0 }
 0x5ae   :  { %v14151_v6 = vadd.f32 %v1157_v20, %v14104_v11  ;;  %v14154_v38 = vadd.f32 %v1230_v17, %v14107_v53  ;;  %v1159_v5 = vpop.f32.mrb[9].mxu1  ;;  %v1232_v54 = vpop.f32.mrb[21].mxu0 }
 0x5af   :  { %v14156_v10 = vadd.f32 %v1159_v5, %v930_v8  ;;  %v14159_v2 = vadd.f32 %v1232_v54, %v14115_v56  ;;  %v1161_v30 = vpop.f32.mrb[10].mxu1  ;;  %v1234_v18 = vpop.f32.mrb[22].mxu0 }
 0x5b0   :  { %16735 = vst [vmem:[#allocation92_spill] sm:$0xff] %v14151_v6  ;;  %16736 = vst [vmem:[#allocation93_spill] sm:$0xff] %v14154_v38  ;;  %v14162_v24 = vadd.f32 %v1161_v30, %v14104_v11  ;;  %v14165_v15 = vadd.f32 %v1234_v18, %v14107_v53  ;;  %v1163_v20 = vpop.f32.mrb[11].mxu1  ;;  %v1236_v6 = vpop.f32.mrb[23].mxu0 }
 0x5b1   :  { %16737 = vst [vmem:[#allocation94_spill] sm:$0xff] %v14156_v10  ;;  %16738 = vst [vmem:[#allocation95_spill] sm:$0xff] %v14159_v2  ;;  %v14167_v45 = vadd.f32 %v1163_v20, %v930_v8  ;;  %v14170_v17 = vadd.f32 %v1236_v6, %v14115_v56 }
 0x5b2   :  { %16739 = vst [vmem:[#allocation96_spill] sm:$0xff] %v14162_v24  ;;  %16740 = vst [vmem:[#allocation97_spill] sm:$0xff] %v14165_v15 }
 0x5b3   :  { %16741 = vst [vmem:[#allocation98_spill] sm:$0xff] %v14167_v45  ;;  %16742 = vst [vmem:[#allocation99_spill] sm:$0xff] %v14170_v17 }
 0x5b5   :  { %v1167_v5 = vpop.f32.mrb[12].mxu1  ;;  %v1240_v10 = vpop.f32.mrb[24].mxu0 }
 0x5b6   :  { %v14173_v54 = vadd.f32 %v1167_v5, %v14104_v11  ;;  %v14176_v2 = vadd.f32 %v1240_v10, %v14107_v53  ;;  %v1169_v30 = vpop.f32.mrb[13].mxu1  ;;  %v1242_v24 = vpop.f32.mrb[25].mxu0 }
 0x5b7   :  { %v14178_v38 = vadd.f32 %v1169_v30, %v930_v8  ;;  %v14181_v18 = vadd.f32 %v1242_v24, %v14115_v56  ;;  %v1171_v20 = vpop.f32.mrb[14].mxu1  ;;  %v1244_v45 = vpop.f32.mrb[26].mxu0  ;;  %v9869_v30 = vld [vmem:[#allocation19] ss:$0 sm:$0xff]  ;;  %v1138_v24 = vadd.f32 %v14099_v9, %v14104_v11 }
 0x5b8   :  { %16743 = vst [vmem:[#allocation100_spill] sm:$0xff] %v14173_v54  ;;  %16744 = vst [vmem:[#allocation101_spill] sm:$0xff] %v14176_v2  ;;  %v14184_v6 = vadd.f32 %v1171_v20, %v14104_v11  ;;  %v14187_v17 = vadd.f32 %v1244_v45, %v14107_v53  ;;  %v1173_v5 = vpop.f32.mrb[15].mxu1  ;;  %v1246_v54 = vpop.f32.mrb[27].mxu0 }
 0x5b9   :  { %16745 = vst [vmem:[#allocation102_spill] sm:$0xff] %v14178_v38  ;;  %16746 = vst [vmem:[#allocation103_spill] sm:$0xff] %v14181_v18  ;;  %v14189_v15 = vadd.f32 %v1173_v5, %v930_v8  ;;  %v14192_v10 = vadd.f32 %v1246_v54, %v14115_v56  ;;  %v1140_v38 = vadd.f32 %v14109_v27, %v930_v8 }
 0x5ba   :  { %16747 = vst [vmem:[#allocation104_spill] sm:$0xff] %v14184_v6  ;;  %16748 = vst [vmem:[#allocation105_spill] sm:$0xff] %v14187_v17 }
 0x5bb   :  { %16749 = vst [vmem:[#allocation106_spill] sm:$0xff] %v14189_v15  ;;  %16750 = vst [vmem:[#allocation107_spill] sm:$0xff] %v14192_v10  ;;  %v14273_v10 = vld [vmem:[#allocation16 + $0xa8] ss:$16 sps:$4 sm:$0xff]  }
 0x5bd   :  { %v10721_v18 = vpop.f32.mrb[16].mxu1 }
 0x5be   :  { %v1397_v2 = vadd.f32 %v10721_v18, %v9869_v30  ;;  %v1663_v20 = vpop.f32.mrb[28].mxu0  ;;  %v1388_v6 = vpop.f32.mrb[17].mxu1 }
 0x5bf   :  { %v1711_v0 = vadd.f32 %v1663_v20, %v1138_v24  ;;  %v14197_v45 = vadd.f32 %v9869_v30, %v1388_v6  ;;  %v1665_v17 = vpop.f32.mrb[29].mxu0  ;;  %v10722_v48 = vpop.f32.mrb[18].mxu1 }
 0x5c0   :  { %v1405_v5 = vmax.f32 %v1397_v2, 0.0  ;;  %v1712_v15 = vadd.f32 %v1665_v17, %v1140_v38  ;;  %v1391_v23 = vpop.f32.mrb[19].mxu1  ;;  %v1667_v54 = vpop.f32.mrb[30].mxu0  ;;  %v1211_v48 = vadd.f32 %v14101_v22, %v14107_v53  ;;  %v1213_v2 = vadd.f32 %v14111_v12, %v14115_v56 }
 0x5c1   :  { %16751 = vst [vmem:[#allocation108_spill] sm:$0xff] %v14197_v45  ;;  %v1392_v43 = vadd.f32 %v9869_v30, %v1391_v23  ;;  %v1668_v61 = vpop.f32.mrb[31].mxu0  ;;  %v9910_v11 = vmul.f32 -1.442695, %v1711_v0  ;;  %v14277_v45 = vld [vmem:[#allocation16 + $0xc4] ss:$16 sps:$4 sm:$0xff]  }
 0x5c2   :  { %1409 = vst [vmem:[#allocation3 + $0x10] sm:$0xff] %v1405_v5  ;;  %v9911_v8 = vmul.f32 -1.442695, %v1712_v15 }
 0x5c3   :  { %v1404_v9 = vmax.f32 %v1392_v43, 0.0 }
 0x5c4   :  { %11379 = vpow2.f32 %v9911_v8 }
 0x5c5   :  { %1408 = vst [vmem:[#allocation3 + $0x8] sm:$0xff] %v1404_v9  ;;  %11381 = vpow2.f32 %v9910_v11 }
 0x5ce   :  { %v11380_v27 = vpop.eup %11379 }
 0x5cf   :  { %v11382_v18 = vpop.eup %11381  ;;  %v1725_v6 = vadd.f32 1.0, %v11380_v27  ;;  %v14207_v27 = vld [vmem:[#allocation16] ss:$16 sps:$4 sm:$0xff]  }
 0x5d0   :  { %v1724_v38 = vadd.f32 1.0, %v11382_v18  ;;  %v14209_v18 = vld [vmem:[#allocation16 + $0x8] ss:$16 sps:$4 sm:$0xff]  }
 0x5d1   :  { %11383 = vrcp.f32 %v1725_v6 }
 0x5d2   :  { %11385 = vrcp.f32 %v1724_v38  ;;  %v14215_v38 = vld [vmem:[#allocation16 + $0x2c] ss:$16 sps:$4 sm:$0xff]  }
 0x5db   :  { %v11384_v24 = vpop.eup %11383 }
 0x5dc   :  { %v11386_v20 = vpop.eup %11385  ;;  %v1734_v22 = vmul.f32 0.0, %v11384_v24  ;;  %v14243_v24 = vld [vmem:[#allocation16 + $0x6c] ss:$16 sps:$4 sm:$0xff]  }
 0x5dd   :  { %v1704_v17 = vpop.f32.mrb[20].mxu1 }
 0x5de   :  { %v1713_v23 = vadd.f32 %v1704_v17, %v1211_v48  ;;  %v1706_v61 = vpop.f32.mrb[21].mxu1  ;;  %v14213_v48 = vld [vmem:[#allocation16 + $0x24] ss:$16 sps:$4 sm:$0xff]   ;;  %v14223_v17 = vld [vmem:[#allocation16 + $0x28] ss:$16 sps:$4 sm:$0xff]  }
 0x5df   :  { %v1714_v43 = vadd.f32 %v1706_v61, %v1213_v2  ;;  %v1708_v30 = vpop.f32.mrb[22].mxu1  ;;  %v14221_v2 = vld [vmem:[#allocation16 + $0x20] ss:$16 sps:$4 sm:$0xff]   ;;  %v14229_v61 = vld [vmem:[#allocation16 + $0x4c] ss:$16 sps:$4 sm:$0xff]  }
 0x5e0   :  { %v9912_v0 = vmul.f32 -1.442695, %v1713_v23  ;;  %v1709_v15 = vpop.f32.mrb[23].mxu1  ;;  %v14227_v23 = vld [vmem:[#allocation16 + $0x44] ss:$16 sps:$4 sm:$0xff]  }
 0x5e1   :  { %11387 = vtanh.f32 %v1714_v43  ;;  %v16752_v43 = vmov 0   ;;  %v14235_v30 = vld [vmem:[#allocation16 + $0x40] ss:$16 sps:$4 sm:$0xff]   ;;  %v14241_v15 = vld [vmem:[#allocation16 + $0x64] ss:$16 sps:$4 sm:$0xff]  }
 0x5e2   :  { %11389 = vpow2.f32 %v9912_v0  ;;  %v14237_v0 = vld [vmem:[#allocation16 + $0x48] ss:$16 sps:$4 sm:$0xff]  }
 0x5eb   :  { %v11388_v5 = vpop.eup %11387 }
 0x5ec   :  { %v11390_v54 = vpop.eup %11389  ;;  %v1735_v53 = vmul.f32 %v11388_v5, %v11386_v20  ;;  %v14247_v20 = vld [vmem:[#allocation16 + $0x60] ss:$16 sps:$4 sm:$0xff]   ;;  %v14249_v5 = vld [vmem:[#allocation16 + $0x68] ss:$16 sps:$4 sm:$0xff]  }
 0x5ed   :  { %v1726_v9 = vadd.f32 1.0, %v11390_v54  ;;  %v14253_v54 = vld [vmem:[#allocation16 + $0x84] ss:$16 sps:$4 sm:$0xff]  }
 0x5ee   :  { %v14204_v8 = vadd.f32 %v1735_v53, %v1734_v22  ;;  %16753 = vst [vmem:[#allocation109_spill] sm:$0xff] %v14253_v54  ;;  %v14255_v22 = vld [vmem:[#allocation16 + $0x8c] ss:$16 sps:$4 sm:$0xff]   ;;  %v14259_v53 = vld [vmem:[#allocation16 + $0x80] ss:$16 sps:$4 sm:$0xff]  }
 0x5ef   :  { %11391 = vrcp.f32 %v1726_v9  ;;  %16754 = vst [vmem:[#allocation110_spill] sm:$0xff] %v14255_v22  ;;  %16755 = vst [vmem:[#allocation111_spill] sm:$0xff] %v14259_v53  ;;  %v14261_v9 = vld [vmem:[#allocation16 + $0x88] ss:$16 sps:$4 sm:$0xff]  }
 0x5f0   :  { %11393 = vtanh.f32 %v14204_v8  ;;  %16756 = vst [vmem:[#allocation112_spill] sm:$0xff] %v14261_v9 }
 0x5f9   :  { %v11392_v12 = vpop.eup %11391 }
 0x5fa   :  { %v11394_v56 = vpop.eup %11393 }
 0x5fb   :  { %v1738_v11 = vmul.f32 %v11394_v56, %v11392_v12  ;;  %v14265_v12 = vld [vmem:[#allocation16 + $0xa4] ss:$16 sps:$4 sm:$0xff]   ;;  %v14267_v56 = vld [vmem:[#allocation16 + $0xac] ss:$16 sps:$4 sm:$0xff]  }
 0x5fc   :  { %16757 = vst [vmem:[#allocation113_spill] sm:$0xff] %v14265_v12  ;;  %16758 = vst [vmem:[#allocation114_spill] sm:$0xff] %v14267_v56 }
 0x5fd   :  { %v14211_v6 = vpack.c.bf16 %v1738_v11, %v1738_v11  ;;  %v14271_v11 = vld [vmem:[#allocation16 + $0xa0] ss:$16 sps:$4 sm:$0xff]  }
 0x5fe   :  { %16759 = vst [vmem:[#allocation115_spill] sm:$0xff] %v14271_v11 }
 0x5ff   :  { %1997 = vmatmul.mubr.bf16.vlgmr.msra.gmra.mrb[32].mxu0 %v14211_v6  ;;  %2038 = vmatmul.mubr.bf16.vlgmr.msra.gmra.mrb[24].mxu1 %v14211_v6 }
 0x600   :  { %2207 = vmatpush1.bf16.msra.mxu0 %v14207_v27  ;;  %2248 = vmatpush1.bf16.msra.mxu1 %v14209_v18 }
 0x601   :  { %2208 = vmatprep.subr.bf16.mxu0 %v14213_v48  ;;  %2249 = vmatprep.subr.bf16.mxu1 %v14215_v38 }
 0x602   :  { %2238 = vmatprep.mubr.bf16.mxu0 %v16752_v43  ;;  %2279 = vmatprep.mubr.bf16.mxu1 %v16752_v43 }
 0x604   :  { %2209 = vmatpush1.bf16.msra.mxu0 %v14221_v2  ;;  %2250 = vmatpush1.bf16.msra.mxu1 %v14223_v17 }
 0x605   :  { %2210 = vmatprep.subr.bf16.mxu0 %v14227_v23  ;;  %2251 = vmatprep.subr.bf16.mxu1 %v14229_v61 }
 0x608   :  { %2211 = vmatpush1.bf16.msra.mxu0 %v14235_v30  ;;  %2252 = vmatpush1.bf16.msra.mxu1 %v14237_v0 }
 0x609   :  { %2212 = vmatprep.subr.bf16.mxu0 %v14241_v15  ;;  %2253 = vmatprep.subr.bf16.mxu1 %v14243_v24 }
 0x60c   :  { %2213 = vmatpush1.bf16.msra.mxu0 %v14247_v20  ;;  %2254 = vmatpush1.bf16.msra.mxu1 %v14249_v5 }
 0x60d   :  { %2214 = vmatprep.subr.bf16.mxu0 %v14253_v54  ;;  %2255 = vmatprep.subr.bf16.mxu1 %v14255_v22  ;;  %v14279_v54 = vld [vmem:[#allocation16 + $0xcc] ss:$16 sps:$4 sm:$0xff]   ;;  %v14283_v22 = vld [vmem:[#allocation16 + $0xc0] ss:$16 sps:$4 sm:$0xff]  }
 0x610   :  { %2215 = vmatpush1.bf16.msra.mxu0 %v14259_v53  ;;  %2256 = vmatpush1.bf16.msra.mxu1 %v14261_v9  ;;  %v14285_v53 = vld [vmem:[#allocation16 + $0xc8] ss:$16 sps:$4 sm:$0xff]   ;;  %v14289_v9 = vld [vmem:[#allocation16 + $0xe4] ss:$16 sps:$4 sm:$0xff]  }
 0x611   :  { %2216 = vmatprep.subr.bf16.mxu0 %v14265_v12  ;;  %2257 = vmatprep.subr.bf16.mxu1 %v14267_v56  ;;  %v14291_v12 = vld [vmem:[#allocation16 + $0xec] ss:$16 sps:$4 sm:$0xff]   ;;  %v14295_v56 = vld [vmem:[#allocation16 + $0xe0] ss:$16 sps:$4 sm:$0xff]  }
 0x614   :  { %2217 = vmatpush1.bf16.msra.mxu0 %v14271_v11  ;;  %2258 = vmatpush1.bf16.msra.mxu1 %v14273_v10  ;;  %v14297_v11 = vld [vmem:[#allocation16 + $0xe8] ss:$16 sps:$4 sm:$0xff]  }
 0x615   :  { %2218 = vmatprep.subr.bf16.mxu0 %v14277_v45  ;;  %2259 = vmatprep.subr.bf16.mxu1 %v14279_v54 }
 0x618   :  { %2219 = vmatpush1.bf16.msra.mxu0 %v14283_v22  ;;  %2260 = vmatpush1.bf16.msra.mxu1 %v14285_v53 }
 0x619   :  { %2220 = vmatprep.subr.bf16.mxu0 %v14289_v9  ;;  %2261 = vmatprep.subr.bf16.mxu1 %v14291_v12 }
 0x61c   :  { %2221 = vmatpush1.bf16.msra.mxu0 %v14295_v56  ;;  %2262 = vmatpush1.bf16.msra.mxu1 %v14297_v11 }
 0x61d   :  { %2321 = vmatprep.subr.bf16.mxu0 %v13719_v21  ;;  %2362 = vmatprep.subr.bf16.mxu1 %v13885_v26  ;;  %v16760_v21 = vld [vmem:[#allocation48_spill] sm:$0xff] }
 0x61e   :  { %v16776_v26 = vld [vmem:[#allocation64_spill] sm:$0xff] }
 0x61f   :  { %2239 = vmatmul.mubr.bf16.vlgmr.msra.gmra.mrb[36].mxu0 %v16752_v43  ;;  %2280 = vmatmul.mubr.bf16.vlgmr.msra.gmra.mrb[28].mxu1 %v16752_v43 }
 0x620   :  { %2322 = vmatpush1.bf16.msra.mxu0 %v13740_v14  ;;  %2363 = vmatpush1.bf16.msra.mxu1 %v13894_v28  ;;  %v16761_v14 = vld [vmem:[#allocation49_spill] sm:$0xff] }
 0x621   :  { %2323 = vmatprep.subr.bf16.mxu0 %v13748_v51  ;;  %2364 = vmatprep.subr.bf16.mxu1 %v13901_v33  ;;  %v16762_v51 = vld [vmem:[#allocation50_spill] sm:$0xff] }
 0x622   :  { %2353 = vmatprep.mubr.bf16.mxu0 %v16752_v43  ;;  %2394 = vmatprep.mubr.bf16.mxu1 %v16752_v43 }
 0x624   :  { %2324 = vmatpush1.bf16.msra.mxu0 %v13757_v29  ;;  %2365 = vmatpush1.bf16.msra.mxu1 %v13908_v3  ;;  %v16763_v29 = vld [vmem:[#allocation51_spill] sm:$0xff] }
 0x625   :  { %2325 = vmatprep.subr.bf16.mxu0 %v13767_v63  ;;  %2366 = vmatprep.subr.bf16.mxu1 %v13914_v35  ;;  %v16764_v63 = vld [vmem:[#allocation52_spill] sm:$0xff] }
 0x628   :  { %2326 = vmatpush1.bf16.msra.mxu0 %v13778_v42  ;;  %2367 = vmatpush1.bf16.msra.mxu1 %v13922_v31  ;;  %v16765_v42 = vld [vmem:[#allocation53_spill] sm:$0xff] }
 0x629   :  { %2327 = vmatprep.subr.bf16.mxu0 %v13787_v1  ;;  %2368 = vmatprep.subr.bf16.mxu1 %v13928_v36  ;;  %v16766_v1 = vld [vmem:[#allocation54_spill] sm:$0xff] }
 0x62c   :  { %2328 = vmatpush1.bf16.msra.mxu0 %v13795_v55  ;;  %2369 = vmatpush1.bf16.msra.mxu1 %v13934_v37  ;;  %v16767_v55 = vld [vmem:[#allocation55_spill] sm:$0xff] }
 0x62d   :  { %2329 = vmatprep.subr.bf16.mxu0 %v13805_v57  ;;  %2370 = vmatprep.subr.bf16.mxu1 %v13940_v41  ;;  %v16768_v57 = vld [vmem:[#allocation56_spill] sm:$0xff] }
 0x630   :  { %2330 = vmatpush1.bf16.msra.mxu0 %v13817_v62  ;;  %2371 = vmatpush1.bf16.msra.mxu1 %v13946_v34  ;;  %v16769_v62 = vld [vmem:[#allocation57_spill] sm:$0xff] }
 0x631   :  { %2331 = vmatprep.subr.bf16.mxu0 %v13827_v32  ;;  %2372 = vmatprep.subr.bf16.mxu1 %v13952_v39  ;;  %v16770_v32 = vld [vmem:[#allocation58_spill] sm:$0xff] }
 0x634   :  { %2332 = vmatpush1.bf16.msra.mxu0 %v13836_v4  ;;  %2373 = vmatpush1.bf16.msra.mxu1 %v13958_v40  ;;  %v16771_v4 = vld [vmem:[#allocation59_spill] sm:$0xff] }
 0x635   :  { %2333 = vmatprep.subr.bf16.mxu0 %v13850_v7  ;;  %2374 = vmatprep.subr.bf16.mxu1 %v13964_v44  ;;  %v16772_v7 = vld [vmem:[#allocation60_spill] sm:$0xff] }
 0x638   :  { %2334 = vmatpush1.bf16.msra.mxu0 %v13865_v13  ;;  %2375 = vmatpush1.bf16.msra.mxu1 %v13970_v46  ;;  %v16773_v13 = vld [vmem:[#allocation61_spill] sm:$0xff] }
 0x639   :  { %2335 = vmatprep.subr.bf16.mxu0 %v13873_v19  ;;  %2376 = vmatprep.subr.bf16.mxu1 %v13976_v47  ;;  %v16774_v19 = vld [vmem:[#allocation62_spill] sm:$0xff] }
 0x63c   :  { %2336 = vmatpush1.bf16.msra.mxu0 %v13880_v25  ;;  %2377 = vmatpush1.bf16.msra.mxu1 %v13982_v49  ;;  %v16775_v25 = vld [vmem:[#allocation63_spill] sm:$0xff] }
 0x63d   :  { %2433 = vmatprep.subr.bf16.mxu0 %v13988_v50  ;;  %2474 = vmatprep.subr.bf16.mxu1 %v13990_v16 }
 0x63f   :  { %2354 = vmatmul.mubr.bf16.vlgmr.msra.gmra.mrb[40].mxu0 %v14211_v6  ;;  %2395 = vmatmul.mubr.bf16.vlgmr.msra.gmra.mrb[32].mxu1 %v14211_v6  ;;  %v16777_v6 = vld [vmem:[#allocation65_spill] sm:$0xff] }
 0x640   :  { %2434 = vmatpush1.bf16.msra.mxu0 %v13992_v52  ;;  %2475 = vmatpush1.bf16.msra.mxu1 %v13994_v58 }
 0x641   :  { %2435 = vmatprep.subr.bf16.mxu0 %v14000_v59  ;;  %2476 = vmatprep.subr.bf16.mxu1 %v14002_v60 }
 0x642   :  { %2465 = vmatprep.mubr.bf16.mxu0 %v16752_v43  ;;  %2506 = vmatprep.mubr.bf16.mxu1 %v16752_v43 }
 0x644   :  { %2436 = vmatpush1.bf16.msra.mxu0 %v16760_v21  ;;  %2477 = vmatpush1.bf16.msra.mxu1 %v16761_v14 }
 0x645   :  { %2437 = vmatprep.subr.bf16.mxu0 %v16762_v51  ;;  %2478 = vmatprep.subr.bf16.mxu1 %v16763_v29  ;;  %v14377_v29 = vld [vmem:[#allocation17] sm:$0xf]  ;;  %v16790_v51 = vld [vmem:[#allocation78_spill] sm:$0xff] }
 0x648   :  { %2438 = vmatpush1.bf16.msra.mxu0 %v16764_v63  ;;  %2479 = vmatpush1.bf16.msra.mxu1 %v16765_v42 }
 0x649   :  { %2439 = vmatprep.subr.bf16.mxu0 %v16766_v1  ;;  %2480 = vmatprep.subr.bf16.mxu1 %v16767_v55  ;;  %v16778_v55 = vld [vmem:[#allocation66_spill] sm:$0xff] }
 0x64c   :  { %2440 = vmatpush1.bf16.msra.mxu0 %v16768_v57  ;;  %2481 = vmatpush1.bf16.msra.mxu1 %v16769_v62  ;;  %v16779_v57 = vld [vmem:[#allocation67_spill] sm:$0xff]  ;;  %v16780_v62 = vld [vmem:[#allocation68_spill] sm:$0xff] }
 0x64d   :  { %2441 = vmatprep.subr.bf16.mxu0 %v16770_v32  ;;  %2482 = vmatprep.subr.bf16.mxu1 %v16771_v4  ;;  %v16781_v32 = vld [vmem:[#allocation69_spill] sm:$0xff]  ;;  %v16782_v4 = vld [vmem:[#allocation70_spill] sm:$0xff] }
 0x650   :  { %2442 = vmatpush1.bf16.msra.mxu0 %v16772_v7  ;;  %2483 = vmatpush1.bf16.msra.mxu1 %v16773_v13  ;;  %v16783_v7 = vld [vmem:[#allocation71_spill] sm:$0xff]  ;;  %v16784_v13 = vld [vmem:[#allocation72_spill] sm:$0xff] }
 0x651   :  { %2443 = vmatprep.subr.bf16.mxu0 %v16774_v19  ;;  %2484 = vmatprep.subr.bf16.mxu1 %v16775_v25  ;;  %v16785_v19 = vld [vmem:[#allocation73_spill] sm:$0xff]  ;;  %v16786_v25 = vld [vmem:[#allocation74_spill] sm:$0xff] }
 0x654   :  { %2444 = vmatpush1.bf16.msra.mxu0 %v16776_v26  ;;  %2485 = vmatpush1.bf16.msra.mxu1 %v16777_v6  ;;  %v16787_v26 = vld [vmem:[#allocation75_spill] sm:$0xff] }
 0x655   :  { %2445 = vmatprep.subr.bf16.mxu0 %v16778_v55  ;;  %2486 = vmatprep.subr.bf16.mxu1 %v16779_v57 }
 0x658   :  { %2446 = vmatpush1.bf16.msra.mxu0 %v16780_v62  ;;  %2487 = vmatpush1.bf16.msra.mxu1 %v16781_v32 }
 0x659   :  { %2447 = vmatprep.subr.bf16.mxu0 %v16782_v4  ;;  %2488 = vmatprep.subr.bf16.mxu1 %v16783_v7  ;;  %v16788_v4 = vld [vmem:[#allocation76_spill] sm:$0xff] }
 0x65a   :  { %v14381_v7 = vrot.slane %v14377_v29, %v16788_v4 }
 0x65c   :  { %2448 = vmatpush1.bf16.msra.mxu0 %v16784_v13  ;;  %2489 = vmatpush1.bf16.msra.mxu1 %v16785_v19  ;;  %16789 = vst [vmem:[#allocation116_spill] sm:$0xff] %v14381_v7 }
 0x65d   :  { %2515 = vmatprep.subr.bf16.mxu0 %v16786_v25  ;;  %2556 = vmatprep.subr.bf16.mxu1 %v16787_v26  ;;  %v14385_v25 = vrot.slane %v14377_v29, %v16790_v51  ;;  %v16792_v51 = vld [vmem:[#allocation79_spill] sm:$0xff] }
 0x65f   :  { %16791 = vst [vmem:[#allocation117_spill] sm:$0xff] %v14385_v25 }
 0x6d2   :  { %v1998_v6 = vpop.f32.mrb[32].mxu0  ;;  %v2039_v55 = vpop.f32.mrb[24].mxu1 }
 0x6d3   :  { %v2000_v1 = vpop.f32.mrb[33].mxu0  ;;  %v2041_v57 = vpop.f32.mrb[25].mxu1 }
 0x6d4   :  { %v2002_v42 = vpop.f32.mrb[34].mxu0  ;;  %v2043_v62 = vpop.f32.mrb[26].mxu1 }
 0x6d5   :  { %v2003_v63 = vpop.f32.mrb[35].mxu0  ;;  %v2044_v32 = vpop.f32.mrb[27].mxu1 }
 0x6f2   :  { %v2240_v13 = vpop.f32.mrb[36].mxu0  ;;  %v2281_v19 = vpop.f32.mrb[28].mxu1 }
 0x6f3   :  { %v2241_v26 = vadd.f32 %v2240_v13, %v1998_v6  ;;  %v14387_v14 = vadd.f32 %v2281_v19, %v2039_v55  ;;  %v2242_v21 = vpop.f32.mrb[37].mxu0  ;;  %v2283_v42 = vpop.f32.mrb[29].mxu1  ;;  %v14393_v55 = vrot.slane %v14377_v29, %v16792_v51  ;;  %v16796_v51 = vld [vmem:[#allocation82_spill] sm:$0xff] }
 0x6f4   :  { %v2243_v62 = vadd.f32 %v2242_v21, %v2000_v1  ;;  %v2284_v63 = vadd.f32 %v2283_v42, %v2041_v57  ;;  %v2244_v32 = vpop.f32.mrb[38].mxu0  ;;  %v2285_v60 = vpop.f32.mrb[30].mxu1  ;;  %v16795_v42 = vld [vmem:[#allocation81_spill] sm:$0xff] }
 0x6f5   :  { %v2288_v59 = vadd.f32 %v2241_v26, %v14381_v7  ;;  %v2245_v58 = vpop.f32.mrb[39].mxu0  ;;  %v2286_v4 = vpop.f32.mrb[31].mxu1  ;;  %16793 = vst [vmem:[#allocation118_spill] sm:$0xff] %v14393_v55  ;;  %v16794_v26 = vld [vmem:[#allocation80_spill] sm:$0xff] }
 0x6f6   :  { %v2289_v52 = vadd.f32 %v2243_v62, %v14385_v25  ;;  %v2291_v13 = vadd.f32 %v2284_v63, %v14393_v55  ;;  %v16797_v55 = vld [vmem:[#allocation83_spill] sm:$0xff] }
 0x6f7   :  { %v9977_v16 = vmul.f32 -1.442695, %v2288_v59 }
 0x6f8   :  { %v9978_v50 = vmul.f32 -1.442695, %v2289_v52 }
 0x6f9   :  { %11395 = vpow2.f32 %v9977_v16 }
 0x6fa   :  { %11397 = vpow2.f32 %v9978_v50 }
 0x6fb   :  { %11399 = vtanh.f32 %v2291_v13 }
 0x703   :  { %v11396_v21 = vpop.eup %11395 }
 0x704   :  { %v2301_v1 = vadd.f32 1.0, %v11396_v21  ;;  %v11398_v57 = vpop.eup %11397 }
 0x705   :  { %v2302_v60 = vadd.f32 1.0, %v11398_v57  ;;  %v11400_v58 = vpop.eup %11399 }
 0x706   :  { %11401 = vrcp.f32 %v2301_v1 }
 0x707   :  { %11403 = vrcp.f32 %v2302_v60 }
 0x710   :  { %v11402_v4 = vpop.eup %11401 }
 0x711   :  { %v2312_v19 = vmul.f32 %v11402_v4, %v11400_v58  ;;  %v11404_v59 = vpop.eup %11403 }
 0x712   :  { %v2355_v52 = vpop.f32.mrb[40].mxu0  ;;  %v2396_v16 = vpop.f32.mrb[32].mxu1  ;;  %v2311_v50 = vmul.f32 0.0, %v11404_v59 }
 0x713   :  { %v2403_v6 = vadd.f32 %v2355_v52, %v16794_v26  ;;  %v2405_v62 = vadd.f32 %v2396_v16, %v16795_v42  ;;  %v2357_v32 = vpop.f32.mrb[41].mxu0  ;;  %v2398_v63 = vpop.f32.mrb[33].mxu1 }
 0x714   :  { %v2404_v21 = vadd.f32 %v2357_v32, %v16796_v51  ;;  %v2406_v13 = vadd.f32 %v2398_v63, %v16797_v55  ;;  %v2359_v1 = vpop.f32.mrb[42].mxu0  ;;  %v2400_v57 = vpop.f32.mrb[34].mxu1  ;;  %v14400_v60 = vadd.f32 %v2312_v19, %v2311_v50 }
 0x715   :  { %v9980_v25 = vmul.f32 -1.442695, %v2403_v6  ;;  %v2360_v58 = vpop.f32.mrb[43].mxu0  ;;  %v2401_v4 = vpop.f32.mrb[35].mxu1  ;;  %v9982_v59 = vmul.f32 -1.442695, %v2405_v62 }
 0x716   :  { %v9981_v7 = vmul.f32 -1.442695, %v2404_v21 }
 0x717   :  { %11405 = vpow2.f32 %v9980_v25 }
 0x718   :  { %11407 = vpow2.f32 %v9981_v7  ;;  %v16798_v7 = vld [vmem:[#allocation77_spill] sm:$0xff] }
 0x719   :  { %11409 = vtanh.f32 %v2406_v13  ;;  %v14408_v25 = vrot.slane %v14377_v29, %v16798_v7  ;;  %v16799_v29 = vld [vmem:[#allocation109_spill] sm:$0xff] }
 0x71a   :  { %11411 = vpow2.f32 %v9982_v59  ;;  %v16800_v59 = vld [vmem:[#allocation110_spill] sm:$0xff] }
 0x71b   :  { %v2290_v62 = vadd.f32 %v14387_v14, %v14408_v25 }
 0x71d   :  { %v9979_v1 = vmul.f32 -1.442695, %v2290_v62  ;;  %v14464_v62 = vld [vmem:[%s16683_s2] ss:$16 sps:$4 sm:$0xff]  }
 0x721   :  { %v11406_v52 = vpop.eup %11405 }
 0x722   :  { %v2416_v26 = vadd.f32 1.0, %v11406_v52  ;;  %v11408_v16 = vpop.eup %11407  ;;  %v16801_v52 = vld [vmem:[#allocation111_spill] sm:$0xff] }
 0x723   :  { %v2417_v51 = vadd.f32 1.0, %v11408_v16  ;;  %v11410_v55 = vpop.eup %11409  ;;  %v16803_v16 = vld [vmem:[#allocation113_spill] sm:$0xff] }
 0x724   :  { %11413 = vrcp.f32 %v2416_v26  ;;  %v11412_v42 = vpop.eup %11411  ;;  %v16802_v26 = vld [vmem:[#allocation112_spill] sm:$0xff] }
 0x725   :  { %11415 = vrcp.f32 %v2417_v51  ;;  %v2418_v6 = vadd.f32 1.0, %v11412_v42  ;;  %v16804_v51 = vld [vmem:[#allocation114_spill] sm:$0xff] }
 0x727   :  { %11417 = vrcp.f32 %v2418_v6  ;;  %v14452_v6 = vld [vmem:[%s16683_s2 + $0x4] ss:$16 sps:$4 sm:$0xff]  }
 0x72e   :  { %v11414_v32 = vpop.eup %11413 }
 0x72f   :  { %v2427_v19 = vmul.f32 %v11414_v32, %v11410_v55  ;;  %v11416_v50 = vpop.eup %11415  ;;  %v16805_v55 = vld [vmem:[#allocation115_spill] sm:$0xff] }
 0x730   :  { %v2426_v63 = vmul.f32 %v11416_v50, %v14204_v8 }
 0x731   :  { %v11418_v13 = vpop.eup %11417 }
 0x732   :  { %v14403_v21 = vadd.f32 %v2427_v19, %v2426_v63  ;;  %v14458_v63 = vld [vmem:[%s16683_s2 + $0xc] ss:$16 sps:$4 sm:$0xff]  }
 0x734   :  { %11419 = vtanh.f32 %v14403_v21 }
 0x735   :  { %11421 = vpow2.f32 %v9979_v1  ;;  %v14480_v1 = vld [vmem:[%s16683_s2 + $0x20] ss:$16 sps:$4 sm:$0xff]  }
 0x736   :  { %11423 = vtanh.f32 %v14400_v60 }
 0x73e   :  { %v11420_v57 = vpop.eup %11419 }
 0x73f   :  { %v2430_v58 = vmul.f32 %v11420_v57, %v11418_v13  ;;  %v11422_v8 = vpop.eup %11421  ;;  %v14471_v13 = vld [vmem:[%s16683_s2 + $0x24] ss:$16 sps:$4 sm:$0xff]  }
 0x740   :  { %v2303_v14 = vadd.f32 1.0, %v11422_v8  ;;  %v11424_v42 = vpop.eup %11423  ;;  %v16816_v57 = vld [vmem:[#allocation42_spill] sm:$0xff] }
 0x741   :  { %v14412_v4 = vpack.c.bf16 %v2430_v58, %v2430_v58  ;;  %v16818_v58 = vld [vmem:[#allocation44_spill] sm:$0xff]  ;;  %v16820_v8 = vld [vmem:[#allocation46_spill] sm:$0xff] }
 0x742   :  { %11425 = vrcp.f32 %v2303_v14  ;;  %v16821_v14 = vld [vmem:[#allocation47_spill] sm:$0xff] }
 0x743   :  { %2466 = vmatmul.mubr.bf16.vlgmr.msra.gmra.mrb[44].mxu0 %v14412_v4  ;;  %2507 = vmatmul.mubr.bf16.vlgmr.msra.gmra.mrb[36].mxu1 %v14412_v4 }
 0x744   :  { %2516 = vmatpush1.bf16.msra.mxu0 %v14207_v27  ;;  %2557 = vmatpush1.bf16.msra.mxu1 %v14209_v18 }
 0x745   :  { %2517 = vmatprep.subr.bf16.mxu0 %v14213_v48  ;;  %2558 = vmatprep.subr.bf16.mxu1 %v14215_v38 }
 0x746   :  { %2547 = vmatprep.mubr.bf16.mxu0 %v16752_v43  ;;  %2588 = vmatprep.mubr.bf16.mxu1 %v16752_v43 }
 0x748   :  { %2518 = vmatpush1.bf16.msra.mxu0 %v14221_v2  ;;  %2559 = vmatpush1.bf16.msra.mxu1 %v14223_v17 }
 0x749   :  { %2519 = vmatprep.subr.bf16.mxu0 %v14227_v23  ;;  %2560 = vmatprep.subr.bf16.mxu1 %v14229_v61 }
 0x74c   :  { %2520 = vmatpush1.bf16.msra.mxu0 %v14235_v30  ;;  %2561 = vmatpush1.bf16.msra.mxu1 %v14237_v0  ;;  %v11426_v32 = vpop.eup %11425 }
 0x74d   :  { %2521 = vmatprep.subr.bf16.mxu0 %v14241_v15  ;;  %2562 = vmatprep.subr.bf16.mxu1 %v14243_v24  ;;  %v2315_v19 = vmul.f32 %v11426_v32, %v11424_v42  ;;  %v16823_v42 = vld [vmem:[#allocation49_spill] sm:$0xff]  ;;  %v16824_v32 = vld [vmem:[#allocation50_spill] sm:$0xff] }
 0x74f   :  { %v2431_v50 = vpack.c.bf16 %v2315_v19, %v2315_v19  ;;  %v16825_v19 = vld [vmem:[#allocation51_spill] sm:$0xff] }
 0x750   :  { %2522 = vmatpush1.bf16.msra.mxu0 %v14247_v20  ;;  %2563 = vmatpush1.bf16.msra.mxu1 %v14249_v5 }
 0x751   :  { %2523 = vmatprep.subr.bf16.mxu0 %v16799_v29  ;;  %2564 = vmatprep.subr.bf16.mxu1 %v16800_v59 }
 0x754   :  { %2524 = vmatpush1.bf16.msra.mxu0 %v16801_v52  ;;  %2565 = vmatpush1.bf16.msra.mxu1 %v16802_v26 }
 0x755   :  { %2525 = vmatprep.subr.bf16.mxu0 %v16803_v16  ;;  %2566 = vmatprep.subr.bf16.mxu1 %v16804_v51 }
 0x758   :  { %2526 = vmatpush1.bf16.msra.mxu0 %v16805_v55  ;;  %2567 = vmatpush1.bf16.msra.mxu1 %v14273_v10 }
 0x759   :  { %2527 = vmatprep.subr.bf16.mxu0 %v14277_v45  ;;  %2568 = vmatprep.subr.bf16.mxu1 %v14279_v54 }
 0x75c   :  { %2528 = vmatpush1.bf16.msra.mxu0 %v14283_v22  ;;  %2569 = vmatpush1.bf16.msra.mxu1 %v14285_v53 }
 0x75d   :  { %2529 = vmatprep.subr.bf16.mxu0 %v14289_v9  ;;  %2570 = vmatprep.subr.bf16.mxu1 %v14291_v12 }
 0x760   :  { %2530 = vmatpush1.bf16.msra.mxu0 %v14295_v56  ;;  %2571 = vmatpush1.bf16.msra.mxu1 %v14297_v11 }
 0x761   :  { %2630 = vmatprep.subr.bf16.mxu0 %v14452_v6  ;;  %2671 = vmatprep.subr.bf16.mxu1 %v14458_v63 }
 0x763   :  { %2548 = vmatmul.mubr.bf16.vlgmr.msra.gmra.mrb[48].mxu0 %v2431_v50  ;;  %2589 = vmatmul.mubr.bf16.vlgmr.msra.gmra.mrb[40].mxu1 %v2431_v50  ;;  %v16827_v50 = vld [vmem:[#allocation53_spill] sm:$0xff] }
 0x764   :  { %2631 = vmatpush1.bf16.msra.mxu0 %v14464_v62  ;;  %2672 = vmatpush1.bf16.msra.mxu1 %v13894_v28  ;;  %v14487_v28 = vld [vmem:[%s16683_s2 + $0x44] ss:$16 sps:$4 sm:$0xff]  }
 0x765   :  { %2632 = vmatprep.subr.bf16.mxu0 %v14471_v13  ;;  %2673 = vmatprep.subr.bf16.mxu1 %v13901_v33  ;;  %v14494_v33 = vld [vmem:[%s16683_s2 + $0x40] ss:$16 sps:$4 sm:$0xff]  }
 0x766   :  { %2662 = vmatprep.mubr.bf16.mxu0 %v16752_v43  ;;  %2703 = vmatprep.mubr.bf16.mxu1 %v16752_v43 }
 0x768   :  { %2633 = vmatpush1.bf16.msra.mxu0 %v14480_v1  ;;  %2674 = vmatpush1.bf16.msra.mxu1 %v13908_v3  ;;  %v14501_v3 = vld [vmem:[%s16683_s2 + $0x64] ss:$16 sps:$4 sm:$0xff]  }
 0x769   :  { %2634 = vmatprep.subr.bf16.mxu0 %v14487_v28  ;;  %2675 = vmatprep.subr.bf16.mxu1 %v13914_v35  ;;  %16806 = vst [vmem:[#allocation80_spill] sm:$0xff] %v14501_v3  ;;  %v14508_v35 = vld [vmem:[%s16683_s2 + $0x60] ss:$16 sps:$4 sm:$0xff]  }
 0x76a   :  { %16807 = vst [vmem:[#allocation81_spill] sm:$0xff] %v14508_v35 }
 0x76c   :  { %2635 = vmatpush1.bf16.msra.mxu0 %v14494_v33  ;;  %2676 = vmatpush1.bf16.msra.mxu1 %v13922_v31  ;;  %v14515_v31 = vld [vmem:[%s16683_s2 + $0x84] ss:$16 sps:$4 sm:$0xff]  }
 0x76d   :  { %2636 = vmatprep.subr.bf16.mxu0 %v14501_v3  ;;  %2677 = vmatprep.subr.bf16.mxu1 %v13928_v36  ;;  %16808 = vst [vmem:[#allocation82_spill] sm:$0xff] %v14515_v31  ;;  %v14522_v36 = vld [vmem:[%s16683_s2 + $0x80] ss:$16 sps:$4 sm:$0xff]  }
 0x76e   :  { %16809 = vst [vmem:[#allocation83_spill] sm:$0xff] %v14522_v36  ;;  %v16851_v3 = vld [vmem:[#allocation117_spill] sm:$0xff] }
 0x770   :  { %2637 = vmatpush1.bf16.msra.mxu0 %v14508_v35  ;;  %2678 = vmatpush1.bf16.msra.mxu1 %v13934_v37  ;;  %v14529_v37 = vld [vmem:[%s16683_s2 + $0xa4] ss:$16 sps:$4 sm:$0xff]  }
 0x771   :  { %2638 = vmatprep.subr.bf16.mxu0 %v14515_v31  ;;  %2679 = vmatprep.subr.bf16.mxu1 %v13940_v41  ;;  %16810 = vst [vmem:[#allocation109_spill] sm:$0xff] %v14529_v37  ;;  %v14536_v41 = vld [vmem:[%s16683_s2 + $0xa0] ss:$16 sps:$4 sm:$0xff]  }
 0x772   :  { %16811 = vst [vmem:[#allocation110_spill] sm:$0xff] %v14536_v41 }
 0x774   :  { %2639 = vmatpush1.bf16.msra.mxu0 %v14522_v36  ;;  %2680 = vmatpush1.bf16.msra.mxu1 %v13946_v34  ;;  %v14543_v34 = vld [vmem:[%s16683_s2 + $0xc4] ss:$16 sps:$4 sm:$0xff]  }
 0x775   :  { %2640 = vmatprep.subr.bf16.mxu0 %v14529_v37  ;;  %2681 = vmatprep.subr.bf16.mxu1 %v13952_v39  ;;  %16812 = vst [vmem:[#allocation111_spill] sm:$0xff] %v14543_v34  ;;  %v14550_v39 = vld [vmem:[%s16683_s2 + $0xc0] ss:$16 sps:$4 sm:$0xff]  }
 0x776   :  { %16813 = vst [vmem:[#allocation112_spill] sm:$0xff] %v14550_v39 }
 0x778   :  { %2641 = vmatpush1.bf16.msra.mxu0 %v14536_v41  ;;  %2682 = vmatpush1.bf16.msra.mxu1 %v13958_v40  ;;  %v14557_v40 = vld [vmem:[%s16683_s2 + $0xe4] ss:$16 sps:$4 sm:$0xff]  }
 0x779   :  { %2642 = vmatprep.subr.bf16.mxu0 %v14543_v34  ;;  %2683 = vmatprep.subr.bf16.mxu1 %v13964_v44  ;;  %16814 = vst [vmem:[#allocation113_spill] sm:$0xff] %v14557_v40  ;;  %v14564_v44 = vld [vmem:[%s16683_s2 + $0xe0] ss:$16 sps:$4 sm:$0xff]  }
 0x77a   :  { %16815 = vst [vmem:[#allocation114_spill] sm:$0xff] %v14564_v44 }
 0x77c   :  { %2643 = vmatpush1.bf16.msra.mxu0 %v14550_v39  ;;  %2684 = vmatpush1.bf16.msra.mxu1 %v13970_v46  ;;  %v16817_v46 = vld [vmem:[#allocation43_spill] sm:$0xff] }
 0x77d   :  { %2644 = vmatprep.subr.bf16.mxu0 %v14557_v40  ;;  %2685 = vmatprep.subr.bf16.mxu1 %v13976_v47  ;;  %v16819_v47 = vld [vmem:[#allocation45_spill] sm:$0xff] }
 0x780   :  { %2645 = vmatpush1.bf16.msra.mxu0 %v14564_v44  ;;  %2686 = vmatpush1.bf16.msra.mxu1 %v13982_v49  ;;  %v16822_v49 = vld [vmem:[#allocation48_spill] sm:$0xff] }
 0x781   :  { %2742 = vmatprep.subr.bf16.mxu0 %v16816_v57  ;;  %2783 = vmatprep.subr.bf16.mxu1 %v16817_v46  ;;  %v16828_v57 = vld [vmem:[#allocation54_spill] sm:$0xff]  ;;  %v16829_v46 = vld [vmem:[#allocation55_spill] sm:$0xff] }
 0x783   :  { %2663 = vmatmul.mubr.bf16.vlgmr.msra.gmra.mrb[52].mxu0 %v14412_v4  ;;  %2704 = vmatmul.mubr.bf16.vlgmr.msra.gmra.mrb[44].mxu1 %v14412_v4  ;;  %v16826_v4 = vld [vmem:[#allocation52_spill] sm:$0xff] }
 0x784   :  { %2743 = vmatpush1.bf16.msra.mxu0 %v16818_v58  ;;  %2784 = vmatpush1.bf16.msra.mxu1 %v16819_v47  ;;  %v16830_v58 = vld [vmem:[#allocation56_spill] sm:$0xff]  ;;  %v16831_v47 = vld [vmem:[#allocation57_spill] sm:$0xff] }
 0x785   :  { %2744 = vmatprep.subr.bf16.mxu0 %v16820_v8  ;;  %2785 = vmatprep.subr.bf16.mxu1 %v16821_v14  ;;  %v16832_v8 = vld [vmem:[#allocation58_spill] sm:$0xff]  ;;  %v16833_v14 = vld [vmem:[#allocation59_spill] sm:$0xff] }
 0x786   :  { %2774 = vmatprep.mubr.bf16.mxu0 %v16752_v43  ;;  %2815 = vmatprep.mubr.bf16.mxu1 %v16752_v43 }
 0x788   :  { %2745 = vmatpush1.bf16.msra.mxu0 %v16822_v49  ;;  %2786 = vmatpush1.bf16.msra.mxu1 %v16823_v42  ;;  %v16834_v49 = vld [vmem:[#allocation60_spill] sm:$0xff]  ;;  %v16835_v42 = vld [vmem:[#allocation61_spill] sm:$0xff] }
 0x789   :  { %2746 = vmatprep.subr.bf16.mxu0 %v16824_v32  ;;  %2787 = vmatprep.subr.bf16.mxu1 %v16825_v19  ;;  %v16836_v32 = vld [vmem:[#allocation62_spill] sm:$0xff]  ;;  %v16837_v19 = vld [vmem:[#allocation63_spill] sm:$0xff] }
 0x78c   :  { %2747 = vmatpush1.bf16.msra.mxu0 %v16826_v4  ;;  %2788 = vmatpush1.bf16.msra.mxu1 %v16827_v50  ;;  %v16838_v4 = vld [vmem:[#allocation64_spill] sm:$0xff]  ;;  %v16839_v50 = vld [vmem:[#allocation65_spill] sm:$0xff] }
 0x78d   :  { %2748 = vmatprep.subr.bf16.mxu0 %v16828_v57  ;;  %2789 = vmatprep.subr.bf16.mxu1 %v16829_v46  ;;  %v16840_v57 = vld [vmem:[#allocation66_spill] sm:$0xff]  ;;  %v16841_v46 = vld [vmem:[#allocation67_spill] sm:$0xff] }
 0x790   :  { %2749 = vmatpush1.bf16.msra.mxu0 %v16830_v58  ;;  %2790 = vmatpush1.bf16.msra.mxu1 %v16831_v47  ;;  %v16842_v58 = vld [vmem:[#allocation68_spill] sm:$0xff]  ;;  %v16843_v47 = vld [vmem:[#allocation69_spill] sm:$0xff] }
 0x791   :  { %2750 = vmatprep.subr.bf16.mxu0 %v16832_v8  ;;  %2791 = vmatprep.subr.bf16.mxu1 %v16833_v14  ;;  %v16844_v8 = vld [vmem:[#allocation70_spill] sm:$0xff]  ;;  %v16845_v14 = vld [vmem:[#allocation71_spill] sm:$0xff] }
 0x794   :  { %2751 = vmatpush1.bf16.msra.mxu0 %v16834_v49  ;;  %2792 = vmatpush1.bf16.msra.mxu1 %v16835_v42  ;;  %v16846_v49 = vld [vmem:[#allocation72_spill] sm:$0xff]  ;;  %v16847_v42 = vld [vmem:[#allocation73_spill] sm:$0xff] }
 0x795   :  { %2752 = vmatprep.subr.bf16.mxu0 %v16836_v32  ;;  %2793 = vmatprep.subr.bf16.mxu1 %v16837_v19  ;;  %v16848_v32 = vld [vmem:[#allocation74_spill] sm:$0xff]  ;;  %v16849_v19 = vld [vmem:[#allocation75_spill] sm:$0xff] }
 0x798   :  { %2753 = vmatpush1.bf16.msra.mxu0 %v16838_v4  ;;  %2794 = vmatpush1.bf16.msra.mxu1 %v16839_v50 }
 0x799   :  { %2754 = vmatprep.subr.bf16.mxu0 %v16840_v57  ;;  %2795 = vmatprep.subr.bf16.mxu1 %v16841_v46 }
 0x79c   :  { %2755 = vmatpush1.bf16.msra.mxu0 %v16842_v58  ;;  %2796 = vmatpush1.bf16.msra.mxu1 %v16843_v47 }
 0x79d   :  { %2756 = vmatprep.subr.bf16.mxu0 %v16844_v8  ;;  %2797 = vmatprep.subr.bf16.mxu1 %v16845_v14 }
 0x7a0   :  { %2757 = vmatpush1.bf16.msra.mxu0 %v16846_v49  ;;  %2798 = vmatpush1.bf16.msra.mxu1 %v16847_v42 }
 0x7a1   :  { %2824 = vmatprep.subr.bf16.mxu0 %v16848_v32  ;;  %2865 = vmatprep.subr.bf16.mxu1 %v16849_v19  ;;  %v16850_v19 = vld [vmem:[#allocation116_spill] sm:$0xff] }
 0x816   :  { %v2467_v4 = vpop.f32.mrb[44].mxu0  ;;  %v2508_v50 = vpop.f32.mrb[36].mxu1 }
 0x817   :  { %v2469_v57 = vpop.f32.mrb[45].mxu0  ;;  %v2510_v46 = vpop.f32.mrb[37].mxu1 }
 0x818   :  { %v2471_v7 = vpop.f32.mrb[46].mxu0  ;;  %v2512_v58 = vpop.f32.mrb[38].mxu1 }
 0x819   :  { %v2472_v44 = vpop.f32.mrb[47].mxu0  ;;  %v2513_v47 = vpop.f32.mrb[39].mxu1 }
 0x81a   :  { %v16852_v47 = vld [vmem:[#allocation118_spill] sm:$0xff] }
 0x836   :  { %v2549_v40 = vpop.f32.mrb[48].mxu0  ;;  %v2590_v8 = vpop.f32.mrb[40].mxu1 }
 0x837   :  { %v2550_v39 = vadd.f32 %v2549_v40, %v2467_v4  ;;  %v14606_v14 = vadd.f32 %v2590_v8, %v2508_v50  ;;  %v2551_v49 = vpop.f32.mrb[49].mxu0  ;;  %v2592_v34 = vpop.f32.mrb[41].mxu1 }
 0x838   :  { %v2552_v42 = vadd.f32 %v2551_v49, %v2469_v57  ;;  %v2593_v41 = vadd.f32 %v2592_v34, %v2510_v46  ;;  %v2553_v32 = vpop.f32.mrb[50].mxu0  ;;  %v2594_v37 = vpop.f32.mrb[42].mxu1  ;;  %v16853_v49 = vld [vmem:[#allocation84_spill] sm:$0xff] }
 0x839   :  { %v2597_v36 = vadd.f32 %v2550_v39, %v16850_v19  ;;  %v2554_v31 = vpop.f32.mrb[51].mxu0  ;;  %v2595_v35 = vpop.f32.mrb[43].mxu1  ;;  %v16854_v32 = vld [vmem:[#allocation85_spill] sm:$0xff] }
 0x83a   :  { %v2598_v7 = vadd.f32 %v2552_v42, %v16851_v3  ;;  %v2600_v40 = vadd.f32 %v2593_v41, %v16852_v47 }
 0x83b   :  { %v9983_v58 = vmul.f32 -1.442695, %v2597_v36 }
 0x83c   :  { %v9984_v44 = vmul.f32 -1.442695, %v2598_v7 }
 0x83d   :  { %11427 = vpow2.f32 %v9983_v58 }
 0x83e   :  { %11429 = vpow2.f32 %v9984_v44  ;;  %v16855_v44 = vld [vmem:[#allocation86_spill] sm:$0xff] }
 0x83f   :  { %11431 = vtanh.f32 %v2600_v40  ;;  %v16856_v40 = vld [vmem:[#allocation87_spill] sm:$0xff] }
 0x847   :  { %v11428_v4 = vpop.eup %11427 }
 0x848   :  { %v2610_v50 = vadd.f32 1.0, %v11428_v4  ;;  %v11430_v8 = vpop.eup %11429 }
 0x849   :  { %v2611_v34 = vadd.f32 1.0, %v11430_v8  ;;  %v11432_v37 = vpop.eup %11431 }
 0x84a   :  { %11433 = vrcp.f32 %v2610_v50 }
 0x84b   :  { %11435 = vrcp.f32 %v2611_v34 }
 0x854   :  { %v11434_v57 = vpop.eup %11433 }
 0x855   :  { %v2621_v39 = vmul.f32 %v11434_v57, %v11432_v37  ;;  %v11436_v31 = vpop.eup %11435 }
 0x856   :  { %v2664_v35 = vpop.f32.mrb[52].mxu0  ;;  %v2705_v46 = vpop.f32.mrb[44].mxu1  ;;  %v2620_v36 = vmul.f32 %v11436_v31, %v14400_v60 }
 0x857   :  { %v2712_v42 = vadd.f32 %v2664_v35, %v16853_v49  ;;  %v2714_v7 = vadd.f32 %v2705_v46, %v16854_v32  ;;  %v2666_v41 = vpop.f32.mrb[53].mxu0  ;;  %v2707_v58 = vpop.f32.mrb[45].mxu1 }
 0x858   :  { %v2713_v4 = vadd.f32 %v2666_v41, %v16855_v44  ;;  %v2715_v50 = vadd.f32 %v2707_v58, %v16856_v40  ;;  %v2668_v8 = vpop.f32.mrb[54].mxu0  ;;  %v2709_v34 = vpop.f32.mrb[46].mxu1  ;;  %v14616_v47 = vadd.f32 %v2621_v39, %v2620_v36 }
 0x859   :  { %v9986_v37 = vmul.f32 -1.442695, %v2712_v42  ;;  %v2669_v57 = vpop.f32.mrb[55].mxu0  ;;  %v2710_v3 = vpop.f32.mrb[47].mxu1  ;;  %v9988_v60 = vmul.f32 -1.442695, %v2714_v7 }
 0x85a   :  { %v9987_v19 = vmul.f32 -1.442695, %v2713_v4  ;;  %v14773_v34 = vld [vmem:[#allocation14 + $0xc] ss:$16 sps:$4 sm:$0xff]   ;;  %v14781_v57 = vld [vmem:[#allocation14 + $0x8] ss:$16 sps:$4 sm:$0xff]  }
 0x85b   :  { %11437 = vpow2.f32 %v9986_v37  ;;  %v14778_v37 = vld [vmem:[#allocation14] ss:$16 sps:$4 sm:$0xff]  }
 0x85c   :  { %11439 = vpow2.f32 %v9987_v19  ;;  %v2599_v19 = vadd.f32 %v14606_v14, %v14408_v25  ;;  %v14770_v14 = vld [vmem:[#allocation14 + $0x4] ss:$16 sps:$4 sm:$0xff]  }
 0x85d   :  { %11441 = vtanh.f32 %v2715_v50 }
 0x85e   :  { %11443 = vpow2.f32 %v9988_v60  ;;  %v9985_v4 = vmul.f32 -1.442695, %v2599_v19  ;;  %v14784_v60 = vld [vmem:[#allocation14 + $0x24] ss:$16 sps:$4 sm:$0xff]  }
 0x85f   :  { %16867 = vst [vmem:[#allocation115_spill] sm:$0xff] %v14784_v60  ;;  %v14822_v19 = vld [vmem:[#allocation14 + $0x84] ss:$16 sps:$4 sm:$0xff]  }
 0x860   :  { %16879 = vst [vmem:[#allocation53_spill] sm:$0xff] %v14822_v19 }
 0x865   :  { %v11438_v31 = vpop.eup %11437 }
 0x866   :  { %v2725_v35 = vadd.f32 1.0, %v11438_v31  ;;  %v11440_v46 = vpop.eup %11439  ;;  %v14787_v31 = vld [vmem:[#allocation14 + $0x2c] ss:$16 sps:$4 sm:$0xff]  }
 0x867   :  { %v2726_v49 = vadd.f32 1.0, %v11440_v46  ;;  %v11442_v32 = vpop.eup %11441  ;;  %16868 = vst [vmem:[#allocation42_spill] sm:$0xff] %v14787_v31  ;;  %v14795_v46 = vld [vmem:[#allocation14 + $0x28] ss:$16 sps:$4 sm:$0xff]  }
 0x868   :  { %11445 = vrcp.f32 %v2725_v35  ;;  %v11444_v41 = vpop.eup %11443  ;;  %v14792_v35 = vld [vmem:[#allocation14 + $0x20] ss:$16 sps:$4 sm:$0xff]   ;;  %16870 = vst [vmem:[#allocation44_spill] sm:$0xff] %v14795_v46 }
 0x869   :  { %11447 = vrcp.f32 %v2726_v49  ;;  %v2727_v42 = vadd.f32 1.0, %v11444_v41  ;;  %16869 = vst [vmem:[#allocation43_spill] sm:$0xff] %v14792_v35  ;;  %v14798_v49 = vld [vmem:[#allocation14 + $0x44] ss:$16 sps:$4 sm:$0xff]   ;;  %v14804_v41 = vld [vmem:[#allocation14 + $0x40] ss:$16 sps:$4 sm:$0xff]  }
 0x86a   :  { %16871 = vst [vmem:[#allocation45_spill] sm:$0xff] %v14798_v49  ;;  %16873 = vst [vmem:[#allocation47_spill] sm:$0xff] %v14804_v41 }
 0x86b   :  { %11449 = vrcp.f32 %v2727_v42  ;;  %v14816_v42 = vld [vmem:[#allocation14 + $0x60] ss:$16 sps:$4 sm:$0xff]  }
 0x86c   :  { %16877 = vst [vmem:[#allocation51_spill] sm:$0xff] %v14816_v42 }
 0x872   :  { %v11446_v58 = vpop.eup %11445 }
 0x873   :  { %v2736_v39 = vmul.f32 %v11446_v58, %v11442_v32  ;;  %v11448_v36 = vpop.eup %11447  ;;  %v14801_v32 = vld [vmem:[#allocation14 + $0x4c] ss:$16 sps:$4 sm:$0xff]   ;;  %v14807_v58 = vld [vmem:[#allocation14 + $0x48] ss:$16 sps:$4 sm:$0xff]  }
 0x874   :  { %v2735_v3 = vmul.f32 %v11448_v36, %v14403_v21  ;;  %16872 = vst [vmem:[#allocation46_spill] sm:$0xff] %v14801_v32  ;;  %16874 = vst [vmem:[#allocation48_spill] sm:$0xff] %v14807_v58  ;;  %v14813_v36 = vld [vmem:[#allocation14 + $0x6c] ss:$16 sps:$4 sm:$0xff]  }
 0x875   :  { %v11450_v7 = vpop.eup %11449  ;;  %16876 = vst [vmem:[#allocation50_spill] sm:$0xff] %v14813_v36 }
 0x876   :  { %v14619_v44 = vadd.f32 %v2736_v39, %v2735_v3  ;;  %v14810_v39 = vld [vmem:[#allocation14 + $0x64] ss:$16 sps:$4 sm:$0xff]   ;;  %v14819_v3 = vld [vmem:[#allocation14 + $0x68] ss:$16 sps:$4 sm:$0xff]  }
 0x877   :  { %16875 = vst [vmem:[#allocation49_spill] sm:$0xff] %v14810_v39  ;;  %16878 = vst [vmem:[#allocation52_spill] sm:$0xff] %v14819_v3 }
 0x878   :  { %11451 = vtanh.f32 %v14619_v44 }
 0x879   :  { %11453 = vpow2.f32 %v9985_v4  ;;  %v14828_v4 = vld [vmem:[#allocation14 + $0x80] ss:$16 sps:$4 sm:$0xff]  }
 0x87a   :  { %11455 = vtanh.f32 %v14616_v47  ;;  %16881 = vst [vmem:[#allocation55_spill] sm:$0xff] %v14828_v4 }
 0x882   :  { %v11452_v40 = vpop.eup %11451 }
 0x883   :  { %v2739_v50 = vmul.f32 %v11452_v40, %v11450_v7  ;;  %v11454_v21 = vpop.eup %11453  ;;  %v14825_v7 = vld [vmem:[#allocation14 + $0x8c] ss:$16 sps:$4 sm:$0xff]   ;;  %v14831_v40 = vld [vmem:[#allocation14 + $0x88] ss:$16 sps:$4 sm:$0xff]  }
 0x884   :  { %16880 = vst [vmem:[#allocation54_spill] sm:$0xff] %v14825_v7  ;;  %16882 = vst [vmem:[#allocation56_spill] sm:$0xff] %v14831_v40 }
 0x885   :  { %v14624_v8 = vpack.c.bf16 %v2739_v50, %v2739_v50  ;;  %v14834_v50 = vld [vmem:[#allocation14 + $0xa4] ss:$16 sps:$4 sm:$0xff]  }
 0x886   :  { %16883 = vst [vmem:[#allocation57_spill] sm:$0xff] %v14834_v50 }
 0x887   :  { %2775 = vmatmul.mubr.bf16.vlgmr.msra.gmra.mrb[56].mxu0 %v14624_v8  ;;  %2816 = vmatmul.mubr.bf16.vlgmr.msra.gmra.mrb[48].mxu1 %v14624_v8 }
 0x888   :  { %2825 = vmatpush1.bf16.msra.mxu0 %v14207_v27  ;;  %2866 = vmatpush1.bf16.msra.mxu1 %v14209_v18  ;;  %v2612_v27 = vadd.f32 1.0, %v11454_v21  ;;  %v11456_v18 = vpop.eup %11455  ;;  %v14840_v21 = vld [vmem:[#allocation14 + $0xa0] ss:$16 sps:$4 sm:$0xff]  }
 0x889   :  { %2826 = vmatprep.subr.bf16.mxu0 %v14213_v48  ;;  %2867 = vmatprep.subr.bf16.mxu1 %v14215_v38  ;;  %16885 = vst [vmem:[#allocation59_spill] sm:$0xff] %v14840_v21 }
 0x88a   :  { %2856 = vmatprep.mubr.bf16.mxu0 %v16752_v43  ;;  %2897 = vmatprep.mubr.bf16.mxu1 %v16752_v43  ;;  %11457 = vrcp.f32 %v2612_v27  ;;  %v14843_v27 = vld [vmem:[#allocation14 + $0xa8] ss:$16 sps:$4 sm:$0xff]  }
 0x88b   :  { %16886 = vst [vmem:[#allocation60_spill] sm:$0xff] %v14843_v27 }
 0x88c   :  { %2827 = vmatpush1.bf16.msra.mxu0 %v14221_v2  ;;  %2868 = vmatpush1.bf16.msra.mxu1 %v14223_v17  ;;  %v14674_v2 = vld [vmem:[%s16683_s2 + $0x2c] ss:$16 sps:$4 sm:$0xff]   ;;  %v14683_v17 = vld [vmem:[%s16683_s2 + $0x28] ss:$16 sps:$4 sm:$0xff]  }
 0x88d   :  { %2828 = vmatprep.subr.bf16.mxu0 %v14227_v23  ;;  %2869 = vmatprep.subr.bf16.mxu1 %v14229_v61  ;;  %v14690_v23 = vld [vmem:[%s16683_s2 + $0x4c] ss:$16 sps:$4 sm:$0xff]   ;;  %v14697_v61 = vld [vmem:[%s16683_s2 + $0x48] ss:$16 sps:$4 sm:$0xff]  }
 0x890   :  { %2829 = vmatpush1.bf16.msra.mxu0 %v14235_v30  ;;  %2870 = vmatpush1.bf16.msra.mxu1 %v14237_v0  ;;  %v16857_v30 = vld [vmem:[#allocation80_spill] sm:$0xff]  ;;  %v14704_v0 = vld [vmem:[%s16683_s2 + $0x6c] ss:$16 sps:$4 sm:$0xff]  }
 0x891   :  { %2830 = vmatprep.subr.bf16.mxu0 %v14241_v15  ;;  %2871 = vmatprep.subr.bf16.mxu1 %v14243_v24  ;;  %v16858_v15 = vld [vmem:[#allocation81_spill] sm:$0xff]  ;;  %v14711_v24 = vld [vmem:[%s16683_s2 + $0x68] ss:$16 sps:$4 sm:$0xff]  }
 0x894   :  { %2831 = vmatpush1.bf16.msra.mxu0 %v14247_v20  ;;  %2872 = vmatpush1.bf16.msra.mxu1 %v14249_v5  ;;  %v11458_v48 = vpop.eup %11457  ;;  %v16859_v20 = vld [vmem:[#allocation82_spill] sm:$0xff]  ;;  %v14718_v5 = vld [vmem:[%s16683_s2 + $0x8c] ss:$16 sps:$4 sm:$0xff]  }
 0x895   :  { %2832 = vmatprep.subr.bf16.mxu0 %v16799_v29  ;;  %2873 = vmatprep.subr.bf16.mxu1 %v16800_v59  ;;  %v2624_v38 = vmul.f32 %v11458_v48, %v11456_v18  ;;  %v14746_v29 = vld [vmem:[%s16683_s2 + $0xcc] ss:$16 sps:$4 sm:$0xff]   ;;  %v16864_v59 = vld [vmem:[#allocation112_spill] sm:$0xff]  ;;  %v14846_v18 = vld [vmem:[#allocation14 + $0xc4] ss:$16 sps:$4 sm:$0xff]  }
 0x896   :  { %16887 = vst [vmem:[#allocation61_spill] sm:$0xff] %v14846_v18  ;;  %v14849_v48 = vld [vmem:[#allocation14 + $0xcc] ss:$16 sps:$4 sm:$0xff]  }
 0x897   :  { %16888 = vst [vmem:[#allocation62_spill] sm:$0xff] %v14849_v48 }
 0x898   :  { %2833 = vmatpush1.bf16.msra.mxu0 %v16801_v52  ;;  %2874 = vmatpush1.bf16.msra.mxu1 %v16802_v26  ;;  %v14753_v52 = vld [vmem:[%s16683_s2 + $0xc8] ss:$16 sps:$4 sm:$0xff]   ;;  %v16865_v26 = vld [vmem:[#allocation113_spill] sm:$0xff] }
 0x899   :  { %2834 = vmatprep.subr.bf16.mxu0 %v16803_v16  ;;  %2875 = vmatprep.subr.bf16.mxu1 %v16804_v51  ;;  %v14760_v16 = vld [vmem:[%s16683_s2 + $0xec] ss:$16 sps:$4 sm:$0xff]   ;;  %v16866_v51 = vld [vmem:[#allocation114_spill] sm:$0xff] }
 0x89c   :  { %2835 = vmatpush1.bf16.msra.mxu0 %v16805_v55  ;;  %2876 = vmatpush1.bf16.msra.mxu1 %v14273_v10  ;;  %v2740_v10 = vpack.c.bf16 %v2624_v38, %v2624_v38  ;;  %v14767_v55 = vld [vmem:[%s16683_s2 + $0xe8] ss:$16 sps:$4 sm:$0xff]   ;;  %v14852_v38 = vld [vmem:[#allocation14 + $0xc0] ss:$16 sps:$4 sm:$0xff]  }
 0x89d   :  { %2836 = vmatprep.subr.bf16.mxu0 %v14277_v45  ;;  %2877 = vmatprep.subr.bf16.mxu1 %v14279_v54  ;;  %v14667_v45 = vld [vmem:[%s16683_s2 + $0x8] ss:$16 sps:$4 sm:$0xff]   ;;  %v16860_v54 = vld [vmem:[#allocation83_spill] sm:$0xff]  ;;  %16889 = vst [vmem:[#allocation63_spill] sm:$0xff] %v14852_v38 }
 0x8a0   :  { %2837 = vmatpush1.bf16.msra.mxu0 %v14283_v22  ;;  %2878 = vmatpush1.bf16.msra.mxu1 %v14285_v53  ;;  %v14725_v22 = vld [vmem:[%s16683_s2 + $0x88] ss:$16 sps:$4 sm:$0xff]   ;;  %v16861_v53 = vld [vmem:[#allocation109_spill] sm:$0xff] }
 0x8a1   :  { %2838 = vmatprep.subr.bf16.mxu0 %v14289_v9  ;;  %2879 = vmatprep.subr.bf16.mxu1 %v14291_v12  ;;  %v14732_v9 = vld [vmem:[%s16683_s2 + $0xac] ss:$16 sps:$4 sm:$0xff]   ;;  %v16862_v12 = vld [vmem:[#allocation110_spill] sm:$0xff] }
 0x8a4   :  { %2839 = vmatpush1.bf16.msra.mxu0 %v14295_v56  ;;  %2880 = vmatpush1.bf16.msra.mxu1 %v14297_v11  ;;  %v14739_v56 = vld [vmem:[%s16683_s2 + $0xa8] ss:$16 sps:$4 sm:$0xff]   ;;  %v16863_v11 = vld [vmem:[#allocation111_spill] sm:$0xff] }
 0x8a5   :  { %2939 = vmatprep.subr.bf16.mxu0 %v14452_v6  ;;  %2980 = vmatprep.subr.bf16.mxu1 %v14458_v63 }
 0x8a7   :  { %2857 = vmatmul.mubr.bf16.vlgmr.msra.gmra.mrb[60].mxu0 %v2740_v10  ;;  %2898 = vmatmul.mubr.bf16.vlgmr.msra.gmra.mrb[52].mxu1 %v2740_v10  ;;  %v14855_v10 = vld [vmem:[#allocation14 + $0xc8] ss:$16 sps:$4 sm:$0xff]  }
 0x8a8   :  { %2940 = vmatpush1.bf16.msra.mxu0 %v14464_v62  ;;  %2981 = vmatpush1.bf16.msra.mxu1 %v14667_v45  ;;  %16890 = vst [vmem:[#allocation64_spill] sm:$0xff] %v14855_v10 }
 0x8a9   :  { %2941 = vmatprep.subr.bf16.mxu0 %v14471_v13  ;;  %2982 = vmatprep.subr.bf16.mxu1 %v14674_v2 }
 0x8aa   :  { %2971 = vmatprep.mubr.bf16.mxu0 %v16752_v43  ;;  %3012 = vmatprep.mubr.bf16.mxu1 %v16752_v43 }
 0x8ac   :  { %2942 = vmatpush1.bf16.msra.mxu0 %v14480_v1  ;;  %2983 = vmatpush1.bf16.msra.mxu1 %v14683_v17 }
 0x8ad   :  { %2943 = vmatprep.subr.bf16.mxu0 %v14487_v28  ;;  %2984 = vmatprep.subr.bf16.mxu1 %v14690_v23 }
 0x8b0   :  { %2944 = vmatpush1.bf16.msra.mxu0 %v14494_v33  ;;  %2985 = vmatpush1.bf16.msra.mxu1 %v14697_v61 }
 0x8b1   :  { %2945 = vmatprep.subr.bf16.mxu0 %v16857_v30  ;;  %2986 = vmatprep.subr.bf16.mxu1 %v14704_v0 }
 0x8b4   :  { %2946 = vmatpush1.bf16.msra.mxu0 %v16858_v15  ;;  %2987 = vmatpush1.bf16.msra.mxu1 %v14711_v24 }
 0x8b5   :  { %2947 = vmatprep.subr.bf16.mxu0 %v16859_v20  ;;  %2988 = vmatprep.subr.bf16.mxu1 %v14718_v5 }
 0x8b8   :  { %2948 = vmatpush1.bf16.msra.mxu0 %v16860_v54  ;;  %2989 = vmatpush1.bf16.msra.mxu1 %v14725_v22 }
 0x8b9   :  { %2949 = vmatprep.subr.bf16.mxu0 %v16861_v53  ;;  %2990 = vmatprep.subr.bf16.mxu1 %v14732_v9 }
 0x8bc   :  { %2950 = vmatpush1.bf16.msra.mxu0 %v16862_v12  ;;  %2991 = vmatpush1.bf16.msra.mxu1 %v14739_v56 }
 0x8bd   :  { %2951 = vmatprep.subr.bf16.mxu0 %v16863_v11  ;;  %2992 = vmatprep.subr.bf16.mxu1 %v14746_v29 }
 0x8c0   :  { %2952 = vmatpush1.bf16.msra.mxu0 %v16864_v59  ;;  %2993 = vmatpush1.bf16.msra.mxu1 %v14753_v52 }
 0x8c1   :  { %2953 = vmatprep.subr.bf16.mxu0 %v16865_v26  ;;  %2994 = vmatprep.subr.bf16.mxu1 %v14760_v16 }
 0x8c4   :  { %2954 = vmatpush1.bf16.msra.mxu0 %v16866_v51  ;;  %2995 = vmatpush1.bf16.msra.mxu1 %v14767_v55 }
 0x8c5   :  { %3051 = vmatprep.subr.bf16.mxu0 %v14770_v14  ;;  %3092 = vmatprep.subr.bf16.mxu1 %v14773_v34 }
 0x8c7   :  { %2972 = vmatmul.mubr.bf16.vlgmr.msra.gmra.mrb[64].mxu0 %v14624_v8  ;;  %3013 = vmatmul.mubr.bf16.vlgmr.msra.gmra.mrb[56].mxu1 %v14624_v8  ;;  %v14837_v8 = vld [vmem:[#allocation14 + $0xac] ss:$16 sps:$4 sm:$0xff]  }
 0x8c8   :  { %3052 = vmatpush1.bf16.msra.mxu0 %v14778_v37  ;;  %3093 = vmatpush1.bf16.msra.mxu1 %v14781_v57  ;;  %16884 = vst [vmem:[#allocation58_spill] sm:$0xff] %v14837_v8 }
 0x8c9   :  { %3053 = vmatprep.subr.bf16.mxu0 %v14784_v60  ;;  %3094 = vmatprep.subr.bf16.mxu1 %v14787_v31  ;;  %v16898_v31 = vld [vmem:[#allocation117_spill] sm:$0xff] }
 0x8ca   :  { %3083 = vmatprep.mubr.bf16.mxu0 %v16752_v43  ;;  %3124 = vmatprep.mubr.bf16.mxu1 %v16752_v43 }
 0x8cc   :  { %3054 = vmatpush1.bf16.msra.mxu0 %v14792_v35  ;;  %3095 = vmatpush1.bf16.msra.mxu1 %v14795_v46 }
 0x8cd   :  { %3055 = vmatprep.subr.bf16.mxu0 %v14798_v49  ;;  %3096 = vmatprep.subr.bf16.mxu1 %v14801_v32 }
 0x8d0   :  { %3056 = vmatpush1.bf16.msra.mxu0 %v14804_v41  ;;  %3097 = vmatpush1.bf16.msra.mxu1 %v14807_v58 }
 0x8d1   :  { %3057 = vmatprep.subr.bf16.mxu0 %v14810_v39  ;;  %3098 = vmatprep.subr.bf16.mxu1 %v14813_v36 }
 0x8d4   :  { %3058 = vmatpush1.bf16.msra.mxu0 %v14816_v42  ;;  %3099 = vmatpush1.bf16.msra.mxu1 %v14819_v3 }
 0x8d5   :  { %3059 = vmatprep.subr.bf16.mxu0 %v14822_v19  ;;  %3100 = vmatprep.subr.bf16.mxu1 %v14825_v7 }
 0x8d8   :  { %3060 = vmatpush1.bf16.msra.mxu0 %v14828_v4  ;;  %3101 = vmatpush1.bf16.msra.mxu1 %v14831_v40 }
 0x8d9   :  { %3061 = vmatprep.subr.bf16.mxu0 %v14834_v50  ;;  %3102 = vmatprep.subr.bf16.mxu1 %v14837_v8 }
 0x8dc   :  { %3062 = vmatpush1.bf16.msra.mxu0 %v14840_v21  ;;  %3103 = vmatpush1.bf16.msra.mxu1 %v14843_v27  ;;  %v14858_v21 = vld [vmem:[#allocation14 + $0xe4] ss:$16 sps:$4 sm:$0xff]   ;;  %v14861_v27 = vld [vmem:[#allocation14 + $0xec] ss:$16 sps:$4 sm:$0xff]  }
 0x8dd   :  { %3063 = vmatprep.subr.bf16.mxu0 %v14846_v18  ;;  %3104 = vmatprep.subr.bf16.mxu1 %v14849_v48  ;;  %16891 = vst [vmem:[#allocation65_spill] sm:$0xff] %v14858_v21  ;;  %16892 = vst [vmem:[#allocation66_spill] sm:$0xff] %v14861_v27  ;;  %v14864_v18 = vld [vmem:[#allocation14 + $0xe0] ss:$16 sps:$4 sm:$0xff]   ;;  %v14867_v48 = vld [vmem:[#allocation14 + $0xe8] ss:$16 sps:$4 sm:$0xff]  }
 0x8de   :  { %16893 = vst [vmem:[#allocation67_spill] sm:$0xff] %v14864_v18  ;;  %16894 = vst [vmem:[#allocation68_spill] sm:$0xff] %v14867_v48 }
 0x8e0   :  { %3064 = vmatpush1.bf16.msra.mxu0 %v14852_v38  ;;  %3105 = vmatpush1.bf16.msra.mxu1 %v14855_v10  ;;  %v14870_v38 = vld [vmem:[#allocation16 + $0x4] ss:$16 sps:$4 sm:$0xff]   ;;  %v14873_v10 = vld [vmem:[#allocation16 + $0xc] ss:$16 sps:$4 sm:$0xff]  }
 0x8e1   :  { %3065 = vmatprep.subr.bf16.mxu0 %v14858_v21  ;;  %3106 = vmatprep.subr.bf16.mxu1 %v14861_v27  ;;  %16895 = vst [vmem:[#allocation69_spill] sm:$0xff] %v14870_v38  ;;  %16896 = vst [vmem:[#allocation70_spill] sm:$0xff] %v14873_v10 }
 0x8e4   :  { %3066 = vmatpush1.bf16.msra.mxu0 %v14864_v18  ;;  %3107 = vmatpush1.bf16.msra.mxu1 %v14867_v48 }
 0x8e5   :  { %3133 = vmatprep.subr.bf16.mxu0 %v14870_v38  ;;  %3174 = vmatprep.subr.bf16.mxu1 %v14873_v10  ;;  %v16897_v10 = vld [vmem:[#allocation116_spill] sm:$0xff] }
 0x95a   :  { %v2776_v21 = vpop.f32.mrb[56].mxu0  ;;  %v2817_v8 = vpop.f32.mrb[48].mxu1 }
 0x95b   :  { %v2778_v50 = vpop.f32.mrb[57].mxu0  ;;  %v2819_v27 = vpop.f32.mrb[49].mxu1 }
 0x95c   :  { %v2780_v40 = vpop.f32.mrb[58].mxu0  ;;  %v2821_v4 = vpop.f32.mrb[50].mxu1 }
 0x95d   :  { %v2781_v7 = vpop.f32.mrb[59].mxu0  ;;  %v2822_v18 = vpop.f32.mrb[51].mxu1 }
 0x95e   :  { %v16899_v18 = vld [vmem:[#allocation118_spill] sm:$0xff] }
 0x97a   :  { %v2858_v19 = vpop.f32.mrb[60].mxu0  ;;  %v2899_v3 = vpop.f32.mrb[52].mxu1 }
 0x97b   :  { %v2859_v42 = vadd.f32 %v2858_v19, %v2776_v21  ;;  %v14876_v48 = vadd.f32 %v2899_v3, %v2817_v8  ;;  %v2860_v36 = vpop.f32.mrb[61].mxu0  ;;  %v2901_v39 = vpop.f32.mrb[53].mxu1 }
 0x97c   :  { %v2861_v38 = vadd.f32 %v2860_v36, %v2778_v50  ;;  %v2902_v58 = vadd.f32 %v2901_v39, %v2819_v27  ;;  %v2862_v41 = vpop.f32.mrb[62].mxu0  ;;  %v2903_v32 = vpop.f32.mrb[54].mxu1  ;;  %v16900_v50 = vld [vmem:[#allocation88_spill] sm:$0xff] }
 0x97d   :  { %v2906_v49 = vadd.f32 %v2859_v42, %v16897_v10  ;;  %v2863_v46 = vpop.f32.mrb[63].mxu0  ;;  %v2904_v35 = vpop.f32.mrb[55].mxu1 }
 0x97e   :  { %v2907_v40 = vadd.f32 %v2861_v38, %v16898_v31  ;;  %v2909_v19 = vadd.f32 %v2902_v58, %v16899_v18  ;;  %v16901_v38 = vld [vmem:[#allocation89_spill] sm:$0xff] }
 0x97f   :  { %v9989_v4 = vmul.f32 -1.442695, %v2906_v49 }
 0x980   :  { %v9990_v7 = vmul.f32 -1.442695, %v2907_v40 }
 0x981   :  { %11459 = vpow2.f32 %v9989_v4 }
 0x982   :  { %11461 = vpow2.f32 %v9990_v7  ;;  %v16902_v7 = vld [vmem:[#allocation90_spill] sm:$0xff] }
 0x983   :  { %11463 = vtanh.f32 %v2909_v19  ;;  %v16903_v19 = vld [vmem:[#allocation91_spill] sm:$0xff] }
 0x98b   :  { %v11460_v3 = vpop.eup %11459 }
 0x98c   :  { %v2919_v8 = vadd.f32 1.0, %v11460_v3  ;;  %v11462_v21 = vpop.eup %11461 }
 0x98d   :  { %v2920_v39 = vadd.f32 1.0, %v11462_v21  ;;  %v11464_v32 = vpop.eup %11463 }
 0x98e   :  { %11465 = vrcp.f32 %v2919_v8 }
 0x98f   :  { %11467 = vrcp.f32 %v2920_v39 }
 0x998   :  { %v11466_v41 = vpop.eup %11465 }
 0x999   :  { %v2930_v36 = vmul.f32 %v11466_v41, %v11464_v32  ;;  %v11468_v46 = vpop.eup %11467 }
 0x99a   :  { %v2973_v35 = vpop.f32.mrb[64].mxu0  ;;  %v3014_v42 = vpop.f32.mrb[56].mxu1  ;;  %v2929_v49 = vmul.f32 %v11468_v46, %v14616_v47 }
 0x99b   :  { %v3021_v27 = vadd.f32 %v2973_v35, %v16900_v50  ;;  %v3023_v40 = vadd.f32 %v3014_v42, %v16901_v38  ;;  %v2975_v58 = vpop.f32.mrb[65].mxu0  ;;  %v3016_v4 = vpop.f32.mrb[57].mxu1 }
 0x99c   :  { %v3022_v3 = vadd.f32 %v2975_v58, %v16902_v7  ;;  %v3024_v8 = vadd.f32 %v3016_v4, %v16903_v19  ;;  %v2977_v21 = vpop.f32.mrb[66].mxu0  ;;  %v3018_v39 = vpop.f32.mrb[58].mxu1  ;;  %v14886_v18 = vadd.f32 %v2930_v36, %v2929_v49 }
 0x99d   :  { %v9992_v32 = vmul.f32 -1.442695, %v3021_v27  ;;  %v2978_v41 = vpop.f32.mrb[67].mxu0  ;;  %v3019_v31 = vpop.f32.mrb[59].mxu1  ;;  %v9994_v47 = vmul.f32 -1.442695, %v3023_v40 }
 0x99e   :  { %v9993_v10 = vmul.f32 -1.442695, %v3022_v3  ;;  %v14901_v39 = vld [vmem:[#allocation16 + $0x8] ss:$16 sps:$4 sm:$0xff]   ;;  %v14912_v41 = vld [vmem:[#allocation16 + $0x20] ss:$16 sps:$4 sm:$0xff]  }
 0x99f   :  { %11469 = vpow2.f32 %v9992_v32  ;;  %v14907_v32 = vld [vmem:[#allocation16 + $0x2c] ss:$16 sps:$4 sm:$0xff]  }
 0x9a0   :  { %11471 = vpow2.f32 %v9993_v10  ;;  %v2908_v10 = vadd.f32 %v14876_v48, %v14408_v25  ;;  %v14904_v48 = vld [vmem:[#allocation16 + $0x24] ss:$16 sps:$4 sm:$0xff]  }
 0x9a1   :  { %11473 = vtanh.f32 %v3024_v8 }
 0x9a2   :  { %11475 = vpow2.f32 %v9994_v47  ;;  %v9991_v3 = vmul.f32 -1.442695, %v2908_v10  ;;  %v14915_v47 = vld [vmem:[#allocation16 + $0x28] ss:$16 sps:$4 sm:$0xff]   ;;  %v14946_v10 = vld [vmem:[#allocation16 + $0x8c] ss:$16 sps:$4 sm:$0xff]  }
 0x9a3   :  { %16906 = vst [vmem:[#allocation73_spill] sm:$0xff] %v14946_v10 }
 0x9a9   :  { %v11470_v46 = vpop.eup %11469 }
 0x9aa   :  { %v3034_v35 = vadd.f32 1.0, %v11470_v46  ;;  %v11472_v42 = vpop.eup %11471  ;;  %v14918_v46 = vld [vmem:[#allocation16 + $0x44] ss:$16 sps:$4 sm:$0xff]  }
 0x9ab   :  { %v3035_v50 = vadd.f32 1.0, %v11472_v42  ;;  %v11474_v38 = vpop.eup %11473 }
 0x9ac   :  { %11477 = vrcp.f32 %v3034_v35  ;;  %v11476_v58 = vpop.eup %11475  ;;  %v14921_v35 = vld [vmem:[#allocation16 + $0x4c] ss:$16 sps:$4 sm:$0xff]  }
 0x9ad   :  { %11479 = vrcp.f32 %v3035_v50  ;;  %v3036_v27 = vadd.f32 1.0, %v11476_v58  ;;  %v14924_v50 = vld [vmem:[#allocation16 + $0x40] ss:$16 sps:$4 sm:$0xff]   ;;  %v14930_v58 = vld [vmem:[#allocation16 + $0x64] ss:$16 sps:$4 sm:$0xff]  }
 0x9af   :  { %11481 = vrcp.f32 %v3036_v27  ;;  %v14940_v27 = vld [vmem:[#allocation16 + $0x68] ss:$16 sps:$4 sm:$0xff]  }
 0x9b0   :  { %16904 = vst [vmem:[#allocation71_spill] sm:$0xff] %v14940_v27 }
 0x9b6   :  { %v11478_v4 = vpop.eup %11477 }
 0x9b7   :  { %v3045_v36 = vmul.f32 %v11478_v4, %v11474_v38  ;;  %v11480_v49 = vpop.eup %11479  ;;  %v14927_v38 = vld [vmem:[#allocation16 + $0x48] ss:$16 sps:$4 sm:$0xff]   ;;  %v14933_v4 = vld [vmem:[#allocation16 + $0x6c] ss:$16 sps:$4 sm:$0xff]  }
 0x9b8   :  { %v3044_v31 = vmul.f32 %v11480_v49, %v14619_v44  ;;  %v14898_v44 = vld [vmem:[#allocation16] ss:$16 sps:$4 sm:$0xff]  }
 0x9b9   :  { %v11482_v40 = vpop.eup %11481  ;;  %v14937_v49 = vld [vmem:[#allocation16 + $0x60] ss:$16 sps:$4 sm:$0xff]  }
 0x9ba   :  { %v14889_v7 = vadd.f32 %v3045_v36, %v3044_v31  ;;  %v14943_v31 = vld [vmem:[#allocation16 + $0x84] ss:$16 sps:$4 sm:$0xff]  }
 0x9bb   :  { %16905 = vst [vmem:[#allocation72_spill] sm:$0xff] %v14943_v31 }
 0x9bc   :  { %11483 = vtanh.f32 %v14889_v7 }
 0x9bd   :  { %11485 = vpow2.f32 %v9991_v3  ;;  %v14952_v3 = vld [vmem:[#allocation16 + $0x88] ss:$16 sps:$4 sm:$0xff]  }
 0x9be   :  { %11487 = vtanh.f32 %v14886_v18  ;;  %16908 = vst [vmem:[#allocation75_spill] sm:$0xff] %v14952_v3 }
 0x9c6   :  { %v11484_v19 = vpop.eup %11483 }
 0x9c7   :  { %v3048_v8 = vmul.f32 %v11484_v19, %v11482_v40  ;;  %v11486_v42 = vpop.eup %11485  ;;  %v14949_v40 = vld [vmem:[#allocation16 + $0x80] ss:$16 sps:$4 sm:$0xff]   ;;  %v14955_v19 = vld [vmem:[#allocation16 + $0xa4] ss:$16 sps:$4 sm:$0xff]  }
 0x9c8   :  { %v2921_v36 = vadd.f32 1.0, %v11486_v42  ;;  %16907 = vst [vmem:[#allocation74_spill] sm:$0xff] %v14949_v40  ;;  %16909 = vst [vmem:[#allocation84_spill] sm:$0xff] %v14955_v19  ;;  %v14961_v42 = vld [vmem:[#allocation16 + $0xa0] ss:$16 sps:$4 sm:$0xff]  }
 0x9c9   :  { %v14894_v21 = vpack.c.bf16 %v3048_v8, %v3048_v8  ;;  %v14958_v8 = vld [vmem:[#allocation16 + $0xac] ss:$16 sps:$4 sm:$0xff]   ;;  %16911 = vst [vmem:[#allocation86_spill] sm:$0xff] %v14961_v42 }
 0x9ca   :  { %11489 = vrcp.f32 %v2921_v36  ;;  %16910 = vst [vmem:[#allocation85_spill] sm:$0xff] %v14958_v8  ;;  %v14964_v36 = vld [vmem:[#allocation16 + $0xa8] ss:$16 sps:$4 sm:$0xff]  }
 0x9cb   :  { %3084 = vmatmul.mubr.bf16.vlgmr.msra.gmra.mrb[68].mxu0 %v14894_v21  ;;  %3125 = vmatmul.mubr.bf16.vlgmr.msra.gmra.mrb[60].mxu1 %v14894_v21  ;;  %16912 = vst [vmem:[#allocation87_spill] sm:$0xff] %v14964_v36 }
 0x9cc   :  { %3134 = vmatpush1.bf16.msra.mxu0 %v14898_v44  ;;  %3175 = vmatpush1.bf16.msra.mxu1 %v14901_v39 }
 0x9cd   :  { %3135 = vmatprep.subr.bf16.mxu0 %v14904_v48  ;;  %3176 = vmatprep.subr.bf16.mxu1 %v14907_v32 }
 0x9ce   :  { %3165 = vmatprep.mubr.bf16.mxu0 %v16752_v43  ;;  %3206 = vmatprep.mubr.bf16.mxu1 %v16752_v43 }
 0x9d0   :  { %3136 = vmatpush1.bf16.msra.mxu0 %v14912_v41  ;;  %3177 = vmatpush1.bf16.msra.mxu1 %v14915_v47 }
 0x9d1   :  { %3137 = vmatprep.subr.bf16.mxu0 %v14918_v46  ;;  %3178 = vmatprep.subr.bf16.mxu1 %v14921_v35 }
 0x9d4   :  { %3138 = vmatpush1.bf16.msra.mxu0 %v14924_v50  ;;  %3179 = vmatpush1.bf16.msra.mxu1 %v14927_v38 }
 0x9d5   :  { %3139 = vmatprep.subr.bf16.mxu0 %v14930_v58  ;;  %3180 = vmatprep.subr.bf16.mxu1 %v14933_v4 }
 0x9d8   :  { %3140 = vmatpush1.bf16.msra.mxu0 %v14937_v49  ;;  %3181 = vmatpush1.bf16.msra.mxu1 %v14940_v27  ;;  %v14988_v27 = vld [vmem:[#allocation16 + $0xe8] ss:$16 sps:$4 sm:$0xff]  }
 0x9d9   :  { %3141 = vmatprep.subr.bf16.mxu0 %v14943_v31  ;;  %3182 = vmatprep.subr.bf16.mxu1 %v14946_v10  ;;  %v14973_v31 = vld [vmem:[#allocation16 + $0xc0] ss:$16 sps:$4 sm:$0xff]  }
 0x9da   :  { %16915 = vst [vmem:[#allocation82_spill] sm:$0xff] %v14973_v31 }
 0x9dc   :  { %3142 = vmatpush1.bf16.msra.mxu0 %v14949_v40  ;;  %3183 = vmatpush1.bf16.msra.mxu1 %v14952_v3  ;;  %v14967_v40 = vld [vmem:[#allocation16 + $0xc4] ss:$16 sps:$4 sm:$0xff]   ;;  %v14970_v3 = vld [vmem:[#allocation16 + $0xcc] ss:$16 sps:$4 sm:$0xff]  }
 0x9dd   :  { %3143 = vmatprep.subr.bf16.mxu0 %v14955_v19  ;;  %3184 = vmatprep.subr.bf16.mxu1 %v14958_v8  ;;  %16913 = vst [vmem:[#allocation80_spill] sm:$0xff] %v14967_v40  ;;  %16914 = vst [vmem:[#allocation81_spill] sm:$0xff] %v14970_v3  ;;  %v11488_v19 = vpop.eup %11487  ;;  %v14976_v8 = vld [vmem:[#allocation16 + $0xc8] ss:$16 sps:$4 sm:$0xff]  }
 0x9de   :  { %v11490_v10 = vpop.eup %11489 }
 0x9e0   :  { %3144 = vmatpush1.bf16.msra.mxu0 %v14961_v42  ;;  %3185 = vmatpush1.bf16.msra.mxu1 %v14964_v36  ;;  %v14979_v42 = vld [vmem:[#allocation16 + $0xe4] ss:$16 sps:$4 sm:$0xff]   ;;  %v14982_v36 = vld [vmem:[#allocation16 + $0xec] ss:$16 sps:$4 sm:$0xff]  }
 0x9e1   :  { %3145 = vmatprep.subr.bf16.mxu0 %v14967_v40  ;;  %3186 = vmatprep.subr.bf16.mxu1 %v14970_v3  ;;  %v2933_v40 = vmul.f32 %v11490_v10, %v11488_v19  ;;  %v14985_v3 = vld [vmem:[#allocation16 + $0xe0] ss:$16 sps:$4 sm:$0xff]  }
 0x9e2   :  { %v16935_v10 = vld [vmem:[#allocation61_spill] sm:$0xff]  ;;  %v16937_v19 = vld [vmem:[#allocation63_spill] sm:$0xff] }
 0x9e4   :  { %3146 = vmatpush1.bf16.msra.mxu0 %v14973_v31  ;;  %3187 = vmatpush1.bf16.msra.mxu1 %v14976_v8  ;;  %v3049_v31 = vpack.c.bf16 %v2933_v40, %v2933_v40  ;;  %v16936_v40 = vld [vmem:[#allocation62_spill] sm:$0xff] }
 0x9e5   :  { %3147 = vmatprep.subr.bf16.mxu0 %v14979_v42  ;;  %3188 = vmatprep.subr.bf16.mxu1 %v14982_v36 }
 0x9e8   :  { %3148 = vmatpush1.bf16.msra.mxu0 %v14985_v3  ;;  %3189 = vmatpush1.bf16.msra.mxu1 %v14988_v27 }
 0x9e9   :  { %3248 = vmatprep.subr.bf16.mxu0 %v14452_v6  ;;  %3289 = vmatprep.subr.bf16.mxu1 %v14458_v63  ;;  %v16916_v6 = vld [vmem:[#allocation42_spill] sm:$0xff]  ;;  %v16917_v63 = vld [vmem:[#allocation43_spill] sm:$0xff] }
 0x9eb   :  { %3166 = vmatmul.mubr.bf16.vlgmr.msra.gmra.mrb[72].mxu0 %v3049_v31  ;;  %3207 = vmatmul.mubr.bf16.vlgmr.msra.gmra.mrb[64].mxu1 %v3049_v31  ;;  %v16934_v31 = vld [vmem:[#allocation60_spill] sm:$0xff] }
 0x9ec   :  { %3249 = vmatpush1.bf16.msra.mxu0 %v14464_v62  ;;  %3290 = vmatpush1.bf16.msra.mxu1 %v14667_v45  ;;  %v16918_v62 = vld [vmem:[#allocation44_spill] sm:$0xff] }
 0x9ed   :  { %3250 = vmatprep.subr.bf16.mxu0 %v14471_v13  ;;  %3291 = vmatprep.subr.bf16.mxu1 %v14674_v2  ;;  %v16919_v13 = vld [vmem:[#allocation45_spill] sm:$0xff] }
 0x9ee   :  { %3280 = vmatprep.mubr.bf16.mxu0 %v16752_v43  ;;  %3321 = vmatprep.mubr.bf16.mxu1 %v16752_v43 }
 0x9f0   :  { %3251 = vmatpush1.bf16.msra.mxu0 %v14480_v1  ;;  %3292 = vmatpush1.bf16.msra.mxu1 %v14683_v17  ;;  %v16920_v1 = vld [vmem:[#allocation46_spill] sm:$0xff] }
 0x9f1   :  { %3252 = vmatprep.subr.bf16.mxu0 %v14487_v28  ;;  %3293 = vmatprep.subr.bf16.mxu1 %v14690_v23  ;;  %v16921_v28 = vld [vmem:[#allocation47_spill] sm:$0xff] }
 0x9f4   :  { %3253 = vmatpush1.bf16.msra.mxu0 %v14494_v33  ;;  %3294 = vmatpush1.bf16.msra.mxu1 %v14697_v61  ;;  %v16922_v33 = vld [vmem:[#allocation48_spill] sm:$0xff] }
 0x9f5   :  { %3254 = vmatprep.subr.bf16.mxu0 %v16857_v30  ;;  %3295 = vmatprep.subr.bf16.mxu1 %v14704_v0  ;;  %v16923_v30 = vld [vmem:[#allocation49_spill] sm:$0xff] }
 0x9f8   :  { %3255 = vmatpush1.bf16.msra.mxu0 %v16858_v15  ;;  %3296 = vmatpush1.bf16.msra.mxu1 %v14711_v24  ;;  %v16924_v15 = vld [vmem:[#allocation50_spill] sm:$0xff] }
 0x9f9   :  { %3256 = vmatprep.subr.bf16.mxu0 %v16859_v20  ;;  %3297 = vmatprep.subr.bf16.mxu1 %v14718_v5  ;;  %v16925_v20 = vld [vmem:[#allocation51_spill] sm:$0xff] }
 0x9fc   :  { %3257 = vmatpush1.bf16.msra.mxu0 %v16860_v54  ;;  %3298 = vmatpush1.bf16.msra.mxu1 %v14725_v22  ;;  %v16926_v54 = vld [vmem:[#allocation52_spill] sm:$0xff] }
 0x9fd   :  { %3258 = vmatprep.subr.bf16.mxu0 %v16861_v53  ;;  %3299 = vmatprep.subr.bf16.mxu1 %v14732_v9  ;;  %v16927_v53 = vld [vmem:[#allocation53_spill] sm:$0xff] }
 0xa00   :  { %3259 = vmatpush1.bf16.msra.mxu0 %v16862_v12  ;;  %3300 = vmatpush1.bf16.msra.mxu1 %v14739_v56  ;;  %v16928_v12 = vld [vmem:[#allocation54_spill] sm:$0xff] }
 0xa01   :  { %3260 = vmatprep.subr.bf16.mxu0 %v16863_v11  ;;  %3301 = vmatprep.subr.bf16.mxu1 %v14746_v29  ;;  %v16929_v11 = vld [vmem:[#allocation55_spill] sm:$0xff] }
 0xa04   :  { %3261 = vmatpush1.bf16.msra.mxu0 %v16864_v59  ;;  %3302 = vmatpush1.bf16.msra.mxu1 %v14753_v52  ;;  %v16930_v59 = vld [vmem:[#allocation56_spill] sm:$0xff] }
 0xa05   :  { %3262 = vmatprep.subr.bf16.mxu0 %v16865_v26  ;;  %3303 = vmatprep.subr.bf16.mxu1 %v14760_v16  ;;  %v16931_v26 = vld [vmem:[#allocation57_spill] sm:$0xff] }
 0xa08   :  { %3263 = vmatpush1.bf16.msra.mxu0 %v16866_v51  ;;  %3304 = vmatpush1.bf16.msra.mxu1 %v14767_v55  ;;  %v16932_v51 = vld [vmem:[#allocation58_spill] sm:$0xff] }
 0xa09   :  { %3360 = vmatprep.subr.bf16.mxu0 %v14770_v14  ;;  %3401 = vmatprep.subr.bf16.mxu1 %v14773_v34 }
 0xa0b   :  { %3281 = vmatmul.mubr.bf16.vlgmr.msra.gmra.mrb[76].mxu0 %v14894_v21  ;;  %3322 = vmatmul.mubr.bf16.vlgmr.msra.gmra.mrb[68].mxu1 %v14894_v21  ;;  %v16933_v21 = vld [vmem:[#allocation59_spill] sm:$0xff] }
 0xa0c   :  { %3361 = vmatpush1.bf16.msra.mxu0 %v14778_v37  ;;  %3402 = vmatpush1.bf16.msra.mxu1 %v14781_v57 }
 0xa0d   :  { %3362 = vmatprep.subr.bf16.mxu0 %v14784_v60  ;;  %3403 = vmatprep.subr.bf16.mxu1 %v16916_v6  ;;  %v16946_v60 = vld [vmem:[#allocation117_spill] sm:$0xff] }
 0xa0e   :  { %3392 = vmatprep.mubr.bf16.mxu0 %v16752_v43  ;;  %3433 = vmatprep.mubr.bf16.mxu1 %v16752_v43 }
 0xa10   :  { %3363 = vmatpush1.bf16.msra.mxu0 %v16917_v63  ;;  %3404 = vmatpush1.bf16.msra.mxu1 %v16918_v62 }
 0xa11   :  { %3364 = vmatprep.subr.bf16.mxu0 %v16919_v13  ;;  %3405 = vmatprep.subr.bf16.mxu1 %v16920_v1 }
 0xa14   :  { %3365 = vmatpush1.bf16.msra.mxu0 %v16921_v28  ;;  %3406 = vmatpush1.bf16.msra.mxu1 %v16922_v33 }
 0xa15   :  { %3366 = vmatprep.subr.bf16.mxu0 %v16923_v30  ;;  %3407 = vmatprep.subr.bf16.mxu1 %v16924_v15 }
 0xa18   :  { %3367 = vmatpush1.bf16.msra.mxu0 %v16925_v20  ;;  %3408 = vmatpush1.bf16.msra.mxu1 %v16926_v54 }
 0xa19   :  { %3368 = vmatprep.subr.bf16.mxu0 %v16927_v53  ;;  %3409 = vmatprep.subr.bf16.mxu1 %v16928_v12  ;;  %v16938_v53 = vld [vmem:[#allocation64_spill] sm:$0xff]  ;;  %v16939_v12 = vld [vmem:[#allocation65_spill] sm:$0xff] }
 0xa1c   :  { %3369 = vmatpush1.bf16.msra.mxu0 %v16929_v11  ;;  %3410 = vmatpush1.bf16.msra.mxu1 %v16930_v59  ;;  %v16940_v11 = vld [vmem:[#allocation66_spill] sm:$0xff]  ;;  %v16941_v59 = vld [vmem:[#allocation67_spill] sm:$0xff] }
 0xa1d   :  { %3370 = vmatprep.subr.bf16.mxu0 %v16931_v26  ;;  %3411 = vmatprep.subr.bf16.mxu1 %v16932_v51  ;;  %v16942_v26 = vld [vmem:[#allocation68_spill] sm:$0xff]  ;;  %v16943_v51 = vld [vmem:[#allocation69_spill] sm:$0xff] }
 0xa20   :  { %3371 = vmatpush1.bf16.msra.mxu0 %v16933_v21  ;;  %3412 = vmatpush1.bf16.msra.mxu1 %v16934_v31  ;;  %v16944_v21 = vld [vmem:[#allocation70_spill] sm:$0xff] }
 0xa21   :  { %3372 = vmatprep.subr.bf16.mxu0 %v16935_v10  ;;  %3413 = vmatprep.subr.bf16.mxu1 %v16936_v40 }
 0xa24   :  { %3373 = vmatpush1.bf16.msra.mxu0 %v16937_v19  ;;  %3414 = vmatpush1.bf16.msra.mxu1 %v16938_v53 }
 0xa25   :  { %3374 = vmatprep.subr.bf16.mxu0 %v16939_v12  ;;  %3415 = vmatprep.subr.bf16.mxu1 %v16940_v11 }
 0xa28   :  { %3375 = vmatpush1.bf16.msra.mxu0 %v16941_v59  ;;  %3416 = vmatpush1.bf16.msra.mxu1 %v16942_v26 }
 0xa29   :  { %3442 = vmatprep.subr.bf16.mxu0 %v16943_v51  ;;  %3483 = vmatprep.subr.bf16.mxu1 %v16944_v21  ;;  %v16945_v21 = vld [vmem:[#allocation116_spill] sm:$0xff] }
 0xa9e   :  { %v3085_v31 = vpop.f32.mrb[68].mxu0  ;;  %v3126_v10 = vpop.f32.mrb[60].mxu1 }
 0xa9f   :  { %v3087_v54 = vpop.f32.mrb[69].mxu0  ;;  %v3128_v40 = vpop.f32.mrb[61].mxu1 }
 0xaa0   :  { %v3089_v20 = vpop.f32.mrb[70].mxu0  ;;  %v3130_v19 = vpop.f32.mrb[62].mxu1 }
 0xaa1   :  { %v3090_v15 = vpop.f32.mrb[71].mxu0  ;;  %v3131_v53 = vpop.f32.mrb[63].mxu1 }
 0xaa2   :  { %v16947_v53 = vld [vmem:[#allocation118_spill] sm:$0xff] }
 0xabe   :  { %v3167_v30 = vpop.f32.mrb[72].mxu0  ;;  %v3208_v12 = vpop.f32.mrb[64].mxu1 }
 0xabf   :  { %v3168_v33 = vadd.f32 %v3167_v30, %v3085_v31  ;;  %v15063_v11 = vadd.f32 %v3208_v12, %v3126_v10  ;;  %v3169_v59 = vpop.f32.mrb[73].mxu0  ;;  %v3210_v28 = vpop.f32.mrb[65].mxu1 }
 0xac0   :  { %v3170_v26 = vadd.f32 %v3169_v59, %v3087_v54  ;;  %v3211_v1 = vadd.f32 %v3210_v28, %v3128_v40  ;;  %v3171_v51 = vpop.f32.mrb[74].mxu0  ;;  %v3212_v13 = vpop.f32.mrb[66].mxu1  ;;  %v16949_v40 = vld [vmem:[#allocation93_spill] sm:$0xff] }
 0xac1   :  { %v3215_v62 = vadd.f32 %v3168_v33, %v16945_v21  ;;  %v3172_v63 = vpop.f32.mrb[75].mxu0  ;;  %v3213_v6 = vpop.f32.mrb[67].mxu1 }
 0xac2   :  { %v3216_v20 = vadd.f32 %v3170_v26, %v16946_v60  ;;  %v3218_v30 = vadd.f32 %v3211_v1, %v16947_v53  ;;  %v16948_v26 = vld [vmem:[#allocation92_spill] sm:$0xff] }
 0xac3   :  { %v9995_v19 = vmul.f32 -1.442695, %v3215_v62 }
 0xac4   :  { %v9996_v15 = vmul.f32 -1.442695, %v3216_v20 }
 0xac5   :  { %11491 = vpow2.f32 %v9995_v19 }
 0xac6   :  { %11493 = vpow2.f32 %v9996_v15  ;;  %v16950_v15 = vld [vmem:[#allocation94_spill] sm:$0xff] }
 0xac7   :  { %11495 = vtanh.f32 %v3218_v30  ;;  %v16951_v30 = vld [vmem:[#allocation95_spill] sm:$0xff] }
 0xacf   :  { %v11492_v12 = vpop.eup %11491 }
 0xad0   :  { %v3228_v31 = vadd.f32 1.0, %v11492_v12  ;;  %v11494_v10 = vpop.eup %11493 }
 0xad1   :  { %v3229_v28 = vadd.f32 1.0, %v11494_v10  ;;  %v11496_v13 = vpop.eup %11495 }
 0xad2   :  { %11497 = vrcp.f32 %v3228_v31 }
 0xad3   :  { %11499 = vrcp.f32 %v3229_v28 }
 0xadc   :  { %v11498_v54 = vpop.eup %11497 }
 0xadd   :  { %v3239_v33 = vmul.f32 %v11498_v54, %v11496_v13  ;;  %v11500_v63 = vpop.eup %11499 }
 0xade   :  { %v3282_v6 = vpop.f32.mrb[76].mxu0  ;;  %v3323_v59 = vpop.f32.mrb[68].mxu1  ;;  %v3238_v62 = vmul.f32 %v11500_v63, %v14886_v18 }
 0xadf   :  { %v3330_v51 = vadd.f32 %v3282_v6, %v16948_v26  ;;  %v3332_v20 = vadd.f32 %v3323_v59, %v16949_v40  ;;  %v3284_v1 = vpop.f32.mrb[77].mxu0  ;;  %v3325_v19 = vpop.f32.mrb[69].mxu1 }
 0xae0   :  { %v3331_v12 = vadd.f32 %v3284_v1, %v16950_v15  ;;  %v3333_v31 = vadd.f32 %v3325_v19, %v16951_v30  ;;  %v3286_v10 = vpop.f32.mrb[78].mxu0  ;;  %v3327_v28 = vpop.f32.mrb[70].mxu1  ;;  %v15073_v53 = vadd.f32 %v3239_v33, %v3238_v62 }
 0xae1   :  { %v9998_v13 = vmul.f32 -1.442695, %v3330_v51  ;;  %v3287_v54 = vpop.f32.mrb[79].mxu0  ;;  %v3328_v60 = vpop.f32.mrb[71].mxu1  ;;  %v10000_v18 = vmul.f32 -1.442695, %v3332_v20 }
 0xae2   :  { %v9999_v21 = vmul.f32 -1.442695, %v3331_v12  ;;  %v16952_v28 = vld [vmem:[#allocation71_spill] sm:$0xff]  ;;  %v16954_v54 = vld [vmem:[#allocation73_spill] sm:$0xff] }
 0xae3   :  { %11501 = vpow2.f32 %v9998_v13  ;;  %v16953_v13 = vld [vmem:[#allocation72_spill] sm:$0xff] }
 0xae4   :  { %11503 = vpow2.f32 %v9999_v21  ;;  %v3217_v21 = vadd.f32 %v15063_v11, %v14408_v25 }
 0xae5   :  { %11505 = vtanh.f32 %v3333_v31 }
 0xae6   :  { %11507 = vpow2.f32 %v10000_v18  ;;  %v9997_v12 = vmul.f32 -1.442695, %v3217_v21  ;;  %v16955_v18 = vld [vmem:[#allocation74_spill] sm:$0xff] }
 0xaed   :  { %v11502_v63 = vpop.eup %11501 }
 0xaee   :  { %v3343_v6 = vadd.f32 1.0, %v11502_v63  ;;  %v11504_v59 = vpop.eup %11503  ;;  %v16956_v63 = vld [vmem:[#allocation75_spill] sm:$0xff] }
 0xaef   :  { %v3344_v26 = vadd.f32 1.0, %v11504_v59  ;;  %v11506_v40 = vpop.eup %11505  ;;  %v16958_v59 = vld [vmem:[#allocation85_spill] sm:$0xff] }
 0xaf0   :  { %11509 = vrcp.f32 %v3343_v6  ;;  %v11508_v1 = vpop.eup %11507  ;;  %v16957_v6 = vld [vmem:[#allocation84_spill] sm:$0xff] }
 0xaf1   :  { %11511 = vrcp.f32 %v3344_v26  ;;  %v3345_v51 = vadd.f32 1.0, %v11508_v1  ;;  %v16959_v26 = vld [vmem:[#allocation86_spill] sm:$0xff]  ;;  %v16961_v1 = vld [vmem:[#allocation80_spill] sm:$0xff] }
 0xaf3   :  { %11513 = vrcp.f32 %v3345_v51  ;;  %v16963_v51 = vld [vmem:[#allocation82_spill] sm:$0xff] }
 0xafa   :  { %v11510_v19 = vpop.eup %11509 }
 0xafb   :  { %v3354_v33 = vmul.f32 %v11510_v19, %v11506_v40  ;;  %v11512_v62 = vpop.eup %11511  ;;  %v16960_v40 = vld [vmem:[#allocation87_spill] sm:$0xff]  ;;  %v16962_v19 = vld [vmem:[#allocation81_spill] sm:$0xff] }
 0xafc   :  { %v3353_v60 = vmul.f32 %v11512_v62, %v14889_v7 }
 0xafd   :  { %v11514_v20 = vpop.eup %11513 }
 0xafe   :  { %v15076_v15 = vadd.f32 %v3354_v33, %v3353_v60 }
 0xb00   :  { %11515 = vtanh.f32 %v15076_v15 }
 0xb01   :  { %11517 = vpow2.f32 %v9997_v12  ;;  %v15127_v12 = vld [vmem:[%s16683_s2 + $0xc] ss:$16 sps:$4 sm:$0xff]  }
 0xb02   :  { %11519 = vtanh.f32 %v15073_v53 }
 0xb0a   :  { %v11516_v30 = vpop.eup %11515 }
 0xb0b   :  { %v3357_v31 = vmul.f32 %v11516_v30, %v11514_v20  ;;  %v11518_v7 = vpop.eup %11517  ;;  %v15121_v20 = vld [vmem:[%s16683_s2 + $0x4] ss:$16 sps:$4 sm:$0xff]   ;;  %v15133_v30 = vld [vmem:[%s16683_s2] ss:$16 sps:$4 sm:$0xff]  }
 0xb0c   :  { %v3230_v11 = vadd.f32 1.0, %v11518_v7  ;;  %v11520_v33 = vpop.eup %11519  ;;  %v15149_v7 = vld [vmem:[%s16683_s2 + $0x20] ss:$16 sps:$4 sm:$0xff]  }
 0xb0d   :  { %v15081_v10 = vpack.c.bf16 %v3357_v31, %v3357_v31  ;;  %v15140_v31 = vld [vmem:[%s16683_s2 + $0x24] ss:$16 sps:$4 sm:$0xff]  }
 0xb0e   :  { %11521 = vrcp.f32 %v3230_v11  ;;  %v16979_v11 = vld [vmem:[#allocation46_spill] sm:$0xff] }
 0xb0f   :  { %3393 = vmatmul.mubr.bf16.vlgmr.msra.gmra.mrb[80].mxu0 %v15081_v10  ;;  %3434 = vmatmul.mubr.bf16.vlgmr.msra.gmra.mrb[72].mxu1 %v15081_v10 }
 0xb10   :  { %3443 = vmatpush1.bf16.msra.mxu0 %v14898_v44  ;;  %3484 = vmatpush1.bf16.msra.mxu1 %v14901_v39 }
 0xb11   :  { %3444 = vmatprep.subr.bf16.mxu0 %v14904_v48  ;;  %3485 = vmatprep.subr.bf16.mxu1 %v14907_v32 }
 0xb12   :  { %3474 = vmatprep.mubr.bf16.mxu0 %v16752_v43  ;;  %3515 = vmatprep.mubr.bf16.mxu1 %v16752_v43 }
 0xb14   :  { %3445 = vmatpush1.bf16.msra.mxu0 %v14912_v41  ;;  %3486 = vmatpush1.bf16.msra.mxu1 %v14915_v47 }
 0xb15   :  { %3446 = vmatprep.subr.bf16.mxu0 %v14918_v46  ;;  %3487 = vmatprep.subr.bf16.mxu1 %v14921_v35 }
 0xb18   :  { %3447 = vmatpush1.bf16.msra.mxu0 %v14924_v50  ;;  %3488 = vmatpush1.bf16.msra.mxu1 %v14927_v38  ;;  %v11522_v62 = vpop.eup %11521 }
 0xb19   :  { %3448 = vmatprep.subr.bf16.mxu0 %v14930_v58  ;;  %3489 = vmatprep.subr.bf16.mxu1 %v14933_v4  ;;  %v3242_v60 = vmul.f32 %v11522_v62, %v11520_v33  ;;  %v16983_v33 = vld [vmem:[#allocation50_spill] sm:$0xff]  ;;  %v16984_v62 = vld [vmem:[#allocation51_spill] sm:$0xff] }
 0xb1b   :  { %v3358_v21 = vpack.c.bf16 %v3242_v60, %v3242_v60  ;;  %v16985_v60 = vld [vmem:[#allocation52_spill] sm:$0xff] }
 0xb1c   :  { %3449 = vmatpush1.bf16.msra.mxu0 %v14937_v49  ;;  %3490 = vmatpush1.bf16.msra.mxu1 %v16952_v28 }
 0xb1d   :  { %3450 = vmatprep.subr.bf16.mxu0 %v16953_v13  ;;  %3491 = vmatprep.subr.bf16.mxu1 %v16954_v54 }
 0xb20   :  { %3451 = vmatpush1.bf16.msra.mxu0 %v16955_v18  ;;  %3492 = vmatpush1.bf16.msra.mxu1 %v16956_v63 }
 0xb21   :  { %3452 = vmatprep.subr.bf16.mxu0 %v16957_v6  ;;  %3493 = vmatprep.subr.bf16.mxu1 %v16958_v59 }
 0xb24   :  { %3453 = vmatpush1.bf16.msra.mxu0 %v16959_v26  ;;  %3494 = vmatpush1.bf16.msra.mxu1 %v16960_v40 }
 0xb25   :  { %3454 = vmatprep.subr.bf16.mxu0 %v16961_v1  ;;  %3495 = vmatprep.subr.bf16.mxu1 %v16962_v19 }
 0xb28   :  { %3455 = vmatpush1.bf16.msra.mxu0 %v16963_v51  ;;  %3496 = vmatpush1.bf16.msra.mxu1 %v14976_v8 }
 0xb29   :  { %3456 = vmatprep.subr.bf16.mxu0 %v14979_v42  ;;  %3497 = vmatprep.subr.bf16.mxu1 %v14982_v36 }
 0xb2c   :  { %3457 = vmatpush1.bf16.msra.mxu0 %v14985_v3  ;;  %3498 = vmatpush1.bf16.msra.mxu1 %v14988_v27 }
 0xb2d   :  { %3557 = vmatprep.subr.bf16.mxu0 %v15121_v20  ;;  %3598 = vmatprep.subr.bf16.mxu1 %v15127_v12 }
 0xb2f   :  { %3475 = vmatmul.mubr.bf16.vlgmr.msra.gmra.mrb[84].mxu0 %v3358_v21  ;;  %3516 = vmatmul.mubr.bf16.vlgmr.msra.gmra.mrb[76].mxu1 %v3358_v21  ;;  %v16986_v21 = vld [vmem:[#allocation53_spill] sm:$0xff] }
 0xb30   :  { %3558 = vmatpush1.bf16.msra.mxu0 %v15133_v30  ;;  %3599 = vmatpush1.bf16.msra.mxu1 %v14667_v45  ;;  %v15156_v45 = vld [vmem:[%s16683_s2 + $0x44] ss:$16 sps:$4 sm:$0xff]  }
 0xb31   :  { %3559 = vmatprep.subr.bf16.mxu0 %v15140_v31  ;;  %3600 = vmatprep.subr.bf16.mxu1 %v14674_v2  ;;  %v15163_v2 = vld [vmem:[%s16683_s2 + $0x40] ss:$16 sps:$4 sm:$0xff]  }
 0xb32   :  { %3589 = vmatprep.mubr.bf16.mxu0 %v16752_v43  ;;  %3630 = vmatprep.mubr.bf16.mxu1 %v16752_v43 }
 0xb34   :  { %3560 = vmatpush1.bf16.msra.mxu0 %v15149_v7  ;;  %3601 = vmatpush1.bf16.msra.mxu1 %v14683_v17  ;;  %v15170_v17 = vld [vmem:[%s16683_s2 + $0x64] ss:$16 sps:$4 sm:$0xff]  }
 0xb35   :  { %3561 = vmatprep.subr.bf16.mxu0 %v15156_v45  ;;  %3602 = vmatprep.subr.bf16.mxu1 %v14690_v23  ;;  %16964 = vst [vmem:[#allocation83_spill] sm:$0xff] %v15170_v17  ;;  %v15177_v23 = vld [vmem:[%s16683_s2 + $0x60] ss:$16 sps:$4 sm:$0xff]  }
 0xb36   :  { %16965 = vst [vmem:[#allocation109_spill] sm:$0xff] %v15177_v23 }
 0xb38   :  { %3562 = vmatpush1.bf16.msra.mxu0 %v15163_v2  ;;  %3603 = vmatpush1.bf16.msra.mxu1 %v14697_v61  ;;  %v15184_v61 = vld [vmem:[%s16683_s2 + $0x84] ss:$16 sps:$4 sm:$0xff]  }
 0xb39   :  { %3563 = vmatprep.subr.bf16.mxu0 %v15170_v17  ;;  %3604 = vmatprep.subr.bf16.mxu1 %v14704_v0  ;;  %16966 = vst [vmem:[#allocation110_spill] sm:$0xff] %v15184_v61  ;;  %v15191_v0 = vld [vmem:[%s16683_s2 + $0x80] ss:$16 sps:$4 sm:$0xff]  }
 0xb3a   :  { %16967 = vst [vmem:[#allocation111_spill] sm:$0xff] %v15191_v0  ;;  %v17005_v17 = vld [vmem:[#allocation117_spill] sm:$0xff] }
 0xb3c   :  { %3564 = vmatpush1.bf16.msra.mxu0 %v15177_v23  ;;  %3605 = vmatpush1.bf16.msra.mxu1 %v14711_v24  ;;  %v15198_v24 = vld [vmem:[%s16683_s2 + $0xa4] ss:$16 sps:$4 sm:$0xff]  }
 0xb3d   :  { %3565 = vmatprep.subr.bf16.mxu0 %v15184_v61  ;;  %3606 = vmatprep.subr.bf16.mxu1 %v14718_v5  ;;  %16968 = vst [vmem:[#allocation112_spill] sm:$0xff] %v15198_v24  ;;  %v15205_v5 = vld [vmem:[%s16683_s2 + $0xa0] ss:$16 sps:$4 sm:$0xff]  }
 0xb3e   :  { %16969 = vst [vmem:[#allocation113_spill] sm:$0xff] %v15205_v5 }
 0xb40   :  { %3566 = vmatpush1.bf16.msra.mxu0 %v15191_v0  ;;  %3607 = vmatpush1.bf16.msra.mxu1 %v14725_v22  ;;  %v15212_v22 = vld [vmem:[%s16683_s2 + $0xc4] ss:$16 sps:$4 sm:$0xff]  }
 0xb41   :  { %3567 = vmatprep.subr.bf16.mxu0 %v15198_v24  ;;  %3608 = vmatprep.subr.bf16.mxu1 %v14732_v9  ;;  %16970 = vst [vmem:[#allocation114_spill] sm:$0xff] %v15212_v22  ;;  %v15219_v9 = vld [vmem:[%s16683_s2 + $0xc0] ss:$16 sps:$4 sm:$0xff]  }
 0xb42   :  { %16971 = vst [vmem:[#allocation88_spill] sm:$0xff] %v15219_v9 }
 0xb44   :  { %3568 = vmatpush1.bf16.msra.mxu0 %v15205_v5  ;;  %3609 = vmatpush1.bf16.msra.mxu1 %v14739_v56  ;;  %v15226_v56 = vld [vmem:[%s16683_s2 + $0xe4] ss:$16 sps:$4 sm:$0xff]  }
 0xb45   :  { %3569 = vmatprep.subr.bf16.mxu0 %v15212_v22  ;;  %3610 = vmatprep.subr.bf16.mxu1 %v14746_v29  ;;  %16972 = vst [vmem:[#allocation89_spill] sm:$0xff] %v15226_v56  ;;  %v15233_v29 = vld [vmem:[%s16683_s2 + $0xe0] ss:$16 sps:$4 sm:$0xff]  }
 0xb46   :  { %16973 = vst [vmem:[#allocation90_spill] sm:$0xff] %v15233_v29 }
 0xb48   :  { %3570 = vmatpush1.bf16.msra.mxu0 %v15219_v9  ;;  %3611 = vmatpush1.bf16.msra.mxu1 %v14753_v52  ;;  %v16974_v52 = vld [vmem:[#allocation115_spill] sm:$0xff] }
 0xb49   :  { %3571 = vmatprep.subr.bf16.mxu0 %v15226_v56  ;;  %3612 = vmatprep.subr.bf16.mxu1 %v14760_v16  ;;  %v16975_v16 = vld [vmem:[#allocation42_spill] sm:$0xff] }
 0xb4c   :  { %3572 = vmatpush1.bf16.msra.mxu0 %v15233_v29  ;;  %3613 = vmatpush1.bf16.msra.mxu1 %v14767_v55  ;;  %v16976_v55 = vld [vmem:[#allocation43_spill] sm:$0xff] }
 0xb4d   :  { %3669 = vmatprep.subr.bf16.mxu0 %v14770_v14  ;;  %3710 = vmatprep.subr.bf16.mxu1 %v14773_v34  ;;  %v16977_v14 = vld [vmem:[#allocation44_spill] sm:$0xff]  ;;  %v16978_v34 = vld [vmem:[#allocation45_spill] sm:$0xff] }
 0xb4f   :  { %3590 = vmatmul.mubr.bf16.vlgmr.msra.gmra.mrb[88].mxu0 %v15081_v10  ;;  %3631 = vmatmul.mubr.bf16.vlgmr.msra.gmra.mrb[80].mxu1 %v15081_v10  ;;  %v16980_v10 = vld [vmem:[#allocation47_spill] sm:$0xff] }
 0xb50   :  { %3670 = vmatpush1.bf16.msra.mxu0 %v14778_v37  ;;  %3711 = vmatpush1.bf16.msra.mxu1 %v14781_v57  ;;  %v16981_v37 = vld [vmem:[#allocation48_spill] sm:$0xff]  ;;  %v16982_v57 = vld [vmem:[#allocation49_spill] sm:$0xff] }
 0xb51   :  { %3671 = vmatprep.subr.bf16.mxu0 %v16974_v52  ;;  %3712 = vmatprep.subr.bf16.mxu1 %v16975_v16  ;;  %v16987_v52 = vld [vmem:[#allocation54_spill] sm:$0xff]  ;;  %v16988_v16 = vld [vmem:[#allocation55_spill] sm:$0xff] }
 0xb52   :  { %3701 = vmatprep.mubr.bf16.mxu0 %v16752_v43  ;;  %3742 = vmatprep.mubr.bf16.mxu1 %v16752_v43 }
 0xb54   :  { %3672 = vmatpush1.bf16.msra.mxu0 %v16976_v55  ;;  %3713 = vmatpush1.bf16.msra.mxu1 %v16977_v14  ;;  %v16989_v55 = vld [vmem:[#allocation56_spill] sm:$0xff]  ;;  %v16990_v14 = vld [vmem:[#allocation57_spill] sm:$0xff] }
 0xb55   :  { %3673 = vmatprep.subr.bf16.mxu0 %v16978_v34  ;;  %3714 = vmatprep.subr.bf16.mxu1 %v16979_v11  ;;  %v16991_v34 = vld [vmem:[#allocation58_spill] sm:$0xff]  ;;  %v16992_v11 = vld [vmem:[#allocation59_spill] sm:$0xff] }
 0xb58   :  { %3674 = vmatpush1.bf16.msra.mxu0 %v16980_v10  ;;  %3715 = vmatpush1.bf16.msra.mxu1 %v16981_v37  ;;  %v16993_v10 = vld [vmem:[#allocation60_spill] sm:$0xff]  ;;  %v16994_v37 = vld [vmem:[#allocation61_spill] sm:$0xff] }
 0xb59   :  { %3675 = vmatprep.subr.bf16.mxu0 %v16982_v57  ;;  %3716 = vmatprep.subr.bf16.mxu1 %v16983_v33  ;;  %v16995_v57 = vld [vmem:[#allocation62_spill] sm:$0xff]  ;;  %v16996_v33 = vld [vmem:[#allocation63_spill] sm:$0xff] }
 0xb5c   :  { %3676 = vmatpush1.bf16.msra.mxu0 %v16984_v62  ;;  %3717 = vmatpush1.bf16.msra.mxu1 %v16985_v60  ;;  %v16997_v62 = vld [vmem:[#allocation64_spill] sm:$0xff]  ;;  %v16998_v60 = vld [vmem:[#allocation65_spill] sm:$0xff] }
 0xb5d   :  { %3677 = vmatprep.subr.bf16.mxu0 %v16986_v21  ;;  %3718 = vmatprep.subr.bf16.mxu1 %v16987_v52  ;;  %v16999_v21 = vld [vmem:[#allocation66_spill] sm:$0xff]  ;;  %v17000_v52 = vld [vmem:[#allocation67_spill] sm:$0xff] }
 0xb60   :  { %3678 = vmatpush1.bf16.msra.mxu0 %v16988_v16  ;;  %3719 = vmatpush1.bf16.msra.mxu1 %v16989_v55  ;;  %v17001_v16 = vld [vmem:[#allocation68_spill] sm:$0xff]  ;;  %v17002_v55 = vld [vmem:[#allocation69_spill] sm:$0xff] }
 0xb61   :  { %3679 = vmatprep.subr.bf16.mxu0 %v16990_v14  ;;  %3720 = vmatprep.subr.bf16.mxu1 %v16991_v34  ;;  %v17003_v14 = vld [vmem:[#allocation70_spill] sm:$0xff] }
 0xb64   :  { %3680 = vmatpush1.bf16.msra.mxu0 %v16992_v11  ;;  %3721 = vmatpush1.bf16.msra.mxu1 %v16993_v10 }
 0xb65   :  { %3681 = vmatprep.subr.bf16.mxu0 %v16994_v37  ;;  %3722 = vmatprep.subr.bf16.mxu1 %v16995_v57 }
 0xb68   :  { %3682 = vmatpush1.bf16.msra.mxu0 %v16996_v33  ;;  %3723 = vmatpush1.bf16.msra.mxu1 %v16997_v62 }
 0xb69   :  { %3683 = vmatprep.subr.bf16.mxu0 %v16998_v60  ;;  %3724 = vmatprep.subr.bf16.mxu1 %v16999_v21 }
 0xb6c   :  { %3684 = vmatpush1.bf16.msra.mxu0 %v17000_v52  ;;  %3725 = vmatpush1.bf16.msra.mxu1 %v17001_v16 }
 0xb6d   :  { %3751 = vmatprep.subr.bf16.mxu0 %v17002_v55  ;;  %3792 = vmatprep.subr.bf16.mxu1 %v17003_v14  ;;  %v17004_v14 = vld [vmem:[#allocation116_spill] sm:$0xff] }
 0xbe2   :  { %v3394_v34 = vpop.f32.mrb[80].mxu0  ;;  %v3435_v11 = vpop.f32.mrb[72].mxu1 }
 0xbe3   :  { %v3396_v10 = vpop.f32.mrb[81].mxu0  ;;  %v3437_v37 = vpop.f32.mrb[73].mxu1 }
 0xbe4   :  { %v3398_v57 = vpop.f32.mrb[82].mxu0  ;;  %v3439_v33 = vpop.f32.mrb[74].mxu1 }
 0xbe5   :  { %v3399_v29 = vpop.f32.mrb[83].mxu0  ;;  %v3440_v62 = vpop.f32.mrb[75].mxu1 }
 0xbe6   :  { %v17006_v62 = vld [vmem:[#allocation118_spill] sm:$0xff] }
 0xc02   :  { %v3476_v56 = vpop.f32.mrb[84].mxu0  ;;  %v3517_v60 = vpop.f32.mrb[76].mxu1 }
 0xc03   :  { %v3477_v9 = vadd.f32 %v3476_v56, %v3394_v34  ;;  %v15275_v21 = vadd.f32 %v3517_v60, %v3435_v11  ;;  %v3478_v52 = vpop.f32.mrb[85].mxu0  ;;  %v3519_v22 = vpop.f32.mrb[77].mxu1 }
 0xc04   :  { %v3479_v16 = vadd.f32 %v3478_v52, %v3396_v10  ;;  %v3520_v5 = vadd.f32 %v3519_v22, %v3437_v37  ;;  %v3480_v55 = vpop.f32.mrb[86].mxu0  ;;  %v3521_v24 = vpop.f32.mrb[78].mxu1  ;;  %v17007_v52 = vld [vmem:[#allocation96_spill] sm:$0xff] }
 0xc05   :  { %v3524_v0 = vadd.f32 %v3477_v9, %v17004_v14  ;;  %v3481_v61 = vpop.f32.mrb[87].mxu0  ;;  %v3522_v23 = vpop.f32.mrb[79].mxu1  ;;  %v17008_v55 = vld [vmem:[#allocation97_spill] sm:$0xff] }
 0xc06   :  { %v3525_v57 = vadd.f32 %v3479_v16, %v17005_v17  ;;  %v3527_v56 = vadd.f32 %v3520_v5, %v17006_v62 }
 0xc07   :  { %v10001_v33 = vmul.f32 -1.442695, %v3524_v0 }
 0xc08   :  { %v10002_v29 = vmul.f32 -1.442695, %v3525_v57 }
 0xc09   :  { %11523 = vpow2.f32 %v10001_v33 }
 0xc0a   :  { %11525 = vpow2.f32 %v10002_v29  ;;  %v17009_v29 = vld [vmem:[#allocation98_spill] sm:$0xff] }
 0xc0b   :  { %11527 = vtanh.f32 %v3527_v56  ;;  %v17010_v56 = vld [vmem:[#allocation99_spill] sm:$0xff] }
 0xc13   :  { %v11524_v34 = vpop.eup %11523 }
 0xc14   :  { %v3537_v11 = vadd.f32 1.0, %v11524_v34  ;;  %v11526_v60 = vpop.eup %11525 }
 0xc15   :  { %v3538_v22 = vadd.f32 1.0, %v11526_v60  ;;  %v11528_v24 = vpop.eup %11527 }
 0xc16   :  { %11529 = vrcp.f32 %v3537_v11 }
 0xc17   :  { %11531 = vrcp.f32 %v3538_v22 }
 0xc20   :  { %v11530_v10 = vpop.eup %11529 }
 0xc21   :  { %v3548_v9 = vmul.f32 %v11530_v10, %v11528_v24  ;;  %v11532_v61 = vpop.eup %11531 }
 0xc22   :  { %v3591_v23 = vpop.f32.mrb[88].mxu0  ;;  %v3632_v37 = vpop.f32.mrb[80].mxu1  ;;  %v3547_v0 = vmul.f32 %v11532_v61, %v15073_v53 }
 0xc23   :  { %v3639_v16 = vadd.f32 %v3591_v23, %v17007_v52  ;;  %v3641_v57 = vadd.f32 %v3632_v37, %v17008_v55  ;;  %v3593_v5 = vpop.f32.mrb[89].mxu0  ;;  %v3634_v33 = vpop.f32.mrb[81].mxu1 }
 0xc24   :  { %v3640_v34 = vadd.f32 %v3593_v5, %v17009_v29  ;;  %v3642_v11 = vadd.f32 %v3634_v33, %v17010_v56  ;;  %v3595_v60 = vpop.f32.mrb[90].mxu0  ;;  %v3636_v22 = vpop.f32.mrb[82].mxu1  ;;  %v15285_v62 = vadd.f32 %v3548_v9, %v3547_v0 }
 0xc25   :  { %v10004_v24 = vmul.f32 -1.442695, %v3639_v16  ;;  %v3596_v10 = vpop.f32.mrb[91].mxu0  ;;  %v3637_v17 = vpop.f32.mrb[83].mxu1  ;;  %v10006_v53 = vmul.f32 -1.442695, %v3641_v57 }
 0xc26   :  { %v10005_v14 = vmul.f32 -1.442695, %v3640_v34  ;;  %v15442_v22 = vld [vmem:[#allocation14 + $0xc] ss:$16 sps:$4 sm:$0xff]   ;;  %v15450_v10 = vld [vmem:[#allocation14 + $0x8] ss:$16 sps:$4 sm:$0xff]  }
 0xc27   :  { %11533 = vpow2.f32 %v10004_v24  ;;  %v15447_v24 = vld [vmem:[#allocation14] ss:$16 sps:$4 sm:$0xff]  }
 0xc28   :  { %11535 = vpow2.f32 %v10005_v14  ;;  %v3526_v14 = vadd.f32 %v15275_v21, %v14408_v25  ;;  %v15439_v21 = vld [vmem:[#allocation14 + $0x4] ss:$16 sps:$4 sm:$0xff]  }
 0xc29   :  { %11537 = vtanh.f32 %v3642_v11 }
 0xc2a   :  { %11539 = vpow2.f32 %v10006_v53  ;;  %v10003_v34 = vmul.f32 -1.442695, %v3526_v14  ;;  %v15453_v53 = vld [vmem:[#allocation14 + $0x24] ss:$16 sps:$4 sm:$0xff]  }
 0xc2b   :  { %v15491_v14 = vld [vmem:[#allocation14 + $0x84] ss:$16 sps:$4 sm:$0xff]  }
 0xc2c   :  { %17032 = vst [vmem:[#allocation85_spill] sm:$0xff] %v15491_v14 }
 0xc31   :  { %v11534_v61 = vpop.eup %11533 }
 0xc32   :  { %v3652_v23 = vadd.f32 1.0, %v11534_v61  ;;  %v11536_v37 = vpop.eup %11535  ;;  %v15456_v61 = vld [vmem:[#allocation14 + $0x2c] ss:$16 sps:$4 sm:$0xff]  }
 0xc33   :  { %v3653_v52 = vadd.f32 1.0, %v11536_v37  ;;  %v11538_v55 = vpop.eup %11537  ;;  %17021 = vst [vmem:[#allocation91_spill] sm:$0xff] %v15456_v61  ;;  %v15464_v37 = vld [vmem:[#allocation14 + $0x28] ss:$16 sps:$4 sm:$0xff]  }
 0xc34   :  { %11541 = vrcp.f32 %v3652_v23  ;;  %v11540_v5 = vpop.eup %11539  ;;  %v15461_v23 = vld [vmem:[#allocation14 + $0x20] ss:$16 sps:$4 sm:$0xff]   ;;  %17023 = vst [vmem:[#allocation93_spill] sm:$0xff] %v15464_v37 }
 0xc35   :  { %11543 = vrcp.f32 %v3653_v52  ;;  %v3654_v16 = vadd.f32 1.0, %v11540_v5  ;;  %17022 = vst [vmem:[#allocation92_spill] sm:$0xff] %v15461_v23  ;;  %v15467_v52 = vld [vmem:[#allocation14 + $0x44] ss:$16 sps:$4 sm:$0xff]   ;;  %v15473_v5 = vld [vmem:[#allocation14 + $0x40] ss:$16 sps:$4 sm:$0xff]  }
 0xc36   :  { %17024 = vst [vmem:[#allocation94_spill] sm:$0xff] %v15467_v52  ;;  %17026 = vst [vmem:[#allocation71_spill] sm:$0xff] %v15473_v5 }
 0xc37   :  { %11545 = vrcp.f32 %v3654_v16  ;;  %v15485_v16 = vld [vmem:[#allocation14 + $0x60] ss:$16 sps:$4 sm:$0xff]  }
 0xc38   :  { %17030 = vst [vmem:[#allocation75_spill] sm:$0xff] %v15485_v16 }
 0xc3e   :  { %v11542_v33 = vpop.eup %11541 }
 0xc3f   :  { %v3663_v9 = vmul.f32 %v11542_v33, %v11538_v55  ;;  %v11544_v0 = vpop.eup %11543  ;;  %v15470_v55 = vld [vmem:[#allocation14 + $0x4c] ss:$16 sps:$4 sm:$0xff]   ;;  %v15476_v33 = vld [vmem:[#allocation14 + $0x48] ss:$16 sps:$4 sm:$0xff]  }
 0xc40   :  { %v3662_v17 = vmul.f32 %v11544_v0, %v15076_v15  ;;  %17025 = vst [vmem:[#allocation95_spill] sm:$0xff] %v15470_v55  ;;  %17027 = vst [vmem:[#allocation72_spill] sm:$0xff] %v15476_v33  ;;  %v15482_v0 = vld [vmem:[#allocation14 + $0x6c] ss:$16 sps:$4 sm:$0xff]  }
 0xc41   :  { %v11546_v57 = vpop.eup %11545  ;;  %17029 = vst [vmem:[#allocation74_spill] sm:$0xff] %v15482_v0 }
 0xc42   :  { %v15288_v29 = vadd.f32 %v3663_v9, %v3662_v17  ;;  %v15479_v9 = vld [vmem:[#allocation14 + $0x64] ss:$16 sps:$4 sm:$0xff]   ;;  %v15488_v17 = vld [vmem:[#allocation14 + $0x68] ss:$16 sps:$4 sm:$0xff]  }
 0xc43   :  { %17028 = vst [vmem:[#allocation73_spill] sm:$0xff] %v15479_v9  ;;  %17031 = vst [vmem:[#allocation84_spill] sm:$0xff] %v15488_v17 }
 0xc44   :  { %11547 = vtanh.f32 %v15288_v29 }
 0xc45   :  { %11549 = vpow2.f32 %v10003_v34  ;;  %v15497_v34 = vld [vmem:[#allocation14 + $0x80] ss:$16 sps:$4 sm:$0xff]  }
 0xc46   :  { %11551 = vtanh.f32 %v15285_v62  ;;  %17034 = vst [vmem:[#allocation87_spill] sm:$0xff] %v15497_v34 }
 0xc4e   :  { %v11548_v56 = vpop.eup %11547 }
 0xc4f   :  { %v3666_v11 = vmul.f32 %v11548_v56, %v11546_v57  ;;  %v11550_v15 = vpop.eup %11549  ;;  %v15494_v57 = vld [vmem:[#allocation14 + $0x8c] ss:$16 sps:$4 sm:$0xff]   ;;  %v15500_v56 = vld [vmem:[#allocation14 + $0x88] ss:$16 sps:$4 sm:$0xff]  }
 0xc50   :  { %17033 = vst [vmem:[#allocation86_spill] sm:$0xff] %v15494_v57  ;;  %17035 = vst [vmem:[#allocation80_spill] sm:$0xff] %v15500_v56 }
 0xc51   :  { %v15293_v60 = vpack.c.bf16 %v3666_v11, %v3666_v11  ;;  %v15503_v11 = vld [vmem:[#allocation14 + $0xa4] ss:$16 sps:$4 sm:$0xff]  }
 0xc52   :  { %17036 = vst [vmem:[#allocation81_spill] sm:$0xff] %v15503_v11 }
 0xc53   :  { %3702 = vmatmul.mubr.bf16.vlgmr.msra.gmra.mrb[92].mxu0 %v15293_v60  ;;  %3743 = vmatmul.mubr.bf16.vlgmr.msra.gmra.mrb[84].mxu1 %v15293_v60 }
 0xc54   :  { %3752 = vmatpush1.bf16.msra.mxu0 %v14898_v44  ;;  %3793 = vmatpush1.bf16.msra.mxu1 %v14901_v39  ;;  %v3539_v44 = vadd.f32 1.0, %v11550_v15  ;;  %v11552_v39 = vpop.eup %11551  ;;  %v15509_v15 = vld [vmem:[#allocation14 + $0xa0] ss:$16 sps:$4 sm:$0xff]  }
 0xc55   :  { %3753 = vmatprep.subr.bf16.mxu0 %v14904_v48  ;;  %3794 = vmatprep.subr.bf16.mxu1 %v14907_v32  ;;  %17038 = vst [vmem:[#allocation115_spill] sm:$0xff] %v15509_v15 }
 0xc56   :  { %3783 = vmatprep.mubr.bf16.mxu0 %v16752_v43  ;;  %3824 = vmatprep.mubr.bf16.mxu1 %v16752_v43  ;;  %11553 = vrcp.f32 %v3539_v44  ;;  %v15512_v44 = vld [vmem:[#allocation14 + $0xa8] ss:$16 sps:$4 sm:$0xff]  }
 0xc57   :  { %17039 = vst [vmem:[#allocation42_spill] sm:$0xff] %v15512_v44 }
 0xc58   :  { %3754 = vmatpush1.bf16.msra.mxu0 %v14912_v41  ;;  %3795 = vmatpush1.bf16.msra.mxu1 %v14915_v47  ;;  %v15336_v47 = vld [vmem:[%s16683_s2 + $0x8] ss:$16 sps:$4 sm:$0xff]  }
 0xc59   :  { %3755 = vmatprep.subr.bf16.mxu0 %v14918_v46  ;;  %3796 = vmatprep.subr.bf16.mxu1 %v14921_v35  ;;  %v15343_v46 = vld [vmem:[%s16683_s2 + $0x2c] ss:$16 sps:$4 sm:$0xff]   ;;  %v15352_v35 = vld [vmem:[%s16683_s2 + $0x28] ss:$16 sps:$4 sm:$0xff]  }
 0xc5c   :  { %3756 = vmatpush1.bf16.msra.mxu0 %v14924_v50  ;;  %3797 = vmatpush1.bf16.msra.mxu1 %v14927_v38  ;;  %v15359_v50 = vld [vmem:[%s16683_s2 + $0x4c] ss:$16 sps:$4 sm:$0xff]   ;;  %v15366_v38 = vld [vmem:[%s16683_s2 + $0x48] ss:$16 sps:$4 sm:$0xff]  }
 0xc5d   :  { %3757 = vmatprep.subr.bf16.mxu0 %v14930_v58  ;;  %3798 = vmatprep.subr.bf16.mxu1 %v14933_v4  ;;  %v17011_v58 = vld [vmem:[#allocation83_spill] sm:$0xff] }
 0xc5e   :  { %v15373_v4 = vld [vmem:[%s16683_s2 + $0x6c] ss:$16 sps:$4 sm:$0xff]  }
 0xc60   :  { %3758 = vmatpush1.bf16.msra.mxu0 %v14937_v49  ;;  %3799 = vmatpush1.bf16.msra.mxu1 %v16952_v28  ;;  %v11554_v48 = vpop.eup %11553  ;;  %v17012_v49 = vld [vmem:[#allocation109_spill] sm:$0xff]  ;;  %v17015_v28 = vld [vmem:[#allocation112_spill] sm:$0xff] }
 0xc61   :  { %3759 = vmatprep.subr.bf16.mxu0 %v16953_v13  ;;  %3800 = vmatprep.subr.bf16.mxu1 %v16954_v54  ;;  %v3551_v32 = vmul.f32 %v11554_v48, %v11552_v39  ;;  %v15401_v13 = vld [vmem:[%s16683_s2 + $0xac] ss:$16 sps:$4 sm:$0xff]   ;;  %v15515_v39 = vld [vmem:[#allocation14 + $0xc4] ss:$16 sps:$4 sm:$0xff]   ;;  %v15518_v48 = vld [vmem:[#allocation14 + $0xcc] ss:$16 sps:$4 sm:$0xff]  }
 0xc62   :  { %v17016_v54 = vld [vmem:[#allocation113_spill] sm:$0xff]  ;;  %17040 = vst [vmem:[#allocation43_spill] sm:$0xff] %v15515_v39  ;;  %17041 = vst [vmem:[#allocation44_spill] sm:$0xff] %v15518_v48 }
 0xc63   :  { %v3667_v41 = vpack.c.bf16 %v3551_v32, %v3551_v32  ;;  %v15521_v32 = vld [vmem:[#allocation14 + $0xc0] ss:$16 sps:$4 sm:$0xff]  }
 0xc64   :  { %3760 = vmatpush1.bf16.msra.mxu0 %v16955_v18  ;;  %3801 = vmatpush1.bf16.msra.mxu1 %v16956_v63  ;;  %v15408_v18 = vld [vmem:[%s16683_s2 + $0xa8] ss:$16 sps:$4 sm:$0xff]   ;;  %17042 = vst [vmem:[#allocation45_spill] sm:$0xff] %v15521_v32 }
 0xc65   :  { %3761 = vmatprep.subr.bf16.mxu0 %v16957_v6  ;;  %3802 = vmatprep.subr.bf16.mxu1 %v16958_v59  ;;  %v17017_v63 = vld [vmem:[#allocation114_spill] sm:$0xff]  ;;  %v15415_v6 = vld [vmem:[%s16683_s2 + $0xcc] ss:$16 sps:$4 sm:$0xff]   ;;  %v17018_v59 = vld [vmem:[#allocation88_spill] sm:$0xff] }
 0xc68   :  { %3762 = vmatpush1.bf16.msra.mxu0 %v16959_v26  ;;  %3803 = vmatpush1.bf16.msra.mxu1 %v16960_v40  ;;  %v15422_v26 = vld [vmem:[%s16683_s2 + $0xc8] ss:$16 sps:$4 sm:$0xff]   ;;  %v17019_v40 = vld [vmem:[#allocation89_spill] sm:$0xff] }
 0xc69   :  { %3763 = vmatprep.subr.bf16.mxu0 %v16961_v1  ;;  %3804 = vmatprep.subr.bf16.mxu1 %v16962_v19  ;;  %v15429_v1 = vld [vmem:[%s16683_s2 + $0xec] ss:$16 sps:$4 sm:$0xff]   ;;  %v17020_v19 = vld [vmem:[#allocation90_spill] sm:$0xff] }
 0xc6c   :  { %3764 = vmatpush1.bf16.msra.mxu0 %v16963_v51  ;;  %3805 = vmatpush1.bf16.msra.mxu1 %v14976_v8  ;;  %v15387_v8 = vld [vmem:[%s16683_s2 + $0x8c] ss:$16 sps:$4 sm:$0xff]   ;;  %v15436_v51 = vld [vmem:[%s16683_s2 + $0xe8] ss:$16 sps:$4 sm:$0xff]  }
 0xc6d   :  { %3765 = vmatprep.subr.bf16.mxu0 %v14979_v42  ;;  %3806 = vmatprep.subr.bf16.mxu1 %v14982_v36  ;;  %v17014_v42 = vld [vmem:[#allocation111_spill] sm:$0xff]  ;;  %v15394_v36 = vld [vmem:[%s16683_s2 + $0x88] ss:$16 sps:$4 sm:$0xff]  }
 0xc70   :  { %3766 = vmatpush1.bf16.msra.mxu0 %v14985_v3  ;;  %3807 = vmatpush1.bf16.msra.mxu1 %v14988_v27  ;;  %v15380_v27 = vld [vmem:[%s16683_s2 + $0x68] ss:$16 sps:$4 sm:$0xff]  }
 0xc71   :  { %3866 = vmatprep.subr.bf16.mxu0 %v15121_v20  ;;  %3907 = vmatprep.subr.bf16.mxu1 %v15127_v12  ;;  %v17013_v3 = vld [vmem:[#allocation110_spill] sm:$0xff] }
 0xc73   :  { %3784 = vmatmul.mubr.bf16.vlgmr.msra.gmra.mrb[96].mxu0 %v3667_v41  ;;  %3825 = vmatmul.mubr.bf16.vlgmr.msra.gmra.mrb[88].mxu1 %v3667_v41  ;;  %v15524_v41 = vld [vmem:[#allocation14 + $0xc8] ss:$16 sps:$4 sm:$0xff]  }
 0xc74   :  { %3867 = vmatpush1.bf16.msra.mxu0 %v15133_v30  ;;  %3908 = vmatpush1.bf16.msra.mxu1 %v15336_v47  ;;  %17043 = vst [vmem:[#allocation46_spill] sm:$0xff] %v15524_v41 }
 0xc75   :  { %3868 = vmatprep.subr.bf16.mxu0 %v15140_v31  ;;  %3909 = vmatprep.subr.bf16.mxu1 %v15343_v46 }
 0xc76   :  { %3898 = vmatprep.mubr.bf16.mxu0 %v16752_v43  ;;  %3939 = vmatprep.mubr.bf16.mxu1 %v16752_v43 }
 0xc78   :  { %3869 = vmatpush1.bf16.msra.mxu0 %v15149_v7  ;;  %3910 = vmatpush1.bf16.msra.mxu1 %v15352_v35 }
 0xc79   :  { %3870 = vmatprep.subr.bf16.mxu0 %v15156_v45  ;;  %3911 = vmatprep.subr.bf16.mxu1 %v15359_v50 }
 0xc7c   :  { %3871 = vmatpush1.bf16.msra.mxu0 %v15163_v2  ;;  %3912 = vmatpush1.bf16.msra.mxu1 %v15366_v38 }
 0xc7d   :  { %3872 = vmatprep.subr.bf16.mxu0 %v17011_v58  ;;  %3913 = vmatprep.subr.bf16.mxu1 %v15373_v4 }
 0xc80   :  { %3873 = vmatpush1.bf16.msra.mxu0 %v17012_v49  ;;  %3914 = vmatpush1.bf16.msra.mxu1 %v15380_v27 }
 0xc81   :  { %3874 = vmatprep.subr.bf16.mxu0 %v17013_v3  ;;  %3915 = vmatprep.subr.bf16.mxu1 %v15387_v8 }
 0xc84   :  { %3875 = vmatpush1.bf16.msra.mxu0 %v17014_v42  ;;  %3916 = vmatpush1.bf16.msra.mxu1 %v15394_v36 }
 0xc85   :  { %3876 = vmatprep.subr.bf16.mxu0 %v17015_v28  ;;  %3917 = vmatprep.subr.bf16.mxu1 %v15401_v13 }
 0xc88   :  { %3877 = vmatpush1.bf16.msra.mxu0 %v17016_v54  ;;  %3918 = vmatpush1.bf16.msra.mxu1 %v15408_v18 }
 0xc89   :  { %3878 = vmatprep.subr.bf16.mxu0 %v17017_v63  ;;  %3919 = vmatprep.subr.bf16.mxu1 %v15415_v6 }
 0xc8c   :  { %3879 = vmatpush1.bf16.msra.mxu0 %v17018_v59  ;;  %3920 = vmatpush1.bf16.msra.mxu1 %v15422_v26 }
 0xc8d   :  { %3880 = vmatprep.subr.bf16.mxu0 %v17019_v40  ;;  %3921 = vmatprep.subr.bf16.mxu1 %v15429_v1 }
 0xc90   :  { %3881 = vmatpush1.bf16.msra.mxu0 %v17020_v19  ;;  %3922 = vmatpush1.bf16.msra.mxu1 %v15436_v51 }
 0xc91   :  { %3978 = vmatprep.subr.bf16.mxu0 %v15439_v21  ;;  %4019 = vmatprep.subr.bf16.mxu1 %v15442_v22 }
 0xc93   :  { %3899 = vmatmul.mubr.bf16.vlgmr.msra.gmra.mrb[100].mxu0 %v15293_v60  ;;  %3940 = vmatmul.mubr.bf16.vlgmr.msra.gmra.mrb[92].mxu1 %v15293_v60  ;;  %v15506_v60 = vld [vmem:[#allocation14 + $0xac] ss:$16 sps:$4 sm:$0xff]  }
 0xc94   :  { %3979 = vmatpush1.bf16.msra.mxu0 %v15447_v24  ;;  %4020 = vmatpush1.bf16.msra.mxu1 %v15450_v10  ;;  %17037 = vst [vmem:[#allocation82_spill] sm:$0xff] %v15506_v60 }
 0xc95   :  { %3980 = vmatprep.subr.bf16.mxu0 %v15453_v53  ;;  %4021 = vmatprep.subr.bf16.mxu1 %v15456_v61  ;;  %v17051_v61 = vld [vmem:[#allocation117_spill] sm:$0xff] }
 0xc96   :  { %4010 = vmatprep.mubr.bf16.mxu0 %v16752_v43  ;;  %4051 = vmatprep.mubr.bf16.mxu1 %v16752_v43 }
 0xc98   :  { %3981 = vmatpush1.bf16.msra.mxu0 %v15461_v23  ;;  %4022 = vmatpush1.bf16.msra.mxu1 %v15464_v37 }
 0xc99   :  { %3982 = vmatprep.subr.bf16.mxu0 %v15467_v52  ;;  %4023 = vmatprep.subr.bf16.mxu1 %v15470_v55 }
 0xc9c   :  { %3983 = vmatpush1.bf16.msra.mxu0 %v15473_v5  ;;  %4024 = vmatpush1.bf16.msra.mxu1 %v15476_v33 }
 0xc9d   :  { %3984 = vmatprep.subr.bf16.mxu0 %v15479_v9  ;;  %4025 = vmatprep.subr.bf16.mxu1 %v15482_v0 }
 0xca0   :  { %3985 = vmatpush1.bf16.msra.mxu0 %v15485_v16  ;;  %4026 = vmatpush1.bf16.msra.mxu1 %v15488_v17 }
 0xca1   :  { %3986 = vmatprep.subr.bf16.mxu0 %v15491_v14  ;;  %4027 = vmatprep.subr.bf16.mxu1 %v15494_v57 }
 0xca4   :  { %3987 = vmatpush1.bf16.msra.mxu0 %v15497_v34  ;;  %4028 = vmatpush1.bf16.msra.mxu1 %v15500_v56 }
 0xca5   :  { %3988 = vmatprep.subr.bf16.mxu0 %v15503_v11  ;;  %4029 = vmatprep.subr.bf16.mxu1 %v15506_v60 }
 0xca8   :  { %3989 = vmatpush1.bf16.msra.mxu0 %v15509_v15  ;;  %4030 = vmatpush1.bf16.msra.mxu1 %v15512_v44  ;;  %v15527_v15 = vld [vmem:[#allocation14 + $0xe4] ss:$16 sps:$4 sm:$0xff]   ;;  %v15530_v44 = vld [vmem:[#allocation14 + $0xec] ss:$16 sps:$4 sm:$0xff]  }
 0xca9   :  { %3990 = vmatprep.subr.bf16.mxu0 %v15515_v39  ;;  %4031 = vmatprep.subr.bf16.mxu1 %v15518_v48  ;;  %17044 = vst [vmem:[#allocation47_spill] sm:$0xff] %v15527_v15  ;;  %17045 = vst [vmem:[#allocation48_spill] sm:$0xff] %v15530_v44  ;;  %v15533_v39 = vld [vmem:[#allocation14 + $0xe0] ss:$16 sps:$4 sm:$0xff]   ;;  %v15536_v48 = vld [vmem:[#allocation14 + $0xe8] ss:$16 sps:$4 sm:$0xff]  }
 0xcaa   :  { %17046 = vst [vmem:[#allocation49_spill] sm:$0xff] %v15533_v39  ;;  %17047 = vst [vmem:[#allocation50_spill] sm:$0xff] %v15536_v48 }
 0xcac   :  { %3991 = vmatpush1.bf16.msra.mxu0 %v15521_v32  ;;  %4032 = vmatpush1.bf16.msra.mxu1 %v15524_v41  ;;  %v15539_v32 = vld [vmem:[#allocation16 + $0x4] ss:$16 sps:$4 sm:$0xff]   ;;  %v15542_v41 = vld [vmem:[#allocation16 + $0xc] ss:$16 sps:$4 sm:$0xff]  }
 0xcad   :  { %3992 = vmatprep.subr.bf16.mxu0 %v15527_v15  ;;  %4033 = vmatprep.subr.bf16.mxu1 %v15530_v44  ;;  %17048 = vst [vmem:[#allocation51_spill] sm:$0xff] %v15539_v32  ;;  %17049 = vst [vmem:[#allocation52_spill] sm:$0xff] %v15542_v41 }
 0xcb0   :  { %3993 = vmatpush1.bf16.msra.mxu0 %v15533_v39  ;;  %4034 = vmatpush1.bf16.msra.mxu1 %v15536_v48 }
 0xcb1   :  { %4060 = vmatprep.subr.bf16.mxu0 %v15539_v32  ;;  %4101 = vmatprep.subr.bf16.mxu1 %v15542_v41  ;;  %v17050_v41 = vld [vmem:[#allocation116_spill] sm:$0xff] }
 0xd26   :  { %v3703_v15 = vpop.f32.mrb[92].mxu0  ;;  %v3744_v60 = vpop.f32.mrb[84].mxu1 }
 0xd27   :  { %v3705_v11 = vpop.f32.mrb[93].mxu0  ;;  %v3746_v44 = vpop.f32.mrb[85].mxu1 }
 0xd28   :  { %v3707_v56 = vpop.f32.mrb[94].mxu0  ;;  %v3748_v34 = vpop.f32.mrb[86].mxu1 }
 0xd29   :  { %v3708_v57 = vpop.f32.mrb[95].mxu0  ;;  %v3749_v39 = vpop.f32.mrb[87].mxu1 }
 0xd2a   :  { %v17052_v39 = vld [vmem:[#allocation118_spill] sm:$0xff] }
 0xd46   :  { %v3785_v14 = vpop.f32.mrb[96].mxu0  ;;  %v3826_v17 = vpop.f32.mrb[88].mxu1 }
 0xd47   :  { %v3786_v16 = vadd.f32 %v3785_v14, %v3703_v15  ;;  %v15545_v48 = vadd.f32 %v3826_v17, %v3744_v60  ;;  %v3787_v0 = vpop.f32.mrb[97].mxu0  ;;  %v3828_v9 = vpop.f32.mrb[89].mxu1 }
 0xd48   :  { %v3788_v32 = vadd.f32 %v3787_v0, %v3705_v11  ;;  %v3829_v33 = vadd.f32 %v3828_v9, %v3746_v44  ;;  %v3789_v5 = vpop.f32.mrb[98].mxu0  ;;  %v3830_v55 = vpop.f32.mrb[90].mxu1  ;;  %v17053_v11 = vld [vmem:[#allocation100_spill] sm:$0xff] }
 0xd49   :  { %v3833_v52 = vadd.f32 %v3786_v16, %v17050_v41  ;;  %v3790_v37 = vpop.f32.mrb[99].mxu0  ;;  %v3831_v23 = vpop.f32.mrb[91].mxu1 }
 0xd4a   :  { %v3834_v56 = vadd.f32 %v3788_v32, %v17051_v61  ;;  %v3836_v14 = vadd.f32 %v3829_v33, %v17052_v39  ;;  %v17054_v32 = vld [vmem:[#allocation101_spill] sm:$0xff] }
 0xd4b   :  { %v10007_v34 = vmul.f32 -1.442695, %v3833_v52 }
 0xd4c   :  { %v10008_v57 = vmul.f32 -1.442695, %v3834_v56 }
 0xd4d   :  { %11555 = vpow2.f32 %v10007_v34 }
 0xd4e   :  { %11557 = vpow2.f32 %v10008_v57  ;;  %v17055_v57 = vld [vmem:[#allocation102_spill] sm:$0xff] }
 0xd4f   :  { %11559 = vtanh.f32 %v3836_v14  ;;  %v17056_v14 = vld [vmem:[#allocation103_spill] sm:$0xff] }
 0xd57   :  { %v11556_v17 = vpop.eup %11555 }
 0xd58   :  { %v3846_v60 = vadd.f32 1.0, %v11556_v17  ;;  %v11558_v15 = vpop.eup %11557 }
 0xd59   :  { %v3847_v9 = vadd.f32 1.0, %v11558_v15  ;;  %v11560_v55 = vpop.eup %11559 }
 0xd5a   :  { %11561 = vrcp.f32 %v3846_v60 }
 0xd5b   :  { %11563 = vrcp.f32 %v3847_v9 }
 0xd64   :  { %v11562_v5 = vpop.eup %11561 }
 0xd65   :  { %v3857_v0 = vmul.f32 %v11562_v5, %v11560_v55  ;;  %v11564_v37 = vpop.eup %11563 }
 0xd66   :  { %v3900_v23 = vpop.f32.mrb[100].mxu0  ;;  %v3941_v16 = vpop.f32.mrb[92].mxu1  ;;  %v3856_v52 = vmul.f32 %v11564_v37, %v15285_v62 }
 0xd67   :  { %v3948_v44 = vadd.f32 %v3900_v23, %v17053_v11  ;;  %v3950_v56 = vadd.f32 %v3941_v16, %v17054_v32  ;;  %v3902_v33 = vpop.f32.mrb[101].mxu0  ;;  %v3943_v34 = vpop.f32.mrb[93].mxu1 }
 0xd68   :  { %v3949_v17 = vadd.f32 %v3902_v33, %v17055_v57  ;;  %v3951_v60 = vadd.f32 %v3943_v34, %v17056_v14  ;;  %v3904_v15 = vpop.f32.mrb[102].mxu0  ;;  %v3945_v9 = vpop.f32.mrb[94].mxu1  ;;  %v15555_v39 = vadd.f32 %v3857_v0, %v3856_v52 }
 0xd69   :  { %v10010_v55 = vmul.f32 -1.442695, %v3948_v44  ;;  %v3905_v5 = vpop.f32.mrb[103].mxu0  ;;  %v3946_v61 = vpop.f32.mrb[95].mxu1  ;;  %v10012_v62 = vmul.f32 -1.442695, %v3950_v56 }
 0xd6a   :  { %v10011_v41 = vmul.f32 -1.442695, %v3949_v17  ;;  %v15570_v9 = vld [vmem:[#allocation16 + $0x8] ss:$16 sps:$4 sm:$0xff]   ;;  %v15581_v5 = vld [vmem:[#allocation16 + $0x20] ss:$16 sps:$4 sm:$0xff]  }
 0xd6b   :  { %11565 = vpow2.f32 %v10010_v55  ;;  %v15576_v55 = vld [vmem:[#allocation16 + $0x2c] ss:$16 sps:$4 sm:$0xff]  }
 0xd6c   :  { %11567 = vpow2.f32 %v10011_v41  ;;  %v3835_v41 = vadd.f32 %v15545_v48, %v14408_v25  ;;  %v15573_v48 = vld [vmem:[#allocation16 + $0x24] ss:$16 sps:$4 sm:$0xff]  }
 0xd6d   :  { %11569 = vtanh.f32 %v3951_v60 }
 0xd6e   :  { %11571 = vpow2.f32 %v10012_v62  ;;  %v10009_v17 = vmul.f32 -1.442695, %v3835_v41  ;;  %v15584_v62 = vld [vmem:[#allocation16 + $0x28] ss:$16 sps:$4 sm:$0xff]   ;;  %v15615_v41 = vld [vmem:[#allocation16 + $0x8c] ss:$16 sps:$4 sm:$0xff]  }
 0xd6f   :  { %17059 = vst [vmem:[#allocation55_spill] sm:$0xff] %v15615_v41 }
 0xd75   :  { %v11566_v37 = vpop.eup %11565 }
 0xd76   :  { %v3961_v23 = vadd.f32 1.0, %v11566_v37  ;;  %v11568_v16 = vpop.eup %11567  ;;  %v15587_v37 = vld [vmem:[#allocation16 + $0x44] ss:$16 sps:$4 sm:$0xff]  }
 0xd77   :  { %v3962_v11 = vadd.f32 1.0, %v11568_v16  ;;  %v11570_v32 = vpop.eup %11569 }
 0xd78   :  { %11573 = vrcp.f32 %v3961_v23  ;;  %v11572_v33 = vpop.eup %11571  ;;  %v15590_v23 = vld [vmem:[#allocation16 + $0x4c] ss:$16 sps:$4 sm:$0xff]  }
 0xd79   :  { %11575 = vrcp.f32 %v3962_v11  ;;  %v3963_v44 = vadd.f32 1.0, %v11572_v33  ;;  %v15593_v11 = vld [vmem:[#allocation16 + $0x40] ss:$16 sps:$4 sm:$0xff]   ;;  %v15599_v33 = vld [vmem:[#allocation16 + $0x64] ss:$16 sps:$4 sm:$0xff]  }
 0xd7b   :  { %11577 = vrcp.f32 %v3963_v44  ;;  %v15609_v44 = vld [vmem:[#allocation16 + $0x68] ss:$16 sps:$4 sm:$0xff]  }
 0xd7c   :  { %17057 = vst [vmem:[#allocation53_spill] sm:$0xff] %v15609_v44 }
 0xd82   :  { %v11574_v34 = vpop.eup %11573 }
 0xd83   :  { %v3972_v0 = vmul.f32 %v11574_v34, %v11570_v32  ;;  %v11576_v52 = vpop.eup %11575  ;;  %v15596_v32 = vld [vmem:[#allocation16 + $0x48] ss:$16 sps:$4 sm:$0xff]   ;;  %v15602_v34 = vld [vmem:[#allocation16 + $0x6c] ss:$16 sps:$4 sm:$0xff]  }
 0xd84   :  { %v3971_v61 = vmul.f32 %v11576_v52, %v15288_v29  ;;  %v15567_v29 = vld [vmem:[#allocation16] ss:$16 sps:$4 sm:$0xff]  }
 0xd85   :  { %v11578_v56 = vpop.eup %11577  ;;  %v15606_v52 = vld [vmem:[#allocation16 + $0x60] ss:$16 sps:$4 sm:$0xff]  }
 0xd86   :  { %v15558_v57 = vadd.f32 %v3972_v0, %v3971_v61  ;;  %v15612_v61 = vld [vmem:[#allocation16 + $0x84] ss:$16 sps:$4 sm:$0xff]  }
 0xd87   :  { %17058 = vst [vmem:[#allocation54_spill] sm:$0xff] %v15612_v61 }
 0xd88   :  { %11579 = vtanh.f32 %v15558_v57 }
 0xd89   :  { %11581 = vpow2.f32 %v10009_v17  ;;  %v15621_v17 = vld [vmem:[#allocation16 + $0x88] ss:$16 sps:$4 sm:$0xff]  }
 0xd8a   :  { %11583 = vtanh.f32 %v15555_v39  ;;  %17061 = vst [vmem:[#allocation57_spill] sm:$0xff] %v15621_v17 }
 0xd92   :  { %v11580_v14 = vpop.eup %11579 }
 0xd93   :  { %v3975_v60 = vmul.f32 %v11580_v14, %v11578_v56  ;;  %v11582_v16 = vpop.eup %11581  ;;  %v15618_v56 = vld [vmem:[#allocation16 + $0x80] ss:$16 sps:$4 sm:$0xff]   ;;  %v15624_v14 = vld [vmem:[#allocation16 + $0xa4] ss:$16 sps:$4 sm:$0xff]  }
 0xd94   :  { %v3848_v0 = vadd.f32 1.0, %v11582_v16  ;;  %17060 = vst [vmem:[#allocation56_spill] sm:$0xff] %v15618_v56  ;;  %17062 = vst [vmem:[#allocation58_spill] sm:$0xff] %v15624_v14  ;;  %v15630_v16 = vld [vmem:[#allocation16 + $0xa0] ss:$16 sps:$4 sm:$0xff]  }
 0xd95   :  { %v15563_v15 = vpack.c.bf16 %v3975_v60, %v3975_v60  ;;  %v15627_v60 = vld [vmem:[#allocation16 + $0xac] ss:$16 sps:$4 sm:$0xff]   ;;  %17064 = vst [vmem:[#allocation60_spill] sm:$0xff] %v15630_v16 }
 0xd96   :  { %11585 = vrcp.f32 %v3848_v0  ;;  %17063 = vst [vmem:[#allocation59_spill] sm:$0xff] %v15627_v60  ;;  %v15633_v0 = vld [vmem:[#allocation16 + $0xa8] ss:$16 sps:$4 sm:$0xff]  }
 0xd97   :  { %4011 = vmatmul.mubr.bf16.vlgmr.msra.gmra.mrb[104].mxu0 %v15563_v15  ;;  %4052 = vmatmul.mubr.bf16.vlgmr.msra.gmra.mrb[96].mxu1 %v15563_v15  ;;  %17065 = vst [vmem:[#allocation61_spill] sm:$0xff] %v15633_v0 }
 0xd98   :  { %4061 = vmatpush1.bf16.msra.mxu0 %v15567_v29  ;;  %4102 = vmatpush1.bf16.msra.mxu1 %v15570_v9 }
 0xd99   :  { %4062 = vmatprep.subr.bf16.mxu0 %v15573_v48  ;;  %4103 = vmatprep.subr.bf16.mxu1 %v15576_v55 }
 0xd9a   :  { %4092 = vmatprep.mubr.bf16.mxu0 %v16752_v43  ;;  %4133 = vmatprep.mubr.bf16.mxu1 %v16752_v43 }
 0xd9c   :  { %4063 = vmatpush1.bf16.msra.mxu0 %v15581_v5  ;;  %4104 = vmatpush1.bf16.msra.mxu1 %v15584_v62 }
 0xd9d   :  { %4064 = vmatprep.subr.bf16.mxu0 %v15587_v37  ;;  %4105 = vmatprep.subr.bf16.mxu1 %v15590_v23 }
 0xda0   :  { %4065 = vmatpush1.bf16.msra.mxu0 %v15593_v11  ;;  %4106 = vmatpush1.bf16.msra.mxu1 %v15596_v32 }
 0xda1   :  { %4066 = vmatprep.subr.bf16.mxu0 %v15599_v33  ;;  %4107 = vmatprep.subr.bf16.mxu1 %v15602_v34 }
 0xda4   :  { %4067 = vmatpush1.bf16.msra.mxu0 %v15606_v52  ;;  %4108 = vmatpush1.bf16.msra.mxu1 %v15609_v44  ;;  %v15657_v44 = vld [vmem:[#allocation16 + $0xe8] ss:$16 sps:$4 sm:$0xff]  }
 0xda5   :  { %4068 = vmatprep.subr.bf16.mxu0 %v15612_v61  ;;  %4109 = vmatprep.subr.bf16.mxu1 %v15615_v41  ;;  %v15642_v61 = vld [vmem:[#allocation16 + $0xc0] ss:$16 sps:$4 sm:$0xff]  }
 0xda6   :  { %17068 = vst [vmem:[#allocation64_spill] sm:$0xff] %v15642_v61 }
 0xda8   :  { %4069 = vmatpush1.bf16.msra.mxu0 %v15618_v56  ;;  %4110 = vmatpush1.bf16.msra.mxu1 %v15621_v17  ;;  %v15636_v56 = vld [vmem:[#allocation16 + $0xc4] ss:$16 sps:$4 sm:$0xff]   ;;  %v15639_v17 = vld [vmem:[#allocation16 + $0xcc] ss:$16 sps:$4 sm:$0xff]  }
 0xda9   :  { %4070 = vmatprep.subr.bf16.mxu0 %v15624_v14  ;;  %4111 = vmatprep.subr.bf16.mxu1 %v15627_v60  ;;  %17066 = vst [vmem:[#allocation62_spill] sm:$0xff] %v15636_v56  ;;  %17067 = vst [vmem:[#allocation63_spill] sm:$0xff] %v15639_v17  ;;  %v11584_v14 = vpop.eup %11583  ;;  %v15645_v60 = vld [vmem:[#allocation16 + $0xc8] ss:$16 sps:$4 sm:$0xff]  }
 0xdaa   :  { %v11586_v41 = vpop.eup %11585 }
 0xdac   :  { %4071 = vmatpush1.bf16.msra.mxu0 %v15630_v16  ;;  %4112 = vmatpush1.bf16.msra.mxu1 %v15633_v0  ;;  %v15648_v16 = vld [vmem:[#allocation16 + $0xe4] ss:$16 sps:$4 sm:$0xff]   ;;  %v15651_v0 = vld [vmem:[#allocation16 + $0xec] ss:$16 sps:$4 sm:$0xff]  }
 0xdad   :  { %4072 = vmatprep.subr.bf16.mxu0 %v15636_v56  ;;  %4113 = vmatprep.subr.bf16.mxu1 %v15639_v17  ;;  %v3860_v56 = vmul.f32 %v11586_v41, %v11584_v14  ;;  %v15654_v17 = vld [vmem:[#allocation16 + $0xe0] ss:$16 sps:$4 sm:$0xff]  }
 0xdb0   :  { %4073 = vmatpush1.bf16.msra.mxu0 %v15642_v61  ;;  %4114 = vmatpush1.bf16.msra.mxu1 %v15645_v60  ;;  %v3976_v61 = vpack.c.bf16 %v3860_v56, %v3860_v56 }
 0xdb1   :  { %4074 = vmatprep.subr.bf16.mxu0 %v15648_v16  ;;  %4115 = vmatprep.subr.bf16.mxu1 %v15651_v0 }
 0xdb4   :  { %4075 = vmatpush1.bf16.msra.mxu0 %v15654_v17  ;;  %4116 = vmatpush1.bf16.msra.mxu1 %v15657_v44 }
 0xdb5   :  { %4175 = vmatprep.subr.bf16.mxu0 %v15121_v20  ;;  %4216 = vmatprep.subr.bf16.mxu1 %v15127_v12  ;;  %v17069_v20 = vld [vmem:[#allocation91_spill] sm:$0xff]  ;;  %v17070_v12 = vld [vmem:[#allocation92_spill] sm:$0xff] }
 0xdb7   :  { %4093 = vmatmul.mubr.bf16.vlgmr.msra.gmra.mrb[108].mxu0 %v3976_v61  ;;  %4134 = vmatmul.mubr.bf16.vlgmr.msra.gmra.mrb[100].mxu1 %v3976_v61 }
 0xdb8   :  { %4176 = vmatpush1.bf16.msra.mxu0 %v15133_v30  ;;  %4217 = vmatpush1.bf16.msra.mxu1 %v15336_v47  ;;  %v17071_v30 = vld [vmem:[#allocation93_spill] sm:$0xff] }
 0xdb9   :  { %4177 = vmatprep.subr.bf16.mxu0 %v15140_v31  ;;  %4218 = vmatprep.subr.bf16.mxu1 %v15343_v46  ;;  %v17072_v31 = vld [vmem:[#allocation94_spill] sm:$0xff]  ;;  %v17076_v47 = vld [vmem:[#allocation73_spill] sm:$0xff] }
 0xdba   :  { %4207 = vmatprep.mubr.bf16.mxu0 %v16752_v43  ;;  %4248 = vmatprep.mubr.bf16.mxu1 %v16752_v43  ;;  %v17077_v46 = vld [vmem:[#allocation74_spill] sm:$0xff] }
 0xdbc   :  { %4178 = vmatpush1.bf16.msra.mxu0 %v15149_v7  ;;  %4219 = vmatpush1.bf16.msra.mxu1 %v15352_v35  ;;  %v17073_v7 = vld [vmem:[#allocation95_spill] sm:$0xff] }
 0xdbd   :  { %4179 = vmatprep.subr.bf16.mxu0 %v15156_v45  ;;  %4220 = vmatprep.subr.bf16.mxu1 %v15359_v50  ;;  %v17074_v45 = vld [vmem:[#allocation71_spill] sm:$0xff]  ;;  %v17079_v50 = vld [vmem:[#allocation84_spill] sm:$0xff] }
 0xdbe   :  { %v17078_v35 = vld [vmem:[#allocation75_spill] sm:$0xff] }
 0xdc0   :  { %4180 = vmatpush1.bf16.msra.mxu0 %v15163_v2  ;;  %4221 = vmatpush1.bf16.msra.mxu1 %v15366_v38  ;;  %v17075_v2 = vld [vmem:[#allocation72_spill] sm:$0xff]  ;;  %v17080_v38 = vld [vmem:[#allocation85_spill] sm:$0xff] }
 0xdc1   :  { %4181 = vmatprep.subr.bf16.mxu0 %v17011_v58  ;;  %4222 = vmatprep.subr.bf16.mxu1 %v15373_v4  ;;  %v17081_v58 = vld [vmem:[#allocation86_spill] sm:$0xff]  ;;  %v17082_v4 = vld [vmem:[#allocation87_spill] sm:$0xff] }
 0xdc4   :  { %4182 = vmatpush1.bf16.msra.mxu0 %v17012_v49  ;;  %4223 = vmatpush1.bf16.msra.mxu1 %v15380_v27  ;;  %v17083_v49 = vld [vmem:[#allocation80_spill] sm:$0xff]  ;;  %v17084_v27 = vld [vmem:[#allocation81_spill] sm:$0xff] }
 0xdc5   :  { %4183 = vmatprep.subr.bf16.mxu0 %v17013_v3  ;;  %4224 = vmatprep.subr.bf16.mxu1 %v15387_v8  ;;  %v17085_v3 = vld [vmem:[#allocation82_spill] sm:$0xff]  ;;  %v17086_v8 = vld [vmem:[#allocation115_spill] sm:$0xff] }
 0xdc8   :  { %4184 = vmatpush1.bf16.msra.mxu0 %v17014_v42  ;;  %4225 = vmatpush1.bf16.msra.mxu1 %v15394_v36  ;;  %v17087_v42 = vld [vmem:[#allocation42_spill] sm:$0xff]  ;;  %v17088_v36 = vld [vmem:[#allocation43_spill] sm:$0xff] }
 0xdc9   :  { %4185 = vmatprep.subr.bf16.mxu0 %v17015_v28  ;;  %4226 = vmatprep.subr.bf16.mxu1 %v15401_v13  ;;  %v17089_v28 = vld [vmem:[#allocation44_spill] sm:$0xff]  ;;  %v17090_v13 = vld [vmem:[#allocation45_spill] sm:$0xff] }
 0xdcc   :  { %4186 = vmatpush1.bf16.msra.mxu0 %v17016_v54  ;;  %4227 = vmatpush1.bf16.msra.mxu1 %v15408_v18  ;;  %v17091_v54 = vld [vmem:[#allocation46_spill] sm:$0xff]  ;;  %v17092_v18 = vld [vmem:[#allocation47_spill] sm:$0xff] }
 0xdcd   :  { %4187 = vmatprep.subr.bf16.mxu0 %v17017_v63  ;;  %4228 = vmatprep.subr.bf16.mxu1 %v15415_v6  ;;  %v17093_v63 = vld [vmem:[#allocation48_spill] sm:$0xff]  ;;  %v17094_v6 = vld [vmem:[#allocation49_spill] sm:$0xff] }
 0xdd0   :  { %4188 = vmatpush1.bf16.msra.mxu0 %v17018_v59  ;;  %4229 = vmatpush1.bf16.msra.mxu1 %v15422_v26  ;;  %v17095_v59 = vld [vmem:[#allocation50_spill] sm:$0xff]  ;;  %v17096_v26 = vld [vmem:[#allocation51_spill] sm:$0xff] }
 0xdd1   :  { %4189 = vmatprep.subr.bf16.mxu0 %v17019_v40  ;;  %4230 = vmatprep.subr.bf16.mxu1 %v15429_v1  ;;  %v17097_v40 = vld [vmem:[#allocation52_spill] sm:$0xff] }
 0xdd4   :  { %4190 = vmatpush1.bf16.msra.mxu0 %v17020_v19  ;;  %4231 = vmatpush1.bf16.msra.mxu1 %v15436_v51 }
 0xdd5   :  { %4287 = vmatprep.subr.bf16.mxu0 %v15439_v21  ;;  %4328 = vmatprep.subr.bf16.mxu1 %v15442_v22 }
 0xdd7   :  { %4208 = vmatmul.mubr.bf16.vlgmr.msra.gmra.mrb[112].mxu0 %v15563_v15  ;;  %4249 = vmatmul.mubr.bf16.vlgmr.msra.gmra.mrb[104].mxu1 %v15563_v15 }
 0xdd8   :  { %4288 = vmatpush1.bf16.msra.mxu0 %v15447_v24  ;;  %4329 = vmatpush1.bf16.msra.mxu1 %v15450_v10 }
 0xdd9   :  { %4289 = vmatprep.subr.bf16.mxu0 %v15453_v53  ;;  %4330 = vmatprep.subr.bf16.mxu1 %v17069_v20 }
 0xdda   :  { %4319 = vmatprep.mubr.bf16.mxu0 %v16752_v43  ;;  %4360 = vmatprep.mubr.bf16.mxu1 %v16752_v43 }
 0xddc   :  { %4290 = vmatpush1.bf16.msra.mxu0 %v17070_v12  ;;  %4331 = vmatpush1.bf16.msra.mxu1 %v17071_v30 }
 0xddd   :  { %4291 = vmatprep.subr.bf16.mxu0 %v17072_v31  ;;  %4332 = vmatprep.subr.bf16.mxu1 %v17073_v7 }
 0xde0   :  { %4292 = vmatpush1.bf16.msra.mxu0 %v17074_v45  ;;  %4333 = vmatpush1.bf16.msra.mxu1 %v17075_v2  ;;  %v17098_v45 = vld [vmem:[#allocation116_spill] sm:$0xff] }
 0xde1   :  { %4293 = vmatprep.subr.bf16.mxu0 %v17076_v47  ;;  %4334 = vmatprep.subr.bf16.mxu1 %v17077_v46 }
 0xde4   :  { %4294 = vmatpush1.bf16.msra.mxu0 %v17078_v35  ;;  %4335 = vmatpush1.bf16.msra.mxu1 %v17079_v50  ;;  %v17099_v35 = vld [vmem:[#allocation117_spill] sm:$0xff] }
 0xde5   :  { %4295 = vmatprep.subr.bf16.mxu0 %v17080_v38  ;;  %4336 = vmatprep.subr.bf16.mxu1 %v17081_v58 }
 0xde8   :  { %4296 = vmatpush1.bf16.msra.mxu0 %v17082_v4  ;;  %4337 = vmatpush1.bf16.msra.mxu1 %v17083_v49  ;;  %v17100_v4 = vld [vmem:[#allocation118_spill] sm:$0xff] }
 0xde9   :  { %4297 = vmatprep.subr.bf16.mxu0 %v17084_v27  ;;  %4338 = vmatprep.subr.bf16.mxu1 %v17085_v3 }
 0xdec   :  { %4298 = vmatpush1.bf16.msra.mxu0 %v17086_v8  ;;  %4339 = vmatpush1.bf16.msra.mxu1 %v17087_v42 }
 0xded   :  { %4299 = vmatprep.subr.bf16.mxu0 %v17088_v36  ;;  %4340 = vmatprep.subr.bf16.mxu1 %v17089_v28 }
 0xdf0   :  { %4300 = vmatpush1.bf16.msra.mxu0 %v17090_v13  ;;  %4341 = vmatpush1.bf16.msra.mxu1 %v17091_v54 }
 0xdf1   :  { %4301 = vmatprep.subr.bf16.mxu0 %v17092_v18  ;;  %4342 = vmatprep.subr.bf16.mxu1 %v17093_v63 }
 0xdf4   :  { %4302 = vmatpush1.bf16.msra.mxu0 %v17094_v6  ;;  %4343 = vmatpush1.bf16.msra.mxu1 %v17095_v59  ;;  %v17101_v59 = vld [vmem:[#allocation104_spill] sm:$0xff] }
 0xdf5   :  { %4369 = vmatprep.subr.bf16.mxu0 %v17096_v26  ;;  %4410 = vmatprep.subr.bf16.mxu1 %v17097_v40  ;;  %v17102_v40 = vld [vmem:[#allocation105_spill] sm:$0xff] }
 0xe6a   :  { %v4012_v1 = vpop.f32.mrb[104].mxu0  ;;  %v4053_v19 = vpop.f32.mrb[96].mxu1 }
 0xe6b   :  { %v4014_v51 = vpop.f32.mrb[105].mxu0  ;;  %v4055_v21 = vpop.f32.mrb[97].mxu1 }
 0xe6c   :  { %v4016_v22 = vpop.f32.mrb[106].mxu0  ;;  %v4057_v24 = vpop.f32.mrb[98].mxu1 }
 0xe6d   :  { %v4017_v10 = vpop.f32.mrb[107].mxu0  ;;  %v4058_v53 = vpop.f32.mrb[99].mxu1  ;;  %v17104_v24 = vld [vmem:[#allocation107_spill] sm:$0xff] }
 0xe8a   :  { %v4094_v15 = vpop.f32.mrb[108].mxu0  ;;  %v4135_v61 = vpop.f32.mrb[100].mxu1 }
 0xe8b   :  { %v4095_v41 = vadd.f32 %v4094_v15, %v4012_v1  ;;  %v15732_v56 = vadd.f32 %v4135_v61, %v4053_v19  ;;  %v4096_v14 = vpop.f32.mrb[109].mxu0  ;;  %v4137_v20 = vpop.f32.mrb[101].mxu1 }
 0xe8c   :  { %v4097_v12 = vadd.f32 %v4096_v14, %v4014_v51  ;;  %v4138_v30 = vadd.f32 %v4137_v20, %v4055_v21  ;;  %v4098_v31 = vpop.f32.mrb[110].mxu0  ;;  %v4139_v7 = vpop.f32.mrb[102].mxu1  ;;  %v17103_v21 = vld [vmem:[#allocation106_spill] sm:$0xff] }
 0xe8d   :  { %v4142_v2 = vadd.f32 %v4095_v41, %v17098_v45  ;;  %v4099_v47 = vpop.f32.mrb[111].mxu0  ;;  %v4140_v46 = vpop.f32.mrb[103].mxu1 }
 0xe8e   :  { %v4143_v50 = vadd.f32 %v4097_v12, %v17099_v35  ;;  %v4145_v49 = vadd.f32 %v4138_v30, %v17100_v4 }
 0xe8f   :  { %v10013_v38 = vmul.f32 -1.442695, %v4142_v2 }
 0xe90   :  { %v10014_v58 = vmul.f32 -1.442695, %v4143_v50 }
 0xe91   :  { %11587 = vpow2.f32 %v10013_v38 }
 0xe92   :  { %11589 = vpow2.f32 %v10014_v58 }
 0xe93   :  { %11591 = vtanh.f32 %v4145_v49 }
 0xe9b   :  { %v11588_v27 = vpop.eup %11587 }
 0xe9c   :  { %v4155_v3 = vadd.f32 1.0, %v11588_v27  ;;  %v11590_v8 = vpop.eup %11589 }
 0xe9d   :  { %v4156_v42 = vadd.f32 1.0, %v11590_v8  ;;  %v11592_v36 = vpop.eup %11591  ;;  %v4144_v8 = vadd.f32 %v15732_v56, %v14408_v25 }
 0xe9e   :  { %11593 = vrcp.f32 %v4155_v3 }
 0xe9f   :  { %11595 = vrcp.f32 %v4156_v42 }
 0xea8   :  { %v11594_v28 = vpop.eup %11593 }
 0xea9   :  { %v4166_v13 = vmul.f32 %v11594_v28, %v11592_v36  ;;  %v11596_v54 = vpop.eup %11595  ;;  %v10015_v36 = vmul.f32 -1.442695, %v4144_v8  ;;  %v11121_v8 = vld [vmem:[#allocation20 + $0xa0] ss:$16 sps:$4 sm:$0xff]  }
 0xeaa   :  { %v4209_v18 = vpop.f32.mrb[112].mxu0  ;;  %v4250_v63 = vpop.f32.mrb[104].mxu1  ;;  %v4165_v6 = vmul.f32 %v11596_v54, %v15555_v39 }
 0xeab   :  { %v4257_v26 = vadd.f32 %v4209_v18, %v17101_v59  ;;  %v4259_v1 = vadd.f32 %v4250_v63, %v17102_v40  ;;  %v4211_v19 = vpop.f32.mrb[113].mxu0  ;;  %v4252_v51 = vpop.f32.mrb[105].mxu1  ;;  %v17116_v18 = vld [vmem:[#allocation64_spill] sm:$0xff] }
 0xeac   :  { %v4258_v22 = vadd.f32 %v4211_v19, %v17103_v21  ;;  %v4260_v10 = vadd.f32 %v4252_v51, %v17104_v24  ;;  %v4213_v53 = vpop.f32.mrb[114].mxu0  ;;  %v4254_v15 = vpop.f32.mrb[106].mxu1  ;;  %v15742_v61 = vadd.f32 %v4166_v13, %v4165_v6  ;;  %v11083_v6 = vld [vmem:[%s16380_s14] sm:$0xff]   ;;  %v11089_v40 = vld [vmem:[%s16380_s14 + $0x30] sm:$0xff]  }
 0xead   :  { %v10016_v41 = vmul.f32 -1.442695, %v4257_v26  ;;  %v4214_v14 = vpop.f32.mrb[115].mxu0  ;;  %v4255_v20 = vpop.f32.mrb[107].mxu1  ;;  %v10018_v39 = vmul.f32 -1.442695, %v4259_v1 }
 0xeae   :  { %v10017_v12 = vmul.f32 -1.442695, %v4258_v22  ;;  %v12983_v26 = vmov 0.0   ;;  %v11090_v1 = vld [vmem:[%s16380_s14 + $0x38] sm:$0xff]   ;;  %v11091_v24 = vld [vmem:[#allocation20] ss:$16 sps:$4 sm:$0xff]  }
 0xeaf   :  { %11597 = vpow2.f32 %v10016_v41  ;;  %v17117_v19 = vld [vmem:[#allocation41_spill] sm:$0xff]  ;;  %v11093_v21 = vld [vmem:[#allocation20 + $0x4] ss:$16 sps:$4 sm:$0xff]  }
 0xeb0   :  { %11599 = vpow2.f32 %v10017_v12  ;;  %v4546_v51 = vpack.c.bf16 %v17117_v19, %v17117_v19  ;;  %v11096_v22 = vld [vmem:[#allocation20 + $0xc] ss:$16 sps:$4 sm:$0xff]   ;;  %v11099_v53 = vld [vmem:[#allocation20 + $0x24] ss:$16 sps:$4 sm:$0xff]   ;;  %v11097_v41 = vld [vmem:[#allocation20 + $0x20] ss:$16 sps:$4 sm:$0xff]  }
 0xeb1   :  { %11601 = vtanh.f32 %v4260_v10  ;;  %v11094_v10 = vld [vmem:[#allocation20 + $0x8] ss:$16 sps:$4 sm:$0xff]   ;;  %v11102_v15 = vld [vmem:[#allocation20 + $0x2c] ss:$16 sps:$4 sm:$0xff]   ;;  %v11105_v20 = vld [vmem:[#allocation20 + $0x44] ss:$16 sps:$4 sm:$0xff]  }
 0xeb2   :  { %11603 = vpow2.f32 %v10018_v39  ;;  %v11100_v14 = vld [vmem:[#allocation20 + $0x28] ss:$16 sps:$4 sm:$0xff]   ;;  %v11108_v12 = vld [vmem:[#allocation20 + $0x4c] ss:$16 sps:$4 sm:$0xff]   ;;  %v11103_v39 = vld [vmem:[#allocation20 + $0x40] ss:$16 sps:$4 sm:$0xff]  }
 0xeb9   :  { %v11598_v30 = vpop.eup %11597 }
 0xeba   :  { %v4270_v31 = vadd.f32 1.0, %v11598_v30  ;;  %v11600_v7 = vpop.eup %11599  ;;  %v11106_v30 = vld [vmem:[#allocation20 + $0x48] ss:$16 sps:$4 sm:$0xff]  }
 0xebb   :  { %v4271_v2 = vadd.f32 1.0, %v11600_v7  ;;  %v11602_v47 = vpop.eup %11601  ;;  %v11114_v7 = vld [vmem:[#allocation20 + $0x6c] ss:$16 sps:$4 sm:$0xff]  }
 0xebc   :  { %11605 = vrcp.f32 %v4270_v31  ;;  %v11604_v46 = vpop.eup %11603  ;;  %v11111_v31 = vld [vmem:[#allocation20 + $0x64] ss:$16 sps:$4 sm:$0xff]  }
 0xebd   :  { %11607 = vrcp.f32 %v4271_v2  ;;  %v4272_v49 = vadd.f32 1.0, %v11604_v46  ;;  %v11109_v2 = vld [vmem:[#allocation20 + $0x60] ss:$16 sps:$4 sm:$0xff]   ;;  %v11117_v46 = vld [vmem:[#allocation20 + $0x84] ss:$16 sps:$4 sm:$0xff]  }
 0xebf   :  { %11609 = vrcp.f32 %v4272_v49  ;;  %v11123_v49 = vld [vmem:[#allocation20 + $0xa4] ss:$16 sps:$4 sm:$0xff]  }
 0xec6   :  { %v11606_v50 = vpop.eup %11605 }
 0xec7   :  { %v4281_v38 = vmul.f32 %v11606_v50, %v11602_v47  ;;  %v11608_v58 = vpop.eup %11607  ;;  %v11112_v47 = vld [vmem:[#allocation20 + $0x68] ss:$16 sps:$4 sm:$0xff]   ;;  %v11120_v50 = vld [vmem:[#allocation20 + $0x8c] ss:$16 sps:$4 sm:$0xff]  }
 0xec8   :  { %v4280_v27 = vmul.f32 %v11608_v58, %v15558_v57  ;;  %v11118_v58 = vld [vmem:[#allocation20 + $0x88] ss:$16 sps:$4 sm:$0xff]  }
 0xec9   :  { %v11610_v42 = vpop.eup %11609 }
 0xeca   :  { %v15745_v3 = vadd.f32 %v4281_v38, %v4280_v27  ;;  %v11115_v38 = vld [vmem:[#allocation20 + $0x80] ss:$16 sps:$4 sm:$0xff]   ;;  %v11126_v27 = vld [vmem:[#allocation20 + $0xac] ss:$16 sps:$4 sm:$0xff]  }
 0xecc   :  { %11611 = vtanh.f32 %v15745_v3 }
 0xecd   :  { %11613 = vpow2.f32 %v10015_v36  ;;  %v11129_v36 = vld [vmem:[#allocation20 + $0xc4] ss:$16 sps:$4 sm:$0xff]  }
 0xece   :  { %11615 = vtanh.f32 %v15742_v61 }
 0xed6   :  { %v11612_v28 = vpop.eup %11611 }
 0xed7   :  { %v4284_v13 = vmul.f32 %v11612_v28, %v11610_v42  ;;  %v11614_v57 = vpop.eup %11613  ;;  %v11124_v42 = vld [vmem:[#allocation20 + $0xa8] ss:$16 sps:$4 sm:$0xff]   ;;  %v11132_v28 = vld [vmem:[#allocation20 + $0xcc] ss:$16 sps:$4 sm:$0xff]  }
 0xed9   :  { %v15750_v54 = vpack.c.bf16 %v4284_v13, %v4284_v13  ;;  %v11127_v13 = vld [vmem:[#allocation20 + $0xc0] ss:$16 sps:$4 sm:$0xff]  }
 0xedb   :  { %4320 = vmatmul.mubr.bf16.vlgmr.msra.gmra.mrb[116].mxu0 %v15750_v54  ;;  %4361 = vmatmul.mubr.bf16.vlgmr.msra.gmra.mrb[108].mxu1 %v15750_v54 }
 0xedc   :  { %4370 = vmatpush1.bf16.msra.mxu0 %v15567_v29  ;;  %4411 = vmatpush1.bf16.msra.mxu1 %v15570_v9  ;;  %v4157_v29 = vadd.f32 1.0, %v11614_v57  ;;  %v17105_v9 = vld [vmem:[#allocation53_spill] sm:$0xff] }
 0xedd   :  { %4371 = vmatprep.subr.bf16.mxu0 %v15573_v48  ;;  %4412 = vmatprep.subr.bf16.mxu1 %v15576_v55  ;;  %v17106_v48 = vld [vmem:[#allocation54_spill] sm:$0xff]  ;;  %v17107_v55 = vld [vmem:[#allocation55_spill] sm:$0xff] }
 0xede   :  { %4401 = vmatprep.mubr.bf16.mxu0 %v16752_v43  ;;  %4442 = vmatprep.mubr.bf16.mxu1 %v16752_v43  ;;  %11617 = vrcp.f32 %v4157_v29  ;;  %v11130_v57 = vld [vmem:[#allocation20 + $0xc8] ss:$16 sps:$4 sm:$0xff]   ;;  %v11135_v29 = vld [vmem:[#allocation20 + $0xe4] ss:$16 sps:$4 sm:$0xff]  }
 0xee0   :  { %4372 = vmatpush1.bf16.msra.mxu0 %v15581_v5  ;;  %4413 = vmatpush1.bf16.msra.mxu1 %v15584_v62  ;;  %v17108_v5 = vld [vmem:[#allocation56_spill] sm:$0xff]  ;;  %v17109_v62 = vld [vmem:[#allocation57_spill] sm:$0xff] }
 0xee1   :  { %4373 = vmatprep.subr.bf16.mxu0 %v15587_v37  ;;  %4414 = vmatprep.subr.bf16.mxu1 %v15590_v23  ;;  %v17110_v37 = vld [vmem:[#allocation58_spill] sm:$0xff]  ;;  %v17111_v23 = vld [vmem:[#allocation59_spill] sm:$0xff] }
 0xee4   :  { %4374 = vmatpush1.bf16.msra.mxu0 %v15593_v11  ;;  %4415 = vmatpush1.bf16.msra.mxu1 %v15596_v32  ;;  %v17112_v11 = vld [vmem:[#allocation60_spill] sm:$0xff]  ;;  %v17113_v32 = vld [vmem:[#allocation61_spill] sm:$0xff] }
 0xee5   :  { %4375 = vmatprep.subr.bf16.mxu0 %v15599_v33  ;;  %4416 = vmatprep.subr.bf16.mxu1 %v15602_v34  ;;  %v17114_v33 = vld [vmem:[#allocation62_spill] sm:$0xff]  ;;  %v17115_v34 = vld [vmem:[#allocation63_spill] sm:$0xff] }
 0xee8   :  { %4376 = vmatpush1.bf16.msra.mxu0 %v15606_v52  ;;  %4417 = vmatpush1.bf16.msra.mxu1 %v17105_v9  ;;  %v11616_v52 = vpop.eup %11615  ;;  %v11138_v9 = vld [vmem:[#allocation20 + $0xec] ss:$16 sps:$4 sm:$0xff]  }
 0xee9   :  { %4377 = vmatprep.subr.bf16.mxu0 %v17106_v48  ;;  %4418 = vmatprep.subr.bf16.mxu1 %v17107_v55  ;;  %v11618_v56 = vpop.eup %11617  ;;  %v11133_v48 = vld [vmem:[#allocation20 + $0xe0] ss:$16 sps:$4 sm:$0xff]   ;;  %v11136_v55 = vld [vmem:[#allocation20 + $0xe8] ss:$16 sps:$4 sm:$0xff]  }
 0xeea   :  { %v4169_v63 = vmul.f32 %v11618_v56, %v11616_v52 }
 0xeec   :  { %4378 = vmatpush1.bf16.msra.mxu0 %v17108_v5  ;;  %4419 = vmatpush1.bf16.msra.mxu1 %v17109_v62  ;;  %v4285_v59 = vpack.c.bf16 %v4169_v63, %v4169_v63  ;;  %v11141_v5 = vld [vmem:[#allocation22 + $0x4] ss:$16 sps:$4 sm:$0xff]   ;;  %v11144_v62 = vld [vmem:[#allocation22 + $0xc] ss:$16 sps:$4 sm:$0xff]  }
 0xeed   :  { %4379 = vmatprep.subr.bf16.mxu0 %v17110_v37  ;;  %4420 = vmatprep.subr.bf16.mxu1 %v17111_v23 }
 0xef0   :  { %4380 = vmatpush1.bf16.msra.mxu0 %v17112_v11  ;;  %4421 = vmatpush1.bf16.msra.mxu1 %v17113_v32 }
 0xef1   :  { %4381 = vmatprep.subr.bf16.mxu0 %v17114_v33  ;;  %4422 = vmatprep.subr.bf16.mxu1 %v17115_v34 }
 0xef4   :  { %4382 = vmatpush1.bf16.msra.mxu0 %v17116_v18  ;;  %4423 = vmatpush1.bf16.msra.mxu1 %v15645_v60  ;;  %v11084_v60 = vld [vmem:[%s16380_s14 + $0x8] sm:$0xff]  }
 0xef5   :  { %4383 = vmatprep.subr.bf16.mxu0 %v15648_v16  ;;  %4424 = vmatprep.subr.bf16.mxu1 %v15651_v0  ;;  %v11087_v16 = vld [vmem:[%s16380_s14 + $0x20] sm:$0xff]   ;;  %v11088_v0 = vld [vmem:[%s16380_s14 + $0x28] sm:$0xff]  }
 0xef8   :  { %4384 = vmatpush1.bf16.msra.mxu0 %v15654_v17  ;;  %4425 = vmatpush1.bf16.msra.mxu1 %v15657_v44  ;;  %v11085_v44 = vld [vmem:[%s16380_s14 + $0x10] sm:$0xff]   ;;  %v11086_v17 = vld [vmem:[%s16380_s14 + $0x18] sm:$0xff]  }
 0xef9   :  { %10723 = vmatprep.subr.bf16.mxu0 %v12983_v26  ;;  %4861 = vmatprep.subr.bf16.mxu1 %v11093_v21 }
 0xefb   :  { %4402 = vmatmul.mubr.bf16.vlgmr.msra.gmra.mrb[120].mxu0 %v4285_v59  ;;  %4443 = vmatmul.mubr.bf16.vlgmr.msra.gmra.mrb[112].mxu1 %v4285_v59 }
 0xefc   :  { %10724 = vmatpush3.bf16.msra.mxu0 %v11083_v6  ;;  %10739 = vmatprep.mubr.msk.bf16.mxu0 %vm12984_vm0, %v12983_v26 }
 0xefd   :  { %10725 = vmatprep.subr.bf16.mxu0 %v12983_v26  ;;  %4893 = vmatprep.mubr.bf16.mxu1 %v16752_v43 }
 0xefe   :  { %4862 = vmatpush1.bf16.msra.mxu1 %v11091_v24 }
 0xeff   :  { %4863 = vmatprep.subr.bf16.mxu1 %v11099_v53 }
 0xf00   :  { %10726 = vmatpush3.bf16.msra.mxu0 %v11084_v60 }
 0xf01   :  { %10727 = vmatprep.subr.bf16.mxu0 %v12983_v26 }
 0xf02   :  { %4864 = vmatpush1.bf16.msra.mxu1 %v11097_v41 }
 0xf03   :  { %4865 = vmatprep.subr.bf16.mxu1 %v11105_v20 }
 0xf04   :  { %10728 = vmatpush3.bf16.msra.mxu0 %v11085_v44 }
 0xf05   :  { %10729 = vmatprep.subr.bf16.mxu0 %v12983_v26 }
 0xf06   :  { %4866 = vmatpush1.bf16.msra.mxu1 %v11103_v39 }
 0xf07   :  { %4867 = vmatprep.subr.bf16.mxu1 %v11111_v31 }
 0xf08   :  { %10730 = vmatpush3.bf16.msra.mxu0 %v11086_v17 }
 0xf09   :  { %10731 = vmatprep.subr.bf16.mxu0 %v12983_v26 }
 0xf0a   :  { %4868 = vmatpush1.bf16.msra.mxu1 %v11109_v2 }
 0xf0b   :  { %4869 = vmatprep.subr.bf16.mxu1 %v11117_v46 }
 0xf0c   :  { %10732 = vmatpush3.bf16.msra.mxu0 %v11087_v16 }
 0xf0d   :  { %10733 = vmatprep.subr.bf16.mxu0 %v12983_v26 }
 0xf0e   :  { %4870 = vmatpush1.bf16.msra.mxu1 %v11115_v38  ;;  %v11142_v38 = vld [vmem:[#allocation22 + $0x8] ss:$16 sps:$4 sm:$0xff]  }
 0xf0f   :  { %4871 = vmatprep.subr.bf16.mxu1 %v11123_v49  ;;  %v11147_v49 = vld [vmem:[#allocation22 + $0x24] ss:$16 sps:$4 sm:$0xff]  }
 0xf10   :  { %10734 = vmatpush3.bf16.msra.mxu0 %v11088_v0 }
 0xf11   :  { %10735 = vmatprep.subr.bf16.mxu0 %v12983_v26 }
 0xf12   :  { %4872 = vmatpush1.bf16.msra.mxu1 %v11121_v8  ;;  %v11145_v8 = vld [vmem:[#allocation22 + $0x20] ss:$16 sps:$4 sm:$0xff]  }
 0xf13   :  { %4873 = vmatprep.subr.bf16.mxu1 %v11129_v36  ;;  %v11156_v36 = vld [vmem:[#allocation22 + $0x4c] ss:$16 sps:$4 sm:$0xff]  }
 0xf14   :  { %10736 = vmatpush3.bf16.msra.mxu0 %v11089_v40 }
 0xf15   :  { %10737 = vmatprep.subr.bf16.mxu0 %v12983_v26 }
 0xf16   :  { %4874 = vmatpush1.bf16.msra.mxu1 %v11127_v13  ;;  %v11154_v13 = vld [vmem:[#allocation22 + $0x48] ss:$16 sps:$4 sm:$0xff]  }
 0xf17   :  { %4875 = vmatprep.subr.bf16.mxu1 %v11135_v29  ;;  %v11162_v29 = vld [vmem:[#allocation22 + $0x6c] ss:$16 sps:$4 sm:$0xff]  }
 0xf18   :  { %10738 = vmatpush3.bf16.msra.mxu0 %v11090_v1 }
 0xf19   :  { %4902 = vmatprep.subr.bf16.mxu0 %v11096_v22 }
 0xf1a   :  { %4876 = vmatpush1.bf16.msra.mxu1 %v11133_v48  ;;  %v11160_v48 = vld [vmem:[#allocation22 + $0x68] ss:$16 sps:$4 sm:$0xff]  }
 0xf1b   :  { %10740 = vmatmul.mubr.bf16.vlgmr.msra.gmra.mrb[124].mxu0 %v4546_v51  ;;  %5103 = vmatprep.subr.bf16.mxu1 %v11141_v5  ;;  %v11168_v5 = vld [vmem:[#allocation22 + $0x8c] ss:$16 sps:$4 sm:$0xff]  }
 0xf1c   :  { %4934 = vmatprep.mubr.bf16.mxu0 %v16752_v43  ;;  %4903 = vmatpush1.bf16.msra.mxu0 %v11094_v10 }
 0xf1d   :  { %4904 = vmatprep.subr.bf16.mxu0 %v11102_v15 }
 0xf20   :  { %4905 = vmatpush1.bf16.msra.mxu0 %v11100_v14 }
 0xf21   :  { %4906 = vmatprep.subr.bf16.mxu0 %v11108_v12 }
 0xf24   :  { %4907 = vmatpush1.bf16.msra.mxu0 %v11106_v30 }
 0xf25   :  { %4908 = vmatprep.subr.bf16.mxu0 %v11114_v7 }
 0xf28   :  { %4909 = vmatpush1.bf16.msra.mxu0 %v11112_v47 }
 0xf29   :  { %4910 = vmatprep.subr.bf16.mxu0 %v11120_v50  ;;  %v11139_v50 = vld [vmem:[#allocation22] ss:$16 sps:$4 sm:$0xff]  }
 0xf2c   :  { %4911 = vmatpush1.bf16.msra.mxu0 %v11118_v58 }
 0xf2d   :  { %4912 = vmatprep.subr.bf16.mxu0 %v11126_v27  ;;  %v11150_v27 = vld [vmem:[#allocation22 + $0x2c] ss:$16 sps:$4 sm:$0xff]  }
 0xf30   :  { %4913 = vmatpush1.bf16.msra.mxu0 %v11124_v42  ;;  %v11148_v42 = vld [vmem:[#allocation22 + $0x28] ss:$16 sps:$4 sm:$0xff]  }
 0xf31   :  { %4914 = vmatprep.subr.bf16.mxu0 %v11132_v28  ;;  %v11151_v28 = vld [vmem:[#allocation22 + $0x40] ss:$16 sps:$4 sm:$0xff]  }
 0xf34   :  { %4915 = vmatpush1.bf16.msra.mxu0 %v11130_v57  ;;  %v11159_v57 = vld [vmem:[#allocation22 + $0x64] ss:$16 sps:$4 sm:$0xff]  }
 0xf35   :  { %4916 = vmatprep.subr.bf16.mxu0 %v11138_v9  ;;  %v11157_v9 = vld [vmem:[#allocation22 + $0x60] ss:$16 sps:$4 sm:$0xff]  }
 0xf38   :  { %4917 = vmatpush1.bf16.msra.mxu0 %v11136_v55  ;;  %v11165_v55 = vld [vmem:[#allocation22 + $0x84] ss:$16 sps:$4 sm:$0xff]  }
 0xf39   :  { %5144 = vmatprep.subr.bf16.mxu0 %v11144_v62  ;;  %v11163_v62 = vld [vmem:[#allocation22 + $0x80] ss:$16 sps:$4 sm:$0xff]  }
 0xfae   :  { %v4321_v37 = vpop.f32.mrb[116].mxu0  ;;  %v4362_v23 = vpop.f32.mrb[108].mxu1 }
 0xfaf   :  { %v4323_v11 = vpop.f32.mrb[117].mxu0  ;;  %v4364_v32 = vpop.f32.mrb[109].mxu1 }
 0xfb0   :  { %v4325_v33 = vpop.f32.mrb[118].mxu0  ;;  %v4366_v34 = vpop.f32.mrb[110].mxu1 }
 0xfb1   :  { %v4326_v52 = vpop.f32.mrb[119].mxu0  ;;  %v4367_v56 = vpop.f32.mrb[111].mxu1  ;;  %v11172_v33 = vld [vmem:[#allocation22 + $0xa8] ss:$16 sps:$4 sm:$0xff]   ;;  %v11177_v34 = vld [vmem:[#allocation22 + $0xc4] ss:$16 sps:$4 sm:$0xff]  }
 0xfb2   :  { %v11180_v52 = vld [vmem:[#allocation22 + $0xcc] ss:$16 sps:$4 sm:$0xff]   ;;  %v11175_v56 = vld [vmem:[#allocation22 + $0xc0] ss:$16 sps:$4 sm:$0xff]  }
 0xfce   :  { %v4403_v18 = vpop.f32.mrb[120].mxu0  ;;  %v4444_v63 = vpop.f32.mrb[112].mxu1 }
 0xfcf   :  { %v4404_v6 = vadd.f32 %v4403_v18, %v4321_v37  ;;  %v15815_v59 = vadd.f32 %v4444_v63, %v4362_v23  ;;  %v4405_v26 = vpop.f32.mrb[121].mxu0  ;;  %v4446_v60 = vpop.f32.mrb[113].mxu1  ;;  %v11166_v37 = vld [vmem:[#allocation22 + $0x88] ss:$16 sps:$4 sm:$0xff]   ;;  %v11171_v23 = vld [vmem:[#allocation22 + $0xa4] ss:$16 sps:$4 sm:$0xff]  }
 0xfd0   :  { %v4406_v44 = vadd.f32 %v4405_v26, %v4323_v11  ;;  %v4447_v17 = vadd.f32 %v4446_v60, %v4364_v32  ;;  %v4407_v16 = vpop.f32.mrb[122].mxu0  ;;  %v4448_v0 = vpop.f32.mrb[114].mxu1  ;;  %v11174_v11 = vld [vmem:[#allocation22 + $0xac] ss:$16 sps:$4 sm:$0xff]   ;;  %v11169_v32 = vld [vmem:[#allocation22 + $0xa0] ss:$16 sps:$4 sm:$0xff]  }
 0xfd1   :  { %v4451_v40 = vadd.f32 %v4404_v6, %v17098_v45  ;;  %v4408_v1 = vpop.f32.mrb[123].mxu0  ;;  %v4449_v19 = vpop.f32.mrb[115].mxu1  ;;  %v15820_v45 = vld [vmem:[#allocation19] ss:$0 sm:$0xff]  ;;  %v11178_v18 = vld [vmem:[#allocation22 + $0xc8] ss:$16 sps:$4 sm:$0xff]  }
 0xfd2   :  { %v4452_v51 = vadd.f32 %v4406_v44, %v17099_v35  ;;  %v4454_v24 = vadd.f32 %v4447_v17, %v17100_v4  ;;  %v11183_v63 = vld [vmem:[#allocation22 + $0xe4] ss:$16 sps:$4 sm:$0xff]   ;;  %v11186_v6 = vld [vmem:[#allocation22 + $0xec] ss:$16 sps:$4 sm:$0xff]   ;;  %v11181_v26 = vld [vmem:[#allocation22 + $0xe0] ss:$16 sps:$4 sm:$0xff]  }
 0xfd3   :  { %v10019_v21 = vmul.f32 -1.442695, %v4451_v40  ;;  %v11184_v60 = vld [vmem:[#allocation22 + $0xe8] ss:$16 sps:$4 sm:$0xff]   ;;  %v11192_v17 = vld [vmem:[#allocation25 + $0xc] ss:$16 sps:$4 sm:$0xff]  }
 0xfd4   :  { %v10020_v22 = vmul.f32 -1.442695, %v4452_v51  ;;  %v11189_v44 = vld [vmem:[#allocation25 + $0x4] ss:$16 sps:$4 sm:$0xff]   ;;  %v11187_v16 = vld [vmem:[#allocation25] ss:$16 sps:$4 sm:$0xff]  }
 0xfd5   :  { %11619 = vpow2.f32 %v10019_v21  ;;  %v11190_v0 = vld [vmem:[#allocation25 + $0x8] ss:$16 sps:$4 sm:$0xff]   ;;  %v11195_v40 = vld [vmem:[#allocation25 + $0x24] ss:$16 sps:$4 sm:$0xff]   ;;  %v11198_v1 = vld [vmem:[#allocation25 + $0x2c] ss:$16 sps:$4 sm:$0xff]  }
 0xfd6   :  { %11621 = vpow2.f32 %v10020_v22  ;;  %v11193_v19 = vld [vmem:[#allocation25 + $0x20] ss:$16 sps:$4 sm:$0xff]   ;;  %v11196_v51 = vld [vmem:[#allocation25 + $0x28] ss:$16 sps:$4 sm:$0xff]   ;;  %v11204_v21 = vld [vmem:[#allocation25 + $0x4c] ss:$16 sps:$4 sm:$0xff]  }
 0xfd7   :  { %11623 = vtanh.f32 %v4454_v24  ;;  %v11199_v22 = vld [vmem:[#allocation25 + $0x40] ss:$16 sps:$4 sm:$0xff]   ;;  %v11202_v24 = vld [vmem:[#allocation25 + $0x48] ss:$16 sps:$4 sm:$0xff]  }
 0xfdf   :  { %v11620_v10 = vpop.eup %11619 }
 0xfe0   :  { %v4464_v53 = vadd.f32 1.0, %v11620_v10  ;;  %v11622_v15 = vpop.eup %11621  ;;  %v11207_v10 = vld [vmem:[#allocation25 + $0x64] ss:$16 sps:$4 sm:$0xff]  }
 0xfe1   :  { %v4465_v41 = vadd.f32 1.0, %v11622_v15  ;;  %v11624_v14 = vpop.eup %11623  ;;  %v11205_v15 = vld [vmem:[#allocation25 + $0x60] ss:$16 sps:$4 sm:$0xff]  }
 0xfe2   :  { %11625 = vrcp.f32 %v4464_v53  ;;  %v11210_v53 = vld [vmem:[#allocation25 + $0x6c] ss:$16 sps:$4 sm:$0xff]  }
 0xfe3   :  { %11627 = vrcp.f32 %v4465_v41  ;;  %v11208_v41 = vld [vmem:[#allocation25 + $0x68] ss:$16 sps:$4 sm:$0xff]  }
 0xfec   :  { %v11626_v20 = vpop.eup %11625 }
 0xfed   :  { %v4475_v12 = vmul.f32 %v11626_v20, %v11624_v14  ;;  %v11628_v39 = vpop.eup %11627  ;;  %v11213_v14 = vld [vmem:[#allocation25 + $0x84] ss:$16 sps:$4 sm:$0xff]   ;;  %v11216_v20 = vld [vmem:[#allocation25 + $0x8c] ss:$16 sps:$4 sm:$0xff]  }
 0xfee   :  { %v4629_v35 = vpop.f32.mrb[124].mxu0  ;;  %v4474_v30 = vmul.f32 %v11628_v39, %v15742_v61  ;;  %v11153_v61 = vld [vmem:[#allocation22 + $0x44] ss:$16 sps:$4 sm:$0xff]   ;;  %v11214_v39 = vld [vmem:[#allocation25 + $0x88] ss:$16 sps:$4 sm:$0xff]  }
 0xfef   :  { %v4630_v31 = vadd.f32 %v15820_v45, %v4629_v35  ;;  %v10741_v7 = vpop.f32.mrb[125].mxu0  ;;  %v11217_v35 = vld [vmem:[#allocation25 + $0xa0] ss:$16 sps:$4 sm:$0xff]  }
 0xff0   :  { %v4632_v4 = vpop.f32.mrb[126].mxu0  ;;  %v15824_v2 = vadd.f32 %v4475_v12, %v4474_v30  ;;  %v11211_v12 = vld [vmem:[#allocation25 + $0x80] ss:$16 sps:$4 sm:$0xff]   ;;  %v11219_v30 = vld [vmem:[#allocation25 + $0xa4] ss:$16 sps:$4 sm:$0xff]  }
 0xff1   :  { %v4635_v47 = vmax.f32 %v4630_v31, 0.0  ;;  %v10742_v46 = vpop.f32.mrb[127].mxu0  ;;  %v11220_v31 = vld [vmem:[#allocation25 + $0xa8] ss:$16 sps:$4 sm:$0xff]   ;;  %v11222_v7 = vld [vmem:[#allocation25 + $0xac] ss:$16 sps:$4 sm:$0xff]  }
 0xff2   :  { %v11225_v4 = vld [vmem:[#allocation25 + $0xc4] ss:$16 sps:$4 sm:$0xff]   ;;  %v11223_v46 = vld [vmem:[#allocation25 + $0xc0] ss:$16 sps:$4 sm:$0xff]  }
 0xff3   :  { %v4700_v58 = vpack.c.bf16 %v4635_v47, %v4635_v47  ;;  %v11228_v47 = vld [vmem:[#allocation25 + $0xcc] ss:$16 sps:$4 sm:$0xff]  }
 0xff5   :  { %4894 = vmatmul.mubr.bf16.vlgmr.msra.gmra.mrb[116].mxu1 %v4700_v58  ;;  %4935 = vmatmul.mubr.bf16.vlgmr.msra.gmra.mrb[128].mxu0 %v4700_v58  ;;  %v11234_v58 = vld [vmem:[#allocation25 + $0xec] ss:$16 sps:$4 sm:$0xff]  }
 0xff6   :  { %5104 = vmatpush1.bf16.msra.mxu1 %v11139_v50  ;;  %5145 = vmatpush1.bf16.msra.mxu0 %v11142_v38  ;;  %v11226_v50 = vld [vmem:[#allocation25 + $0xc8] ss:$16 sps:$4 sm:$0xff]   ;;  %v11231_v38 = vld [vmem:[#allocation25 + $0xe4] ss:$16 sps:$4 sm:$0xff]  }
 0xff7   :  { %5105 = vmatprep.subr.bf16.mxu1 %v11147_v49  ;;  %5146 = vmatprep.subr.bf16.mxu0 %v11150_v27  ;;  %v11229_v49 = vld [vmem:[#allocation25 + $0xe0] ss:$16 sps:$4 sm:$0xff]   ;;  %v11232_v27 = vld [vmem:[#allocation25 + $0xe8] ss:$16 sps:$4 sm:$0xff]  }
 0xff8   :  { %5135 = vmatprep.mubr.bf16.mxu1 %v16752_v43  ;;  %5176 = vmatprep.mubr.bf16.mxu0 %v16752_v43 }
 0xffa   :  { %5106 = vmatpush1.bf16.msra.mxu1 %v11145_v8  ;;  %5147 = vmatpush1.bf16.msra.mxu0 %v11148_v42  ;;  %v11237_v8 = vld [vmem:[#allocation26 + $0x4] ss:$16 sps:$4 sm:$0xff]   ;;  %v11240_v42 = vld [vmem:[#allocation26 + $0xc] ss:$16 sps:$4 sm:$0xff]  }
 0xffb   :  { %5107 = vmatprep.subr.bf16.mxu1 %v11153_v61  ;;  %5148 = vmatprep.subr.bf16.mxu0 %v11156_v36 }
 0xffe   :  { %5108 = vmatpush1.bf16.msra.mxu1 %v11151_v28  ;;  %5149 = vmatpush1.bf16.msra.mxu0 %v11154_v13 }
 0xfff   :  { %5109 = vmatprep.subr.bf16.mxu1 %v11159_v57  ;;  %5150 = vmatprep.subr.bf16.mxu0 %v11162_v29 }
0x1002   :  { %5110 = vmatpush1.bf16.msra.mxu1 %v11157_v9  ;;  %5151 = vmatpush1.bf16.msra.mxu0 %v11160_v48 }
0x1003   :  { %5111 = vmatprep.subr.bf16.mxu1 %v11165_v55  ;;  %5152 = vmatprep.subr.bf16.mxu0 %v11168_v5  ;;  %v4479_v55 = vld [vmem:[#allocation23] sm:$0xf] }
0x1004   :  { %v17118_v5 = vld [vmem:[#allocation76_spill] sm:$0xff] }
0x1006   :  { %5112 = vmatpush1.bf16.msra.mxu1 %v11163_v62  ;;  %5153 = vmatpush1.bf16.msra.mxu0 %v11166_v37  ;;  %v15833_v62 = vrot.slane %v4479_v55, %v17118_v5 }
0x1007   :  { %5113 = vmatprep.subr.bf16.mxu1 %v11171_v23  ;;  %5154 = vmatprep.subr.bf16.mxu0 %v11174_v11  ;;  %v17119_v11 = vld [vmem:[#allocation78_spill] sm:$0xff] }
0x100a   :  { %5114 = vmatpush1.bf16.msra.mxu1 %v11169_v32  ;;  %5155 = vmatpush1.bf16.msra.mxu0 %v11172_v33  ;;  %v15836_v32 = vrot.slane %v4479_v55, %v17119_v11 }
0x100b   :  { %5115 = vmatprep.subr.bf16.mxu1 %v11177_v34  ;;  %5156 = vmatprep.subr.bf16.mxu0 %v11180_v52 }
0x100e   :  { %5116 = vmatpush1.bf16.msra.mxu1 %v11175_v56  ;;  %5157 = vmatpush1.bf16.msra.mxu0 %v11178_v18 }
0x100f   :  { %5117 = vmatprep.subr.bf16.mxu1 %v11183_v63  ;;  %5158 = vmatprep.subr.bf16.mxu0 %v11186_v6 }
0x1012   :  { %5118 = vmatpush1.bf16.msra.mxu1 %v11181_v26  ;;  %5159 = vmatpush1.bf16.msra.mxu0 %v11184_v60 }
0x1013   :  { %5439 = vmatprep.subr.bf16.mxu1 %v11189_v44  ;;  %5480 = vmatprep.subr.bf16.mxu0 %v11192_v17 }
0x1015   :  { %5136 = vmatmul.mubr.bf16.vlgmr.msra.gmra.mrb[120].mxu1 %v15750_v54  ;;  %5177 = vmatmul.mubr.bf16.vlgmr.msra.gmra.mrb[132].mxu0 %v15750_v54  ;;  %v11201_v54 = vld [vmem:[#allocation25 + $0x44] ss:$16 sps:$4 sm:$0xff]  }
0x1016   :  { %5471 = vmatprep.mubr.bf16.mxu1 %v16752_v43  ;;  %5512 = vmatprep.mubr.bf16.mxu0 %v16752_v43 }
0x1017   :  { %5440 = vmatpush1.bf16.msra.mxu1 %v11187_v16  ;;  %5481 = vmatpush1.bf16.msra.mxu0 %v11190_v0 }
0x1018   :  { %5441 = vmatprep.subr.bf16.mxu1 %v11195_v40  ;;  %5482 = vmatprep.subr.bf16.mxu0 %v11198_v1  ;;  %v17120_v1 = vld [vmem:[#allocation77_spill] sm:$0xff] }
0x101b   :  { %5442 = vmatpush1.bf16.msra.mxu1 %v11193_v19  ;;  %5483 = vmatpush1.bf16.msra.mxu0 %v11196_v51  ;;  %v15841_v19 = vrot.slane %v4479_v55, %v17120_v1  ;;  %v17121_v51 = vld [vmem:[#allocation79_spill] sm:$0xff] }
0x101c   :  { %5443 = vmatprep.subr.bf16.mxu1 %v11201_v54  ;;  %5484 = vmatprep.subr.bf16.mxu0 %v11204_v21  ;;  %v15844_v54 = vrot.slane %v4479_v55, %v17121_v51  ;;  %v11261_v55 = vld [vmem:[#allocation26 + $0x84] ss:$16 sps:$4 sm:$0xff]  }
0x101f   :  { %5444 = vmatpush1.bf16.msra.mxu1 %v11199_v22  ;;  %5485 = vmatpush1.bf16.msra.mxu0 %v11202_v24 }
0x1020   :  { %5445 = vmatprep.subr.bf16.mxu1 %v11207_v10  ;;  %5486 = vmatprep.subr.bf16.mxu0 %v11210_v53 }
0x1023   :  { %5446 = vmatpush1.bf16.msra.mxu1 %v11205_v15  ;;  %5487 = vmatpush1.bf16.msra.mxu0 %v11208_v41 }
0x1024   :  { %5447 = vmatprep.subr.bf16.mxu1 %v11213_v14  ;;  %5488 = vmatprep.subr.bf16.mxu0 %v11216_v20 }
0x1027   :  { %5448 = vmatpush1.bf16.msra.mxu1 %v11211_v12  ;;  %5489 = vmatpush1.bf16.msra.mxu0 %v11214_v39 }
0x1028   :  { %5449 = vmatprep.subr.bf16.mxu1 %v11219_v30  ;;  %5490 = vmatprep.subr.bf16.mxu0 %v11222_v7 }
0x102b   :  { %5450 = vmatpush1.bf16.msra.mxu1 %v11217_v35  ;;  %5491 = vmatpush1.bf16.msra.mxu0 %v11220_v31 }
0x102c   :  { %5451 = vmatprep.subr.bf16.mxu1 %v11225_v4  ;;  %5492 = vmatprep.subr.bf16.mxu0 %v11228_v47  ;;  %v4453_v4 = vadd.f32 %v15815_v59, %v14408_v25  ;;  %v11249_v25 = vld [vmem:[#allocation26 + $0x44] ss:$16 sps:$4 sm:$0xff]   ;;  %v11252_v59 = vld [vmem:[#allocation26 + $0x4c] ss:$16 sps:$4 sm:$0xff]  }
0x102f   :  { %5452 = vmatpush1.bf16.msra.mxu1 %v11223_v46  ;;  %5493 = vmatpush1.bf16.msra.mxu0 %v11226_v50  ;;  %v10021_v46 = vmul.f32 -1.442695, %v4453_v4  ;;  %v15922_v4 = vld [vmem:[%s16380_s14 + $0x2c] sm:$0xf] }
0x1030   :  { %5453 = vmatprep.subr.bf16.mxu1 %v11231_v38  ;;  %5494 = vmatprep.subr.bf16.mxu0 %v11234_v58  ;;  %v11235_v58 = vld [vmem:[#allocation26] ss:$16 sps:$4 sm:$0xff]  }
0x1033   :  { %5454 = vmatpush1.bf16.msra.mxu1 %v11229_v49  ;;  %5495 = vmatpush1.bf16.msra.mxu0 %v11232_v27  ;;  %v11238_v49 = vld [vmem:[#allocation26 + $0x8] ss:$16 sps:$4 sm:$0xff]  }
0x1034   :  { %5681 = vmatprep.subr.bf16.mxu1 %v11237_v8  ;;  %5722 = vmatprep.subr.bf16.mxu0 %v11240_v42  ;;  %v11243_v8 = vld [vmem:[#allocation26 + $0x24] ss:$16 sps:$4 sm:$0xff]   ;;  %v11246_v42 = vld [vmem:[#allocation26 + $0x2c] ss:$16 sps:$4 sm:$0xff]  }
0x10c8   :  { %v4895_v61 = vpop.f32.mrb[116].mxu1  ;;  %v4936_v36 = vpop.f32.mrb[128].mxu0 }
0x10c9   :  { %v4897_v28 = vpop.f32.mrb[117].mxu1  ;;  %v4938_v13 = vpop.f32.mrb[129].mxu0 }
0x10ca   :  { %v4899_v57 = vpop.f32.mrb[118].mxu1  ;;  %v4940_v29 = vpop.f32.mrb[130].mxu0 }
0x10cb   :  { %v4900_v9 = vpop.f32.mrb[119].mxu1  ;;  %v4941_v48 = vpop.f32.mrb[131].mxu0  ;;  %v11258_v57 = vld [vmem:[#allocation26 + $0x6c] ss:$16 sps:$4 sm:$0xff]  }
0x10cc   :  { %v11253_v9 = vld [vmem:[#allocation26 + $0x60] ss:$16 sps:$4 sm:$0xff]   ;;  %v11256_v48 = vld [vmem:[#allocation26 + $0x68] ss:$16 sps:$4 sm:$0xff]  }
0x10e8   :  { %v5137_v37 = vpop.f32.mrb[120].mxu1  ;;  %v5178_v23 = vpop.f32.mrb[132].mxu0 }
0x10e9   :  { %v5138_v33 = vadd.f32 %v5137_v37, %v4895_v61  ;;  %v5179_v34 = vadd.f32 %v5178_v23, %v4936_v36  ;;  %v5139_v52 = vpop.f32.mrb[121].mxu1  ;;  %v5180_v56 = vpop.f32.mrb[133].mxu0  ;;  %v11244_v61 = vld [vmem:[#allocation26 + $0x28] ss:$16 sps:$4 sm:$0xff]   ;;  %v11247_v36 = vld [vmem:[#allocation26 + $0x40] ss:$16 sps:$4 sm:$0xff]  }
0x10ea   :  { %v5140_v18 = vadd.f32 %v5139_v52, %v4897_v28  ;;  %v5181_v63 = vadd.f32 %v5180_v56, %v4938_v13  ;;  %v5141_v6 = vpop.f32.mrb[122].mxu1  ;;  %v5182_v26 = vpop.f32.mrb[134].mxu0  ;;  %v11250_v28 = vld [vmem:[#allocation26 + $0x48] ss:$16 sps:$4 sm:$0xff]   ;;  %v11255_v13 = vld [vmem:[#allocation26 + $0x64] ss:$16 sps:$4 sm:$0xff]  }
0x10eb   :  { %v5185_v60 = vadd.f32 %v5138_v33, %v15833_v62  ;;  %v5142_v44 = vpop.f32.mrb[123].mxu1  ;;  %v5183_v17 = vpop.f32.mrb[135].mxu0  ;;  %v5187_v21 = vadd.f32 %v5179_v34, %v15841_v19  ;;  %v11264_v37 = vld [vmem:[#allocation26 + $0x8c] ss:$16 sps:$4 sm:$0xff]   ;;  %v11262_v33 = vld [vmem:[#allocation26 + $0x88] ss:$16 sps:$4 sm:$0xff]  }
0x10ec   :  { %v5186_v16 = vadd.f32 %v5140_v18, %v15836_v32  ;;  %v5188_v22 = vadd.f32 %v5181_v63, %v15844_v54  ;;  %v11267_v34 = vld [vmem:[#allocation26 + $0xa4] ss:$16 sps:$4 sm:$0xff]   ;;  %v11270_v52 = vld [vmem:[#allocation26 + $0xac] ss:$16 sps:$4 sm:$0xff]   ;;  %v11265_v56 = vld [vmem:[#allocation26 + $0xa0] ss:$16 sps:$4 sm:$0xff]  }
0x10ed   :  { %v10095_v0 = vmul.f32 -1.442695, %v5185_v60  ;;  %v10097_v24 = vmul.f32 -1.442695, %v5187_v21  ;;  %v11268_v18 = vld [vmem:[#allocation26 + $0xa8] ss:$16 sps:$4 sm:$0xff]  }
0x10ee   :  { %v10096_v40 = vmul.f32 -1.442695, %v5186_v16  ;;  %v11273_v63 = vld [vmem:[#allocation26 + $0xc4] ss:$16 sps:$4 sm:$0xff]   ;;  %v11276_v6 = vld [vmem:[#allocation26 + $0xcc] ss:$16 sps:$4 sm:$0xff]  }
0x10ef   :  { %11629 = vpow2.f32 %v10095_v0  ;;  %v11271_v26 = vld [vmem:[#allocation26 + $0xc0] ss:$16 sps:$4 sm:$0xff]   ;;  %v11274_v60 = vld [vmem:[#allocation26 + $0xc8] ss:$16 sps:$4 sm:$0xff]   ;;  %v11279_v44 = vld [vmem:[#allocation26 + $0xe4] ss:$16 sps:$4 sm:$0xff]  }
0x10f0   :  { %11631 = vpow2.f32 %v10096_v40  ;;  %v11282_v17 = vld [vmem:[#allocation26 + $0xec] ss:$16 sps:$4 sm:$0xff]   ;;  %v11277_v40 = vld [vmem:[#allocation26 + $0xe0] ss:$16 sps:$4 sm:$0xff]   ;;  %v11280_v21 = vld [vmem:[#allocation26 + $0xe8] ss:$16 sps:$4 sm:$0xff]  }
0x10f1   :  { %11633 = vtanh.f32 %v5188_v22 }
0x10f2   :  { %11635 = vpow2.f32 %v10097_v24 }
0x10f9   :  { %v11630_v10 = vpop.eup %11629 }
0x10fa   :  { %v5198_v53 = vadd.f32 1.0, %v11630_v10  ;;  %v11632_v15 = vpop.eup %11631  ;;  %v15867_v10 = vld [vmem:[%s16380_s14] sm:$0xf] }
0x10fb   :  { %v5199_v41 = vadd.f32 1.0, %v11632_v15  ;;  %v11634_v14 = vpop.eup %11633  ;;  %v15877_v15 = vld [vmem:[%s16380_s14 + $0x8] sm:$0xf] }
0x10fc   :  { %11637 = vrcp.f32 %v5198_v53  ;;  %v11636_v20 = vpop.eup %11635  ;;  %v15872_v53 = vld [vmem:[%s16380_s14 + $0x4] sm:$0xf] }
0x10fd   :  { %11639 = vrcp.f32 %v5199_v41  ;;  %v5200_v30 = vadd.f32 1.0, %v11636_v20  ;;  %v15882_v41 = vld [vmem:[%s16380_s14 + $0xc] sm:$0xf]  ;;  %v15892_v20 = vld [vmem:[%s16380_s14 + $0x14] sm:$0xf] }
0x10ff   :  { %11641 = vrcp.f32 %v5200_v30  ;;  %v15912_v30 = vld [vmem:[%s16380_s14 + $0x24] sm:$0xf] }
0x1106   :  { %v11638_v12 = vpop.eup %11637 }
0x1107   :  { %v5209_v39 = vmul.f32 %v11638_v12, %v11634_v14  ;;  %v11640_v35 = vpop.eup %11639  ;;  %v15887_v14 = vld [vmem:[%s16380_s14 + $0x10] sm:$0xf]  ;;  %v15897_v12 = vld [vmem:[%s16380_s14 + $0x18] sm:$0xf] }
0x1108   :  { %v5208_v31 = vmul.f32 %v11640_v35, %v15745_v3  ;;  %v11241_v3 = vld [vmem:[#allocation26 + $0x20] ss:$16 sps:$4 sm:$0xff]   ;;  %v15907_v35 = vld [vmem:[%s16380_s14 + $0x20] sm:$0xf] }
0x1109   :  { %v11642_v47 = vpop.eup %11641 }
0x110a   :  { %v15849_v7 = vadd.f32 %v5209_v39, %v5208_v31  ;;  %v15902_v39 = vld [vmem:[%s16380_s14 + $0x1c] sm:$0xf]  ;;  %v15917_v31 = vld [vmem:[%s16380_s14 + $0x28] sm:$0xf] }
0x110c   :  { %11643 = vtanh.f32 %v15849_v7 }
0x110d   :  { %11645 = vpow2.f32 %v10021_v46  ;;  %v15932_v46 = vld [vmem:[%s16380_s14 + $0x34] sm:$0xf] }
0x110e   :  { %11647 = vtanh.f32 %v15824_v2 }
0x1116   :  { %v11644_v50 = vpop.eup %11643 }
0x1117   :  { %v5212_v38 = vmul.f32 %v11644_v50, %v11642_v47  ;;  %v11646_v29 = vpop.eup %11645  ;;  %v15927_v47 = vld [vmem:[%s16380_s14 + $0x30] sm:$0xf]  ;;  %v15937_v50 = vld [vmem:[%s16380_s14 + $0x38] sm:$0xf] }
0x1118   :  { %v4466_v23 = vadd.f32 1.0, %v11646_v29  ;;  %v11648_v16 = vpop.eup %11647 }
0x1119   :  { %v15854_v27 = vpack.c.bf16 %v5212_v38, %v5212_v38  ;;  %v15942_v38 = vld [vmem:[%s16380_s14 + $0x3c] sm:$0xf] }
0x111a   :  { %11649 = vrcp.f32 %v4466_v23 }
0x111b   :  { %5472 = vmatmul.mubr.bf16.vlgmr.msra.gmra.mrb[124].mxu1 %v15854_v27  ;;  %5513 = vmatmul.mubr.bf16.vlgmr.msra.gmra.mrb[136].mxu0 %v15854_v27 }
0x111c   :  { %5682 = vmatpush1.bf16.msra.mxu1 %v11235_v58  ;;  %5723 = vmatpush1.bf16.msra.mxu0 %v11238_v49 }
0x111d   :  { %5683 = vmatprep.subr.bf16.mxu1 %v11243_v8  ;;  %5724 = vmatprep.subr.bf16.mxu0 %v11246_v42 }
0x111e   :  { %5713 = vmatprep.mubr.bf16.mxu1 %v16752_v43  ;;  %5754 = vmatprep.mubr.bf16.mxu0 %v16752_v43  ;;  %v11259_v43 = vld [vmem:[#allocation26 + $0x80] ss:$16 sps:$4 sm:$0xff]  }
0x1120   :  { %5684 = vmatpush1.bf16.msra.mxu1 %v11241_v3  ;;  %5725 = vmatpush1.bf16.msra.mxu0 %v11244_v61 }
0x1121   :  { %5685 = vmatprep.subr.bf16.mxu1 %v11249_v25  ;;  %5726 = vmatprep.subr.bf16.mxu0 %v11252_v59 }
0x1124   :  { %5686 = vmatpush1.bf16.msra.mxu1 %v11247_v36  ;;  %5727 = vmatpush1.bf16.msra.mxu0 %v11250_v28  ;;  %v11650_v0 = vpop.eup %11649  ;;  %v4501_v36 = vld [vmem:[#allocation28] sm:$0xf] }
0x1125   :  { %5687 = vmatprep.subr.bf16.mxu1 %v11255_v13  ;;  %5728 = vmatprep.subr.bf16.mxu0 %v11258_v57  ;;  %v4478_v22 = vmul.f32 %v11650_v0, %v11648_v16  ;;  %v15945_v28 = vrot.slane %v4501_v36, %v17118_v5  ;;  %v15948_v29 = vrot.slane %v4501_v36, %v17119_v11 }
0x1126   :  { %v15953_v11 = vrot.slane %v4501_v36, %v17120_v1 }
0x1127   :  { %v5245_v24 = vpack.c.bf16 %v4478_v22, %v4478_v22 }
0x1128   :  { %5688 = vmatpush1.bf16.msra.mxu1 %v11253_v9  ;;  %5729 = vmatpush1.bf16.msra.mxu0 %v11256_v48 }
0x1129   :  { %5689 = vmatprep.subr.bf16.mxu1 %v11261_v55  ;;  %5730 = vmatprep.subr.bf16.mxu0 %v11264_v37 }
0x112c   :  { %5690 = vmatpush1.bf16.msra.mxu1 %v11259_v43  ;;  %5731 = vmatpush1.bf16.msra.mxu0 %v11262_v33 }
0x112d   :  { %5691 = vmatprep.subr.bf16.mxu1 %v11267_v34  ;;  %5732 = vmatprep.subr.bf16.mxu0 %v11270_v52 }
0x1130   :  { %5692 = vmatpush1.bf16.msra.mxu1 %v11265_v56  ;;  %5733 = vmatpush1.bf16.msra.mxu0 %v11268_v18 }
0x1131   :  { %5693 = vmatprep.subr.bf16.mxu1 %v11273_v63  ;;  %5734 = vmatprep.subr.bf16.mxu0 %v11276_v6 }
0x1134   :  { %5694 = vmatpush1.bf16.msra.mxu1 %v11271_v26  ;;  %5735 = vmatpush1.bf16.msra.mxu0 %v11274_v60  ;;  %v15956_v26 = vrot.slane %v4501_v36, %v17121_v51 }
0x1135   :  { %5695 = vmatprep.subr.bf16.mxu1 %v11279_v44  ;;  %5736 = vmatprep.subr.bf16.mxu0 %v11282_v17 }
0x1138   :  { %5696 = vmatpush1.bf16.msra.mxu1 %v11277_v40  ;;  %5737 = vmatpush1.bf16.msra.mxu0 %v11280_v21 }
0x113b   :  { %5714 = vmatmul.mubr.bf16.vlgmr.msra.gmra.mrb[128].mxu1 %v5245_v24  ;;  %5755 = vmatmul.mubr.bf16.vlgmr.msra.gmra.mrb[140].mxu0 %v5245_v24 }
0x11ee   :  { %v5473_v58 = vpop.f32.mrb[124].mxu1  ;;  %v5514_v49 = vpop.f32.mrb[136].mxu0 }
0x11ef   :  { %v5475_v8 = vpop.f32.mrb[125].mxu1  ;;  %v5516_v42 = vpop.f32.mrb[137].mxu0 }
0x11f0   :  { %v5477_v3 = vpop.f32.mrb[126].mxu1  ;;  %v5518_v61 = vpop.f32.mrb[138].mxu0 }
0x11f1   :  { %v5478_v25 = vpop.f32.mrb[127].mxu1  ;;  %v5519_v59 = vpop.f32.mrb[139].mxu0 }
0x11f2   :  { %v17122_v59 = vld [vmem:[#allocation108_spill] sm:$0xff] }
0x11f3   :  { %v17123_v36 = vmax.f32 %v17122_v59, 0.0  }
0x120e   :  { %v5715_v13 = vpop.f32.mrb[128].mxu1  ;;  %v5756_v57 = vpop.f32.mrb[140].mxu0 }
0x120f   :  { %v5716_v9 = vadd.f32 %v5715_v13, %v5473_v58  ;;  %v5757_v48 = vadd.f32 %v5756_v57, %v5514_v49  ;;  %v5717_v55 = vpop.f32.mrb[129].mxu1  ;;  %v5758_v37 = vpop.f32.mrb[141].mxu0  ;;  %v12951_v13 = vmov %v17123_v36   ;;  %v12985_v57 = vmov (!%p5793_p7), 0.0  }
0x1210   :  { %v5718_v23 = vadd.f32 %v5717_v55, %v5475_v8  ;;  %v5759_v43 = vadd.f32 %v5758_v37, %v5516_v42  ;;  %v5719_v33 = vpop.f32.mrb[130].mxu1  ;;  %v5760_v34 = vpop.f32.mrb[142].mxu0  ;;  %10743 = vmatprep.subr.bf16.mxu0 (!%p5793_p7), %v12985_v57  ;;  %10759 = vmatprep.mubr.msk.bf16.mxu0 (!%p5793_p7), %vm12986_vm1, %v12985_v57  ;;  %v10168_v55 = vcombine.low (!%p5793_p7), %v15897_v12, %v15902_v39 }
0x1211   :  { %v5763_v52 = vadd.f32 %v5716_v9, %v15945_v28  ;;  %v5720_v56 = vpop.f32.mrb[131].mxu1  ;;  %v5761_v18 = vpop.f32.mrb[143].mxu0  ;;  %v5765_v60 = vadd.f32 %v5757_v48, %v15953_v11  ;;  %v10166_v9 = vcombine.low (!%p5793_p7), %v15877_v15, %v15882_v41  ;;  %v10167_v48 = vcombine.low (!%p5793_p7), %v15887_v14, %v15892_v20 }
0x1212   :  { %v5764_v5 = vadd.f32 %v5718_v23, %v15948_v29  ;;  %v5766_v44 = vadd.f32 %v5759_v43, %v15956_v26  ;;  %v10171_v15 = vcombine.low (!%p5793_p7), %v15927_v47, %v15932_v46  ;;  %v10172_v41 = vcombine.low (!%p5793_p7), %v15937_v50, %v15942_v38 }
0x1213   :  { %v10162_v63 = vmul.f32 -1.442695, %v5763_v52  ;;  %v10164_v17 = vmul.f32 -1.442695, %v5765_v60 }
0x1214   :  { %v10163_v6 = vmul.f32 -1.442695, %v5764_v5 }
0x1215   :  { %11651 = vpow2.f32 %v10162_v63 }
0x1216   :  { %11653 = vpow2.f32 %v10163_v6 }
0x1217   :  { %11655 = vtanh.f32 %v5766_v44 }
0x1218   :  { %11657 = vpow2.f32 %v10164_v17 }
0x121f   :  { %v11652_v16 = vpop.eup %11651 }
0x1220   :  { %v5776_v0 = vadd.f32 1.0, %v11652_v16  ;;  %v11654_v40 = vpop.eup %11653 }
0x1221   :  { %v5777_v21 = vadd.f32 1.0, %v11654_v40  ;;  %v11656_v22 = vpop.eup %11655 }
0x1222   :  { %11659 = vrcp.f32 %v5776_v0  ;;  %v11658_v1 = vpop.eup %11657 }
0x1223   :  { %11661 = vrcp.f32 %v5777_v21  ;;  %v5778_v51 = vadd.f32 1.0, %v11658_v1 }
0x1225   :  { %11663 = vrcp.f32 %v5778_v51 }
0x122c   :  { %v11660_v24 = vpop.eup %11659 }
0x122d   :  { %v5787_v58 = vmul.f32 %v11660_v24, %v11656_v22  ;;  %v11662_v49 = vpop.eup %11661 }
0x122e   :  { %v5786_v8 = vmul.f32 %v11662_v49, %v15824_v2  ;;  %v10165_v2 = vcombine.low (!%p5793_p7), %v15867_v10, %v15872_v53  ;;  %v10169_v10 = vcombine.low (!%p5793_p7), %v15907_v35, %v15912_v30  ;;  %v10170_v53 = vcombine.low (!%p5793_p7), %v15917_v31, %v15922_v4 }
0x122f   :  { %v11664_v3 = vpop.eup %11663 }
0x1230   :  { %v15961_v42 = vadd.f32 %v5787_v58, %v5786_v8  ;;  %10744 = vmatpush3.bf16.msra.mxu0 (!%p5793_p7), %v10165_v2 }
0x1231   :  { %10745 = vmatprep.subr.bf16.mxu0 (!%p5793_p7), %v12985_v57 }
0x1232   :  { %11665 = vtanh.f32 %v15961_v42 }
0x1234   :  { %10746 = vmatpush3.bf16.msra.mxu0 (!%p5793_p7), %v10166_v9 }
0x1235   :  { %10747 = vmatprep.subr.bf16.mxu0 (!%p5793_p7), %v12985_v57 }
0x1238   :  { %10748 = vmatpush3.bf16.msra.mxu0 (!%p5793_p7), %v10167_v48 }
0x1239   :  { %5816 = sbr.rel (%p5793_p7) target bundleno = 4902 (0x1326), region = 173  ;;  %10749 = vmatprep.subr.bf16.mxu0 (!%p5793_p7), %v12985_v57 }
0x123c   :  { %v11666_v61 = vpop.eup %11665  ;;  %10750 = vmatpush3.bf16.msra.mxu0 (!%p5793_p7), %v10168_v55 }
0x123d   :  { %v15964_v25 = vmul.f32 %v11666_v61, %v11664_v3  ;;  %10751 = vmatprep.subr.bf16.mxu0 (!%p5793_p7), %v12985_v57 }
0x123f   :  { %5791 = vst [vmem:[%s16390_s24] sm:$0xff] %v15964_v25  ;;  %v5817_v14 = vpack.c.bf16 (!%p5793_p7), %v15964_v25, %v15964_v25 }
0x1240   :  { %10752 = vmatpush3.bf16.msra.mxu0 %v10169_v10 }
0x1241   :  { %10753 = vmatprep.subr.bf16.mxu0 %v12985_v57 }
0x1244   :  { %10754 = vmatpush3.bf16.msra.mxu0 %v10170_v53 }
0x1245   :  { %10755 = vmatprep.subr.bf16.mxu0 %v12985_v57 }
0x1248   :  { %10756 = vmatpush3.bf16.msra.mxu0 %v10171_v15 }
0x1249   :  { %10757 = vmatprep.subr.bf16.mxu0 %v12985_v57 }
0x124c   :  { %10758 = vmatpush3.bf16.msra.mxu0 %v10172_v41 }
0x124f   :  { %10760 = vmatmul.mubr.bf16.vlgmr.msra.gmra.mrb[0].mxu0 %v5817_v14 }
0x1322   :  { %v5900_v20 = vpop.f32.mrb[0].mxu0 }
0x1323   :  { %v5901_v12 = vadd.f32 %v15820_v45, %v5900_v20  ;;  %v10761_v39 = vpop.f32.mrb[1].mxu0 }
0x1324   :  { %v5903_v35 = vpop.f32.mrb[2].mxu0 }
0x1325   :  { %v5906_v13 = vmax.f32 %v5901_v12, 0.0   ;;  %v10762_v30 = vpop.f32.mrb[3].mxu0 }
0x1326 PF:  { %v11859_v31 = vld [vmem:[#allocation20 + $0x4] ss:$16 sps:$4 sm:$0xff]   ;;  %v17124_v4 = vmov 0   ;;  %v11861_v47 = vld [vmem:[#allocation20 + $0xc] ss:$16 sps:$4 sm:$0xff]   ;;  %v5972_v2 = vpack.c.bf16 %v12953_v13, %v12953_v13  ;;  %s16021_s18 = sld [smem:[#allocation4 + $0x1]]  ;;  %v12953_v13 = vphi %v12951_v13, %v5906_v13  }
0x1327   :  { %6165 = vmatprep.mubr.bf16.mxu0 %v17124_v4  ;;  %6206 = vmatprep.mubr.bf16.mxu1 %v17124_v4  ;;  %v11863_v46 = vld [vmem:[#allocation20] ss:$16 sps:$4 sm:$0xff]   ;;  %v11864_v50 = vld [vmem:[#allocation20 + $0x8] ss:$16 sps:$4 sm:$0xff]   ;;  %v11865_v38 = vld [vmem:[#allocation20 + $0x24] ss:$16 sps:$4 sm:$0xff]  }
0x1328   :  { %6133 = vmatprep.subr.bf16.mxu0 %v11859_v31  ;;  %6174 = vmatprep.subr.bf16.mxu1 %v11861_v47  ;;  %v11867_v37 = vld [vmem:[#allocation20 + $0x2c] ss:$16 sps:$4 sm:$0xff]   ;;  %v11869_v23 = vld [vmem:[#allocation20 + $0x20] ss:$16 sps:$4 sm:$0xff]   ;;  %v11870_v43 = vld [vmem:[#allocation20 + $0x28] ss:$16 sps:$4 sm:$0xff]  }
0x1329   :  { %6134 = vmatpush1.bf16.msra.mxu0 %v11863_v46  ;;  %6175 = vmatpush1.bf16.msra.mxu1 %v11864_v50  ;;  %v11871_v33 = vld [vmem:[#allocation20 + $0x44] ss:$16 sps:$4 sm:$0xff]   ;;  %v11873_v34 = vld [vmem:[#allocation20 + $0x4c] ss:$16 sps:$4 sm:$0xff]   ;;  %v11875_v52 = vld [vmem:[#allocation20 + $0x40] ss:$16 sps:$4 sm:$0xff]  }
0x132a   :  { %6135 = vmatprep.subr.bf16.mxu0 %v11865_v38  ;;  %6176 = vmatprep.subr.bf16.mxu1 %v11867_v37  ;;  %v11876_v56 = vld [vmem:[#allocation20 + $0x48] ss:$16 sps:$4 sm:$0xff]   ;;  %v11877_v18 = vld [vmem:[#allocation20 + $0x64] ss:$16 sps:$4 sm:$0xff]   ;;  %v11879_v5 = vld [vmem:[#allocation20 + $0x6c] ss:$16 sps:$4 sm:$0xff]  }
0x132b   :  { %v11881_v63 = vld [vmem:[#allocation20 + $0x60] ss:$16 sps:$4 sm:$0xff]   ;;  %v11882_v6 = vld [vmem:[#allocation20 + $0x68] ss:$16 sps:$4 sm:$0xff]   ;;  %v11883_v60 = vld [vmem:[#allocation20 + $0x84] ss:$16 sps:$4 sm:$0xff]  }
0x132c   :  { %v11885_v44 = vld [vmem:[#allocation20 + $0x8c] ss:$16 sps:$4 sm:$0xff]   ;;  %v11887_v17 = vld [vmem:[#allocation20 + $0x80] ss:$16 sps:$4 sm:$0xff]   ;;  %v11888_v16 = vld [vmem:[#allocation20 + $0x88] ss:$16 sps:$4 sm:$0xff]  }
0x132d   :  { %6136 = vmatpush1.bf16.msra.mxu0 %v11869_v23  ;;  %6177 = vmatpush1.bf16.msra.mxu1 %v11870_v43  ;;  %v11889_v0 = vld [vmem:[#allocation20 + $0xa4] ss:$16 sps:$4 sm:$0xff]   ;;  %v11891_v40 = vld [vmem:[#allocation20 + $0xac] ss:$16 sps:$4 sm:$0xff]   ;;  %v11893_v21 = vld [vmem:[#allocation20 + $0xa0] ss:$16 sps:$4 sm:$0xff]  }
0x132e   :  { %6137 = vmatprep.subr.bf16.mxu0 %v11871_v33  ;;  %6178 = vmatprep.subr.bf16.mxu1 %v11873_v34  ;;  %v11894_v22 = vld [vmem:[#allocation20 + $0xa8] ss:$16 sps:$4 sm:$0xff]   ;;  %v11895_v1 = vld [vmem:[#allocation20 + $0xc4] ss:$16 sps:$4 sm:$0xff]   ;;  %v11897_v24 = vld [vmem:[#allocation20 + $0xcc] ss:$16 sps:$4 sm:$0xff]  }
0x132f   :  { %v11899_v58 = vld [vmem:[#allocation20 + $0xc0] ss:$16 sps:$4 sm:$0xff]   ;;  %v11900_v49 = vld [vmem:[#allocation20 + $0xc8] ss:$16 sps:$4 sm:$0xff]   ;;  %v11901_v51 = vld [vmem:[#allocation20 + $0xe4] ss:$16 sps:$4 sm:$0xff]  }
0x1330   :  { %v11903_v8 = vld [vmem:[#allocation20 + $0xec] ss:$16 sps:$4 sm:$0xff]   ;;  %v11905_v3 = vld [vmem:[#allocation20 + $0xe0] ss:$16 sps:$4 sm:$0xff]   ;;  %v11906_v61 = vld [vmem:[#allocation20 + $0xe8] ss:$16 sps:$4 sm:$0xff]  }
0x1331   :  { %6138 = vmatpush1.bf16.msra.mxu0 %v11875_v52  ;;  %6179 = vmatpush1.bf16.msra.mxu1 %v11876_v56  ;;  %v11909_v59 = vld [vmem:[#allocation22 + $0x4] ss:$16 sps:$4 sm:$0xff]   ;;  %v11912_v36 = vld [vmem:[#allocation22 + $0xc] ss:$16 sps:$4 sm:$0xff]   ;;  %v11907_v57 = vld [vmem:[#allocation22] ss:$16 sps:$4 sm:$0xff]  }
0x1332   :  { %6139 = vmatprep.subr.bf16.mxu0 %v11877_v18  ;;  %6180 = vmatprep.subr.bf16.mxu1 %v11879_v5  ;;  %v11910_v9 = vld [vmem:[#allocation22 + $0x8] ss:$16 sps:$4 sm:$0xff]   ;;  %v11915_v48 = vld [vmem:[#allocation22 + $0x24] ss:$16 sps:$4 sm:$0xff]   ;;  %v11918_v55 = vld [vmem:[#allocation22 + $0x2c] ss:$16 sps:$4 sm:$0xff]  }
0x1333   :  { %v11913_v10 = vld [vmem:[#allocation22 + $0x20] ss:$16 sps:$4 sm:$0xff]   ;;  %v11916_v53 = vld [vmem:[#allocation22 + $0x28] ss:$16 sps:$4 sm:$0xff]   ;;  %v11921_v15 = vld [vmem:[#allocation22 + $0x44] ss:$16 sps:$4 sm:$0xff]  }
0x1334   :  { %v11924_v41 = vld [vmem:[#allocation22 + $0x4c] ss:$16 sps:$4 sm:$0xff]   ;;  %v11919_v13 = vld [vmem:[#allocation22 + $0x40] ss:$16 sps:$4 sm:$0xff]   ;;  %v11922_v14 = vld [vmem:[#allocation22 + $0x48] ss:$16 sps:$4 sm:$0xff]  }
0x1335   :  { %6140 = vmatpush1.bf16.msra.mxu0 %v11881_v63  ;;  %6181 = vmatpush1.bf16.msra.mxu1 %v11882_v6  ;;  %v11927_v20 = vld [vmem:[#allocation22 + $0x64] ss:$16 sps:$4 sm:$0xff]   ;;  %v11930_v12 = vld [vmem:[#allocation22 + $0x6c] ss:$16 sps:$4 sm:$0xff]   ;;  %v11925_v39 = vld [vmem:[#allocation22 + $0x60] ss:$16 sps:$4 sm:$0xff]  }
0x1336   :  { %6141 = vmatprep.subr.bf16.mxu0 %v11883_v60  ;;  %6182 = vmatprep.subr.bf16.mxu1 %v11885_v44  ;;  %v11928_v35 = vld [vmem:[#allocation22 + $0x68] ss:$16 sps:$4 sm:$0xff]   ;;  %v11933_v30 = vld [vmem:[#allocation22 + $0x84] ss:$16 sps:$4 sm:$0xff]   ;;  %v11936_v31 = vld [vmem:[#allocation22 + $0x8c] ss:$16 sps:$4 sm:$0xff]  }
0x1337   :  { %v11931_v47 = vld [vmem:[#allocation22 + $0x80] ss:$16 sps:$4 sm:$0xff]   ;;  %v11934_v46 = vld [vmem:[#allocation22 + $0x88] ss:$16 sps:$4 sm:$0xff]   ;;  %v11939_v50 = vld [vmem:[#allocation22 + $0xa4] ss:$16 sps:$4 sm:$0xff]  }
0x1338   :  { %v11942_v38 = vld [vmem:[#allocation22 + $0xac] ss:$16 sps:$4 sm:$0xff]   ;;  %v11937_v37 = vld [vmem:[#allocation22 + $0xa0] ss:$16 sps:$4 sm:$0xff]   ;;  %v11940_v23 = vld [vmem:[#allocation22 + $0xa8] ss:$16 sps:$4 sm:$0xff]  }
0x1339   :  { %6142 = vmatpush1.bf16.msra.mxu0 %v11887_v17  ;;  %6183 = vmatpush1.bf16.msra.mxu1 %v11888_v16  ;;  %v11945_v43 = vld [vmem:[#allocation22 + $0xc4] ss:$16 sps:$4 sm:$0xff]   ;;  %v11948_v33 = vld [vmem:[#allocation22 + $0xcc] ss:$16 sps:$4 sm:$0xff]   ;;  %v11943_v34 = vld [vmem:[#allocation22 + $0xc0] ss:$16 sps:$4 sm:$0xff]  }
0x133a   :  { %6143 = vmatprep.subr.bf16.mxu0 %v11889_v0  ;;  %6184 = vmatprep.subr.bf16.mxu1 %v11891_v40  ;;  %v11946_v52 = vld [vmem:[#allocation22 + $0xc8] ss:$16 sps:$4 sm:$0xff]   ;;  %v11951_v56 = vld [vmem:[#allocation22 + $0xe4] ss:$16 sps:$4 sm:$0xff]   ;;  %v11954_v18 = vld [vmem:[#allocation22 + $0xec] ss:$16 sps:$4 sm:$0xff]  }
0x133b   :  { %v11949_v5 = vld [vmem:[#allocation22 + $0xe0] ss:$16 sps:$4 sm:$0xff]   ;;  %v11952_v63 = vld [vmem:[#allocation22 + $0xe8] ss:$16 sps:$4 sm:$0xff]   ;;  %v11955_v44 = vld [vmem:[#allocation25] ss:$16 sps:$4 sm:$0xff]  }
0x133c   :  { %v11957_v6 = vld [vmem:[#allocation25 + $0x4] ss:$16 sps:$4 sm:$0xff]   ;;  %v11960_v60 = vld [vmem:[#allocation25 + $0xc] ss:$16 sps:$4 sm:$0xff]   ;;  %v11958_v17 = vld [vmem:[#allocation25 + $0x8] ss:$16 sps:$4 sm:$0xff]  }
0x133d   :  { %6144 = vmatpush1.bf16.msra.mxu0 %v11893_v21  ;;  %6185 = vmatpush1.bf16.msra.mxu1 %v11894_v22  ;;  %v11963_v16 = vld [vmem:[#allocation25 + $0x24] ss:$16 sps:$4 sm:$0xff]   ;;  %v11966_v0 = vld [vmem:[#allocation25 + $0x2c] ss:$16 sps:$4 sm:$0xff]   ;;  %v11961_v40 = vld [vmem:[#allocation25 + $0x20] ss:$16 sps:$4 sm:$0xff]  }
0x133e   :  { %6145 = vmatprep.subr.bf16.mxu0 %v11895_v1  ;;  %6186 = vmatprep.subr.bf16.mxu1 %v11897_v24  ;;  %v11964_v21 = vld [vmem:[#allocation25 + $0x28] ss:$16 sps:$4 sm:$0xff]   ;;  %v11972_v22 = vld [vmem:[#allocation25 + $0x4c] ss:$16 sps:$4 sm:$0xff]   ;;  %v11967_v1 = vld [vmem:[#allocation25 + $0x40] ss:$16 sps:$4 sm:$0xff]  }
0x133f   :  { %v11970_v24 = vld [vmem:[#allocation25 + $0x48] ss:$16 sps:$4 sm:$0xff]   ;;  %p7066_p8 = scmp.gt.s32.totalorder %s16021_s18, 0 }
0x1340   :  { %vm12988_vm2 = vmmov (!%p7066_p8), 0  }
0x1341   :  { %6146 = vmatpush1.bf16.msra.mxu0 %v11899_v58  ;;  %6187 = vmatpush1.bf16.msra.mxu1 %v11900_v49  ;;  %v11975_v58 = vld [vmem:[#allocation25 + $0x64] ss:$16 sps:$4 sm:$0xff]   ;;  %v11978_v49 = vld [vmem:[#allocation25 + $0x6c] ss:$16 sps:$4 sm:$0xff]  }
0x1342   :  { %6147 = vmatprep.subr.bf16.mxu0 %v11901_v51  ;;  %6188 = vmatprep.subr.bf16.mxu1 %v11903_v8  ;;  %v11973_v51 = vld [vmem:[#allocation25 + $0x60] ss:$16 sps:$4 sm:$0xff]   ;;  %v11976_v8 = vld [vmem:[#allocation25 + $0x68] ss:$16 sps:$4 sm:$0xff]  }
0x1345   :  { %6148 = vmatpush1.bf16.msra.mxu0 %v11905_v3  ;;  %6189 = vmatpush1.bf16.msra.mxu1 %v11906_v61  ;;  %v11981_v3 = vld [vmem:[#allocation25 + $0x84] ss:$16 sps:$4 sm:$0xff]   ;;  %v11984_v61 = vld [vmem:[#allocation25 + $0x8c] ss:$16 sps:$4 sm:$0xff]  }
0x1346   :  { %6375 = vmatprep.subr.bf16.mxu0 %v11909_v59  ;;  %6416 = vmatprep.subr.bf16.mxu1 %v11912_v36  ;;  %v11979_v59 = vld [vmem:[#allocation25 + $0x80] ss:$16 sps:$4 sm:$0xff]   ;;  %v11982_v36 = vld [vmem:[#allocation25 + $0x88] ss:$16 sps:$4 sm:$0xff]  }
0x1348   :  { %6166 = vmatmul.mubr.bf16.vlgmr.msra.gmra.mrb[0].mxu0 %v5972_v2  ;;  %6207 = vmatmul.mubr.bf16.vlgmr.msra.gmra.mrb[0].mxu1 %v5972_v2  ;;  %v11985_v2 = vld [vmem:[#allocation25 + $0xa0] ss:$16 sps:$4 sm:$0xff]  }
0x1349   :  { %6376 = vmatpush1.bf16.msra.mxu0 %v11907_v57  ;;  %6417 = vmatpush1.bf16.msra.mxu1 %v11910_v9  ;;  %v11987_v57 = vld [vmem:[#allocation25 + $0xa4] ss:$16 sps:$4 sm:$0xff]   ;;  %v11988_v9 = vld [vmem:[#allocation25 + $0xa8] ss:$16 sps:$4 sm:$0xff]  }
0x134a   :  { %6377 = vmatprep.subr.bf16.mxu0 %v11915_v48  ;;  %6418 = vmatprep.subr.bf16.mxu1 %v11918_v55  ;;  %v11990_v48 = vld [vmem:[#allocation25 + $0xac] ss:$16 sps:$4 sm:$0xff]   ;;  %v11993_v55 = vld [vmem:[#allocation25 + $0xc4] ss:$16 sps:$4 sm:$0xff]  }
0x134b   :  { %6407 = vmatprep.mubr.bf16.mxu0 %v17124_v4  ;;  %6448 = vmatprep.mubr.bf16.mxu1 %v17124_v4 }
0x134d   :  { %6378 = vmatpush1.bf16.msra.mxu0 %v11913_v10  ;;  %6419 = vmatpush1.bf16.msra.mxu1 %v11916_v53  ;;  %v11996_v10 = vld [vmem:[#allocation25 + $0xcc] ss:$16 sps:$4 sm:$0xff]   ;;  %v11991_v53 = vld [vmem:[#allocation25 + $0xc0] ss:$16 sps:$4 sm:$0xff]  }
0x134e   :  { %6379 = vmatprep.subr.bf16.mxu0 %v11921_v15  ;;  %6420 = vmatprep.subr.bf16.mxu1 %v11924_v41  ;;  %v11994_v15 = vld [vmem:[#allocation25 + $0xc8] ss:$16 sps:$4 sm:$0xff]   ;;  %v11999_v41 = vld [vmem:[#allocation25 + $0xe4] ss:$16 sps:$4 sm:$0xff]  }
0x1351   :  { %6380 = vmatpush1.bf16.msra.mxu0 %v11919_v13  ;;  %6421 = vmatpush1.bf16.msra.mxu1 %v11922_v14  ;;  %v12002_v13 = vld [vmem:[#allocation25 + $0xec] ss:$16 sps:$4 sm:$0xff]   ;;  %v11997_v14 = vld [vmem:[#allocation25 + $0xe0] ss:$16 sps:$4 sm:$0xff]  }
0x1352   :  { %6381 = vmatprep.subr.bf16.mxu0 %v11927_v20  ;;  %6422 = vmatprep.subr.bf16.mxu1 %v11930_v12  ;;  %v12000_v20 = vld [vmem:[#allocation25 + $0xe8] ss:$16 sps:$4 sm:$0xff]   ;;  %v12005_v12 = vld [vmem:[#allocation26 + $0x4] ss:$16 sps:$4 sm:$0xff]  }
0x1355   :  { %6382 = vmatpush1.bf16.msra.mxu0 %v11925_v39  ;;  %6423 = vmatpush1.bf16.msra.mxu1 %v11928_v35  ;;  %v12008_v39 = vld [vmem:[#allocation26 + $0xc] ss:$16 sps:$4 sm:$0xff]  }
0x1356   :  { %6383 = vmatprep.subr.bf16.mxu0 %v11933_v30  ;;  %6424 = vmatprep.subr.bf16.mxu1 %v11936_v31 }
0x1359   :  { %6384 = vmatpush1.bf16.msra.mxu0 %v11931_v47  ;;  %6425 = vmatpush1.bf16.msra.mxu1 %v11934_v46 }
0x135a   :  { %6385 = vmatprep.subr.bf16.mxu0 %v11939_v50  ;;  %6426 = vmatprep.subr.bf16.mxu1 %v11942_v38 }
0x135d   :  { %6386 = vmatpush1.bf16.msra.mxu0 %v11937_v37  ;;  %6427 = vmatpush1.bf16.msra.mxu1 %v11940_v23 }
0x135e   :  { %6387 = vmatprep.subr.bf16.mxu0 %v11945_v43  ;;  %6428 = vmatprep.subr.bf16.mxu1 %v11948_v33 }
0x1361   :  { %6388 = vmatpush1.bf16.msra.mxu0 %v11943_v34  ;;  %6429 = vmatpush1.bf16.msra.mxu1 %v11946_v52 }
0x1362   :  { %6389 = vmatprep.subr.bf16.mxu0 %v11951_v56  ;;  %6430 = vmatprep.subr.bf16.mxu1 %v11954_v18 }
0x1365   :  { %6390 = vmatpush1.bf16.msra.mxu0 %v11949_v5  ;;  %6431 = vmatpush1.bf16.msra.mxu1 %v11952_v63 }
0x1366   :  { %6711 = vmatprep.subr.bf16.mxu0 %v11957_v6  ;;  %6752 = vmatprep.subr.bf16.mxu1 %v11960_v60 }
0x1368   :  { %6408 = vmatmul.mubr.bf16.vlgmr.msra.gmra.mrb[4].mxu0 %v15854_v27  ;;  %6449 = vmatmul.mubr.bf16.vlgmr.msra.gmra.mrb[4].mxu1 %v15854_v27  ;;  %v11969_v27 = vld [vmem:[#allocation25 + $0x44] ss:$16 sps:$4 sm:$0xff]  }
0x1369   :  { %6743 = vmatprep.mubr.bf16.mxu0 %v17124_v4  ;;  %6784 = vmatprep.mubr.bf16.mxu1 %v17124_v4 }
0x136a   :  { %6712 = vmatpush1.bf16.msra.mxu0 %v11955_v44  ;;  %6753 = vmatpush1.bf16.msra.mxu1 %v11958_v17 }
0x136b   :  { %6713 = vmatprep.subr.bf16.mxu0 %v11963_v16  ;;  %6754 = vmatprep.subr.bf16.mxu1 %v11966_v0 }
0x136e   :  { %6714 = vmatpush1.bf16.msra.mxu0 %v11961_v40  ;;  %6755 = vmatpush1.bf16.msra.mxu1 %v11964_v21 }
0x136f   :  { %6715 = vmatprep.subr.bf16.mxu0 %v11969_v27  ;;  %6756 = vmatprep.subr.bf16.mxu1 %v11972_v22 }
0x1372   :  { %6716 = vmatpush1.bf16.msra.mxu0 %v11967_v1  ;;  %6757 = vmatpush1.bf16.msra.mxu1 %v11970_v24 }
0x1373   :  { %6717 = vmatprep.subr.bf16.mxu0 %v11975_v58  ;;  %6758 = vmatprep.subr.bf16.mxu1 %v11978_v49 }
0x1376   :  { %6718 = vmatpush1.bf16.msra.mxu0 %v11973_v51  ;;  %6759 = vmatpush1.bf16.msra.mxu1 %v11976_v8 }
0x1377   :  { %6719 = vmatprep.subr.bf16.mxu0 %v11981_v3  ;;  %6760 = vmatprep.subr.bf16.mxu1 %v11984_v61 }
0x137a   :  { %6720 = vmatpush1.bf16.msra.mxu0 %v11979_v59  ;;  %6761 = vmatpush1.bf16.msra.mxu1 %v11982_v36 }
0x137b   :  { %6721 = vmatprep.subr.bf16.mxu0 %v11987_v57  ;;  %6762 = vmatprep.subr.bf16.mxu1 %v11990_v48 }
0x137e   :  { %6722 = vmatpush1.bf16.msra.mxu0 %v11985_v2  ;;  %6763 = vmatpush1.bf16.msra.mxu1 %v11988_v9 }
0x137f   :  { %6723 = vmatprep.subr.bf16.mxu0 %v11993_v55  ;;  %6764 = vmatprep.subr.bf16.mxu1 %v11996_v10  ;;  %v12003_v10 = vld [vmem:[#allocation26] ss:$16 sps:$4 sm:$0xff]  }
0x1382   :  { %6724 = vmatpush1.bf16.msra.mxu0 %v11991_v53  ;;  %6765 = vmatpush1.bf16.msra.mxu1 %v11994_v15  ;;  %v12006_v53 = vld [vmem:[#allocation26 + $0x8] ss:$16 sps:$4 sm:$0xff]  }
0x1383   :  { %6725 = vmatprep.subr.bf16.mxu0 %v11999_v41  ;;  %6766 = vmatprep.subr.bf16.mxu1 %v12002_v13  ;;  %v12011_v41 = vld [vmem:[#allocation26 + $0x24] ss:$16 sps:$4 sm:$0xff]   ;;  %v12014_v13 = vld [vmem:[#allocation26 + $0x2c] ss:$16 sps:$4 sm:$0xff]  }
0x1386   :  { %6726 = vmatpush1.bf16.msra.mxu0 %v11997_v14  ;;  %6767 = vmatpush1.bf16.msra.mxu1 %v12000_v20  ;;  %v12012_v14 = vld [vmem:[#allocation26 + $0x28] ss:$16 sps:$4 sm:$0xff]   ;;  %v12017_v20 = vld [vmem:[#allocation26 + $0x44] ss:$16 sps:$4 sm:$0xff]  }
0x1387   :  { %6953 = vmatprep.subr.bf16.mxu0 %v12005_v12  ;;  %6994 = vmatprep.subr.bf16.mxu1 %v12008_v39  ;;  %v12020_v12 = vld [vmem:[#allocation26 + $0x4c] ss:$16 sps:$4 sm:$0xff]   ;;  %v12015_v39 = vld [vmem:[#allocation26 + $0x40] ss:$16 sps:$4 sm:$0xff]  }
0x141b   :  { %v6167_v35 = vpop.f32.mrb[0].mxu0  ;;  %v6208_v30 = vpop.f32.mrb[0].mxu1 }
0x141c   :  { %v6169_v31 = vpop.f32.mrb[1].mxu0  ;;  %v6210_v47 = vpop.f32.mrb[1].mxu1 }
0x141d   :  { %v6171_v46 = vpop.f32.mrb[2].mxu0  ;;  %v6212_v50 = vpop.f32.mrb[2].mxu1 }
0x141e   :  { %v6172_v38 = vpop.f32.mrb[3].mxu0  ;;  %v6213_v37 = vpop.f32.mrb[3].mxu1  ;;  %v12024_v46 = vld [vmem:[#allocation26 + $0x68] ss:$16 sps:$4 sm:$0xff]   ;;  %v12029_v50 = vld [vmem:[#allocation26 + $0x84] ss:$16 sps:$4 sm:$0xff]  }
0x141f   :  { %v12032_v38 = vld [vmem:[#allocation26 + $0x8c] ss:$16 sps:$4 sm:$0xff]   ;;  %v12027_v37 = vld [vmem:[#allocation26 + $0x80] ss:$16 sps:$4 sm:$0xff]  }
0x143b   :  { %v6409_v23 = vpop.f32.mrb[4].mxu0  ;;  %v6450_v43 = vpop.f32.mrb[4].mxu1 }
0x143c   :  { %v6410_v33 = vadd.f32 %v6409_v23, %v6167_v35  ;;  %v6451_v34 = vadd.f32 %v6450_v43, %v6208_v30  ;;  %v6411_v52 = vpop.f32.mrb[5].mxu0  ;;  %v6452_v56 = vpop.f32.mrb[5].mxu1  ;;  %v12018_v35 = vld [vmem:[#allocation26 + $0x48] ss:$16 sps:$4 sm:$0xff]   ;;  %v12023_v30 = vld [vmem:[#allocation26 + $0x64] ss:$16 sps:$4 sm:$0xff]  }
0x143d   :  { %v6412_v18 = vadd.f32 %v6411_v52, %v6169_v31  ;;  %v6453_v5 = vadd.f32 %v6452_v56, %v6210_v47  ;;  %v6413_v63 = vpop.f32.mrb[6].mxu0  ;;  %v6454_v6 = vpop.f32.mrb[6].mxu1  ;;  %v12026_v31 = vld [vmem:[#allocation26 + $0x6c] ss:$16 sps:$4 sm:$0xff]   ;;  %v12021_v47 = vld [vmem:[#allocation26 + $0x60] ss:$16 sps:$4 sm:$0xff]  }
0x143e   :  { %v6457_v60 = vadd.f32 %v6410_v33, %v15833_v62  ;;  %v6414_v44 = vpop.f32.mrb[7].mxu0  ;;  %v6455_v17 = vpop.f32.mrb[7].mxu1  ;;  %v6459_v21 = vadd.f32 %v6451_v34, %v15841_v19  ;;  %v12035_v23 = vld [vmem:[#allocation26 + $0xa4] ss:$16 sps:$4 sm:$0xff]   ;;  %v12038_v43 = vld [vmem:[#allocation26 + $0xac] ss:$16 sps:$4 sm:$0xff]  }
0x143f   :  { %v6458_v16 = vadd.f32 %v6412_v18, %v15836_v32  ;;  %v6460_v27 = vadd.f32 %v6453_v5, %v15844_v54  ;;  %v12033_v33 = vld [vmem:[#allocation26 + $0xa0] ss:$16 sps:$4 sm:$0xff]   ;;  %v12036_v34 = vld [vmem:[#allocation26 + $0xa8] ss:$16 sps:$4 sm:$0xff]   ;;  %v12041_v52 = vld [vmem:[#allocation26 + $0xc4] ss:$16 sps:$4 sm:$0xff]   ;;  %v6517_v17 = vpack.c.bf16 %v15964_v25, %v15964_v25 }
0x1440   :  { %v10237_v0 = vmul.f32 -1.442695, %v6457_v60  ;;  %v10239_v22 = vmul.f32 -1.442695, %v6459_v21  ;;  %v12044_v56 = vld [vmem:[#allocation26 + $0xcc] ss:$16 sps:$4 sm:$0xff]  }
0x1441   :  { %v10238_v40 = vmul.f32 -1.442695, %v6458_v16  ;;  %v12039_v18 = vld [vmem:[#allocation26 + $0xc0] ss:$16 sps:$4 sm:$0xff]   ;;  %v12042_v5 = vld [vmem:[#allocation26 + $0xc8] ss:$16 sps:$4 sm:$0xff]  }
0x1442   :  { %12051 = vpow2.f32 %v10237_v0  ;;  %v12047_v63 = vld [vmem:[#allocation26 + $0xe4] ss:$16 sps:$4 sm:$0xff]   ;;  %v12050_v6 = vld [vmem:[#allocation26 + $0xec] ss:$16 sps:$4 sm:$0xff]   ;;  %v12045_v60 = vld [vmem:[#allocation26 + $0xe0] ss:$16 sps:$4 sm:$0xff]  }
0x1443   :  { %12053 = vpow2.f32 %v10238_v40  ;;  %v12048_v44 = vld [vmem:[#allocation26 + $0xe8] ss:$16 sps:$4 sm:$0xff]   ;;  %v16034_v40 = vld [vmem:[%s16380_s14 + $0x4] sm:$0xf]  ;;  %v16039_v25 = vld [vmem:[%s16380_s14 + $0x8] sm:$0xf] }
0x1444   :  { %12055 = vtanh.f32 %v6460_v27  ;;  %v16024_v16 = vld [vmem:[#allocation3 + $0x8] sm:$0xff]   ;;  %v16029_v0 = vld [vmem:[%s16380_s14] sm:$0xf]  ;;  %v16049_v27 = vld [vmem:[%s16380_s14 + $0x10] sm:$0xf] }
0x1445   :  { %12057 = vpow2.f32 %v10239_v22  ;;  %v16044_v21 = vld [vmem:[%s16380_s14 + $0xc] sm:$0xf]  ;;  %v16054_v22 = vld [vmem:[%s16380_s14 + $0x14] sm:$0xf] }
0x144c   :  { %v12052_v1 = vpop.eup %12051 }
0x144d   :  { %v6470_v24 = vadd.f32 1.0, %v12052_v1  ;;  %v12054_v58 = vpop.eup %12053  ;;  %v16059_v1 = vld [vmem:[%s16380_s14 + $0x18] sm:$0xf] }
0x144e   :  { %v6471_v49 = vadd.f32 1.0, %v12054_v58  ;;  %v12056_v51 = vpop.eup %12055  ;;  %v16069_v58 = vld [vmem:[%s16380_s14 + $0x20] sm:$0xf] }
0x144f   :  { %12059 = vrcp.f32 %v6470_v24  ;;  %v12058_v8 = vpop.eup %12057  ;;  %v16064_v24 = vld [vmem:[%s16380_s14 + $0x1c] sm:$0xf] }
0x1450   :  { %12061 = vrcp.f32 %v6471_v49  ;;  %v6472_v36 = vadd.f32 1.0, %v12058_v8  ;;  %v16074_v49 = vld [vmem:[%s16380_s14 + $0x24] sm:$0xf]  ;;  %v16084_v8 = vld [vmem:[%s16380_s14 + $0x2c] sm:$0xf] }
0x1452   :  { %12063 = vrcp.f32 %v6472_v36  ;;  %v16104_v36 = vld [vmem:[%s16380_s14 + $0x3c] sm:$0xf] }
0x1459   :  { %v12060_v3 = vpop.eup %12059 }
0x145a   :  { %v6481_v61 = vmul.f32 %v12060_v3, %v12056_v51  ;;  %v12062_v59 = vpop.eup %12061  ;;  %v16079_v51 = vld [vmem:[%s16380_s14 + $0x28] sm:$0xf]  ;;  %v16089_v3 = vld [vmem:[%s16380_s14 + $0x30] sm:$0xf] }
0x145b   :  { %v6480_v2 = vmul.f32 %v12062_v59, %v15849_v7  ;;  %v12009_v7 = vld [vmem:[#allocation26 + $0x20] ss:$16 sps:$4 sm:$0xff]  }
0x145c   :  { %v12064_v9 = vpop.eup %12063  ;;  %v16099_v59 = vld [vmem:[%s16380_s14 + $0x38] sm:$0xf] }
0x145d   :  { %v16010_v57 = vadd.f32 %v6481_v61, %v6480_v2  ;;  %v16094_v61 = vld [vmem:[%s16380_s14 + $0x34] sm:$0xf] }
0x145f   :  { %12065 = vtanh.f32 %v16010_v57 }
0x1469   :  { %v12066_v48 = vpop.eup %12065 }
0x146a   :  { %v6484_v55 = vmul.f32 %v12066_v48, %v12064_v9 }
0x146c   :  { %v16013_v15 = vpack.c.bf16 %v6484_v55, %v6484_v55 }
0x146e   :  { %6744 = vmatmul.mubr.bf16.vlgmr.msra.gmra.mrb[8].mxu0 %v16013_v15  ;;  %6785 = vmatmul.mubr.bf16.vlgmr.msra.gmra.mrb[8].mxu1 %v16013_v15 }
0x146f   :  { %6954 = vmatpush1.bf16.msra.mxu0 %v12003_v10  ;;  %6995 = vmatpush1.bf16.msra.mxu1 %v12006_v53 }
0x1470   :  { %6955 = vmatprep.subr.bf16.mxu0 %v12011_v41  ;;  %6996 = vmatprep.subr.bf16.mxu1 %v12014_v13 }
0x1471   :  { %6985 = vmatprep.mubr.bf16.mxu0 %v17124_v4  ;;  %7026 = vmatprep.mubr.bf16.mxu1 %v17124_v4  ;;  %v12030_v4 = vld [vmem:[#allocation26 + $0x88] ss:$16 sps:$4 sm:$0xff]  }
0x1473   :  { %6956 = vmatpush1.bf16.msra.mxu0 %v12009_v7  ;;  %6997 = vmatpush1.bf16.msra.mxu1 %v12012_v14 }
0x1474   :  { %6957 = vmatprep.subr.bf16.mxu0 %v12017_v20  ;;  %6998 = vmatprep.subr.bf16.mxu1 %v12020_v12 }
0x1477   :  { %6958 = vmatpush1.bf16.msra.mxu0 %v12015_v39  ;;  %6999 = vmatpush1.bf16.msra.mxu1 %v12018_v35 }
0x1478   :  { %6959 = vmatprep.subr.bf16.mxu0 %v12023_v30  ;;  %7000 = vmatprep.subr.bf16.mxu1 %v12026_v31 }
0x147b   :  { %6960 = vmatpush1.bf16.msra.mxu0 %v12021_v47  ;;  %7001 = vmatpush1.bf16.msra.mxu1 %v12024_v46 }
0x147c   :  { %6961 = vmatprep.subr.bf16.mxu0 %v12029_v50  ;;  %7002 = vmatprep.subr.bf16.mxu1 %v12032_v38 }
0x147f   :  { %6962 = vmatpush1.bf16.msra.mxu0 %v12027_v37  ;;  %7003 = vmatpush1.bf16.msra.mxu1 %v12030_v4 }
0x1480   :  { %6963 = vmatprep.subr.bf16.mxu0 %v12035_v23  ;;  %7004 = vmatprep.subr.bf16.mxu1 %v12038_v43 }
0x1483   :  { %6964 = vmatpush1.bf16.msra.mxu0 %v12033_v33  ;;  %7005 = vmatpush1.bf16.msra.mxu1 %v12036_v34 }
0x1484   :  { %6965 = vmatprep.subr.bf16.mxu0 %v12041_v52  ;;  %7006 = vmatprep.subr.bf16.mxu1 %v12044_v56 }
0x1487   :  { %6966 = vmatpush1.bf16.msra.mxu0 %v12039_v18  ;;  %7007 = vmatpush1.bf16.msra.mxu1 %v12042_v5 }
0x1488   :  { %6967 = vmatprep.subr.bf16.mxu0 %v12047_v63  ;;  %7008 = vmatprep.subr.bf16.mxu1 %v12050_v6 }
0x148b   :  { %6968 = vmatpush1.bf16.msra.mxu0 %v12045_v60  ;;  %7009 = vmatpush1.bf16.msra.mxu1 %v12048_v44 }
0x148e   :  { %6986 = vmatmul.mubr.bf16.vlgmr.msra.gmra.mrb[12].mxu0 %v6517_v17  ;;  %7027 = vmatmul.mubr.bf16.vlgmr.msra.gmra.mrb[12].mxu1 %v6517_v17 }
0x1541   :  { %v6745_v2 = vpop.f32.mrb[8].mxu0  ;;  %v6786_v9 = vpop.f32.mrb[8].mxu1 }
0x1542   :  { %v6747_v48 = vpop.f32.mrb[9].mxu0  ;;  %v6788_v55 = vpop.f32.mrb[9].mxu1 }
0x1543   :  { %v6749_v10 = vpop.f32.mrb[10].mxu0  ;;  %v6790_v53 = vpop.f32.mrb[10].mxu1 }
0x1544   :  { %v6750_v41 = vpop.f32.mrb[11].mxu0  ;;  %v6791_v13 = vpop.f32.mrb[11].mxu1 }
0x1545   :  { %v12955_v13 = vmov %v16024_v16   ;;  %v10312_v16 = vcombine.low (!%p7066_p8), %v16059_v1, %v16064_v24 }
0x1561   :  { %v6987_v7 = vpop.f32.mrb[12].mxu0  ;;  %v7028_v14 = vpop.f32.mrb[12].mxu1 }
0x1562   :  { %v6988_v20 = vadd.f32 %v6987_v7, %v6745_v2  ;;  %v7029_v12 = vadd.f32 %v7028_v14, %v6786_v9  ;;  %v6989_v39 = vpop.f32.mrb[13].mxu0  ;;  %v7030_v35 = vpop.f32.mrb[13].mxu1  ;;  %v12987_v7 = vmov (!%p7066_p8), 0.0   ;;  %v10310_v14 = vcombine.low (!%p7066_p8), %v16039_v25, %v16044_v21 }
0x1563   :  { %v6990_v30 = vadd.f32 %v6989_v39, %v6747_v48  ;;  %v7031_v31 = vadd.f32 %v7030_v35, %v6788_v55  ;;  %v6991_v47 = vpop.f32.mrb[14].mxu0  ;;  %v7032_v46 = vpop.f32.mrb[14].mxu1  ;;  %10763 = vmatprep.subr.bf16.mxu0 (!%p7066_p8), %v12987_v7  ;;  %10779 = vmatprep.mubr.msk.bf16.mxu0 (!%p7066_p8), %vm12988_vm2, %v12987_v7  ;;  %v10315_v25 = vcombine.low (!%p7066_p8), %v16089_v3, %v16094_v61 }
0x1564   :  { %v7035_v50 = vadd.f32 %v6988_v20, %v15945_v28  ;;  %v6992_v38 = vpop.f32.mrb[15].mxu0  ;;  %v7033_v37 = vpop.f32.mrb[15].mxu1  ;;  %v7037_v33 = vadd.f32 %v7029_v12, %v15953_v11  ;;  %v10311_v20 = vcombine.low (!%p7066_p8), %v16049_v27, %v16054_v22  ;;  %v10316_v21 = vcombine.low (!%p7066_p8), %v16099_v59, %v16104_v36 }
0x1565   :  { %v7036_v4 = vadd.f32 %v6990_v30, %v15948_v29  ;;  %v7038_v34 = vadd.f32 %v7031_v31, %v15956_v26 }
0x1566   :  { %v10304_v23 = vmul.f32 -1.442695, %v7035_v50  ;;  %v10306_v52 = vmul.f32 -1.442695, %v7037_v33 }
0x1567   :  { %v10305_v43 = vmul.f32 -1.442695, %v7036_v4 }
0x1568   :  { %12067 = vpow2.f32 %v10304_v23 }
0x1569   :  { %12069 = vpow2.f32 %v10305_v43 }
0x156a   :  { %12071 = vtanh.f32 %v7038_v34 }
0x156b   :  { %12073 = vpow2.f32 %v10306_v52 }
0x1572   :  { %v12068_v56 = vpop.eup %12067 }
0x1573   :  { %v7048_v18 = vadd.f32 1.0, %v12068_v56  ;;  %v12070_v5 = vpop.eup %12069 }
0x1574   :  { %v7049_v63 = vadd.f32 1.0, %v12070_v5  ;;  %v12072_v6 = vpop.eup %12071 }
0x1575   :  { %12075 = vrcp.f32 %v7048_v18  ;;  %v12074_v60 = vpop.eup %12073 }
0x1576   :  { %12077 = vrcp.f32 %v7049_v63  ;;  %v7050_v9 = vadd.f32 1.0, %v12074_v60 }
0x1578   :  { %12079 = vrcp.f32 %v7050_v9 }
0x157f   :  { %v12076_v44 = vpop.eup %12075 }
0x1580   :  { %v7059_v17 = vmul.f32 %v12076_v44, %v12072_v6  ;;  %v12078_v2 = vpop.eup %12077 }
0x1581   :  { %v7058_v48 = vmul.f32 %v12078_v2, %v15961_v42  ;;  %v10309_v42 = vcombine.low (!%p7066_p8), %v16029_v0, %v16034_v40  ;;  %v10313_v0 = vcombine.low (!%p7066_p8), %v16069_v58, %v16074_v49  ;;  %v10314_v40 = vcombine.low (!%p7066_p8), %v16079_v51, %v16084_v8 }
0x1582   :  { %v12080_v10 = vpop.eup %12079 }
0x1583   :  { %v16111_v55 = vadd.f32 %v7059_v17, %v7058_v48  ;;  %10764 = vmatpush3.bf16.msra.mxu0 (!%p7066_p8), %v10309_v42 }
0x1584   :  { %10765 = vmatprep.subr.bf16.mxu0 (!%p7066_p8), %v12987_v7 }
0x1585   :  { %12081 = vtanh.f32 %v16111_v55 }
0x1587   :  { %10766 = vmatpush3.bf16.msra.mxu0 (!%p7066_p8), %v10310_v14 }
0x1588   :  { %10767 = vmatprep.subr.bf16.mxu0 (!%p7066_p8), %v12987_v7 }
0x158b   :  { %10768 = vmatpush3.bf16.msra.mxu0 (!%p7066_p8), %v10311_v20 }
0x158c   :  { %7090 = sbr.rel (%p7066_p8) target bundleno = 5753 (0x1679), region = 181  ;;  %10769 = vmatprep.subr.bf16.mxu0 (!%p7066_p8), %v12987_v7 }
0x158f   :  { %v12082_v53 = vpop.eup %12081  ;;  %10770 = vmatpush3.bf16.msra.mxu0 (!%p7066_p8), %v10312_v16 }
0x1590   :  { %v16114_v41 = vmul.f32 %v12082_v53, %v12080_v10  ;;  %10771 = vmatprep.subr.bf16.mxu0 (!%p7066_p8), %v12987_v7 }
0x1592   :  { %10307 = vst [vmem:[%s16390_s24 + $0x8] sm:$0xff] %v16114_v41  ;;  %v7091_v27 = vpack.c.bf16 (!%p7066_p8), %v16114_v41, %v16114_v41 }
0x1593   :  { %10772 = vmatpush3.bf16.msra.mxu0 %v10313_v0 }
0x1594   :  { %10773 = vmatprep.subr.bf16.mxu0 %v12987_v7 }
0x1597   :  { %10774 = vmatpush3.bf16.msra.mxu0 %v10314_v40 }
0x1598   :  { %10775 = vmatprep.subr.bf16.mxu0 %v12987_v7 }
0x159b   :  { %10776 = vmatpush3.bf16.msra.mxu0 %v10315_v25 }
0x159c   :  { %10777 = vmatprep.subr.bf16.mxu0 %v12987_v7 }
0x159f   :  { %10778 = vmatpush3.bf16.msra.mxu0 %v10316_v21 }
0x15a2   :  { %10780 = vmatmul.mubr.bf16.vlgmr.msra.gmra.mrb[0].mxu0 %v7091_v27 }
0x1675   :  { %v7174_v22 = vpop.f32.mrb[0].mxu0 }
0x1676   :  { %v7175_v1 = vadd.f32 %v15820_v45, %v7174_v22  ;;  %v10781_v24 = vpop.f32.mrb[1].mxu0 }
0x1677   :  { %v7177_v58 = vpop.f32.mrb[2].mxu0 }
0x1678   :  { %v7180_v13 = vmax.f32 %v7175_v1, 0.0   ;;  %v10782_v49 = vpop.f32.mrb[3].mxu0 }
0x1679 PF:  { %v12083_v51 = vld [vmem:[#allocation20 + $0x4] ss:$16 sps:$4 sm:$0xff]   ;;  %v17125_v8 = vmov 0   ;;  %v12085_v3 = vld [vmem:[#allocation20 + $0xc] ss:$16 sps:$4 sm:$0xff]   ;;  %v7246_v42 = vpack.c.bf16 %v12957_v13, %v12957_v13  ;;  %s16170_s18 = sld [smem:[#allocation4 + $0x2]]  ;;  %v12957_v13 = vphi %v12955_v13, %v7180_v13  }
0x167a   :  { %7439 = vmatprep.mubr.bf16.mxu0 %v17125_v8  ;;  %7480 = vmatprep.mubr.bf16.mxu1 %v17125_v8  ;;  %v12087_v61 = vld [vmem:[#allocation20] ss:$16 sps:$4 sm:$0xff]   ;;  %v12088_v59 = vld [vmem:[#allocation20 + $0x8] ss:$16 sps:$4 sm:$0xff]   ;;  %v12089_v36 = vld [vmem:[#allocation20 + $0x24] ss:$16 sps:$4 sm:$0xff]  }
0x167b   :  { %7407 = vmatprep.subr.bf16.mxu0 %v12083_v51  ;;  %7448 = vmatprep.subr.bf16.mxu1 %v12085_v3  ;;  %v12091_v12 = vld [vmem:[#allocation20 + $0x2c] ss:$16 sps:$4 sm:$0xff]   ;;  %v12093_v39 = vld [vmem:[#allocation20 + $0x20] ss:$16 sps:$4 sm:$0xff]   ;;  %v12094_v35 = vld [vmem:[#allocation20 + $0x28] ss:$16 sps:$4 sm:$0xff]  }
0x167c   :  { %7408 = vmatpush1.bf16.msra.mxu0 %v12087_v61  ;;  %7449 = vmatpush1.bf16.msra.mxu1 %v12088_v59  ;;  %v12095_v30 = vld [vmem:[#allocation20 + $0x44] ss:$16 sps:$4 sm:$0xff]   ;;  %v12097_v31 = vld [vmem:[#allocation20 + $0x4c] ss:$16 sps:$4 sm:$0xff]   ;;  %v12099_v47 = vld [vmem:[#allocation20 + $0x40] ss:$16 sps:$4 sm:$0xff]  }
0x167d   :  { %7409 = vmatprep.subr.bf16.mxu0 %v12089_v36  ;;  %7450 = vmatprep.subr.bf16.mxu1 %v12091_v12  ;;  %v12100_v46 = vld [vmem:[#allocation20 + $0x48] ss:$16 sps:$4 sm:$0xff]   ;;  %v12101_v50 = vld [vmem:[#allocation20 + $0x64] ss:$16 sps:$4 sm:$0xff]   ;;  %v12103_v38 = vld [vmem:[#allocation20 + $0x6c] ss:$16 sps:$4 sm:$0xff]  }
0x167e   :  { %v12105_v37 = vld [vmem:[#allocation20 + $0x60] ss:$16 sps:$4 sm:$0xff]   ;;  %v12106_v4 = vld [vmem:[#allocation20 + $0x68] ss:$16 sps:$4 sm:$0xff]   ;;  %v12107_v23 = vld [vmem:[#allocation20 + $0x84] ss:$16 sps:$4 sm:$0xff]  }
0x167f   :  { %v12109_v43 = vld [vmem:[#allocation20 + $0x8c] ss:$16 sps:$4 sm:$0xff]   ;;  %v12111_v33 = vld [vmem:[#allocation20 + $0x80] ss:$16 sps:$4 sm:$0xff]   ;;  %v12112_v34 = vld [vmem:[#allocation20 + $0x88] ss:$16 sps:$4 sm:$0xff]  }
0x1680   :  { %7410 = vmatpush1.bf16.msra.mxu0 %v12093_v39  ;;  %7451 = vmatpush1.bf16.msra.mxu1 %v12094_v35  ;;  %v12113_v52 = vld [vmem:[#allocation20 + $0xa4] ss:$16 sps:$4 sm:$0xff]   ;;  %v12115_v56 = vld [vmem:[#allocation20 + $0xac] ss:$16 sps:$4 sm:$0xff]   ;;  %v12117_v18 = vld [vmem:[#allocation20 + $0xa0] ss:$16 sps:$4 sm:$0xff]  }
0x1681   :  { %7411 = vmatprep.subr.bf16.mxu0 %v12095_v30  ;;  %7452 = vmatprep.subr.bf16.mxu1 %v12097_v31  ;;  %v12118_v5 = vld [vmem:[#allocation20 + $0xa8] ss:$16 sps:$4 sm:$0xff]   ;;  %v12119_v63 = vld [vmem:[#allocation20 + $0xc4] ss:$16 sps:$4 sm:$0xff]   ;;  %v12121_v6 = vld [vmem:[#allocation20 + $0xcc] ss:$16 sps:$4 sm:$0xff]  }
0x1682   :  { %v12123_v60 = vld [vmem:[#allocation20 + $0xc0] ss:$16 sps:$4 sm:$0xff]   ;;  %v12124_v44 = vld [vmem:[#allocation20 + $0xc8] ss:$16 sps:$4 sm:$0xff]   ;;  %v12125_v17 = vld [vmem:[#allocation20 + $0xe4] ss:$16 sps:$4 sm:$0xff]  }
0x1683   :  { %v12127_v2 = vld [vmem:[#allocation20 + $0xec] ss:$16 sps:$4 sm:$0xff]   ;;  %v12129_v9 = vld [vmem:[#allocation20 + $0xe0] ss:$16 sps:$4 sm:$0xff]   ;;  %v12130_v48 = vld [vmem:[#allocation20 + $0xe8] ss:$16 sps:$4 sm:$0xff]  }
0x1684   :  { %7412 = vmatpush1.bf16.msra.mxu0 %v12099_v47  ;;  %7453 = vmatpush1.bf16.msra.mxu1 %v12100_v46  ;;  %v12133_v10 = vld [vmem:[#allocation22 + $0x4] ss:$16 sps:$4 sm:$0xff]   ;;  %v12136_v53 = vld [vmem:[#allocation22 + $0xc] ss:$16 sps:$4 sm:$0xff]   ;;  %v12131_v7 = vld [vmem:[#allocation22] ss:$16 sps:$4 sm:$0xff]  }
0x1685   :  { %7413 = vmatprep.subr.bf16.mxu0 %v12101_v50  ;;  %7454 = vmatprep.subr.bf16.mxu1 %v12103_v38  ;;  %v12134_v14 = vld [vmem:[#allocation22 + $0x8] ss:$16 sps:$4 sm:$0xff]   ;;  %v12139_v20 = vld [vmem:[#allocation22 + $0x24] ss:$16 sps:$4 sm:$0xff]   ;;  %v12142_v16 = vld [vmem:[#allocation22 + $0x2c] ss:$16 sps:$4 sm:$0xff]  }
0x1686   :  { %v12137_v0 = vld [vmem:[#allocation22 + $0x20] ss:$16 sps:$4 sm:$0xff]   ;;  %v12140_v40 = vld [vmem:[#allocation22 + $0x28] ss:$16 sps:$4 sm:$0xff]   ;;  %v12145_v25 = vld [vmem:[#allocation22 + $0x44] ss:$16 sps:$4 sm:$0xff]  }
0x1687   :  { %v12148_v21 = vld [vmem:[#allocation22 + $0x4c] ss:$16 sps:$4 sm:$0xff]   ;;  %v12143_v13 = vld [vmem:[#allocation22 + $0x40] ss:$16 sps:$4 sm:$0xff]   ;;  %v12146_v27 = vld [vmem:[#allocation22 + $0x48] ss:$16 sps:$4 sm:$0xff]  }
0x1688   :  { %7414 = vmatpush1.bf16.msra.mxu0 %v12105_v37  ;;  %7455 = vmatpush1.bf16.msra.mxu1 %v12106_v4  ;;  %v12151_v22 = vld [vmem:[#allocation22 + $0x64] ss:$16 sps:$4 sm:$0xff]   ;;  %v12154_v1 = vld [vmem:[#allocation22 + $0x6c] ss:$16 sps:$4 sm:$0xff]   ;;  %v12149_v24 = vld [vmem:[#allocation22 + $0x60] ss:$16 sps:$4 sm:$0xff]  }
0x1689   :  { %7415 = vmatprep.subr.bf16.mxu0 %v12107_v23  ;;  %7456 = vmatprep.subr.bf16.mxu1 %v12109_v43  ;;  %v12152_v58 = vld [vmem:[#allocation22 + $0x68] ss:$16 sps:$4 sm:$0xff]   ;;  %v12157_v49 = vld [vmem:[#allocation22 + $0x84] ss:$16 sps:$4 sm:$0xff]   ;;  %v12160_v51 = vld [vmem:[#allocation22 + $0x8c] ss:$16 sps:$4 sm:$0xff]  }
0x168a   :  { %v12155_v3 = vld [vmem:[#allocation22 + $0x80] ss:$16 sps:$4 sm:$0xff]   ;;  %v12158_v61 = vld [vmem:[#allocation22 + $0x88] ss:$16 sps:$4 sm:$0xff]   ;;  %v12163_v59 = vld [vmem:[#allocation22 + $0xa4] ss:$16 sps:$4 sm:$0xff]  }
0x168b   :  { %v12166_v36 = vld [vmem:[#allocation22 + $0xac] ss:$16 sps:$4 sm:$0xff]   ;;  %v12161_v12 = vld [vmem:[#allocation22 + $0xa0] ss:$16 sps:$4 sm:$0xff]   ;;  %v12164_v39 = vld [vmem:[#allocation22 + $0xa8] ss:$16 sps:$4 sm:$0xff]  }
0x168c   :  { %7416 = vmatpush1.bf16.msra.mxu0 %v12111_v33  ;;  %7457 = vmatpush1.bf16.msra.mxu1 %v12112_v34  ;;  %v12169_v35 = vld [vmem:[#allocation22 + $0xc4] ss:$16 sps:$4 sm:$0xff]   ;;  %v12172_v30 = vld [vmem:[#allocation22 + $0xcc] ss:$16 sps:$4 sm:$0xff]   ;;  %v12167_v31 = vld [vmem:[#allocation22 + $0xc0] ss:$16 sps:$4 sm:$0xff]  }
0x168d   :  { %7417 = vmatprep.subr.bf16.mxu0 %v12113_v52  ;;  %7458 = vmatprep.subr.bf16.mxu1 %v12115_v56  ;;  %v12170_v47 = vld [vmem:[#allocation22 + $0xc8] ss:$16 sps:$4 sm:$0xff]   ;;  %v12175_v46 = vld [vmem:[#allocation22 + $0xe4] ss:$16 sps:$4 sm:$0xff]   ;;  %v12178_v50 = vld [vmem:[#allocation22 + $0xec] ss:$16 sps:$4 sm:$0xff]  }
0x168e   :  { %v12173_v38 = vld [vmem:[#allocation22 + $0xe0] ss:$16 sps:$4 sm:$0xff]   ;;  %v12176_v37 = vld [vmem:[#allocation22 + $0xe8] ss:$16 sps:$4 sm:$0xff]   ;;  %v12179_v43 = vld [vmem:[#allocation25] ss:$16 sps:$4 sm:$0xff]  }
0x168f   :  { %v12181_v4 = vld [vmem:[#allocation25 + $0x4] ss:$16 sps:$4 sm:$0xff]   ;;  %v12184_v23 = vld [vmem:[#allocation25 + $0xc] ss:$16 sps:$4 sm:$0xff]   ;;  %v12182_v33 = vld [vmem:[#allocation25 + $0x8] ss:$16 sps:$4 sm:$0xff]  }
0x1690   :  { %7418 = vmatpush1.bf16.msra.mxu0 %v12117_v18  ;;  %7459 = vmatpush1.bf16.msra.mxu1 %v12118_v5  ;;  %v12187_v34 = vld [vmem:[#allocation25 + $0x24] ss:$16 sps:$4 sm:$0xff]   ;;  %v12190_v52 = vld [vmem:[#allocation25 + $0x2c] ss:$16 sps:$4 sm:$0xff]   ;;  %v12185_v56 = vld [vmem:[#allocation25 + $0x20] ss:$16 sps:$4 sm:$0xff]  }
0x1691   :  { %7419 = vmatprep.subr.bf16.mxu0 %v12119_v63  ;;  %7460 = vmatprep.subr.bf16.mxu1 %v12121_v6  ;;  %v12188_v18 = vld [vmem:[#allocation25 + $0x28] ss:$16 sps:$4 sm:$0xff]   ;;  %v12196_v5 = vld [vmem:[#allocation25 + $0x4c] ss:$16 sps:$4 sm:$0xff]   ;;  %v12191_v63 = vld [vmem:[#allocation25 + $0x40] ss:$16 sps:$4 sm:$0xff]  }
0x1692   :  { %v12194_v6 = vld [vmem:[#allocation25 + $0x48] ss:$16 sps:$4 sm:$0xff]   ;;  %p8340_p9 = scmp.gt.s32.totalorder %s16170_s18, 0 }
0x1693   :  { %vm12990_vm3 = vmmov (!%p8340_p9), 0  }
0x1694   :  { %7420 = vmatpush1.bf16.msra.mxu0 %v12123_v60  ;;  %7461 = vmatpush1.bf16.msra.mxu1 %v12124_v44  ;;  %v12199_v60 = vld [vmem:[#allocation25 + $0x64] ss:$16 sps:$4 sm:$0xff]   ;;  %v12202_v44 = vld [vmem:[#allocation25 + $0x6c] ss:$16 sps:$4 sm:$0xff]  }
0x1695   :  { %7421 = vmatprep.subr.bf16.mxu0 %v12125_v17  ;;  %7462 = vmatprep.subr.bf16.mxu1 %v12127_v2  ;;  %v12197_v17 = vld [vmem:[#allocation25 + $0x60] ss:$16 sps:$4 sm:$0xff]   ;;  %v12200_v2 = vld [vmem:[#allocation25 + $0x68] ss:$16 sps:$4 sm:$0xff]  }
0x1698   :  { %7422 = vmatpush1.bf16.msra.mxu0 %v12129_v9  ;;  %7463 = vmatpush1.bf16.msra.mxu1 %v12130_v48  ;;  %v12205_v9 = vld [vmem:[#allocation25 + $0x84] ss:$16 sps:$4 sm:$0xff]   ;;  %v12208_v48 = vld [vmem:[#allocation25 + $0x8c] ss:$16 sps:$4 sm:$0xff]  }
0x1699   :  { %7649 = vmatprep.subr.bf16.mxu0 %v12133_v10  ;;  %7690 = vmatprep.subr.bf16.mxu1 %v12136_v53  ;;  %v12203_v10 = vld [vmem:[#allocation25 + $0x80] ss:$16 sps:$4 sm:$0xff]   ;;  %v12206_v53 = vld [vmem:[#allocation25 + $0x88] ss:$16 sps:$4 sm:$0xff]  }
0x169b   :  { %7440 = vmatmul.mubr.bf16.vlgmr.msra.gmra.mrb[0].mxu0 %v7246_v42  ;;  %7481 = vmatmul.mubr.bf16.vlgmr.msra.gmra.mrb[0].mxu1 %v7246_v42  ;;  %v12209_v42 = vld [vmem:[#allocation25 + $0xa0] ss:$16 sps:$4 sm:$0xff]  }
0x169c   :  { %7650 = vmatpush1.bf16.msra.mxu0 %v12131_v7  ;;  %7691 = vmatpush1.bf16.msra.mxu1 %v12134_v14  ;;  %v12211_v7 = vld [vmem:[#allocation25 + $0xa4] ss:$16 sps:$4 sm:$0xff]   ;;  %v12212_v14 = vld [vmem:[#allocation25 + $0xa8] ss:$16 sps:$4 sm:$0xff]  }
0x169d   :  { %7651 = vmatprep.subr.bf16.mxu0 %v12139_v20  ;;  %7692 = vmatprep.subr.bf16.mxu1 %v12142_v16  ;;  %v12214_v20 = vld [vmem:[#allocation25 + $0xac] ss:$16 sps:$4 sm:$0xff]   ;;  %v12217_v16 = vld [vmem:[#allocation25 + $0xc4] ss:$16 sps:$4 sm:$0xff]  }
0x169e   :  { %7681 = vmatprep.mubr.bf16.mxu0 %v17125_v8  ;;  %7722 = vmatprep.mubr.bf16.mxu1 %v17125_v8 }
0x16a0   :  { %7652 = vmatpush1.bf16.msra.mxu0 %v12137_v0  ;;  %7693 = vmatpush1.bf16.msra.mxu1 %v12140_v40  ;;  %v12220_v0 = vld [vmem:[#allocation25 + $0xcc] ss:$16 sps:$4 sm:$0xff]   ;;  %v12215_v40 = vld [vmem:[#allocation25 + $0xc0] ss:$16 sps:$4 sm:$0xff]  }
0x16a1   :  { %7653 = vmatprep.subr.bf16.mxu0 %v12145_v25  ;;  %7694 = vmatprep.subr.bf16.mxu1 %v12148_v21  ;;  %v12218_v25 = vld [vmem:[#allocation25 + $0xc8] ss:$16 sps:$4 sm:$0xff]   ;;  %v12223_v21 = vld [vmem:[#allocation25 + $0xe4] ss:$16 sps:$4 sm:$0xff]  }
0x16a4   :  { %7654 = vmatpush1.bf16.msra.mxu0 %v12143_v13  ;;  %7695 = vmatpush1.bf16.msra.mxu1 %v12146_v27  ;;  %v12226_v13 = vld [vmem:[#allocation25 + $0xec] ss:$16 sps:$4 sm:$0xff]   ;;  %v12221_v27 = vld [vmem:[#allocation25 + $0xe0] ss:$16 sps:$4 sm:$0xff]  }
0x16a5   :  { %7655 = vmatprep.subr.bf16.mxu0 %v12151_v22  ;;  %7696 = vmatprep.subr.bf16.mxu1 %v12154_v1  ;;  %v12224_v22 = vld [vmem:[#allocation25 + $0xe8] ss:$16 sps:$4 sm:$0xff]   ;;  %v12229_v1 = vld [vmem:[#allocation26 + $0x4] ss:$16 sps:$4 sm:$0xff]  }
0x16a8   :  { %7656 = vmatpush1.bf16.msra.mxu0 %v12149_v24  ;;  %7697 = vmatpush1.bf16.msra.mxu1 %v12152_v58  ;;  %v12232_v24 = vld [vmem:[#allocation26 + $0xc] ss:$16 sps:$4 sm:$0xff]  }
0x16a9   :  { %7657 = vmatprep.subr.bf16.mxu0 %v12157_v49  ;;  %7698 = vmatprep.subr.bf16.mxu1 %v12160_v51 }
0x16ac   :  { %7658 = vmatpush1.bf16.msra.mxu0 %v12155_v3  ;;  %7699 = vmatpush1.bf16.msra.mxu1 %v12158_v61 }
0x16ad   :  { %7659 = vmatprep.subr.bf16.mxu0 %v12163_v59  ;;  %7700 = vmatprep.subr.bf16.mxu1 %v12166_v36 }
0x16b0   :  { %7660 = vmatpush1.bf16.msra.mxu0 %v12161_v12  ;;  %7701 = vmatpush1.bf16.msra.mxu1 %v12164_v39 }
0x16b1   :  { %7661 = vmatprep.subr.bf16.mxu0 %v12169_v35  ;;  %7702 = vmatprep.subr.bf16.mxu1 %v12172_v30 }
0x16b4   :  { %7662 = vmatpush1.bf16.msra.mxu0 %v12167_v31  ;;  %7703 = vmatpush1.bf16.msra.mxu1 %v12170_v47 }
0x16b5   :  { %7663 = vmatprep.subr.bf16.mxu0 %v12175_v46  ;;  %7704 = vmatprep.subr.bf16.mxu1 %v12178_v50 }
0x16b8   :  { %7664 = vmatpush1.bf16.msra.mxu0 %v12173_v38  ;;  %7705 = vmatpush1.bf16.msra.mxu1 %v12176_v37 }
0x16b9   :  { %7985 = vmatprep.subr.bf16.mxu0 %v12181_v4  ;;  %8026 = vmatprep.subr.bf16.mxu1 %v12184_v23 }
0x16bb   :  { %7682 = vmatmul.mubr.bf16.vlgmr.msra.gmra.mrb[4].mxu0 %v16013_v15  ;;  %7723 = vmatmul.mubr.bf16.vlgmr.msra.gmra.mrb[4].mxu1 %v16013_v15  ;;  %v12193_v15 = vld [vmem:[#allocation25 + $0x44] ss:$16 sps:$4 sm:$0xff]  }
0x16bc   :  { %8017 = vmatprep.mubr.bf16.mxu0 %v17125_v8  ;;  %8058 = vmatprep.mubr.bf16.mxu1 %v17125_v8 }
0x16bd   :  { %7986 = vmatpush1.bf16.msra.mxu0 %v12179_v43  ;;  %8027 = vmatpush1.bf16.msra.mxu1 %v12182_v33 }
0x16be   :  { %7987 = vmatprep.subr.bf16.mxu0 %v12187_v34  ;;  %8028 = vmatprep.subr.bf16.mxu1 %v12190_v52 }
0x16c1   :  { %7988 = vmatpush1.bf16.msra.mxu0 %v12185_v56  ;;  %8029 = vmatpush1.bf16.msra.mxu1 %v12188_v18 }
0x16c2   :  { %7989 = vmatprep.subr.bf16.mxu0 %v12193_v15  ;;  %8030 = vmatprep.subr.bf16.mxu1 %v12196_v5 }
0x16c5   :  { %7990 = vmatpush1.bf16.msra.mxu0 %v12191_v63  ;;  %8031 = vmatpush1.bf16.msra.mxu1 %v12194_v6 }
0x16c6   :  { %7991 = vmatprep.subr.bf16.mxu0 %v12199_v60  ;;  %8032 = vmatprep.subr.bf16.mxu1 %v12202_v44 }
0x16c9   :  { %7992 = vmatpush1.bf16.msra.mxu0 %v12197_v17  ;;  %8033 = vmatpush1.bf16.msra.mxu1 %v12200_v2 }
0x16ca   :  { %7993 = vmatprep.subr.bf16.mxu0 %v12205_v9  ;;  %8034 = vmatprep.subr.bf16.mxu1 %v12208_v48 }
0x16cd   :  { %7994 = vmatpush1.bf16.msra.mxu0 %v12203_v10  ;;  %8035 = vmatpush1.bf16.msra.mxu1 %v12206_v53 }
0x16ce   :  { %7995 = vmatprep.subr.bf16.mxu0 %v12211_v7  ;;  %8036 = vmatprep.subr.bf16.mxu1 %v12214_v20 }
0x16d1   :  { %7996 = vmatpush1.bf16.msra.mxu0 %v12209_v42  ;;  %8037 = vmatpush1.bf16.msra.mxu1 %v12212_v14 }
0x16d2   :  { %7997 = vmatprep.subr.bf16.mxu0 %v12217_v16  ;;  %8038 = vmatprep.subr.bf16.mxu1 %v12220_v0  ;;  %v12227_v0 = vld [vmem:[#allocation26] ss:$16 sps:$4 sm:$0xff]  }
0x16d5   :  { %7998 = vmatpush1.bf16.msra.mxu0 %v12215_v40  ;;  %8039 = vmatpush1.bf16.msra.mxu1 %v12218_v25  ;;  %v12230_v40 = vld [vmem:[#allocation26 + $0x8] ss:$16 sps:$4 sm:$0xff]  }
0x16d6   :  { %7999 = vmatprep.subr.bf16.mxu0 %v12223_v21  ;;  %8040 = vmatprep.subr.bf16.mxu1 %v12226_v13  ;;  %v12235_v21 = vld [vmem:[#allocation26 + $0x24] ss:$16 sps:$4 sm:$0xff]   ;;  %v12238_v13 = vld [vmem:[#allocation26 + $0x2c] ss:$16 sps:$4 sm:$0xff]  }
0x16d9   :  { %8000 = vmatpush1.bf16.msra.mxu0 %v12221_v27  ;;  %8041 = vmatpush1.bf16.msra.mxu1 %v12224_v22  ;;  %v12236_v27 = vld [vmem:[#allocation26 + $0x28] ss:$16 sps:$4 sm:$0xff]   ;;  %v12241_v22 = vld [vmem:[#allocation26 + $0x44] ss:$16 sps:$4 sm:$0xff]  }
0x16da   :  { %8227 = vmatprep.subr.bf16.mxu0 %v12229_v1  ;;  %8268 = vmatprep.subr.bf16.mxu1 %v12232_v24  ;;  %v12244_v1 = vld [vmem:[#allocation26 + $0x4c] ss:$16 sps:$4 sm:$0xff]   ;;  %v12239_v24 = vld [vmem:[#allocation26 + $0x40] ss:$16 sps:$4 sm:$0xff]  }
0x176e   :  { %v7441_v58 = vpop.f32.mrb[0].mxu0  ;;  %v7482_v49 = vpop.f32.mrb[0].mxu1 }
0x176f   :  { %v7443_v51 = vpop.f32.mrb[1].mxu0  ;;  %v7484_v3 = vpop.f32.mrb[1].mxu1 }
0x1770   :  { %v7445_v61 = vpop.f32.mrb[2].mxu0  ;;  %v7486_v59 = vpop.f32.mrb[2].mxu1 }
0x1771   :  { %v7446_v36 = vpop.f32.mrb[3].mxu0  ;;  %v7487_v12 = vpop.f32.mrb[3].mxu1  ;;  %v12248_v61 = vld [vmem:[#allocation26 + $0x68] ss:$16 sps:$4 sm:$0xff]   ;;  %v12253_v59 = vld [vmem:[#allocation26 + $0x84] ss:$16 sps:$4 sm:$0xff]  }
0x1772   :  { %v12256_v36 = vld [vmem:[#allocation26 + $0x8c] ss:$16 sps:$4 sm:$0xff]   ;;  %v12251_v12 = vld [vmem:[#allocation26 + $0x80] ss:$16 sps:$4 sm:$0xff]  }
0x178e   :  { %v7683_v39 = vpop.f32.mrb[4].mxu0  ;;  %v7724_v35 = vpop.f32.mrb[4].mxu1 }
0x178f   :  { %v7684_v30 = vadd.f32 %v7683_v39, %v7441_v58  ;;  %v7725_v31 = vadd.f32 %v7724_v35, %v7482_v49  ;;  %v7685_v47 = vpop.f32.mrb[5].mxu0  ;;  %v7726_v46 = vpop.f32.mrb[5].mxu1  ;;  %v12242_v58 = vld [vmem:[#allocation26 + $0x48] ss:$16 sps:$4 sm:$0xff]   ;;  %v12247_v49 = vld [vmem:[#allocation26 + $0x64] ss:$16 sps:$4 sm:$0xff]  }
0x1790   :  { %v7686_v50 = vadd.f32 %v7685_v47, %v7443_v51  ;;  %v7727_v38 = vadd.f32 %v7726_v46, %v7484_v3  ;;  %v7687_v37 = vpop.f32.mrb[6].mxu0  ;;  %v7728_v4 = vpop.f32.mrb[6].mxu1  ;;  %v12250_v51 = vld [vmem:[#allocation26 + $0x6c] ss:$16 sps:$4 sm:$0xff]   ;;  %v12245_v3 = vld [vmem:[#allocation26 + $0x60] ss:$16 sps:$4 sm:$0xff]  }
0x1791   :  { %v7731_v23 = vadd.f32 %v7684_v30, %v15833_v62  ;;  %v7688_v43 = vpop.f32.mrb[7].mxu0  ;;  %v7729_v33 = vpop.f32.mrb[7].mxu1  ;;  %v7733_v18 = vadd.f32 %v7725_v31, %v15841_v19  ;;  %v12259_v39 = vld [vmem:[#allocation26 + $0xa4] ss:$16 sps:$4 sm:$0xff]   ;;  %v12262_v35 = vld [vmem:[#allocation26 + $0xac] ss:$16 sps:$4 sm:$0xff]  }
0x1792   :  { %v7732_v34 = vadd.f32 %v7686_v50, %v15836_v32  ;;  %v7734_v15 = vadd.f32 %v7727_v38, %v15844_v54  ;;  %v12257_v30 = vld [vmem:[#allocation26 + $0xa0] ss:$16 sps:$4 sm:$0xff]   ;;  %v12260_v31 = vld [vmem:[#allocation26 + $0xa8] ss:$16 sps:$4 sm:$0xff]   ;;  %v12265_v47 = vld [vmem:[#allocation26 + $0xc4] ss:$16 sps:$4 sm:$0xff]   ;;  %v7791_v33 = vpack.c.bf16 %v16114_v41, %v16114_v41 }
0x1793   :  { %v10381_v52 = vmul.f32 -1.442695, %v7731_v23  ;;  %v10383_v5 = vmul.f32 -1.442695, %v7733_v18  ;;  %v12268_v46 = vld [vmem:[#allocation26 + $0xcc] ss:$16 sps:$4 sm:$0xff]  }
0x1794   :  { %v10382_v56 = vmul.f32 -1.442695, %v7732_v34  ;;  %v12263_v50 = vld [vmem:[#allocation26 + $0xc0] ss:$16 sps:$4 sm:$0xff]   ;;  %v12266_v38 = vld [vmem:[#allocation26 + $0xc8] ss:$16 sps:$4 sm:$0xff]  }
0x1795   :  { %12275 = vpow2.f32 %v10381_v52  ;;  %v12271_v37 = vld [vmem:[#allocation26 + $0xe4] ss:$16 sps:$4 sm:$0xff]   ;;  %v12274_v4 = vld [vmem:[#allocation26 + $0xec] ss:$16 sps:$4 sm:$0xff]   ;;  %v12269_v23 = vld [vmem:[#allocation26 + $0xe0] ss:$16 sps:$4 sm:$0xff]  }
0x1796   :  { %12277 = vpow2.f32 %v10382_v56  ;;  %v12272_v43 = vld [vmem:[#allocation26 + $0xe8] ss:$16 sps:$4 sm:$0xff]   ;;  %v16183_v56 = vld [vmem:[%s16380_s14 + $0x4] sm:$0xf]  ;;  %v16188_v41 = vld [vmem:[%s16380_s14 + $0x8] sm:$0xf] }
0x1797   :  { %12279 = vtanh.f32 %v7734_v15  ;;  %v16173_v34 = vld [vmem:[#allocation3 + $0x10] sm:$0xff]   ;;  %v16178_v52 = vld [vmem:[%s16380_s14] sm:$0xf]  ;;  %v16193_v18 = vld [vmem:[%s16380_s14 + $0xc] sm:$0xf] }
0x1798   :  { %12281 = vpow2.f32 %v10383_v5  ;;  %v16198_v15 = vld [vmem:[%s16380_s14 + $0x10] sm:$0xf]  ;;  %v16203_v5 = vld [vmem:[%s16380_s14 + $0x14] sm:$0xf] }
0x179f   :  { %v12276_v63 = vpop.eup %12275 }
0x17a0   :  { %v7744_v6 = vadd.f32 1.0, %v12276_v63  ;;  %v12278_v60 = vpop.eup %12277  ;;  %v16208_v63 = vld [vmem:[%s16380_s14 + $0x18] sm:$0xf] }
0x17a1   :  { %v7745_v44 = vadd.f32 1.0, %v12278_v60  ;;  %v12280_v17 = vpop.eup %12279  ;;  %v16218_v60 = vld [vmem:[%s16380_s14 + $0x20] sm:$0xf] }
0x17a2   :  { %12283 = vrcp.f32 %v7744_v6  ;;  %v12282_v2 = vpop.eup %12281  ;;  %v16213_v6 = vld [vmem:[%s16380_s14 + $0x1c] sm:$0xf] }
0x17a3   :  { %12285 = vrcp.f32 %v7745_v44  ;;  %v7746_v53 = vadd.f32 1.0, %v12282_v2  ;;  %v16223_v44 = vld [vmem:[%s16380_s14 + $0x24] sm:$0xf]  ;;  %v16233_v2 = vld [vmem:[%s16380_s14 + $0x2c] sm:$0xf] }
0x17a5   :  { %12287 = vrcp.f32 %v7746_v53  ;;  %v16253_v53 = vld [vmem:[%s16380_s14 + $0x3c] sm:$0xf] }
0x17ac   :  { %v12284_v9 = vpop.eup %12283 }
0x17ad   :  { %v7755_v48 = vmul.f32 %v12284_v9, %v12280_v17  ;;  %v12286_v10 = vpop.eup %12285  ;;  %v16228_v17 = vld [vmem:[%s16380_s14 + $0x28] sm:$0xf]  ;;  %v16238_v9 = vld [vmem:[%s16380_s14 + $0x30] sm:$0xf] }
0x17ae   :  { %v7754_v42 = vmul.f32 %v12286_v10, %v16010_v57  ;;  %v12233_v57 = vld [vmem:[#allocation26 + $0x20] ss:$16 sps:$4 sm:$0xff]  }
0x17af   :  { %v12288_v14 = vpop.eup %12287  ;;  %v16248_v10 = vld [vmem:[%s16380_s14 + $0x38] sm:$0xf] }
0x17b0   :  { %v16159_v7 = vadd.f32 %v7755_v48, %v7754_v42  ;;  %v16243_v48 = vld [vmem:[%s16380_s14 + $0x34] sm:$0xf] }
0x17b2   :  { %12289 = vtanh.f32 %v16159_v7 }
0x17bc   :  { %v12290_v20 = vpop.eup %12289 }
0x17bd   :  { %v7758_v16 = vmul.f32 %v12290_v20, %v12288_v14 }
0x17bf   :  { %v16162_v25 = vpack.c.bf16 %v7758_v16, %v7758_v16 }
0x17c1   :  { %8018 = vmatmul.mubr.bf16.vlgmr.msra.gmra.mrb[8].mxu0 %v16162_v25  ;;  %8059 = vmatmul.mubr.bf16.vlgmr.msra.gmra.mrb[8].mxu1 %v16162_v25 }
0x17c2   :  { %8228 = vmatpush1.bf16.msra.mxu0 %v12227_v0  ;;  %8269 = vmatpush1.bf16.msra.mxu1 %v12230_v40 }
0x17c3   :  { %8229 = vmatprep.subr.bf16.mxu0 %v12235_v21  ;;  %8270 = vmatprep.subr.bf16.mxu1 %v12238_v13 }
0x17c4   :  { %8259 = vmatprep.mubr.bf16.mxu0 %v17125_v8  ;;  %8300 = vmatprep.mubr.bf16.mxu1 %v17125_v8  ;;  %v12254_v8 = vld [vmem:[#allocation26 + $0x88] ss:$16 sps:$4 sm:$0xff]  }
0x17c6   :  { %8230 = vmatpush1.bf16.msra.mxu0 %v12233_v57  ;;  %8271 = vmatpush1.bf16.msra.mxu1 %v12236_v27 }
0x17c7   :  { %8231 = vmatprep.subr.bf16.mxu0 %v12241_v22  ;;  %8272 = vmatprep.subr.bf16.mxu1 %v12244_v1 }
0x17ca   :  { %8232 = vmatpush1.bf16.msra.mxu0 %v12239_v24  ;;  %8273 = vmatpush1.bf16.msra.mxu1 %v12242_v58 }
0x17cb   :  { %8233 = vmatprep.subr.bf16.mxu0 %v12247_v49  ;;  %8274 = vmatprep.subr.bf16.mxu1 %v12250_v51 }
0x17ce   :  { %8234 = vmatpush1.bf16.msra.mxu0 %v12245_v3  ;;  %8275 = vmatpush1.bf16.msra.mxu1 %v12248_v61 }
0x17cf   :  { %8235 = vmatprep.subr.bf16.mxu0 %v12253_v59  ;;  %8276 = vmatprep.subr.bf16.mxu1 %v12256_v36 }
0x17d2   :  { %8236 = vmatpush1.bf16.msra.mxu0 %v12251_v12  ;;  %8277 = vmatpush1.bf16.msra.mxu1 %v12254_v8 }
0x17d3   :  { %8237 = vmatprep.subr.bf16.mxu0 %v12259_v39  ;;  %8278 = vmatprep.subr.bf16.mxu1 %v12262_v35 }
0x17d6   :  { %8238 = vmatpush1.bf16.msra.mxu0 %v12257_v30  ;;  %8279 = vmatpush1.bf16.msra.mxu1 %v12260_v31 }
0x17d7   :  { %8239 = vmatprep.subr.bf16.mxu0 %v12265_v47  ;;  %8280 = vmatprep.subr.bf16.mxu1 %v12268_v46 }
0x17da   :  { %8240 = vmatpush1.bf16.msra.mxu0 %v12263_v50  ;;  %8281 = vmatpush1.bf16.msra.mxu1 %v12266_v38 }
0x17db   :  { %8241 = vmatprep.subr.bf16.mxu0 %v12271_v37  ;;  %8282 = vmatprep.subr.bf16.mxu1 %v12274_v4 }
0x17de   :  { %8242 = vmatpush1.bf16.msra.mxu0 %v12269_v23  ;;  %8283 = vmatpush1.bf16.msra.mxu1 %v12272_v43 }
0x17e1   :  { %8260 = vmatmul.mubr.bf16.vlgmr.msra.gmra.mrb[12].mxu0 %v7791_v33  ;;  %8301 = vmatmul.mubr.bf16.vlgmr.msra.gmra.mrb[12].mxu1 %v7791_v33 }
0x1894   :  { %v8019_v42 = vpop.f32.mrb[8].mxu0  ;;  %v8060_v14 = vpop.f32.mrb[8].mxu1 }
0x1895   :  { %v8021_v20 = vpop.f32.mrb[9].mxu0  ;;  %v8062_v16 = vpop.f32.mrb[9].mxu1 }
0x1896   :  { %v8023_v0 = vpop.f32.mrb[10].mxu0  ;;  %v8064_v40 = vpop.f32.mrb[10].mxu1 }
0x1897   :  { %v8024_v21 = vpop.f32.mrb[11].mxu0  ;;  %v8065_v13 = vpop.f32.mrb[11].mxu1 }
0x1898   :  { %v12959_v13 = vmov %v16173_v34   ;;  %v10456_v34 = vcombine.low (!%p8340_p9), %v16208_v63, %v16213_v6 }
0x18b4   :  { %v8261_v57 = vpop.f32.mrb[12].mxu0  ;;  %v8302_v27 = vpop.f32.mrb[12].mxu1 }
0x18b5   :  { %v8262_v22 = vadd.f32 %v8261_v57, %v8019_v42  ;;  %v8303_v1 = vadd.f32 %v8302_v27, %v8060_v14  ;;  %v8263_v24 = vpop.f32.mrb[13].mxu0  ;;  %v8304_v58 = vpop.f32.mrb[13].mxu1  ;;  %v12989_v57 = vmov (!%p8340_p9), 0.0   ;;  %v10454_v27 = vcombine.low (!%p8340_p9), %v16188_v41, %v16193_v18 }
0x18b6   :  { %v8264_v49 = vadd.f32 %v8263_v24, %v8021_v20  ;;  %v8305_v51 = vadd.f32 %v8304_v58, %v8062_v16  ;;  %v8265_v3 = vpop.f32.mrb[14].mxu0  ;;  %v8306_v61 = vpop.f32.mrb[14].mxu1  ;;  %10783 = vmatprep.subr.bf16.mxu0 (!%p8340_p9), %v12989_v57  ;;  %10799 = vmatprep.mubr.msk.bf16.mxu0 (!%p8340_p9), %vm12990_vm3, %v12989_v57  ;;  %v10459_v41 = vcombine.low (!%p8340_p9), %v16238_v9, %v16243_v48 }
0x18b7   :  { %v8309_v59 = vadd.f32 %v8262_v22, %v15945_v28  ;;  %v8266_v36 = vpop.f32.mrb[15].mxu0  ;;  %v8307_v12 = vpop.f32.mrb[15].mxu1  ;;  %v8311_v30 = vadd.f32 %v8303_v1, %v15953_v11  ;;  %v10455_v22 = vcombine.low (!%p8340_p9), %v16198_v15, %v16203_v5  ;;  %v10460_v18 = vcombine.low (!%p8340_p9), %v16248_v10, %v16253_v53 }
0x18b8   :  { %v8310_v8 = vadd.f32 %v8264_v49, %v15948_v29  ;;  %v8312_v31 = vadd.f32 %v8305_v51, %v15956_v26 }
0x18b9   :  { %v10448_v39 = vmul.f32 -1.442695, %v8309_v59  ;;  %v10450_v47 = vmul.f32 -1.442695, %v8311_v30 }
0x18ba   :  { %v10449_v35 = vmul.f32 -1.442695, %v8310_v8 }
0x18bb   :  { %12291 = vpow2.f32 %v10448_v39 }
0x18bc   :  { %12293 = vpow2.f32 %v10449_v35 }
0x18bd   :  { %12295 = vtanh.f32 %v8312_v31 }
0x18be   :  { %12297 = vpow2.f32 %v10450_v47 }
0x18c5   :  { %v12292_v46 = vpop.eup %12291 }
0x18c6   :  { %v8322_v50 = vadd.f32 1.0, %v12292_v46  ;;  %v12294_v38 = vpop.eup %12293 }
0x18c7   :  { %v8323_v37 = vadd.f32 1.0, %v12294_v38  ;;  %v12296_v4 = vpop.eup %12295 }
0x18c8   :  { %12299 = vrcp.f32 %v8322_v50  ;;  %v12298_v23 = vpop.eup %12297 }
0x18c9   :  { %12301 = vrcp.f32 %v8323_v37  ;;  %v8324_v14 = vadd.f32 1.0, %v12298_v23 }
0x18cb   :  { %12303 = vrcp.f32 %v8324_v14 }
0x18d2   :  { %v12300_v43 = vpop.eup %12299 }
0x18d3   :  { %v8333_v33 = vmul.f32 %v12300_v43, %v12296_v4  ;;  %v12302_v42 = vpop.eup %12301 }
0x18d4   :  { %v8332_v20 = vmul.f32 %v12302_v42, %v16111_v55  ;;  %v10453_v55 = vcombine.low (!%p8340_p9), %v16178_v52, %v16183_v56  ;;  %v10457_v52 = vcombine.low (!%p8340_p9), %v16218_v60, %v16223_v44  ;;  %v10458_v56 = vcombine.low (!%p8340_p9), %v16228_v17, %v16233_v2 }
0x18d5   :  { %v12304_v0 = vpop.eup %12303 }
0x18d6   :  { %v16260_v16 = vadd.f32 %v8333_v33, %v8332_v20  ;;  %10784 = vmatpush3.bf16.msra.mxu0 (!%p8340_p9), %v10453_v55 }
0x18d7   :  { %10785 = vmatprep.subr.bf16.mxu0 (!%p8340_p9), %v12989_v57 }
0x18d8   :  { %12305 = vtanh.f32 %v16260_v16 }
0x18da   :  { %10786 = vmatpush3.bf16.msra.mxu0 (!%p8340_p9), %v10454_v27 }
0x18db   :  { %10787 = vmatprep.subr.bf16.mxu0 (!%p8340_p9), %v12989_v57 }
0x18de   :  { %10788 = vmatpush3.bf16.msra.mxu0 (!%p8340_p9), %v10455_v22 }
0x18df   :  { %8364 = sbr.rel (%p8340_p9) target bundleno = 6604 (0x19cc), region = 189  ;;  %10789 = vmatprep.subr.bf16.mxu0 (!%p8340_p9), %v12989_v57 }
0x18e2   :  { %v12306_v40 = vpop.eup %12305  ;;  %10790 = vmatpush3.bf16.msra.mxu0 (!%p8340_p9), %v10456_v34 }
0x18e3   :  { %v16263_v21 = vmul.f32 %v12306_v40, %v12304_v0  ;;  %10791 = vmatprep.subr.bf16.mxu0 (!%p8340_p9), %v12989_v57 }
0x18e5   :  { %10451 = vst [vmem:[%s16390_s24 + $0x10] sm:$0xff] %v16263_v21  ;;  %v8365_v15 = vpack.c.bf16 (!%p8340_p9), %v16263_v21, %v16263_v21 }
0x18e6   :  { %10792 = vmatpush3.bf16.msra.mxu0 %v10457_v52 }
0x18e7   :  { %10793 = vmatprep.subr.bf16.mxu0 %v12989_v57 }
0x18ea   :  { %10794 = vmatpush3.bf16.msra.mxu0 %v10458_v56 }
0x18eb   :  { %10795 = vmatprep.subr.bf16.mxu0 %v12989_v57 }
0x18ee   :  { %10796 = vmatpush3.bf16.msra.mxu0 %v10459_v41 }
0x18ef   :  { %10797 = vmatprep.subr.bf16.mxu0 %v12989_v57 }
0x18f2   :  { %10798 = vmatpush3.bf16.msra.mxu0 %v10460_v18 }
0x18f5   :  { %10800 = vmatmul.mubr.bf16.vlgmr.msra.gmra.mrb[0].mxu0 %v8365_v15 }
0x19c8   :  { %v8448_v5 = vpop.f32.mrb[0].mxu0 }
0x19c9   :  { %v8449_v63 = vadd.f32 %v15820_v45, %v8448_v5  ;;  %v10801_v6 = vpop.f32.mrb[1].mxu0 }
0x19ca   :  { %v8451_v60 = vpop.f32.mrb[2].mxu0 }
0x19cb   :  { %v8454_v13 = vmax.f32 %v8449_v63, 0.0   ;;  %v10802_v44 = vpop.f32.mrb[3].mxu0 }
0x19cc PF:  { %v12307_v17 = vld [vmem:[#allocation20 + $0x4] ss:$16 sps:$4 sm:$0xff]   ;;  %v17126_v2 = vmov 0   ;;  %v12309_v9 = vld [vmem:[#allocation20 + $0xc] ss:$16 sps:$4 sm:$0xff]   ;;  %v8520_v40 = vpack.c.bf16 %v12961_v13, %v12961_v13  ;;  %s17128_s8 = sld [smem:[#allocation129_spill]]  ;;  %v12961_v13 = vphi %v12959_v13, %v8454_v13  }
0x19cd   :  { %8713 = vmatprep.mubr.bf16.mxu0 %v17126_v2  ;;  %8754 = vmatprep.mubr.bf16.mxu1 %v17126_v2  ;;  %v12311_v48 = vld [vmem:[#allocation20] ss:$16 sps:$4 sm:$0xff]   ;;  %v12312_v10 = vld [vmem:[#allocation20 + $0x8] ss:$16 sps:$4 sm:$0xff]   ;;  %v12313_v45 = vld [vmem:[#allocation20 + $0x24] ss:$16 sps:$4 sm:$0xff]  }
0x19ce   :  { %8681 = vmatprep.subr.bf16.mxu0 %v12307_v17  ;;  %8722 = vmatprep.subr.bf16.mxu1 %v12309_v9  ;;  %v12315_v53 = vld [vmem:[#allocation20 + $0x2c] ss:$16 sps:$4 sm:$0xff]   ;;  %v12317_v1 = vld [vmem:[#allocation20 + $0x20] ss:$16 sps:$4 sm:$0xff]   ;;  %v12318_v24 = vld [vmem:[#allocation20 + $0x28] ss:$16 sps:$4 sm:$0xff]  }
0x19cf   :  { %8682 = vmatpush1.bf16.msra.mxu0 %v12311_v48  ;;  %8723 = vmatpush1.bf16.msra.mxu1 %v12312_v10  ;;  %v12319_v58 = vld [vmem:[#allocation20 + $0x44] ss:$16 sps:$4 sm:$0xff]   ;;  %v12321_v49 = vld [vmem:[#allocation20 + $0x4c] ss:$16 sps:$4 sm:$0xff]   ;;  %v12323_v51 = vld [vmem:[#allocation20 + $0x40] ss:$16 sps:$4 sm:$0xff]  }
0x19d0   :  { %8683 = vmatprep.subr.bf16.mxu0 %v12313_v45  ;;  %8724 = vmatprep.subr.bf16.mxu1 %v12315_v53  ;;  %v12324_v3 = vld [vmem:[#allocation20 + $0x48] ss:$16 sps:$4 sm:$0xff]   ;;  %v12325_v61 = vld [vmem:[#allocation20 + $0x64] ss:$16 sps:$4 sm:$0xff]   ;;  %v12327_v59 = vld [vmem:[#allocation20 + $0x6c] ss:$16 sps:$4 sm:$0xff]  }
0x19d1   :  { %v12329_v36 = vld [vmem:[#allocation20 + $0x60] ss:$16 sps:$4 sm:$0xff]   ;;  %v12330_v12 = vld [vmem:[#allocation20 + $0x68] ss:$16 sps:$4 sm:$0xff]   ;;  %v12331_v8 = vld [vmem:[#allocation20 + $0x84] ss:$16 sps:$4 sm:$0xff]  }
0x19d2   :  { %v12333_v39 = vld [vmem:[#allocation20 + $0x8c] ss:$16 sps:$4 sm:$0xff]   ;;  %v12335_v35 = vld [vmem:[#allocation20 + $0x80] ss:$16 sps:$4 sm:$0xff]   ;;  %v12336_v30 = vld [vmem:[#allocation20 + $0x88] ss:$16 sps:$4 sm:$0xff]  }
0x19d3   :  { %8684 = vmatpush1.bf16.msra.mxu0 %v12317_v1  ;;  %8725 = vmatpush1.bf16.msra.mxu1 %v12318_v24  ;;  %v12337_v31 = vld [vmem:[#allocation20 + $0xa4] ss:$16 sps:$4 sm:$0xff]   ;;  %v12339_v47 = vld [vmem:[#allocation20 + $0xac] ss:$16 sps:$4 sm:$0xff]   ;;  %v12341_v46 = vld [vmem:[#allocation20 + $0xa0] ss:$16 sps:$4 sm:$0xff]  }
0x19d4   :  { %8685 = vmatprep.subr.bf16.mxu0 %v12319_v58  ;;  %8726 = vmatprep.subr.bf16.mxu1 %v12321_v49  ;;  %v12342_v50 = vld [vmem:[#allocation20 + $0xa8] ss:$16 sps:$4 sm:$0xff]   ;;  %v12343_v38 = vld [vmem:[#allocation20 + $0xc4] ss:$16 sps:$4 sm:$0xff]   ;;  %v12345_v37 = vld [vmem:[#allocation20 + $0xcc] ss:$16 sps:$4 sm:$0xff]  }
0x19d5   :  { %v12347_v4 = vld [vmem:[#allocation20 + $0xc0] ss:$16 sps:$4 sm:$0xff]   ;;  %v12348_v23 = vld [vmem:[#allocation20 + $0xc8] ss:$16 sps:$4 sm:$0xff]   ;;  %v12349_v43 = vld [vmem:[#allocation20 + $0xe4] ss:$16 sps:$4 sm:$0xff]  }
0x19d6   :  { %v12351_v33 = vld [vmem:[#allocation20 + $0xec] ss:$16 sps:$4 sm:$0xff]   ;;  %v12353_v42 = vld [vmem:[#allocation20 + $0xe0] ss:$16 sps:$4 sm:$0xff]   ;;  %v12354_v14 = vld [vmem:[#allocation20 + $0xe8] ss:$16 sps:$4 sm:$0xff]  }
0x19d7   :  { %8686 = vmatpush1.bf16.msra.mxu0 %v12323_v51  ;;  %8727 = vmatpush1.bf16.msra.mxu1 %v12324_v3  ;;  %v12357_v20 = vld [vmem:[#allocation22 + $0x4] ss:$16 sps:$4 sm:$0xff]   ;;  %v12360_v0 = vld [vmem:[#allocation22 + $0xc] ss:$16 sps:$4 sm:$0xff]   ;;  %v12355_v55 = vld [vmem:[#allocation22] ss:$16 sps:$4 sm:$0xff]  }
0x19d8   :  { %8687 = vmatprep.subr.bf16.mxu0 %v12325_v61  ;;  %8728 = vmatprep.subr.bf16.mxu1 %v12327_v59  ;;  %v12358_v57 = vld [vmem:[#allocation22 + $0x8] ss:$16 sps:$4 sm:$0xff]   ;;  %v12363_v27 = vld [vmem:[#allocation22 + $0x24] ss:$16 sps:$4 sm:$0xff]   ;;  %v12366_v22 = vld [vmem:[#allocation22 + $0x2c] ss:$16 sps:$4 sm:$0xff]  }
0x19d9   :  { %v12361_v34 = vld [vmem:[#allocation22 + $0x20] ss:$16 sps:$4 sm:$0xff]   ;;  %v12364_v52 = vld [vmem:[#allocation22 + $0x28] ss:$16 sps:$4 sm:$0xff]   ;;  %v12369_v56 = vld [vmem:[#allocation22 + $0x44] ss:$16 sps:$4 sm:$0xff]  }
0x19da   :  { %v12372_v41 = vld [vmem:[#allocation22 + $0x4c] ss:$16 sps:$4 sm:$0xff]   ;;  %v12367_v13 = vld [vmem:[#allocation22 + $0x40] ss:$16 sps:$4 sm:$0xff]   ;;  %v12370_v18 = vld [vmem:[#allocation22 + $0x48] ss:$16 sps:$4 sm:$0xff]  }
0x19db   :  { %8688 = vmatpush1.bf16.msra.mxu0 %v12329_v36  ;;  %8729 = vmatpush1.bf16.msra.mxu1 %v12330_v12  ;;  %v12375_v15 = vld [vmem:[#allocation22 + $0x64] ss:$16 sps:$4 sm:$0xff]   ;;  %v12378_v5 = vld [vmem:[#allocation22 + $0x6c] ss:$16 sps:$4 sm:$0xff]   ;;  %v12373_v63 = vld [vmem:[#allocation22 + $0x60] ss:$16 sps:$4 sm:$0xff]  }
0x19dc   :  { %8689 = vmatprep.subr.bf16.mxu0 %v12331_v8  ;;  %8730 = vmatprep.subr.bf16.mxu1 %v12333_v39  ;;  %v12376_v6 = vld [vmem:[#allocation22 + $0x68] ss:$16 sps:$4 sm:$0xff]   ;;  %v12381_v60 = vld [vmem:[#allocation22 + $0x84] ss:$16 sps:$4 sm:$0xff]   ;;  %v12384_v44 = vld [vmem:[#allocation22 + $0x8c] ss:$16 sps:$4 sm:$0xff]  }
0x19dd   :  { %v12379_v17 = vld [vmem:[#allocation22 + $0x80] ss:$16 sps:$4 sm:$0xff]   ;;  %v12382_v9 = vld [vmem:[#allocation22 + $0x88] ss:$16 sps:$4 sm:$0xff]   ;;  %v12387_v48 = vld [vmem:[#allocation22 + $0xa4] ss:$16 sps:$4 sm:$0xff]  }
0x19de   :  { %v12390_v10 = vld [vmem:[#allocation22 + $0xac] ss:$16 sps:$4 sm:$0xff]   ;;  %v12385_v45 = vld [vmem:[#allocation22 + $0xa0] ss:$16 sps:$4 sm:$0xff]   ;;  %v12388_v53 = vld [vmem:[#allocation22 + $0xa8] ss:$16 sps:$4 sm:$0xff]  }
0x19df   :  { %8690 = vmatpush1.bf16.msra.mxu0 %v12335_v35  ;;  %8731 = vmatpush1.bf16.msra.mxu1 %v12336_v30  ;;  %v12393_v1 = vld [vmem:[#allocation22 + $0xc4] ss:$16 sps:$4 sm:$0xff]   ;;  %v12396_v24 = vld [vmem:[#allocation22 + $0xcc] ss:$16 sps:$4 sm:$0xff]   ;;  %v12391_v58 = vld [vmem:[#allocation22 + $0xc0] ss:$16 sps:$4 sm:$0xff]  }
0x19e0   :  { %8691 = vmatprep.subr.bf16.mxu0 %v12337_v31  ;;  %8732 = vmatprep.subr.bf16.mxu1 %v12339_v47  ;;  %v12394_v49 = vld [vmem:[#allocation22 + $0xc8] ss:$16 sps:$4 sm:$0xff]   ;;  %v12399_v51 = vld [vmem:[#allocation22 + $0xe4] ss:$16 sps:$4 sm:$0xff]   ;;  %v12402_v3 = vld [vmem:[#allocation22 + $0xec] ss:$16 sps:$4 sm:$0xff]  }
0x19e1   :  { %v12397_v61 = vld [vmem:[#allocation22 + $0xe0] ss:$16 sps:$4 sm:$0xff]   ;;  %v12400_v59 = vld [vmem:[#allocation22 + $0xe8] ss:$16 sps:$4 sm:$0xff]   ;;  %v12403_v8 = vld [vmem:[#allocation25] ss:$16 sps:$4 sm:$0xff]  }
0x19e2   :  { %v12405_v36 = vld [vmem:[#allocation25 + $0x4] ss:$16 sps:$4 sm:$0xff]   ;;  %v12408_v12 = vld [vmem:[#allocation25 + $0xc] ss:$16 sps:$4 sm:$0xff]   ;;  %v12406_v39 = vld [vmem:[#allocation25 + $0x8] ss:$16 sps:$4 sm:$0xff]  }
0x19e3   :  { %8692 = vmatpush1.bf16.msra.mxu0 %v12341_v46  ;;  %8733 = vmatpush1.bf16.msra.mxu1 %v12342_v50  ;;  %v12411_v35 = vld [vmem:[#allocation25 + $0x24] ss:$16 sps:$4 sm:$0xff]   ;;  %v12414_v30 = vld [vmem:[#allocation25 + $0x2c] ss:$16 sps:$4 sm:$0xff]   ;;  %v12409_v31 = vld [vmem:[#allocation25 + $0x20] ss:$16 sps:$4 sm:$0xff]  }
0x19e4   :  { %8693 = vmatprep.subr.bf16.mxu0 %v12343_v38  ;;  %8734 = vmatprep.subr.bf16.mxu1 %v12345_v37  ;;  %v12412_v47 = vld [vmem:[#allocation25 + $0x28] ss:$16 sps:$4 sm:$0xff]   ;;  %v12420_v46 = vld [vmem:[#allocation25 + $0x4c] ss:$16 sps:$4 sm:$0xff]   ;;  %v12415_v50 = vld [vmem:[#allocation25 + $0x40] ss:$16 sps:$4 sm:$0xff]  }
0x19e5   :  { %v12418_v38 = vld [vmem:[#allocation25 + $0x48] ss:$16 sps:$4 sm:$0xff]   ;;  %v12423_v37 = vld [vmem:[#allocation25 + $0x64] ss:$16 sps:$4 sm:$0xff]  }
0x19e7   :  { %8694 = vmatpush1.bf16.msra.mxu0 %v12347_v4  ;;  %8735 = vmatpush1.bf16.msra.mxu1 %v12348_v23  ;;  %v12426_v4 = vld [vmem:[#allocation25 + $0x6c] ss:$16 sps:$4 sm:$0xff]   ;;  %v12421_v23 = vld [vmem:[#allocation25 + $0x60] ss:$16 sps:$4 sm:$0xff]  }
0x19e8   :  { %8695 = vmatprep.subr.bf16.mxu0 %v12349_v43  ;;  %8736 = vmatprep.subr.bf16.mxu1 %v12351_v33  ;;  %v12424_v43 = vld [vmem:[#allocation25 + $0x68] ss:$16 sps:$4 sm:$0xff]   ;;  %v12429_v33 = vld [vmem:[#allocation25 + $0x84] ss:$16 sps:$4 sm:$0xff]  }
0x19eb   :  { %8696 = vmatpush1.bf16.msra.mxu0 %v12353_v42  ;;  %8737 = vmatpush1.bf16.msra.mxu1 %v12354_v14  ;;  %v12432_v42 = vld [vmem:[#allocation25 + $0x8c] ss:$16 sps:$4 sm:$0xff]   ;;  %v12427_v14 = vld [vmem:[#allocation25 + $0x80] ss:$16 sps:$4 sm:$0xff]  }
0x19ec   :  { %8923 = vmatprep.subr.bf16.mxu0 %v12357_v20  ;;  %8964 = vmatprep.subr.bf16.mxu1 %v12360_v0  ;;  %v12430_v20 = vld [vmem:[#allocation25 + $0x88] ss:$16 sps:$4 sm:$0xff]   ;;  %v12433_v0 = vld [vmem:[#allocation25 + $0xa0] ss:$16 sps:$4 sm:$0xff]  }
0x19ee   :  { %8714 = vmatmul.mubr.bf16.vlgmr.msra.gmra.mrb[0].mxu0 %v8520_v40  ;;  %8755 = vmatmul.mubr.bf16.vlgmr.msra.gmra.mrb[0].mxu1 %v8520_v40  ;;  %v12435_v40 = vld [vmem:[#allocation25 + $0xa4] ss:$16 sps:$4 sm:$0xff]  }
0x19ef   :  { %8924 = vmatpush1.bf16.msra.mxu0 %v12355_v55  ;;  %8965 = vmatpush1.bf16.msra.mxu1 %v12358_v57  ;;  %v12436_v55 = vld [vmem:[#allocation25 + $0xa8] ss:$16 sps:$4 sm:$0xff]   ;;  %v12438_v57 = vld [vmem:[#allocation25 + $0xac] ss:$16 sps:$4 sm:$0xff]  }
0x19f0   :  { %8925 = vmatprep.subr.bf16.mxu0 %v12363_v27  ;;  %8966 = vmatprep.subr.bf16.mxu1 %v12366_v22  ;;  %v12441_v27 = vld [vmem:[#allocation25 + $0xc4] ss:$16 sps:$4 sm:$0xff]   ;;  %v12444_v22 = vld [vmem:[#allocation25 + $0xcc] ss:$16 sps:$4 sm:$0xff]  }
0x19f1   :  { %8955 = vmatprep.mubr.bf16.mxu0 %v17126_v2  ;;  %8996 = vmatprep.mubr.bf16.mxu1 %v17126_v2 }
0x19f3   :  { %8926 = vmatpush1.bf16.msra.mxu0 %v12361_v34  ;;  %8967 = vmatpush1.bf16.msra.mxu1 %v12364_v52  ;;  %v12439_v34 = vld [vmem:[#allocation25 + $0xc0] ss:$16 sps:$4 sm:$0xff]   ;;  %v12442_v52 = vld [vmem:[#allocation25 + $0xc8] ss:$16 sps:$4 sm:$0xff]  }
0x19f4   :  { %8927 = vmatprep.subr.bf16.mxu0 %v12369_v56  ;;  %8968 = vmatprep.subr.bf16.mxu1 %v12372_v41  ;;  %v12447_v56 = vld [vmem:[#allocation25 + $0xe4] ss:$16 sps:$4 sm:$0xff]   ;;  %v12450_v41 = vld [vmem:[#allocation25 + $0xec] ss:$16 sps:$4 sm:$0xff]  }
0x19f7   :  { %8928 = vmatpush1.bf16.msra.mxu0 %v12367_v13  ;;  %8969 = vmatpush1.bf16.msra.mxu1 %v12370_v18  ;;  %v12445_v13 = vld [vmem:[#allocation25 + $0xe0] ss:$16 sps:$4 sm:$0xff]   ;;  %v12448_v18 = vld [vmem:[#allocation25 + $0xe8] ss:$16 sps:$4 sm:$0xff]  }
0x19f8   :  { %8929 = vmatprep.subr.bf16.mxu0 %v12375_v15  ;;  %8970 = vmatprep.subr.bf16.mxu1 %v12378_v5  ;;  %v12453_v15 = vld [vmem:[#allocation26 + $0x4] ss:$16 sps:$4 sm:$0xff]   ;;  %v12456_v5 = vld [vmem:[#allocation26 + $0xc] ss:$16 sps:$4 sm:$0xff]  }
0x19fb   :  { %8930 = vmatpush1.bf16.msra.mxu0 %v12373_v63  ;;  %8971 = vmatpush1.bf16.msra.mxu1 %v12376_v6 }
0x19fc   :  { %8931 = vmatprep.subr.bf16.mxu0 %v12381_v60  ;;  %8972 = vmatprep.subr.bf16.mxu1 %v12384_v44 }
0x19ff   :  { %8932 = vmatpush1.bf16.msra.mxu0 %v12379_v17  ;;  %8973 = vmatpush1.bf16.msra.mxu1 %v12382_v9 }
0x1a00   :  { %8933 = vmatprep.subr.bf16.mxu0 %v12387_v48  ;;  %8974 = vmatprep.subr.bf16.mxu1 %v12390_v10 }
0x1a03   :  { %8934 = vmatpush1.bf16.msra.mxu0 %v12385_v45  ;;  %8975 = vmatpush1.bf16.msra.mxu1 %v12388_v53 }
0x1a04   :  { %8935 = vmatprep.subr.bf16.mxu0 %v12393_v1  ;;  %8976 = vmatprep.subr.bf16.mxu1 %v12396_v24 }
0x1a07   :  { %8936 = vmatpush1.bf16.msra.mxu0 %v12391_v58  ;;  %8977 = vmatpush1.bf16.msra.mxu1 %v12394_v49 }
0x1a08   :  { %8937 = vmatprep.subr.bf16.mxu0 %v12399_v51  ;;  %8978 = vmatprep.subr.bf16.mxu1 %v12402_v3 }
0x1a0b   :  { %8938 = vmatpush1.bf16.msra.mxu0 %v12397_v61  ;;  %8979 = vmatpush1.bf16.msra.mxu1 %v12400_v59 }
0x1a0c   :  { %9259 = vmatprep.subr.bf16.mxu0 %v12405_v36  ;;  %9300 = vmatprep.subr.bf16.mxu1 %v12408_v12 }
0x1a0e   :  { %8956 = vmatmul.mubr.bf16.vlgmr.msra.gmra.mrb[4].mxu0 %v16162_v25  ;;  %8997 = vmatmul.mubr.bf16.vlgmr.msra.gmra.mrb[4].mxu1 %v16162_v25  ;;  %v12417_v25 = vld [vmem:[#allocation25 + $0x44] ss:$16 sps:$4 sm:$0xff]  }
0x1a0f   :  { %9291 = vmatprep.mubr.bf16.mxu0 %v17126_v2  ;;  %9332 = vmatprep.mubr.bf16.mxu1 %v17126_v2 }
0x1a10   :  { %9260 = vmatpush1.bf16.msra.mxu0 %v12403_v8  ;;  %9301 = vmatpush1.bf16.msra.mxu1 %v12406_v39 }
0x1a11   :  { %9261 = vmatprep.subr.bf16.mxu0 %v12411_v35  ;;  %9302 = vmatprep.subr.bf16.mxu1 %v12414_v30 }
0x1a14   :  { %9262 = vmatpush1.bf16.msra.mxu0 %v12409_v31  ;;  %9303 = vmatpush1.bf16.msra.mxu1 %v12412_v47 }
0x1a15   :  { %9263 = vmatprep.subr.bf16.mxu0 %v12417_v25  ;;  %9304 = vmatprep.subr.bf16.mxu1 %v12420_v46 }
0x1a18   :  { %9264 = vmatpush1.bf16.msra.mxu0 %v12415_v50  ;;  %9305 = vmatpush1.bf16.msra.mxu1 %v12418_v38 }
0x1a19   :  { %9265 = vmatprep.subr.bf16.mxu0 %v12423_v37  ;;  %9306 = vmatprep.subr.bf16.mxu1 %v12426_v4 }
0x1a1c   :  { %9266 = vmatpush1.bf16.msra.mxu0 %v12421_v23  ;;  %9307 = vmatpush1.bf16.msra.mxu1 %v12424_v43 }
0x1a1d   :  { %9267 = vmatprep.subr.bf16.mxu0 %v12429_v33  ;;  %9308 = vmatprep.subr.bf16.mxu1 %v12432_v42 }
0x1a20   :  { %9268 = vmatpush1.bf16.msra.mxu0 %v12427_v14  ;;  %9309 = vmatpush1.bf16.msra.mxu1 %v12430_v20 }
0x1a21   :  { %9269 = vmatprep.subr.bf16.mxu0 %v12435_v40  ;;  %9310 = vmatprep.subr.bf16.mxu1 %v12438_v57  ;;  %v12454_v40 = vld [vmem:[#allocation26 + $0x8] ss:$16 sps:$4 sm:$0xff]   ;;  %v12459_v57 = vld [vmem:[#allocation26 + $0x24] ss:$16 sps:$4 sm:$0xff]  }
0x1a24   :  { %9270 = vmatpush1.bf16.msra.mxu0 %v12433_v0  ;;  %9311 = vmatpush1.bf16.msra.mxu1 %v12436_v55  ;;  %v12451_v0 = vld [vmem:[#allocation26] ss:$16 sps:$4 sm:$0xff]  }
0x1a25   :  { %9271 = vmatprep.subr.bf16.mxu0 %v12441_v27  ;;  %9312 = vmatprep.subr.bf16.mxu1 %v12444_v22  ;;  %v12462_v27 = vld [vmem:[#allocation26 + $0x2c] ss:$16 sps:$4 sm:$0xff]   ;;  %v12457_v22 = vld [vmem:[#allocation26 + $0x20] ss:$16 sps:$4 sm:$0xff]  }
0x1a28   :  { %9272 = vmatpush1.bf16.msra.mxu0 %v12439_v34  ;;  %9313 = vmatpush1.bf16.msra.mxu1 %v12442_v52  ;;  %v12460_v34 = vld [vmem:[#allocation26 + $0x28] ss:$16 sps:$4 sm:$0xff]   ;;  %v12468_v52 = vld [vmem:[#allocation26 + $0x4c] ss:$16 sps:$4 sm:$0xff]  }
0x1a29   :  { %9273 = vmatprep.subr.bf16.mxu0 %v12447_v56  ;;  %9314 = vmatprep.subr.bf16.mxu1 %v12450_v41  ;;  %v12463_v56 = vld [vmem:[#allocation26 + $0x40] ss:$16 sps:$4 sm:$0xff]   ;;  %v12466_v41 = vld [vmem:[#allocation26 + $0x48] ss:$16 sps:$4 sm:$0xff]  }
0x1a2c   :  { %9274 = vmatpush1.bf16.msra.mxu0 %v12445_v13  ;;  %9315 = vmatpush1.bf16.msra.mxu1 %v12448_v18  ;;  %v12471_v13 = vld [vmem:[#allocation26 + $0x64] ss:$16 sps:$4 sm:$0xff]   ;;  %v12474_v18 = vld [vmem:[#allocation26 + $0x6c] ss:$16 sps:$4 sm:$0xff]  }
0x1a2d   :  { %9501 = vmatprep.subr.bf16.mxu0 %v12453_v15  ;;  %9542 = vmatprep.subr.bf16.mxu1 %v12456_v5  ;;  %v12469_v15 = vld [vmem:[#allocation26 + $0x60] ss:$16 sps:$4 sm:$0xff]   ;;  %v12472_v5 = vld [vmem:[#allocation26 + $0x68] ss:$16 sps:$4 sm:$0xff]  }
0x1ac1   :  { %v8715_v63 = vpop.f32.mrb[0].mxu0  ;;  %v8756_v6 = vpop.f32.mrb[0].mxu1 }
0x1ac2   :  { %v8717_v60 = vpop.f32.mrb[1].mxu0  ;;  %v8758_v44 = vpop.f32.mrb[1].mxu1 }
0x1ac3   :  { %v8719_v17 = vpop.f32.mrb[2].mxu0  ;;  %v8760_v9 = vpop.f32.mrb[2].mxu1 }
0x1ac4   :  { %v8720_v48 = vpop.f32.mrb[3].mxu0  ;;  %v8761_v10 = vpop.f32.mrb[3].mxu1  ;;  %v12486_v17 = vld [vmem:[#allocation26 + $0xac] ss:$16 sps:$4 sm:$0xff]   ;;  %v12481_v9 = vld [vmem:[#allocation26 + $0xa0] ss:$16 sps:$4 sm:$0xff]  }
0x1ac5   :  { %v12484_v48 = vld [vmem:[#allocation26 + $0xa8] ss:$16 sps:$4 sm:$0xff]   ;;  %v12489_v10 = vld [vmem:[#allocation26 + $0xc4] ss:$16 sps:$4 sm:$0xff]  }
0x1ae1   :  { %v8957_v45 = vpop.f32.mrb[4].mxu0  ;;  %v8998_v53 = vpop.f32.mrb[4].mxu1 }
0x1ae2   :  { %v8958_v1 = vadd.f32 %v8957_v45, %v8715_v63  ;;  %v8999_v24 = vadd.f32 %v8998_v53, %v8756_v6  ;;  %v8959_v58 = vpop.f32.mrb[5].mxu0  ;;  %v9000_v49 = vpop.f32.mrb[5].mxu1  ;;  %v12477_v63 = vld [vmem:[#allocation26 + $0x84] ss:$16 sps:$4 sm:$0xff]   ;;  %v12480_v6 = vld [vmem:[#allocation26 + $0x8c] ss:$16 sps:$4 sm:$0xff]  }
0x1ae3   :  { %v8960_v51 = vadd.f32 %v8959_v58, %v8717_v60  ;;  %v9001_v3 = vadd.f32 %v9000_v49, %v8758_v44  ;;  %v8961_v61 = vpop.f32.mrb[6].mxu0  ;;  %v9002_v59 = vpop.f32.mrb[6].mxu1  ;;  %v12475_v60 = vld [vmem:[#allocation26 + $0x80] ss:$16 sps:$4 sm:$0xff]   ;;  %v12483_v44 = vld [vmem:[#allocation26 + $0xa4] ss:$16 sps:$4 sm:$0xff]  }
0x1ae4   :  { %v9005_v36 = vadd.f32 %v8958_v1, %v15833_v62  ;;  %v8962_v12 = vpop.f32.mrb[7].mxu0  ;;  %v9003_v8 = vpop.f32.mrb[7].mxu1  ;;  %v9007_v31 = vadd.f32 %v8999_v24, %v15841_v19  ;;  %v12492_v45 = vld [vmem:[#allocation26 + $0xcc] ss:$16 sps:$4 sm:$0xff]   ;;  %v12487_v53 = vld [vmem:[#allocation26 + $0xc0] ss:$16 sps:$4 sm:$0xff]  }
0x1ae5   :  { %v9006_v39 = vadd.f32 %v8960_v51, %v15836_v32  ;;  %v9008_v47 = vadd.f32 %v9001_v3, %v15844_v54  ;;  %v12490_v1 = vld [vmem:[#allocation26 + $0xc8] ss:$16 sps:$4 sm:$0xff]   ;;  %v12495_v24 = vld [vmem:[#allocation26 + $0xe4] ss:$16 sps:$4 sm:$0xff]   ;;  %v12498_v58 = vld [vmem:[#allocation26 + $0xec] ss:$16 sps:$4 sm:$0xff]   ;;  %v9065_v3 = vpack.c.bf16 %v16263_v21, %v16263_v21 }
0x1ae6   :  { %v10525_v35 = vmul.f32 -1.442695, %v9005_v36  ;;  %v10527_v25 = vmul.f32 -1.442695, %v9007_v31  ;;  %v12493_v49 = vld [vmem:[#allocation26 + $0xe0] ss:$16 sps:$4 sm:$0xff]  }
0x1ae7   :  { %v10526_v30 = vmul.f32 -1.442695, %v9006_v39  ;;  %v12496_v51 = vld [vmem:[#allocation26 + $0xe8] ss:$16 sps:$4 sm:$0xff]  }
0x1ae8   :  { %12507 = vpow2.f32 %v10525_v35  ;;  %v12499_v61 = vld [vmem:[%s16388_s22] sm:$0xff]   ;;  %v12500_v59 = vld [vmem:[%s16388_s22 + $0x8] sm:$0xff]   ;;  %v12501_v21 = vld [vmem:[%s16388_s22 + $0x10] sm:$0xff]  }
0x1ae9   :  { %12509 = vpow2.f32 %v10526_v30  ;;  %v12502_v36 = vld [vmem:[%s16388_s22 + $0x18] sm:$0xff]   ;;  %v12503_v12 = vld [vmem:[%s16388_s22 + $0x20] sm:$0xff]   ;;  %v12504_v8 = vld [vmem:[%s16388_s22 + $0x28] sm:$0xff]  }
0x1aea   :  { %12511 = vtanh.f32 %v9008_v47  ;;  %v12505_v39 = vld [vmem:[%s16388_s22 + $0x30] sm:$0xff]   ;;  %v12506_v35 = vld [vmem:[%s16388_s22 + $0x38] sm:$0xff]   ;;  %v9613_v30 = vld [vmem:[%s16390_s24] sm:$0xff] }
0x1aeb   :  { %12513 = vpow2.f32 %v10527_v25  ;;  %v9614_v31 = vld [vmem:[%s16390_s24 + $0x8] sm:$0xff] }
0x1aec   :  { %v9633_v47 = vpack.c.bf16 %v9614_v31, %v9613_v30 }
0x1af2   :  { %v12508_v46 = vpop.eup %12507 }
0x1af3   :  { %v9018_v50 = vadd.f32 1.0, %v12508_v46  ;;  %v12510_v38 = vpop.eup %12509 }
0x1af4   :  { %v9019_v62 = vadd.f32 1.0, %v12510_v38  ;;  %v12512_v37 = vpop.eup %12511 }
0x1af5   :  { %12515 = vrcp.f32 %v9018_v50  ;;  %v12514_v4 = vpop.eup %12513 }
0x1af6   :  { %12517 = vrcp.f32 %v9019_v62  ;;  %v9020_v33 = vadd.f32 1.0, %v12514_v4 }
0x1af8   :  { %12519 = vrcp.f32 %v9020_v33 }
0x1aff   :  { %v12516_v32 = vpop.eup %12515 }
0x1b00   :  { %v9029_v23 = vmul.f32 %v12516_v32, %v12512_v37  ;;  %v12518_v43 = vpop.eup %12517 }
0x1b01   :  { %v9028_v42 = vmul.f32 %v12518_v43, %v16159_v7  ;;  %v12465_v7 = vld [vmem:[#allocation26 + $0x44] ss:$16 sps:$4 sm:$0xff]  }
0x1b02   :  { %v12520_v54 = vpop.eup %12519 }
0x1b03   :  { %v9030_v19 = vadd.f32 %v9029_v23, %v9028_v42 }
0x1b05   :  { %12521 = vtanh.f32 %v9030_v19 }
0x1b0f   :  { %v12522_v14 = vpop.eup %12521 }
0x1b10   :  { %v9032_v20 = vmul.f32 %v12522_v14, %v12520_v54 }
0x1b12   :  { %v9098_v55 = vpack.c.bf16 %v9032_v20, %v9032_v20 }
0x1b14   :  { %9292 = vmatmul.mubr.bf16.vlgmr.msra.gmra.mrb[8].mxu0 %v9098_v55  ;;  %9333 = vmatmul.mubr.bf16.vlgmr.msra.gmra.mrb[8].mxu1 %v9098_v55 }
0x1b15   :  { %9502 = vmatpush1.bf16.msra.mxu0 %v12451_v0  ;;  %9543 = vmatpush1.bf16.msra.mxu1 %v12454_v40 }
0x1b16   :  { %9503 = vmatprep.subr.bf16.mxu0 %v12459_v57  ;;  %9544 = vmatprep.subr.bf16.mxu1 %v12462_v27 }
0x1b17   :  { %9533 = vmatprep.mubr.bf16.mxu0 %v17126_v2  ;;  %9574 = vmatprep.mubr.bf16.mxu1 %v17126_v2  ;;  %v12478_v2 = vld [vmem:[#allocation26 + $0x88] ss:$16 sps:$4 sm:$0xff]  }
0x1b19   :  { %9504 = vmatpush1.bf16.msra.mxu0 %v12457_v22  ;;  %9545 = vmatpush1.bf16.msra.mxu1 %v12460_v34 }
0x1b1a   :  { %9505 = vmatprep.subr.bf16.mxu0 %v12465_v7  ;;  %9546 = vmatprep.subr.bf16.mxu1 %v12468_v52 }
0x1b1d   :  { %9506 = vmatpush1.bf16.msra.mxu0 %v12463_v56  ;;  %9547 = vmatpush1.bf16.msra.mxu1 %v12466_v41 }
0x1b1e   :  { %9507 = vmatprep.subr.bf16.mxu0 %v12471_v13  ;;  %9548 = vmatprep.subr.bf16.mxu1 %v12474_v18 }
0x1b21   :  { %9508 = vmatpush1.bf16.msra.mxu0 %v12469_v15  ;;  %9549 = vmatpush1.bf16.msra.mxu1 %v12472_v5 }
0x1b22   :  { %9509 = vmatprep.subr.bf16.mxu0 %v12477_v63  ;;  %9550 = vmatprep.subr.bf16.mxu1 %v12480_v6 }
0x1b25   :  { %9510 = vmatpush1.bf16.msra.mxu0 %v12475_v60  ;;  %9551 = vmatpush1.bf16.msra.mxu1 %v12478_v2 }
0x1b26   :  { %9511 = vmatprep.subr.bf16.mxu0 %v12483_v44  ;;  %9552 = vmatprep.subr.bf16.mxu1 %v12486_v17 }
0x1b29   :  { %9512 = vmatpush1.bf16.msra.mxu0 %v12481_v9  ;;  %9553 = vmatpush1.bf16.msra.mxu1 %v12484_v48  ;;  %v9615_v9 = vld [vmem:[%s16390_s24 + $0x10] sm:$0xff] }
0x1b2a   :  { %9513 = vmatprep.subr.bf16.mxu0 %v12489_v10  ;;  %9554 = vmatprep.subr.bf16.mxu1 %v12492_v45  ;;  %v17127_v45 = vlaneseq }
0x1b2d   :  { %9514 = vmatpush1.bf16.msra.mxu0 %v12487_v53  ;;  %9555 = vmatpush1.bf16.msra.mxu1 %v12490_v1  ;;  %v9740_v53 = vand.u32 127, %v17127_v45  ;;  %v10596_v1 = vld [vmem:[#allocation29] ss:$0 sm:$0xff] }
0x1b2e   :  { %9515 = vmatprep.subr.bf16.mxu0 %v12495_v24  ;;  %9556 = vmatprep.subr.bf16.mxu1 %v12498_v58 }
0x1b2f   :  { %vm9741_vm4 = vcmp.lt.s32.totalorder %v9740_v53, 43 }
0x1b31   :  { %9516 = vmatpush1.bf16.msra.mxu0 %v12493_v49  ;;  %9557 = vmatpush1.bf16.msra.mxu1 %v12496_v51 }
0x1b32   :  { %10803 = vmatprep.subr.bf16.mxu0 %v12499_v61 }
0x1b34   :  { %9534 = vmatmul.mubr.bf16.vlgmr.msra.gmra.mrb[12].mxu0 %v9065_v3  ;;  %9575 = vmatmul.mubr.bf16.vlgmr.msra.gmra.mrb[12].mxu1 %v9065_v3 }
0x1b35   :  { %10804 = vmatpush3.bf16.msra.mxu0 %v12499_v61  ;;  %10819 = vmatprep.mubr.bf16.mxu0 %v9633_v47 }
0x1b36   :  { %10805 = vmatprep.subr.bf16.mxu0 %v12500_v59 }
0x1b39   :  { %10806 = vmatpush3.bf16.msra.mxu0 %v12500_v59 }
0x1b3a   :  { %10807 = vmatprep.subr.bf16.mxu0 %v12501_v21 }
0x1b3d   :  { %10808 = vmatpush3.bf16.msra.mxu0 %v12501_v21 }
0x1b3e   :  { %10809 = vmatprep.subr.bf16.mxu0 %v12502_v36 }
0x1b41   :  { %10810 = vmatpush3.bf16.msra.mxu0 %v12502_v36 }
0x1b42   :  { %10811 = vmatprep.subr.bf16.mxu0 %v12503_v12 }
0x1b45   :  { %10812 = vmatpush3.bf16.msra.mxu0 %v12503_v12 }
0x1b46   :  { %10813 = vmatprep.subr.bf16.mxu0 %v12504_v8 }
0x1b49   :  { %10814 = vmatpush3.bf16.msra.mxu0 %v12504_v8 }
0x1b4a   :  { %10815 = vmatprep.subr.bf16.mxu0 %v12505_v39 }
0x1b4d   :  { %10816 = vmatpush3.bf16.msra.mxu0 %v12505_v39 }
0x1b4e   :  { %10817 = vmatprep.subr.bf16.mxu0 %v12506_v35 }
0x1b51   :  { %10818 = vmatpush3.bf16.msra.mxu0 %v12506_v35 }
0x1be7   :  { %v9293_v25 = vpop.f32.mrb[8].mxu0  ;;  %v9334_v46 = vpop.f32.mrb[8].mxu1 }
0x1be8   :  { %v9295_v50 = vpop.f32.mrb[9].mxu0  ;;  %v9336_v38 = vpop.f32.mrb[9].mxu1 }
0x1be9   :  { %v9297_v62 = vpop.f32.mrb[10].mxu0  ;;  %v9338_v37 = vpop.f32.mrb[10].mxu1 }
0x1bea   :  { %v9298_v4 = vpop.f32.mrb[11].mxu0  ;;  %v9339_v32 = vpop.f32.mrb[11].mxu1 }
0x1c07   :  { %v9535_v23 = vpop.f32.mrb[12].mxu0  ;;  %v9576_v43 = vpop.f32.mrb[12].mxu1 }
0x1c08   :  { %v9536_v33 = vadd.f32 %v9535_v23, %v9293_v25  ;;  %v9577_v42 = vadd.f32 %v9576_v43, %v9334_v46  ;;  %v9537_v19 = vpop.f32.mrb[13].mxu0  ;;  %v9578_v54 = vpop.f32.mrb[13].mxu1 }
0x1c09   :  { %v9538_v14 = vadd.f32 %v9537_v19, %v9295_v50  ;;  %v9579_v20 = vadd.f32 %v9578_v54, %v9336_v38  ;;  %v9539_v0 = vpop.f32.mrb[14].mxu0  ;;  %v9580_v40 = vpop.f32.mrb[14].mxu1 }
0x1c0a   :  { %v9583_v55 = vadd.f32 %v9536_v33, %v15945_v28  ;;  %v9540_v57 = vpop.f32.mrb[15].mxu0  ;;  %v9581_v27 = vpop.f32.mrb[15].mxu1  ;;  %v9585_v52 = vadd.f32 %v9577_v42, %v15953_v11 }
0x1c0b   :  { %v9584_v22 = vadd.f32 %v9538_v14, %v15948_v29  ;;  %v9586_v56 = vadd.f32 %v9579_v20, %v15956_v26 }
0x1c0c   :  { %v10592_v34 = vmul.f32 -1.442695, %v9583_v55  ;;  %v10594_v41 = vmul.f32 -1.442695, %v9585_v52 }
0x1c0d   :  { %v10593_v7 = vmul.f32 -1.442695, %v9584_v22 }
0x1c0e   :  { %12523 = vpow2.f32 %v10592_v34 }
0x1c0f   :  { %12525 = vpow2.f32 %v10593_v7 }
0x1c10   :  { %12527 = vtanh.f32 %v9586_v56 }
0x1c11   :  { %12529 = vpow2.f32 %v10594_v41 }
0x1c18   :  { %v12524_v13 = vpop.eup %12523 }
0x1c19   :  { %v9596_v18 = vadd.f32 1.0, %v12524_v13  ;;  %v12526_v15 = vpop.eup %12525 }
0x1c1a   :  { %v9597_v28 = vadd.f32 1.0, %v12526_v15  ;;  %v12528_v5 = vpop.eup %12527 }
0x1c1b   :  { %12531 = vrcp.f32 %v9596_v18  ;;  %v12530_v63 = vpop.eup %12529 }
0x1c1c   :  { %12533 = vrcp.f32 %v9597_v28  ;;  %v9598_v2 = vadd.f32 1.0, %v12530_v63 }
0x1c1e   :  { %12535 = vrcp.f32 %v9598_v2 }
0x1c25   :  { %v12532_v29 = vpop.eup %12531 }
0x1c26   :  { %v9607_v6 = vmul.f32 %v12532_v29, %v12528_v5  ;;  %v12534_v60 = vpop.eup %12533 }
0x1c27   :  { %v9606_v44 = vmul.f32 %v12534_v60, %v16260_v16 }
0x1c28   :  { %v12536_v26 = vpop.eup %12535 }
0x1c29   :  { %v9608_v11 = vadd.f32 %v9607_v6, %v9606_v44 }
0x1c2b   :  { %12537 = vtanh.f32 %v9608_v11 }
0x1c35   :  { %v12538_v17 = vpop.eup %12537 }
0x1c36   :  { %v9610_v48 = vmul.f32 %v12538_v17, %v12536_v26 }
0x1c38   :  { %10595 = vst [vmem:[%s16390_s24 + $0x18] sm:$0xff] %v9610_v48  ;;  %v9634_v10 = vpack.c.bf16 %v9610_v48, %v9615_v9 }
0x1c3a   :  { %10820 = vmatmul.mubr.bf16.vlgmr.msra.gmra.mrb[16].mxu0 %v9634_v10 }
0x1d0d   :  { %v10821_v16 = vpop.f32.mrb[16].mxu0 }
0x1d0e   :  { %v9733_v24 = vadd.f32 %v10821_v16, %v10596_v1  ;;  %v9724_v58 = vpop.f32.mrb[17].mxu0 }
0x1d0f   :  { %v9725_v49 = vadd.f32 %v10596_v1, %v9724_v58  ;;  %v10822_v51 = vpop.f32.mrb[18].mxu0 }
0x1d10   :  { %v9736_v3 = vadd.f32 %v10822_v51, %v10596_v1  ;;  %v9727_v61 = vpop.f32.mrb[19].mxu0  ;;  %v9744_v59 = vsel %vm9741_vm4, %v9733_v24, -1e+30 }
0x1d11   :  { %v9728_v21 = vadd.f32 %v10596_v1, %v9727_v61  ;;  %9750 = vmax.xlane.f32.xlu1 %v9744_v59  ;;  %v9742_v36 = vsel %vm9741_vm4, %v9725_v49, -1e+30 }
0x1d12   :  { %9746 = vmax.xlane.f32.xlu0 %v9742_v36  ;;  %v9745_v12 = vsel %vm9741_vm4, %v9736_v3, -1e+30 }
0x1d13   :  { %v9743_v8 = vsel %vm9741_vm4, %v9728_v21, -1e+30 }
0x1d15   :  { %9752 = vmax.xlane.f32.xlu1 %v9745_v12 }
0x1d16   :  { %9748 = vmax.xlane.f32.xlu0 %v9743_v8 }
0x1d9e   :  { %v9751_v39 = vpop.xlane.xlu1 %9750 }
0x1d9f   :  { %v9756_v35 = vsub.f32 %v9744_v59, %v9751_v39  ;;  %v9747_v30 = vpop.xlane.xlu0 %9746 }
0x1da0   :  { %v9754_v31 = vsub.f32 %v9742_v36, %v9747_v30 }
0x1da1   :  { %v9762_v46 = vmul.f32 1.442695, %v9756_v35 }
0x1da2   :  { %v9758_v47 = vmul.f32 1.442695, %v9754_v31  ;;  %v9753_v25 = vpop.xlane.xlu1 %9752 }
0x1da3   :  { %v9749_v50 = vpop.xlane.xlu0 %9748  ;;  %v9757_v38 = vsub.f32 %v9745_v12, %v9753_v25 }
0x1da4   :  { %12539 = vpow2.f32 %v9758_v47  ;;  %v9755_v62 = vsub.f32 %v9743_v8, %v9749_v50 }
0x1da5   :  { %12541 = vpow2.f32 %v9762_v46  ;;  %v9764_v4 = vmul.f32 1.442695, %v9757_v38 }
0x1da6   :  { %v9760_v37 = vmul.f32 1.442695, %v9755_v62 }
0x1da8   :  { %12543 = vpow2.f32 %v9760_v37 }
0x1da9   :  { %12545 = vpow2.f32 %v9764_v4 }
0x1dae   :  { %v12540_v32 = vpop.eup %12539 }
0x1daf   :  { %9766 = vadd.xlane.f32.xlu0 %v12540_v32  ;;  %v12542_v23 = vpop.eup %12541 }
0x1db2   :  { %v12544_v43 = vpop.eup %12543 }
0x1db3   :  { %9770 = vadd.xlane.f32.xlu0 %v12542_v23  ;;  %9768 = vadd.xlane.f32.xlu1 %v12544_v43  ;;  %v12546_v33 = vpop.eup %12545 }
0x1db7   :  { %9772 = vadd.xlane.f32.xlu1 %v12546_v33 }
0x1e3c   :  { %v9767_v42 = vpop.xlane.xlu0 %9766 }
0x1e3d   :  { %12547 = vlog2.f32 %v9767_v42 }
0x1e40   :  { %v9769_v19 = vpop.xlane.xlu1 %9768  ;;  %v9771_v54 = vpop.xlane.xlu0 %9770 }
0x1e41   :  { %12549 = vlog2.f32 %v9769_v19 }
0x1e42   :  { %12551 = vlog2.f32 %v9771_v54 }
0x1e44   :  { %v9773_v14 = vpop.xlane.xlu1 %9772 }
0x1e45   :  { %12553 = vlog2.f32 %v9773_v14 }
0x1e47   :  { %v12548_v20 = vpop.eup %12547 }
0x1e48   :  { %v9775_v0 = vmul.f32 0.6931472, %v12548_v20 }
0x1e4a   :  { %v9782_v40 = vadd.f32 %v9775_v0, %v9747_v30 }
0x1e4b   :  { %v12550_v55 = vpop.eup %12549 }
0x1e4c   :  { %v12552_v57 = vpop.eup %12551  ;;  %v9786_v27 = vsub.f32 %v9742_v36, %v9782_v40  ;;  %v9777_v22 = vmul.f32 0.6931472, %v12550_v55 }
0x1e4d   :  { %v9779_v34 = vmul.f32 0.6931472, %v12552_v57 }
0x1e4e   :  { %9790 = vst [vmem:[%s17128_s8] sm:$0xff] %v9786_v27  ;;  %v9783_v7 = vadd.f32 %v9777_v22, %v9749_v50 }
0x1e4f   :  { %v12554_v52 = vpop.eup %12553  ;;  %v9784_v56 = vadd.f32 %v9779_v34, %v9751_v39 }
0x1e50   :  { %v9787_v41 = vsub.f32 %v9743_v8, %v9783_v7  ;;  %v9781_v13 = vmul.f32 0.6931472, %v12554_v52 }
0x1e51   :  { %v9788_v18 = vsub.f32 %v9744_v59, %v9784_v56 }
0x1e52   :  { %9791 = vst [vmem:[%s17128_s8 + $0x8] sm:$0xff] %v9787_v41  ;;  %v9785_v15 = vadd.f32 %v9781_v13, %v9753_v25 }
0x1e53   :  { %9792 = vst [vmem:[%s17128_s8 + $0x10] sm:$0xff] %v9788_v18 }
0x1e54   :  { %v9789_v28 = vsub.f32 %v9745_v12, %v9785_v15 }
0x1e56   :  { %9793 = vst [vmem:[%s17128_s8 + $0x18] sm:$0xff] %v9789_v28 }
0x1e57   :  { %9802 = vsyncpa [#allocation5], 1 }
0x1e58   :  { %9803 = vsyncpa [#allocation9], 1 }
0x1e59   :  { %9804 = vsyncpa [#allocation12], 1 }
0x1e5a   :  { %9805 = vsyncpa [#allocation15], 1 }
0x1e5b   :  { %9806 = vsyncpa [#allocation18], 1 }
0x1e5c   :  { %9807 = vsyncpa [#allocation21], 1 }
0x1e5d   :  { %9808 = vsyncpa [#allocation24], 1 }
0x1e5e   :  { %9809 = vsyncpa [#allocation27], 1 }
0x1e5f   :  { %9810 = vsyncpa [#allocation30], 1 }
0x1e60   :  { %9811 = vsyncpa [#allocation6], 1 }

</bundles_post_ra>
